<compile_context>
chip_gen: v7x
topology: tpu7x:2x2x1
jax: 0.10.0
libtpu: 0.0.40
codegen_flags: <defaults>
</compile_context>

<pallas_src>
from functools import partial

import jax
import jax.numpy as jnp
from jax.experimental import pallas as pl
from jax.experimental.pallas import tpu as pltpu

H_IN = W_IN = 31      # implied by fc1(128): 31 -> 15 -> 7 -> 3 -> 1
OH1 = OW1 = 15
K1_PAD = 128          # conv1 im2col K: 27 -> 128 (lane-dense)


# ------------------------------ host packing --------------------------------

def prepare_params(params, eps=1e-5):
    """Fold eval-mode BN scale into bf16 weights; pack conv taps along K."""
    packed = []
    for li in range(1, 5):
        w = params[f"conv{li}_w"]                                 # (Cout, Cin, 3, 3)
        cout, cin = int(w.shape[0]), int(w.shape[1])
        scale = params[f"bn{li}_gamma"] / jnp.sqrt(params[f"bn{li}_var"] + eps)
        shift = params[f"bn{li}_beta"] - params[f"bn{li}_mean"] * scale
        # rows ordered as t*Cin + c with tap t = 3*ki + kj
        wp = jnp.transpose(w, (2, 3, 1, 0)).reshape(9 * cin, cout) * scale[None, :]
        if li == 1:
            wp = jnp.pad(wp, ((0, K1_PAD - 9 * cin), (0, 0)))     # 27 -> 128
        packed.append(wp.astype(jnp.bfloat16))
        packed.append(shift.reshape(1, cout).astype(jnp.float32))
    packed.append(jnp.transpose(params["fc_w"]).astype(jnp.bfloat16))  # (128, 10)
    packed.append(params["fc_b"].reshape(1, -1).astype(jnp.float32))   # (1, 10)
    return tuple(packed)


def _conv1_im2col(x_nchw):
    """Host-side im2col for conv1.  Rows per image are emitted even-flat-index
    first (113 rows), then odd (112 rows), so in-kernel conv2 tap reads are
    contiguous slices of the a1 scratch."""
    n = x_nchw.shape[0]
    x = jnp.transpose(x_nchw, (0, 2, 3, 1)).astype(jnp.float32)       # NHWC
    taps = [x[:, ki:ki + 2 * OH1 - 1:2, kj:kj + 2 * OW1 - 1:2, :]     # (N,15,15,3)
            for ki in range(3) for kj in range(3)]
    p = jnp.stack(taps, axis=3).reshape(n, OH1 * OW1, 27)             # cols t*3+c
    perm = jnp.concatenate([jnp.arange(0, 225, 2), jnp.arange(1, 225, 2)])
    p = p[:, perm, :]                                                 # even/odd split
    p = jnp.pad(p, ((0, 0), (0, 0), (0, K1_PAD - 27)))
    return p.astype(jnp.bfloat16)                                     # (N, 225, 128)


# ------------------------------ fused forward --------------------------------

@partial(jax.jit, static_argnames=("block_batch",))
def forward(x_nchw, packed, block_batch=4):
    N, C, H, W = x_nchw.shape
    assert (C, H, W) == (3, H_IN, W_IN), "fc1(128) implies a 3x31x31 input"
    bb = max(1, min(block_batch, N))            # images per grid step
    G = -(-N // bb)                             # grid length
    Npad = G * bb

    xi = _conv1_im2col(x_nchw)                  # (N, 225, 128) bf16
    if Npad > N:
        xi = jnp.pad(xi, ((0, Npad - N), (0, 0), (0, 0)))
    xi = xi.reshape(G, bb * 225, K1_PAD)

    (w1, s1, w2, s2, w3, s3, w4, s4, fcw, fcb) = packed

    def kernel(x_ref, w1r, s1r, w2r, s2r, w3r, s3r, w4r, s4r, fcwr, fcbr,
               o_ref, a1, a2, a4lhs):
        # ---- conv1 + BN + ReLU: one K-fused matmul for the whole block ------
        y1 = jnp.dot(x_ref[0], w1r[...], preferred_element_type=jnp.float32)
        a1[...] = jnp.maximum(y1 + s1r[...], 0.0)          # (bb*225, 128) f32

        # ---- per image: conv2, conv3 (all contiguous static slices) ---------
        for b in range(bb):
            o1 = b * 225
            # conv2: tap (ki,kj) needs a1 flat rows 2*v + (15*ki+kj), v=0..96.
            # With a1 stored even-rows-first the read is a contiguous slice.
            taps2 = []
            for ki in range(3):
                for kj in range(3):
                    t = 15 * ki + kj
                    start = o1 + (t // 2 if t % 2 == 0 else 113 + t // 2)
                    taps2.append(a1[start:start + 97, :].astype(jnp.bfloat16))
            y2 = jnp.dot(jnp.concatenate(taps2, axis=1), w2r[...],   # (97,1152)@(1152,256)
                         preferred_element_type=jnp.float32)
            y2 = jnp.maximum(y2 + s2r[...], 0.0)                     # (97, 256)
            # compact the 49 valid rows (v = 15*oh+ow) to pitch-7 layout
            o2 = b * 49
            for oh in range(7):
                a2[o2 + 7 * oh:o2 + 7 * oh + 7, :] = y2[15 * oh:15 * oh + 7, :]

            # conv3: contiguous reads from compact a2; output dilated by 2
            taps3 = []
            for ki in range(3):
                for kj in range(3):
                    start = o2 + 7 * ki + kj
                    taps3.append(a2[start:start + 33, :].astype(jnp.bfloat16))
            y3 = jnp.dot(jnp.concatenate(taps3, axis=1), w3r[...],   # (33,2304)@(2304,512)
                         preferred_element_type=jnp.float32)
            y3 = jnp.maximum(y3 + s3r[...], 0.0)                     # (33, 512)
            # conv4 im2col row for this image: valid y3 rows are 2*(7*ki+kj)
            for ki in range(3):
                for kj in range(3):
                    t = 3 * ki + kj
                    r = 2 * (7 * ki + kj)
                    a4lhs[b:b + 1, t * 512:(t + 1) * 512] = y3[r:r + 1, :]

        # ---- conv4 + fc1 + log_softmax for the whole batch block ------------
        y4 = jnp.dot(a4lhs[...].astype(jnp.bfloat16), w4r[...],      # (bb,4608)@(4608,128)
                     preferred_element_type=jnp.float32)
        feat = jnp.maximum(y4 + s4r[...], 0.0).astype(jnp.bfloat16)  # (bb, 128)
        # Dropout(p=0.3) is identity in eval mode.
        logits = jnp.dot(feat, fcwr[...],
                         preferred_element_type=jnp.float32) + fcbr[...]
        m = jnp.max(logits, axis=-1, keepdims=True)
        lse = jnp.log(jnp.sum(jnp.exp(logits - m), axis=-1, keepdims=True)) + m
        o_ref[0] = logits - lse

    def const_spec(a):
        nd = a.ndim
        return pl.BlockSpec(a.shape, lambda n, _nd=nd: (0,) * _nd)

    out = pl.pallas_call(
        kernel,
        out_shape=jax.ShapeDtypeStruct((G, bb, 10), jnp.float32),
        grid=(G,),
        in_specs=[pl.BlockSpec((1, bb * 225, K1_PAD), lambda n: (n, 0, 0))]
                 + [const_spec(p) for p in packed],
        out_specs=pl.BlockSpec((1, bb, 10), lambda n: (n, 0, 0)),
        scratch_shapes=[
            pltpu.VMEM((bb * 225, 128), jnp.float32),     # a1 (even/odd split rows)
            pltpu.VMEM((bb * 49, 256), jnp.float32),      # a2 (compact 7x7)
            pltpu.VMEM((bb, 9 * 512), jnp.float32),       # conv4 im2col LHS
        ],
        compiler_params=pltpu.CompilerParams(
            dimension_semantics=("parallel",),            # 2nd TensorCore on v7x
            vmem_limit_bytes=32 * 1024 * 1024),
    )(xi, *packed)
    return out.reshape(Npad, 10)[:N]


# ----------------------- parameters & pure-JAX reference ---------------------

def make_params(key):
    """Module-shaped parameters.  torch.randn-style init scaled by 1/sqrt(9*cin)
    so the f32-vs-bf16 self-check is well conditioned (forward semantics do not
    depend on the particular test values)."""
    conv_dims = [(3, 128), (128, 256), (256, 512), (512, 128)]
    params = {}
    keys = jax.random.split(key, len(conv_dims) + 2)
    for li, (cin, cout) in enumerate(conv_dims):
        std = 1.0 / (3.0 * float(cin) ** 0.5)
        params[f"conv{li+1}_w"] = std * jax.random.normal(
            keys[li], (cout, cin, 3, 3), dtype=jnp.float32)
        params[f"bn{li+1}_gamma"] = jnp.ones((cout,), jnp.float32)
        params[f"bn{li+1}_beta"] = jnp.zeros((cout,), jnp.float32)
        params[f"bn{li+1}_mean"] = jnp.zeros((cout,), jnp.float32)
        params[f"bn{li+1}_var"] = jnp.ones((cout,), jnp.float32)
    params["fc_w"] = 0.08 * jax.random.normal(keys[-2], (10, 128), jnp.float32)
    params["fc_b"] = 0.08 * jax.random.normal(keys[-1], (10,), jnp.float32)
    return params


def reference_forward(x_nchw, params, eps=1e-5):
    """Pure-JAX f32 reference (eval-mode BN, Dropout = identity)."""
    x = jnp.transpose(x_nchw, (0, 2, 3, 1)).astype(jnp.float32)
    for li in range(1, 5):
        w = jnp.transpose(params[f"conv{li}_w"], (2, 3, 1, 0))       # HWIO
        x = jax.lax.conv_general_dilated(
            x, w, window_strides=(2, 2), padding="VALID",
            dimension_numbers=("NHWC", "HWIO", "NHWC"),
            precision=jax.lax.Precision.HIGHEST)
        scale = params[f"bn{li}_gamma"] / jnp.sqrt(params[f"bn{li}_var"] + eps)
        shift = params[f"bn{li}_beta"] - params[f"bn{li}_mean"] * scale
        x = jnp.maximum(x * scale + shift, 0.0)
    feat = x.reshape(x.shape[0], -1)                                 # (N, 128)
    logits = feat @ params["fc_w"].T + params["fc_b"]
    return jax.nn.log_softmax(logits, axis=-1)


# ---------------------------------- main -------------------------------------

if __name__ == "__main__":
    key = jax.random.PRNGKey(0)
    k_in, k_par = jax.random.split(key)
    x = jax.random.normal(k_in, (2, 3, H_IN, W_IN), dtype=jnp.float32)
    params = make_params(k_par)
    packed = prepare_params(params)

    out = jax.block_until_ready(forward(x, packed))

    assert out.shape == (2, 10), out.shape
    assert bool(jnp.all(jnp.isfinite(out)))
    # log_softmax rows sum (in prob space) to ~1
    assert bool(jnp.allclose(jnp.sum(jnp.exp(out), axis=1), 1.0, atol=1e-4))
    # matches the pure-JAX f32 reference up to bf16 weight/LHS rounding
    ref = reference_forward(x, params)
    assert bool(jnp.allclose(out, ref, atol=0.1)), float(jnp.max(jnp.abs(out - ref)))
    print("KERNEL_OK")
</pallas_src>

<mosaic_0001>
module attributes {stable_mosaic.version = 11 : i64} {
  func.func @kernel(%arg0: i32, %arg1: memref<1x450x128xbf16, #tpu.memory_space<vmem>>, %arg2: memref<128x128xbf16, #tpu.memory_space<vmem>>, %arg3: memref<1x128xf32, #tpu.memory_space<vmem>>, %arg4: memref<1152x256xbf16, #tpu.memory_space<vmem>>, %arg5: memref<1x256xf32, #tpu.memory_space<vmem>>, %arg6: memref<2304x512xbf16, #tpu.memory_space<vmem>>, %arg7: memref<1x512xf32, #tpu.memory_space<vmem>>, %arg8: memref<4608x128xbf16, #tpu.memory_space<vmem>>, %arg9: memref<1x128xf32, #tpu.memory_space<vmem>>, %arg10: memref<128x10xbf16, #tpu.memory_space<vmem>>, %arg11: memref<1x10xf32, #tpu.memory_space<vmem>>, %arg12: memref<1x2x10xf32, #tpu.memory_space<vmem>>, %arg13: memref<450x128xf32, #tpu.memory_space<vmem>>, %arg14: memref<98x256xf32, #tpu.memory_space<vmem>>, %arg15: memref<2x4608xf32, #tpu.memory_space<vmem>>) attributes {dimension_semantics = [#tpu.dimension_semantics<parallel>], iteration_bounds = array<i64: 1>, scalar_prefetch = 0 : i64, scratch_operands = 3 : i64, tpu.core_type = #tpu.core_type<tc>, window_params = [{transform_indices = @transform_0, window_bounds = array<i64: 1, 450, 128>}, {pipeline_mode = #tpu.pipeline_mode<synchronous>, transform_indices = @transform_1, window_bounds = array<i64: 128, 128>}, {pipeline_mode = #tpu.pipeline_mode<synchronous>, transform_indices = @transform_2, window_bounds = array<i64: 1, 128>}, {pipeline_mode = #tpu.pipeline_mode<synchronous>, transform_indices = @transform_3, window_bounds = array<i64: 1152, 256>}, {pipeline_mode = #tpu.pipeline_mode<synchronous>, transform_indices = @transform_4, window_bounds = array<i64: 1, 256>}, {pipeline_mode = #tpu.pipeline_mode<synchronous>, transform_indices = @transform_5, window_bounds = array<i64: 2304, 512>}, {pipeline_mode = #tpu.pipeline_mode<synchronous>, transform_indices = @transform_6, window_bounds = array<i64: 1, 512>}, {pipeline_mode = #tpu.pipeline_mode<synchronous>, transform_indices = @transform_7, window_bounds = array<i64: 4608, 128>}, {pipeline_mode = #tpu.pipeline_mode<synchronous>, transform_indices = @transform_8, window_bounds = array<i64: 1, 128>}, {pipeline_mode = #tpu.pipeline_mode<synchronous>, transform_indices = @transform_9, window_bounds = array<i64: 128, 10>}, {pipeline_mode = #tpu.pipeline_mode<synchronous>, transform_indices = @transform_10, window_bounds = array<i64: 1, 10>}, {transform_indices = @transform_11, window_bounds = array<i64: 1, 2, 10>}]} {
    %c0 = arith.constant 0 : index
    %c0_0 = arith.constant 0 : index
    %c0_1 = arith.constant 0 : index
    %0 = vector.load %arg1[%c0, %c0_0, %c0_1] : memref<1x450x128xbf16, #tpu.memory_space<vmem>>, vector<1x450x128xbf16>
    %1 = vector.shape_cast %0 : vector<1x450x128xbf16> to vector<450x128xbf16>
    %c0_2 = arith.constant 0 : index
    %c0_3 = arith.constant 0 : index
    %2 = vector.load %arg2[%c0_2, %c0_3] : memref<128x128xbf16, #tpu.memory_space<vmem>>, vector<128x128xbf16>
    %cst = arith.constant dense<0.000000e+00> : vector<450x128xf32>
    %3 = tpu.matmul %1, %2, %cst {dimension_numbers = #tpu.dot_dimension_numbers<[1], [0], [0], [1], [0, 0, 1, 1], [], []>} : vector<450x128xbf16>, vector<128x128xbf16>, vector<450x128xf32> -> vector<450x128xf32>
    %c0_4 = arith.constant 0 : index
    %c0_5 = arith.constant 0 : index
    %4 = vector.load %arg3[%c0_4, %c0_5] : memref<1x128xf32, #tpu.memory_space<vmem>>, vector<1x128xf32>
    %5 = vector.broadcast %4 : vector<1x128xf32> to vector<450x128xf32>
    %6 = arith.addf %3, %5 : vector<450x128xf32>
    %cst_6 = arith.constant 0.000000e+00 : f32
    %7 = vector.broadcast %cst_6 : f32 to vector<450x128xf32>
    %8 = arith.maximumf %6, %7 : vector<450x128xf32>
    %c0_7 = arith.constant 0 : index
    %c0_8 = arith.constant 0 : index
    %9 = vector.load %arg13[%c0_7, %c0_8] : memref<450x128xf32, #tpu.memory_space<vmem>>, vector<450x128xf32>
    tpu.vector_store %arg13[%c0_7, %c0_8], %8 {strides = array<i32>} : memref<450x128xf32, #tpu.memory_space<vmem>>, vector<450x128xf32>,
    %c0_9 = arith.constant 0 : index
    %c0_10 = arith.constant 0 : index
    %10 = vector.load %arg13[%c0_9, %c0_10] : memref<450x128xf32, #tpu.memory_space<vmem>>, vector<97x128xf32>
    %11 = arith.truncf %10 : vector<97x128xf32> to vector<97x128xbf16>
    %c113 = arith.constant 113 : index
    %c0_11 = arith.constant 0 : index
    %12 = vector.load %arg13[%c113, %c0_11] : memref<450x128xf32, #tpu.memory_space<vmem>>, vector<97x128xf32>
    %13 = arith.truncf %12 : vector<97x128xf32> to vector<97x128xbf16>
    %c1 = arith.constant 1 : index
    %c0_12 = arith.constant 0 : index
    %14 = vector.load %arg13[%c1, %c0_12] : memref<450x128xf32, #tpu.memory_space<vmem>>, vector<97x128xf32>
    %15 = arith.truncf %14 : vector<97x128xf32> to vector<97x128xbf16>
    %c120 = arith.constant 120 : index
    %c0_13 = arith.constant 0 : index
    %16 = vector.load %arg13[%c120, %c0_13] : memref<450x128xf32, #tpu.memory_space<vmem>>, vector<97x128xf32>
    %17 = arith.truncf %16 : vector<97x128xf32> to vector<97x128xbf16>
    %c8 = arith.constant 8 : index
    %c0_14 = arith.constant 0 : index
    %18 = vector.load %arg13[%c8, %c0_14] : memref<450x128xf32, #tpu.memory_space<vmem>>, vector<97x128xf32>
    %19 = arith.truncf %18 : vector<97x128xf32> to vector<97x128xbf16>
    %c121 = arith.constant 121 : index
    %c0_15 = arith.constant 0 : index
    %20 = vector.load %arg13[%c121, %c0_15] : memref<450x128xf32, #tpu.memory_space<vmem>>, vector<97x128xf32>
    %21 = arith.truncf %20 : vector<97x128xf32> to vector<97x128xbf16>
    %c15 = arith.constant 15 : index
    %c0_16 = arith.constant 0 : index
    %22 = vector.load %arg13[%c15, %c0_16] : memref<450x128xf32, #tpu.memory_space<vmem>>, vector<97x128xf32>
    %23 = arith.truncf %22 : vector<97x128xf32> to vector<97x128xbf16>
    %c128 = arith.constant 128 : index
    %c0_17 = arith.constant 0 : index
    %24 = vector.load %arg13[%c128, %c0_17] : memref<450x128xf32, #tpu.memory_space<vmem>>, vector<97x128xf32>
    %25 = arith.truncf %24 : vector<97x128xf32> to vector<97x128xbf16>
    %c16 = arith.constant 16 : index
    %c0_18 = arith.constant 0 : index
    %26 = vector.load %arg13[%c16, %c0_18] : memref<450x128xf32, #tpu.memory_space<vmem>>, vector<97x128xf32>
    %27 = arith.truncf %26 : vector<97x128xf32> to vector<97x128xbf16>
    %28 = tpu.concatenate %11, %13, %15, %17, %19, %21, %23, %25, %27 in 1 : vector<97x128xbf16>, vector<97x128xbf16>, vector<97x128xbf16>, vector<97x128xbf16>, vector<97x128xbf16>, vector<97x128xbf16>, vector<97x128xbf16>, vector<97x128xbf16>, vector<97x128xbf16> -> vector<97x1152xbf16>
    %c0_19 = arith.constant 0 : index
    %c0_20 = arith.constant 0 : index
    %29 = vector.load %arg4[%c0_19, %c0_20] : memref<1152x256xbf16, #tpu.memory_space<vmem>>, vector<1152x256xbf16>
    %cst_21 = arith.constant dense<0.000000e+00> : vector<97x256xf32>
    %30 = tpu.matmul %28, %29, %cst_21 {dimension_numbers = #tpu.dot_dimension_numbers<[1], [0], [0], [1], [0, 0, 1, 1], [], []>} : vector<97x1152xbf16>, vector<1152x256xbf16>, vector<97x256xf32> -> vector<97x256xf32>
    %c0_22 = arith.constant 0 : index
    %c0_23 = arith.constant 0 : index
    %31 = vector.load %arg5[%c0_22, %c0_23] : memref<1x256xf32, #tpu.memory_space<vmem>>, vector<1x256xf32>
    %32 = vector.broadcast %31 : vector<1x256xf32> to vector<97x256xf32>
    %33 = arith.addf %30, %32 : vector<97x256xf32>
    %cst_24 = arith.constant 0.000000e+00 : f32
    %34 = vector.broadcast %cst_24 : f32 to vector<97x256xf32>
    %35 = arith.maximumf %33, %34 : vector<97x256xf32>
    %36 = vector.extract_strided_slice %35 {offsets = [0, 0], sizes = [7, 256], strides = [1, 1]} : vector<97x256xf32> to vector<7x256xf32>
    %c0_25 = arith.constant 0 : index
    %c0_26 = arith.constant 0 : index
    %37 = vector.load %arg14[%c0_25, %c0_26] : memref<98x256xf32, #tpu.memory_space<vmem>>, vector<7x256xf32>
    tpu.vector_store %arg14[%c0_25, %c0_26], %36 {strides = array<i32>} : memref<98x256xf32, #tpu.memory_space<vmem>>, vector<7x256xf32>,
    %38 = vector.extract_strided_slice %35 {offsets = [15, 0], sizes = [7, 256], strides = [1, 1]} : vector<97x256xf32> to vector<7x256xf32>
    %c7 = arith.constant 7 : index
    %c0_27 = arith.constant 0 : index
    %39 = vector.load %arg14[%c7, %c0_27] : memref<98x256xf32, #tpu.memory_space<vmem>>, vector<7x256xf32>
    tpu.vector_store %arg14[%c7, %c0_27], %38 {strides = array<i32>} : memref<98x256xf32, #tpu.memory_space<vmem>>, vector<7x256xf32>,
    %40 = vector.extract_strided_slice %35 {offsets = [30, 0], sizes = [7, 256], strides = [1, 1]} : vector<97x256xf32> to vector<7x256xf32>
    %c14 = arith.constant 14 : index
    %c0_28 = arith.constant 0 : index
    %41 = vector.load %arg14[%c14, %c0_28] : memref<98x256xf32, #tpu.memory_space<vmem>>, vector<7x256xf32>
    tpu.vector_store %arg14[%c14, %c0_28], %40 {strides = array<i32>} : memref<98x256xf32, #tpu.memory_space<vmem>>, vector<7x256xf32>,
    %42 = vector.extract_strided_slice %35 {offsets = [45, 0], sizes = [7, 256], strides = [1, 1]} : vector<97x256xf32> to vector<7x256xf32>
    %c21 = arith.constant 21 : index
    %c0_29 = arith.constant 0 : index
    %43 = vector.load %arg14[%c21, %c0_29] : memref<98x256xf32, #tpu.memory_space<vmem>>, vector<7x256xf32>
    tpu.vector_store %arg14[%c21, %c0_29], %42 {strides = array<i32>} : memref<98x256xf32, #tpu.memory_space<vmem>>, vector<7x256xf32>,
    %44 = vector.extract_strided_slice %35 {offsets = [60, 0], sizes = [7, 256], strides = [1, 1]} : vector<97x256xf32> to vector<7x256xf32>
    %c28 = arith.constant 28 : index
    %c0_30 = arith.constant 0 : index
    %45 = vector.load %arg14[%c28, %c0_30] : memref<98x256xf32, #tpu.memory_space<vmem>>, vector<7x256xf32>
    tpu.vector_store %arg14[%c28, %c0_30], %44 {strides = array<i32>} : memref<98x256xf32, #tpu.memory_space<vmem>>, vector<7x256xf32>,
    %46 = vector.extract_strided_slice %35 {offsets = [75, 0], sizes = [7, 256], strides = [1, 1]} : vector<97x256xf32> to vector<7x256xf32>
    %c35 = arith.constant 35 : index
    %c0_31 = arith.constant 0 : index
    %47 = vector.load %arg14[%c35, %c0_31] : memref<98x256xf32, #tpu.memory_space<vmem>>, vector<7x256xf32>
    tpu.vector_store %arg14[%c35, %c0_31], %46 {strides = array<i32>} : memref<98x256xf32, #tpu.memory_space<vmem>>, vector<7x256xf32>,
    %48 = vector.extract_strided_slice %35 {offsets = [90, 0], sizes = [7, 256], strides = [1, 1]} : vector<97x256xf32> to vector<7x256xf32>
    %c42 = arith.constant 42 : index
    %c0_32 = arith.constant 0 : index
    %49 = vector.load %arg14[%c42, %c0_32] : memref<98x256xf32, #tpu.memory_space<vmem>>, vector<7x256xf32>
    tpu.vector_store %arg14[%c42, %c0_32], %48 {strides = array<i32>} : memref<98x256xf32, #tpu.memory_space<vmem>>, vector<7x256xf32>,
    %c0_33 = arith.constant 0 : index
    %c0_34 = arith.constant 0 : index
    %50 = vector.load %arg14[%c0_33, %c0_34] : memref<98x256xf32, #tpu.memory_space<vmem>>, vector<33x256xf32>
    %51 = arith.truncf %50 : vector<33x256xf32> to vector<33x256xbf16>
    %c1_35 = arith.constant 1 : index
    %c0_36 = arith.constant 0 : index
    %52 = vector.load %arg14[%c1_35, %c0_36] : memref<98x256xf32, #tpu.memory_space<vmem>>, vector<33x256xf32>
    %53 = arith.truncf %52 : vector<33x256xf32> to vector<33x256xbf16>
    %c2 = arith.constant 2 : index
    %c0_37 = arith.constant 0 : index
    %54 = vector.load %arg14[%c2, %c0_37] : memref<98x256xf32, #tpu.memory_space<vmem>>, vector<33x256xf32>
    %55 = arith.truncf %54 : vector<33x256xf32> to vector<33x256xbf16>
    %c7_38 = arith.constant 7 : index
    %c0_39 = arith.constant 0 : index
    %56 = vector.load %arg14[%c7_38, %c0_39] : memref<98x256xf32, #tpu.memory_space<vmem>>, vector<33x256xf32>
    %57 = arith.truncf %56 : vector<33x256xf32> to vector<33x256xbf16>
    %c8_40 = arith.constant 8 : index
    %c0_41 = arith.constant 0 : index
    %58 = vector.load %arg14[%c8_40, %c0_41] : memref<98x256xf32, #tpu.memory_space<vmem>>, vector<33x256xf32>
    %59 = arith.truncf %58 : vector<33x256xf32> to vector<33x256xbf16>
    %c9 = arith.constant 9 : index
    %c0_42 = arith.constant 0 : index
    %60 = vector.load %arg14[%c9, %c0_42] : memref<98x256xf32, #tpu.memory_space<vmem>>, vector<33x256xf32>
    %61 = arith.truncf %60 : vector<33x256xf32> to vector<33x256xbf16>
    %c14_43 = arith.constant 14 : index
    %c0_44 = arith.constant 0 : index
    %62 = vector.load %arg14[%c14_43, %c0_44] : memref<98x256xf32, #tpu.memory_space<vmem>>, vector<33x256xf32>
    %63 = arith.truncf %62 : vector<33x256xf32> to vector<33x256xbf16>
    %c15_45 = arith.constant 15 : index
    %c0_46 = arith.constant 0 : index
    %64 = vector.load %arg14[%c15_45, %c0_46] : memref<98x256xf32, #tpu.memory_space<vmem>>, vector<33x256xf32>
    %65 = arith.truncf %64 : vector<33x256xf32> to vector<33x256xbf16>
    %c16_47 = arith.constant 16 : index
    %c0_48 = arith.constant 0 : index
    %66 = vector.load %arg14[%c16_47, %c0_48] : memref<98x256xf32, #tpu.memory_space<vmem>>, vector<33x256xf32>
    %67 = arith.truncf %66 : vector<33x256xf32> to vector<33x256xbf16>
    %68 = tpu.concatenate %51, %53, %55, %57, %59, %61, %63, %65, %67 in 1 : vector<33x256xbf16>, vector<33x256xbf16>, vector<33x256xbf16>, vector<33x256xbf16>, vector<33x256xbf16>, vector<33x256xbf16>, vector<33x256xbf16>, vector<33x256xbf16>, vector<33x256xbf16> -> vector<33x2304xbf16>
    %c0_49 = arith.constant 0 : index
    %c0_50 = arith.constant 0 : index
    %69 = vector.load %arg6[%c0_49, %c0_50] : memref<2304x512xbf16, #tpu.memory_space<vmem>>, vector<2304x512xbf16>
    %cst_51 = arith.constant dense<0.000000e+00> : vector<33x512xf32>
    %70 = tpu.matmul %68, %69, %cst_51 {dimension_numbers = #tpu.dot_dimension_numbers<[1], [0], [0], [1], [0, 0, 1, 1], [], []>} : vector<33x2304xbf16>, vector<2304x512xbf16>, vector<33x512xf32> -> vector<33x512xf32>
    %c0_52 = arith.constant 0 : index
    %c0_53 = arith.constant 0 : index
    %71 = vector.load %arg7[%c0_52, %c0_53] : memref<1x512xf32, #tpu.memory_space<vmem>>, vector<1x512xf32>
    %72 = vector.broadcast %71 : vector<1x512xf32> to vector<33x512xf32>
    %73 = arith.addf %70, %72 : vector<33x512xf32>
    %cst_54 = arith.constant 0.000000e+00 : f32
    %74 = vector.broadcast %cst_54 : f32 to vector<33x512xf32>
    %75 = arith.maximumf %73, %74 : vector<33x512xf32>
    %76 = vector.extract_strided_slice %75 {offsets = [0, 0], sizes = [1, 512], strides = [1, 1]} : vector<33x512xf32> to vector<1x512xf32>
    %c0_55 = arith.constant 0 : index
    %c0_56 = arith.constant 0 : index
    %77 = vector.load %arg15[%c0_55, %c0_56] : memref<2x4608xf32, #tpu.memory_space<vmem>>, vector<1x512xf32>
    tpu.vector_store %arg15[%c0_55, %c0_56], %76 {strides = array<i32>} : memref<2x4608xf32, #tpu.memory_space<vmem>>, vector<1x512xf32>,
    %78 = vector.extract_strided_slice %75 {offsets = [2, 0], sizes = [1, 512], strides = [1, 1]} : vector<33x512xf32> to vector<1x512xf32>
    %c0_57 = arith.constant 0 : index
    %c512 = arith.constant 512 : index
    %79 = vector.load %arg15[%c0_57, %c512] : memref<2x4608xf32, #tpu.memory_space<vmem>>, vector<1x512xf32>
    tpu.vector_store %arg15[%c0_57, %c512], %78 {strides = array<i32>} : memref<2x4608xf32, #tpu.memory_space<vmem>>, vector<1x512xf32>,
    %80 = vector.extract_strided_slice %75 {offsets = [4, 0], sizes = [1, 512], strides = [1, 1]} : vector<33x512xf32> to vector<1x512xf32>
    %c0_58 = arith.constant 0 : index
    %c1024 = arith.constant 1024 : index
    %81 = vector.load %arg15[%c0_58, %c1024] : memref<2x4608xf32, #tpu.memory_space<vmem>>, vector<1x512xf32>
    tpu.vector_store %arg15[%c0_58, %c1024], %80 {strides = array<i32>} : memref<2x4608xf32, #tpu.memory_space<vmem>>, vector<1x512xf32>,
    %82 = vector.extract_strided_slice %75 {offsets = [14, 0], sizes = [1, 512], strides = [1, 1]} : vector<33x512xf32> to vector<1x512xf32>
    %c0_59 = arith.constant 0 : index
    %c1536 = arith.constant 1536 : index
    %83 = vector.load %arg15[%c0_59, %c1536] : memref<2x4608xf32, #tpu.memory_space<vmem>>, vector<1x512xf32>
    tpu.vector_store %arg15[%c0_59, %c1536], %82 {strides = array<i32>} : memref<2x4608xf32, #tpu.memory_space<vmem>>, vector<1x512xf32>,
    %84 = vector.extract_strided_slice %75 {offsets = [16, 0], sizes = [1, 512], strides = [1, 1]} : vector<33x512xf32> to vector<1x512xf32>
    %c0_60 = arith.constant 0 : index
    %c2048 = arith.constant 2048 : index
    %85 = vector.load %arg15[%c0_60, %c2048] : memref<2x4608xf32, #tpu.memory_space<vmem>>, vector<1x512xf32>
    tpu.vector_store %arg15[%c0_60, %c2048], %84 {strides = array<i32>} : memref<2x4608xf32, #tpu.memory_space<vmem>>, vector<1x512xf32>,
    %86 = vector.extract_strided_slice %75 {offsets = [18, 0], sizes = [1, 512], strides = [1, 1]} : vector<33x512xf32> to vector<1x512xf32>
    %c0_61 = arith.constant 0 : index
    %c2560 = arith.constant 2560 : index
    %87 = vector.load %arg15[%c0_61, %c2560] : memref<2x4608xf32, #tpu.memory_space<vmem>>, vector<1x512xf32>
    tpu.vector_store %arg15[%c0_61, %c2560], %86 {strides = array<i32>} : memref<2x4608xf32, #tpu.memory_space<vmem>>, vector<1x512xf32>,
    %88 = vector.extract_strided_slice %75 {offsets = [28, 0], sizes = [1, 512], strides = [1, 1]} : vector<33x512xf32> to vector<1x512xf32>
    %c0_62 = arith.constant 0 : index
    %c3072 = arith.constant 3072 : index
    %89 = vector.load %arg15[%c0_62, %c3072] : memref<2x4608xf32, #tpu.memory_space<vmem>>, vector<1x512xf32>
    tpu.vector_store %arg15[%c0_62, %c3072], %88 {strides = array<i32>} : memref<2x4608xf32, #tpu.memory_space<vmem>>, vector<1x512xf32>,
    %90 = vector.extract_strided_slice %75 {offsets = [30, 0], sizes = [1, 512], strides = [1, 1]} : vector<33x512xf32> to vector<1x512xf32>
    %c0_63 = arith.constant 0 : index
    %c3584 = arith.constant 3584 : index
    %91 = vector.load %arg15[%c0_63, %c3584] : memref<2x4608xf32, #tpu.memory_space<vmem>>, vector<1x512xf32>
    tpu.vector_store %arg15[%c0_63, %c3584], %90 {strides = array<i32>} : memref<2x4608xf32, #tpu.memory_space<vmem>>, vector<1x512xf32>,
    %92 = vector.extract_strided_slice %75 {offsets = [32, 0], sizes = [1, 512], strides = [1, 1]} : vector<33x512xf32> to vector<1x512xf32>
    %c0_64 = arith.constant 0 : index
    %c4096 = arith.constant 4096 : index
    %93 = vector.load %arg15[%c0_64, %c4096] : memref<2x4608xf32, #tpu.memory_space<vmem>>, vector<1x512xf32>
    tpu.vector_store %arg15[%c0_64, %c4096], %92 {strides = array<i32>} : memref<2x4608xf32, #tpu.memory_space<vmem>>, vector<1x512xf32>,
    %c225 = arith.constant 225 : index
    %c0_65 = arith.constant 0 : index
    %94 = vector.load %arg13[%c225, %c0_65] : memref<450x128xf32, #tpu.memory_space<vmem>>, vector<97x128xf32>
    %95 = arith.truncf %94 : vector<97x128xf32> to vector<97x128xbf16>
    %c338 = arith.constant 338 : index
    %c0_66 = arith.constant 0 : index
    %96 = vector.load %arg13[%c338, %c0_66] : memref<450x128xf32, #tpu.memory_space<vmem>>, vector<97x128xf32>
    %97 = arith.truncf %96 : vector<97x128xf32> to vector<97x128xbf16>
    %c226 = arith.constant 226 : index
    %c0_67 = arith.constant 0 : index
    %98 = vector.load %arg13[%c226, %c0_67] : memref<450x128xf32, #tpu.memory_space<vmem>>, vector<97x128xf32>
    %99 = arith.truncf %98 : vector<97x128xf32> to vector<97x128xbf16>
    %c345 = arith.constant 345 : index
    %c0_68 = arith.constant 0 : index
    %100 = vector.load %arg13[%c345, %c0_68] : memref<450x128xf32, #tpu.memory_space<vmem>>, vector<97x128xf32>
    %101 = arith.truncf %100 : vector<97x128xf32> to vector<97x128xbf16>
    %c233 = arith.constant 233 : index
    %c0_69 = arith.constant 0 : index
    %102 = vector.load %arg13[%c233, %c0_69] : memref<450x128xf32, #tpu.memory_space<vmem>>, vector<97x128xf32>
    %103 = arith.truncf %102 : vector<97x128xf32> to vector<97x128xbf16>
    %c346 = arith.constant 346 : index
    %c0_70 = arith.constant 0 : index
    %104 = vector.load %arg13[%c346, %c0_70] : memref<450x128xf32, #tpu.memory_space<vmem>>, vector<97x128xf32>
    %105 = arith.truncf %104 : vector<97x128xf32> to vector<97x128xbf16>
    %c240 = arith.constant 240 : index
    %c0_71 = arith.constant 0 : index
    %106 = vector.load %arg13[%c240, %c0_71] : memref<450x128xf32, #tpu.memory_space<vmem>>, vector<97x128xf32>
    %107 = arith.truncf %106 : vector<97x128xf32> to vector<97x128xbf16>
    %c353 = arith.constant 353 : index
    %c0_72 = arith.constant 0 : index
    %108 = vector.load %arg13[%c353, %c0_72] : memref<450x128xf32, #tpu.memory_space<vmem>>, vector<97x128xf32>
    %109 = arith.truncf %108 : vector<97x128xf32> to vector<97x128xbf16>
    %c241 = arith.constant 241 : index
    %c0_73 = arith.constant 0 : index
    %110 = vector.load %arg13[%c241, %c0_73] : memref<450x128xf32, #tpu.memory_space<vmem>>, vector<97x128xf32>
    %111 = arith.truncf %110 : vector<97x128xf32> to vector<97x128xbf16>
    %112 = tpu.concatenate %95, %97, %99, %101, %103, %105, %107, %109, %111 in 1 : vector<97x128xbf16>, vector<97x128xbf16>, vector<97x128xbf16>, vector<97x128xbf16>, vector<97x128xbf16>, vector<97x128xbf16>, vector<97x128xbf16>, vector<97x128xbf16>, vector<97x128xbf16> -> vector<97x1152xbf16>
    %c0_74 = arith.constant 0 : index
    %c0_75 = arith.constant 0 : index
    %113 = vector.load %arg4[%c0_74, %c0_75] : memref<1152x256xbf16, #tpu.memory_space<vmem>>, vector<1152x256xbf16>
    %cst_76 = arith.constant dense<0.000000e+00> : vector<97x256xf32>
    %114 = tpu.matmul %112, %113, %cst_76 {dimension_numbers = #tpu.dot_dimension_numbers<[1], [0], [0], [1], [0, 0, 1, 1], [], []>} : vector<97x1152xbf16>, vector<1152x256xbf16>, vector<97x256xf32> -> vector<97x256xf32>
    %c0_77 = arith.constant 0 : index
    %c0_78 = arith.constant 0 : index
    %115 = vector.load %arg5[%c0_77, %c0_78] : memref<1x256xf32, #tpu.memory_space<vmem>>, vector<1x256xf32>
    %116 = vector.broadcast %115 : vector<1x256xf32> to vector<97x256xf32>
    %117 = arith.addf %114, %116 : vector<97x256xf32>
    %cst_79 = arith.constant 0.000000e+00 : f32
    %118 = vector.broadcast %cst_79 : f32 to vector<97x256xf32>
    %119 = arith.maximumf %117, %118 : vector<97x256xf32>
    %120 = vector.extract_strided_slice %119 {offsets = [0, 0], sizes = [7, 256], strides = [1, 1]} : vector<97x256xf32> to vector<7x256xf32>
    %c49 = arith.constant 49 : index
    %c0_80 = arith.constant 0 : index
    %121 = vector.load %arg14[%c49, %c0_80] : memref<98x256xf32, #tpu.memory_space<vmem>>, vector<7x256xf32>
    tpu.vector_store %arg14[%c49, %c0_80], %120 {strides = array<i32>} : memref<98x256xf32, #tpu.memory_space<vmem>>, vector<7x256xf32>,
    %122 = vector.extract_strided_slice %119 {offsets = [15, 0], sizes = [7, 256], strides = [1, 1]} : vector<97x256xf32> to vector<7x256xf32>
    %c56 = arith.constant 56 : index
    %c0_81 = arith.constant 0 : index
    %123 = vector.load %arg14[%c56, %c0_81] : memref<98x256xf32, #tpu.memory_space<vmem>>, vector<7x256xf32>
    tpu.vector_store %arg14[%c56, %c0_81], %122 {strides = array<i32>} : memref<98x256xf32, #tpu.memory_space<vmem>>, vector<7x256xf32>,
    %124 = vector.extract_strided_slice %119 {offsets = [30, 0], sizes = [7, 256], strides = [1, 1]} : vector<97x256xf32> to vector<7x256xf32>
    %c63 = arith.constant 63 : index
    %c0_82 = arith.constant 0 : index
    %125 = vector.load %arg14[%c63, %c0_82] : memref<98x256xf32, #tpu.memory_space<vmem>>, vector<7x256xf32>
    tpu.vector_store %arg14[%c63, %c0_82], %124 {strides = array<i32>} : memref<98x256xf32, #tpu.memory_space<vmem>>, vector<7x256xf32>,
    %126 = vector.extract_strided_slice %119 {offsets = [45, 0], sizes = [7, 256], strides = [1, 1]} : vector<97x256xf32> to vector<7x256xf32>
    %c70 = arith.constant 70 : index
    %c0_83 = arith.constant 0 : index
    %127 = vector.load %arg14[%c70, %c0_83] : memref<98x256xf32, #tpu.memory_space<vmem>>, vector<7x256xf32>
    tpu.vector_store %arg14[%c70, %c0_83], %126 {strides = array<i32>} : memref<98x256xf32, #tpu.memory_space<vmem>>, vector<7x256xf32>,
    %128 = vector.extract_strided_slice %119 {offsets = [60, 0], sizes = [7, 256], strides = [1, 1]} : vector<97x256xf32> to vector<7x256xf32>
    %c77 = arith.constant 77 : index
    %c0_84 = arith.constant 0 : index
    %129 = vector.load %arg14[%c77, %c0_84] : memref<98x256xf32, #tpu.memory_space<vmem>>, vector<7x256xf32>
    tpu.vector_store %arg14[%c77, %c0_84], %128 {strides = array<i32>} : memref<98x256xf32, #tpu.memory_space<vmem>>, vector<7x256xf32>,
    %130 = vector.extract_strided_slice %119 {offsets = [75, 0], sizes = [7, 256], strides = [1, 1]} : vector<97x256xf32> to vector<7x256xf32>
    %c84 = arith.constant 84 : index
    %c0_85 = arith.constant 0 : index
    %131 = vector.load %arg14[%c84, %c0_85] : memref<98x256xf32, #tpu.memory_space<vmem>>, vector<7x256xf32>
    tpu.vector_store %arg14[%c84, %c0_85], %130 {strides = array<i32>} : memref<98x256xf32, #tpu.memory_space<vmem>>, vector<7x256xf32>,
    %132 = vector.extract_strided_slice %119 {offsets = [90, 0], sizes = [7, 256], strides = [1, 1]} : vector<97x256xf32> to vector<7x256xf32>
    %c91 = arith.constant 91 : index
    %c0_86 = arith.constant 0 : index
    %133 = vector.load %arg14[%c91, %c0_86] : memref<98x256xf32, #tpu.memory_space<vmem>>, vector<7x256xf32>
    tpu.vector_store %arg14[%c91, %c0_86], %132 {strides = array<i32>} : memref<98x256xf32, #tpu.memory_space<vmem>>, vector<7x256xf32>,
    %c49_87 = arith.constant 49 : index
    %c0_88 = arith.constant 0 : index
    %134 = vector.load %arg14[%c49_87, %c0_88] : memref<98x256xf32, #tpu.memory_space<vmem>>, vector<33x256xf32>
    %135 = arith.truncf %134 : vector<33x256xf32> to vector<33x256xbf16>
    %c50 = arith.constant 50 : index
    %c0_89 = arith.constant 0 : index
    %136 = vector.load %arg14[%c50, %c0_89] : memref<98x256xf32, #tpu.memory_space<vmem>>, vector<33x256xf32>
    %137 = arith.truncf %136 : vector<33x256xf32> to vector<33x256xbf16>
    %c51 = arith.constant 51 : index
    %c0_90 = arith.constant 0 : index
    %138 = vector.load %arg14[%c51, %c0_90] : memref<98x256xf32, #tpu.memory_space<vmem>>, vector<33x256xf32>
    %139 = arith.truncf %138 : vector<33x256xf32> to vector<33x256xbf16>
    %c56_91 = arith.constant 56 : index
    %c0_92 = arith.constant 0 : index
    %140 = vector.load %arg14[%c56_91, %c0_92] : memref<98x256xf32, #tpu.memory_space<vmem>>, vector<33x256xf32>
    %141 = arith.truncf %140 : vector<33x256xf32> to vector<33x256xbf16>
    %c57 = arith.constant 57 : index
    %c0_93 = arith.constant 0 : index
    %142 = vector.load %arg14[%c57, %c0_93] : memref<98x256xf32, #tpu.memory_space<vmem>>, vector<33x256xf32>
    %143 = arith.truncf %142 : vector<33x256xf32> to vector<33x256xbf16>
    %c58 = arith.constant 58 : index
    %c0_94 = arith.constant 0 : index
    %144 = vector.load %arg14[%c58, %c0_94] : memref<98x256xf32, #tpu.memory_space<vmem>>, vector<33x256xf32>
    %145 = arith.truncf %144 : vector<33x256xf32> to vector<33x256xbf16>
    %c63_95 = arith.constant 63 : index
    %c0_96 = arith.constant 0 : index
    %146 = vector.load %arg14[%c63_95, %c0_96] : memref<98x256xf32, #tpu.memory_space<vmem>>, vector<33x256xf32>
    %147 = arith.truncf %146 : vector<33x256xf32> to vector<33x256xbf16>
    %c64 = arith.constant 64 : index
    %c0_97 = arith.constant 0 : index
    %148 = vector.load %arg14[%c64, %c0_97] : memref<98x256xf32, #tpu.memory_space<vmem>>, vector<33x256xf32>
    %149 = arith.truncf %148 : vector<33x256xf32> to vector<33x256xbf16>
    %c65 = arith.constant 65 : index
    %c0_98 = arith.constant 0 : index
    %150 = vector.load %arg14[%c65, %c0_98] : memref<98x256xf32, #tpu.memory_space<vmem>>, vector<33x256xf32>
    %151 = arith.truncf %150 : vector<33x256xf32> to vector<33x256xbf16>
    %152 = tpu.concatenate %135, %137, %139, %141, %143, %145, %147, %149, %151 in 1 : vector<33x256xbf16>, vector<33x256xbf16>, vector<33x256xbf16>, vector<33x256xbf16>, vector<33x256xbf16>, vector<33x256xbf16>, vector<33x256xbf16>, vector<33x256xbf16>, vector<33x256xbf16> -> vector<33x2304xbf16>
    %c0_99 = arith.constant 0 : index
    %c0_100 = arith.constant 0 : index
    %153 = vector.load %arg6[%c0_99, %c0_100] : memref<2304x512xbf16, #tpu.memory_space<vmem>>, vector<2304x512xbf16>
    %cst_101 = arith.constant dense<0.000000e+00> : vector<33x512xf32>
    %154 = tpu.matmul %152, %153, %cst_101 {dimension_numbers = #tpu.dot_dimension_numbers<[1], [0], [0], [1], [0, 0, 1, 1], [], []>} : vector<33x2304xbf16>, vector<2304x512xbf16>, vector<33x512xf32> -> vector<33x512xf32>
    %c0_102 = arith.constant 0 : index
    %c0_103 = arith.constant 0 : index
    %155 = vector.load %arg7[%c0_102, %c0_103] : memref<1x512xf32, #tpu.memory_space<vmem>>, vector<1x512xf32>
    %156 = vector.broadcast %155 : vector<1x512xf32> to vector<33x512xf32>
    %157 = arith.addf %154, %156 : vector<33x512xf32>
    %cst_104 = arith.constant 0.000000e+00 : f32
    %158 = vector.broadcast %cst_104 : f32 to vector<33x512xf32>
    %159 = arith.maximumf %157, %158 : vector<33x512xf32>
    %160 = vector.extract_strided_slice %159 {offsets = [0, 0], sizes = [1, 512], strides = [1, 1]} : vector<33x512xf32> to vector<1x512xf32>
    %c1_105 = arith.constant 1 : index
    %c0_106 = arith.constant 0 : index
    %161 = vector.load %arg15[%c1_105, %c0_106] : memref<2x4608xf32, #tpu.memory_space<vmem>>, vector<1x512xf32>
    tpu.vector_store %arg15[%c1_105, %c0_106], %160 {strides = array<i32>} : memref<2x4608xf32, #tpu.memory_space<vmem>>, vector<1x512xf32>,
    %162 = vector.extract_strided_slice %159 {offsets = [2, 0], sizes = [1, 512], strides = [1, 1]} : vector<33x512xf32> to vector<1x512xf32>
    %c1_107 = arith.constant 1 : index
    %c512_108 = arith.constant 512 : index
    %163 = vector.load %arg15[%c1_107, %c512_108] : memref<2x4608xf32, #tpu.memory_space<vmem>>, vector<1x512xf32>
    tpu.vector_store %arg15[%c1_107, %c512_108], %162 {strides = array<i32>} : memref<2x4608xf32, #tpu.memory_space<vmem>>, vector<1x512xf32>,
    %164 = vector.extract_strided_slice %159 {offsets = [4, 0], sizes = [1, 512], strides = [1, 1]} : vector<33x512xf32> to vector<1x512xf32>
    %c1_109 = arith.constant 1 : index
    %c1024_110 = arith.constant 1024 : index
    %165 = vector.load %arg15[%c1_109, %c1024_110] : memref<2x4608xf32, #tpu.memory_space<vmem>>, vector<1x512xf32>
    tpu.vector_store %arg15[%c1_109, %c1024_110], %164 {strides = array<i32>} : memref<2x4608xf32, #tpu.memory_space<vmem>>, vector<1x512xf32>,
    %166 = vector.extract_strided_slice %159 {offsets = [14, 0], sizes = [1, 512], strides = [1, 1]} : vector<33x512xf32> to vector<1x512xf32>
    %c1_111 = arith.constant 1 : index
    %c1536_112 = arith.constant 1536 : index
    %167 = vector.load %arg15[%c1_111, %c1536_112] : memref<2x4608xf32, #tpu.memory_space<vmem>>, vector<1x512xf32>
    tpu.vector_store %arg15[%c1_111, %c1536_112], %166 {strides = array<i32>} : memref<2x4608xf32, #tpu.memory_space<vmem>>, vector<1x512xf32>,
    %168 = vector.extract_strided_slice %159 {offsets = [16, 0], sizes = [1, 512], strides = [1, 1]} : vector<33x512xf32> to vector<1x512xf32>
    %c1_113 = arith.constant 1 : index
    %c2048_114 = arith.constant 2048 : index
    %169 = vector.load %arg15[%c1_113, %c2048_114] : memref<2x4608xf32, #tpu.memory_space<vmem>>, vector<1x512xf32>
    tpu.vector_store %arg15[%c1_113, %c2048_114], %168 {strides = array<i32>} : memref<2x4608xf32, #tpu.memory_space<vmem>>, vector<1x512xf32>,
    %170 = vector.extract_strided_slice %159 {offsets = [18, 0], sizes = [1, 512], strides = [1, 1]} : vector<33x512xf32> to vector<1x512xf32>
    %c1_115 = arith.constant 1 : index
    %c2560_116 = arith.constant 2560 : index
    %171 = vector.load %arg15[%c1_115, %c2560_116] : memref<2x4608xf32, #tpu.memory_space<vmem>>, vector<1x512xf32>
    tpu.vector_store %arg15[%c1_115, %c2560_116], %170 {strides = array<i32>} : memref<2x4608xf32, #tpu.memory_space<vmem>>, vector<1x512xf32>,
    %172 = vector.extract_strided_slice %159 {offsets = [28, 0], sizes = [1, 512], strides = [1, 1]} : vector<33x512xf32> to vector<1x512xf32>
    %c1_117 = arith.constant 1 : index
    %c3072_118 = arith.constant 3072 : index
    %173 = vector.load %arg15[%c1_117, %c3072_118] : memref<2x4608xf32, #tpu.memory_space<vmem>>, vector<1x512xf32>
    tpu.vector_store %arg15[%c1_117, %c3072_118], %172 {strides = array<i32>} : memref<2x4608xf32, #tpu.memory_space<vmem>>, vector<1x512xf32>,
    %174 = vector.extract_strided_slice %159 {offsets = [30, 0], sizes = [1, 512], strides = [1, 1]} : vector<33x512xf32> to vector<1x512xf32>
    %c1_119 = arith.constant 1 : index
    %c3584_120 = arith.constant 3584 : index
    %175 = vector.load %arg15[%c1_119, %c3584_120] : memref<2x4608xf32, #tpu.memory_space<vmem>>, vector<1x512xf32>
    tpu.vector_store %arg15[%c1_119, %c3584_120], %174 {strides = array<i32>} : memref<2x4608xf32, #tpu.memory_space<vmem>>, vector<1x512xf32>,
    %176 = vector.extract_strided_slice %159 {offsets = [32, 0], sizes = [1, 512], strides = [1, 1]} : vector<33x512xf32> to vector<1x512xf32>
    %c1_121 = arith.constant 1 : index
    %c4096_122 = arith.constant 4096 : index
    %177 = vector.load %arg15[%c1_121, %c4096_122] : memref<2x4608xf32, #tpu.memory_space<vmem>>, vector<1x512xf32>
    tpu.vector_store %arg15[%c1_121, %c4096_122], %176 {strides = array<i32>} : memref<2x4608xf32, #tpu.memory_space<vmem>>, vector<1x512xf32>,
    %c0_123 = arith.constant 0 : index
    %c0_124 = arith.constant 0 : index
    %178 = vector.load %arg15[%c0_123, %c0_124] : memref<2x4608xf32, #tpu.memory_space<vmem>>, vector<2x4608xf32>
    %179 = arith.truncf %178 : vector<2x4608xf32> to vector<2x4608xbf16>
    %c0_125 = arith.constant 0 : index
    %c0_126 = arith.constant 0 : index
    %180 = vector.load %arg8[%c0_125, %c0_126] : memref<4608x128xbf16, #tpu.memory_space<vmem>>, vector<4608x128xbf16>
    %cst_127 = arith.constant dense<0.000000e+00> : vector<2x128xf32>
    %181 = tpu.matmul %179, %180, %cst_127 {dimension_numbers = #tpu.dot_dimension_numbers<[1], [0], [0], [1], [0, 0, 1, 1], [], []>} : vector<2x4608xbf16>, vector<4608x128xbf16>, vector<2x128xf32> -> vector<2x128xf32>
    %c0_128 = arith.constant 0 : index
    %c0_129 = arith.constant 0 : index
    %182 = vector.load %arg9[%c0_128, %c0_129] : memref<1x128xf32, #tpu.memory_space<vmem>>, vector<1x128xf32>
    %183 = vector.broadcast %182 : vector<1x128xf32> to vector<2x128xf32>
    %184 = arith.addf %181, %183 : vector<2x128xf32>
    %cst_130 = arith.constant 0.000000e+00 : f32
    %185 = vector.broadcast %cst_130 : f32 to vector<2x128xf32>
    %186 = arith.maximumf %184, %185 : vector<2x128xf32>
    %187 = arith.truncf %186 : vector<2x128xf32> to vector<2x128xbf16>
    %c0_131 = arith.constant 0 : index
    %c0_132 = arith.constant 0 : index
    %188 = vector.load %arg10[%c0_131, %c0_132] : memref<128x10xbf16, #tpu.memory_space<vmem>>, vector<128x10xbf16>
    %cst_133 = arith.constant dense<0.000000e+00> : vector<2x10xf32>
    %189 = tpu.matmul %187, %188, %cst_133 {dimension_numbers = #tpu.dot_dimension_numbers<[1], [0], [0], [1], [0, 0, 1, 1], [], []>} : vector<2x128xbf16>, vector<128x10xbf16>, vector<2x10xf32> -> vector<2x10xf32>
    %c0_134 = arith.constant 0 : index
    %c0_135 = arith.constant 0 : index
    %190 = vector.load %arg11[%c0_134, %c0_135] : memref<1x10xf32, #tpu.memory_space<vmem>>, vector<1x10xf32>
    %191 = vector.broadcast %190 : vector<1x10xf32> to vector<2x10xf32>
    %192 = arith.addf %189, %191 : vector<2x10xf32>
    %cst_136 = arith.constant dense<0xFF800000> : vector<2xf32>
    %193 = vector.multi_reduction <maximumf>, %192, %cst_136 [1] : vector<2x10xf32> to vector<2xf32>
    %194 = vector.shape_cast %193 : vector<2xf32> to vector<2x1xf32>
    %195 = vector.broadcast %194 : vector<2x1xf32> to vector<2x10xf32>
    %196 = arith.subf %192, %195 : vector<2x10xf32>
    %197 = math.exp %196 : vector<2x10xf32>
    %cst_137 = arith.constant dense<0.000000e+00> : vector<2xf32>
    %198 = vector.multi_reduction <add>, %197, %cst_137 [1] : vector<2x10xf32> to vector<2xf32>
    %199 = vector.shape_cast %198 : vector<2xf32> to vector<2x1xf32>
    %200 = math.log %199 : vector<2x1xf32>
    %201 = arith.addf %200, %194 : vector<2x1xf32>
    %202 = vector.broadcast %201 : vector<2x1xf32> to vector<2x10xf32>
    %203 = arith.subf %192, %202 : vector<2x10xf32>
    %c0_138 = arith.constant 0 : index
    %c0_139 = arith.constant 0 : index
    %c0_140 = arith.constant 0 : index
    %204 = vector.load %arg12[%c0_138, %c0_139, %c0_140] : memref<1x2x10xf32, #tpu.memory_space<vmem>>, vector<1x2x10xf32>
    %205 = vector.shape_cast %204 : vector<1x2x10xf32> to vector<2x10xf32>
    %206 = vector.shape_cast %203 : vector<2x10xf32> to vector<1x2x10xf32>
    tpu.vector_store %arg12[%c0_138, %c0_139, %c0_140], %206 {strides = array<i32>} : memref<1x2x10xf32, #tpu.memory_space<vmem>>, vector<1x2x10xf32>,
    return
  }
  func.func @transform_0(%arg0: i32) -> (i32, i32, i32) {
    %c0_i32 = arith.constant 0 : i32
    %c0_i32_0 = arith.constant 0 : i32
    %c0_i32_1 = arith.constant 0 : i32
    return %arg0, %c0_i32, %c0_i32_0 : i32, i32, i32
  }
  func.func @transform_1(%arg0: i32) -> (i32, i32) {
    %c0_i32 = arith.constant 0 : i32
    %c0_i32_0 = arith.constant 0 : i32
    %c0_i32_1 = arith.constant 0 : i32
    return %c0_i32, %c0_i32_0 : i32, i32
  }
  func.func @transform_2(%arg0: i32) -> (i32, i32) {
    %c0_i32 = arith.constant 0 : i32
    %c0_i32_0 = arith.constant 0 : i32
    %c0_i32_1 = arith.constant 0 : i32
    return %c0_i32, %c0_i32_0 : i32, i32
  }
  func.func @transform_3(%arg0: i32) -> (i32, i32) {
    %c0_i32 = arith.constant 0 : i32
    %c0_i32_0 = arith.constant 0 : i32
    %c0_i32_1 = arith.constant 0 : i32
    return %c0_i32, %c0_i32_0 : i32, i32
  }
  func.func @transform_4(%arg0: i32) -> (i32, i32) {
    %c0_i32 = arith.constant 0 : i32
    %c0_i32_0 = arith.constant 0 : i32
    %c0_i32_1 = arith.constant 0 : i32
    return %c0_i32, %c0_i32_0 : i32, i32
  }
  func.func @transform_5(%arg0: i32) -> (i32, i32) {
    %c0_i32 = arith.constant 0 : i32
    %c0_i32_0 = arith.constant 0 : i32
    %c0_i32_1 = arith.constant 0 : i32
    return %c0_i32, %c0_i32_0 : i32, i32
  }
  func.func @transform_6(%arg0: i32) -> (i32, i32) {
    %c0_i32 = arith.constant 0 : i32
    %c0_i32_0 = arith.constant 0 : i32
    %c0_i32_1 = arith.constant 0 : i32
    return %c0_i32, %c0_i32_0 : i32, i32
  }
  func.func @transform_7(%arg0: i32) -> (i32, i32) {
    %c0_i32 = arith.constant 0 : i32
    %c0_i32_0 = arith.constant 0 : i32
    %c0_i32_1 = arith.constant 0 : i32
    return %c0_i32, %c0_i32_0 : i32, i32
  }
  func.func @transform_8(%arg0: i32) -> (i32, i32) {
    %c0_i32 = arith.constant 0 : i32
    %c0_i32_0 = arith.constant 0 : i32
    %c0_i32_1 = arith.constant 0 : i32
    return %c0_i32, %c0_i32_0 : i32, i32
  }
  func.func @transform_9(%arg0: i32) -> (i32, i32) {
    %c0_i32 = arith.constant 0 : i32
    %c0_i32_0 = arith.constant 0 : i32
    %c0_i32_1 = arith.constant 0 : i32
    return %c0_i32, %c0_i32_0 : i32, i32
  }
  func.func @transform_10(%arg0: i32) -> (i32, i32) {
    %c0_i32 = arith.constant 0 : i32
    %c0_i32_0 = arith.constant 0 : i32
    %c0_i32_1 = arith.constant 0 : i32
    return %c0_i32, %c0_i32_0 : i32, i32
  }
  func.func @transform_11(%arg0: i32) -> (i32, i32, i32) {
    %c0_i32 = arith.constant 0 : i32
    %c0_i32_0 = arith.constant 0 : i32
    %c0_i32_1 = arith.constant 0 : i32
    return %arg0, %c0_i32, %c0_i32_0 : i32, i32, i32
  }
}

</mosaic_0001>

<bundles_post_ra>
// kernel: forward.1
= control target key start
LH: loop header
LB: loop body
LE: loop exit
PB: predicated region body
PF: predicated region fallthrough
CT: control target
= control target key end

     0   :  { %16 = vsyncpa [#allocation6], 0  ;;  %s29082_s0 = inlined_call_operand.vmem [shape: bf16[1,450,128], index: 0, kind: input, shape index: {}]   ;;  %s29083_s1 = inlined_call_operand.vmem [shape: bf16[128,128], index: 1, kind: input, shape index: {}]   ;;  %s29084_s2 = inlined_call_operand.vmem [shape: f32[1,128], index: 2, kind: input, shape index: {}]   ;;  %s29085_s3 = inlined_call_operand.hbm [shape: bf16[1152,256], index: 3, kind: input, shape index: {}]   ;;  %s29086_s4 = inlined_call_operand.vmem [shape: f32[1,256], index: 4, kind: input, shape index: {}]   ;;  %s29087_s5 = inlined_call_operand.vmem [shape: bf16[2304,512], index: 5, kind: input, shape index: {}]   ;;  %s29088_s6 = inlined_call_operand.vmem [shape: f32[1,512], index: 6, kind: input, shape index: {}]   ;;  %s29089_s7 = inlined_call_operand.hbm [shape: bf16[4608,128], index: 7, kind: input, shape index: {}]   ;;  %s29090_s8 = inlined_call_operand.vmem [shape: f32[1,128], index: 8, kind: input, shape index: {}]   ;;  %s29091_s9 = inlined_call_operand.vmem [shape: bf16[128,10], index: 9, kind: input, shape index: {}]   ;;  %s29092_s10 = inlined_call_operand.vmem [shape: f32[1,10], index: 10, kind: input, shape index: {}]   ;;  %s29093_s11 = inlined_call_operand.hbm [shape: f32[1,2,10], index: 11, kind: output, shape index: {}]  }
   0x1   :  { %17 = vsyncpa [#allocation9], 0 }
   0x2   :  { %18 = vsyncpa [#allocation7], 0  ;;  %s23669_s17 = smov [#allocation5]   ;;  %s23597_s21 = scalar_lea.hbm %s29085_s3, 18432 }
   0x3   :  { %s30_s18 = sshll.u32 %s23669_s17, 4  ;;  %p23598_p0 = scmp.ne.s32.totalorder %s29085_s3, %s23597_s21  ;;  %s31_s18 = int_to_ptr.vmem [resolvable:$true] %s30_s18 }
   0x4   :  { %p23601_p1 = scmp.lt.u32.totalorder %s23597_s21, %s29085_s3 }
   0x6   :  { %p23603_p2 = pnand %p23601_p1, %p23598_p0 }
   0x8   :  { %23606 = shalt.err (!%p23603_p2)
}
   0x9   :  { %s23607_s26 = scalar_lea.vmem %s31_s18, 18432  ;;  %p23612_p4 = scmp.lt.s32.totalorder %s31_s18, %s31_s18 }
   0xa   :  { %p23608_p3 = scmp.ne.s32.totalorder %s31_s18, %s23607_s26  ;;  %p23613_p5 = scmp.lt.s32.totalorder %s23607_s26, %s23607_s26 }
   0xc   :  { %p23614_p6 = por %p23613_p5, %p23612_p4 }
   0xe   :  { %p23615_p7 = pnand %p23614_p6, %p23608_p3 }
  0x10   :  { %23618 = shalt.err (!%p23615_p7)
}
  0x11   :  { %s23670_s27 = smov 128   ;;  %s23671_s28 = smov 8  }
  0x12   :  { %36 = dma.hbm_to_vmem [thread:$0]  %s29085_s3, 18432, %s31_s18, [#allocation6], %s23670_s27, %s23670_s27, %s23671_s28  }
  0x13   :  { %s23672_s12 = smov [#allocation8]   ;;  %s23619_s16 = scalar_lea.hbm %s29089_s7, 36864 }
  0x14   :  { %s48_s13 = sshll.u32 %s23672_s12, 4  ;;  %p23620_p8 = scmp.ne.s32.totalorder %s29089_s7, %s23619_s16  ;;  %s49_s13 = int_to_ptr.vmem [resolvable:$true] %s48_s13 }
  0x15   :  { %p23623_p9 = scmp.lt.u32.totalorder %s23619_s16, %s29089_s7 }
  0x17   :  { %p23625_p10 = pnand %p23623_p9, %p23620_p8 }
  0x19   :  { %23628 = shalt.err (!%p23625_p10)
}
  0x1a   :  { %s23629_s22 = scalar_lea.vmem %s49_s13, 36864  ;;  %p23634_p12 = scmp.lt.s32.totalorder %s49_s13, %s49_s13 }
  0x1b   :  { %p23630_p11 = scmp.ne.s32.totalorder %s49_s13, %s23629_s22  ;;  %p23635_p13 = scmp.lt.s32.totalorder %s23629_s22, %s23629_s22 }
  0x1d   :  { %p23636_p0 = por %p23635_p13, %p23634_p12 }
  0x1f   :  { %p23637_p1 = pnand %p23636_p0, %p23630_p11 }
  0x21   :  { %23640 = shalt.err (!%p23637_p1)
}
  0x22   :  { %s23673_s3 = smov 64   ;;  %s23674_s18 = smov 4  }
  0x23   :  { %54 = dma.hbm_to_vmem [thread:$0]  %s29089_s7, 36864, %s49_s13, [#allocation9], %s23673_s3, %s23673_s3, %s23674_s18  }
  0x24   :  { %23663 = dma.done.wait [#allocation6], 18432  }
  0x25   :  { %23664 = vsyncadd [#allocation6], 4294948864 }
  0x26   :  { %23665 = dma.done.wait [#allocation9], 36864  }
  0x27   :  { %23666 = vsyncadd [#allocation9], 4294930432  ;;  %v29094_v0 = vmov 0.0   ;;  %vm23676_vm0 = vmmov 0   ;;  %v21052_v1 = vld [vmem:[%s29083_s1] sm:$0xff]   ;;  %v21053_v2 = vld [vmem:[%s29083_s1 + $0x8] sm:$0xff]  }
  0x28   :  { %20188 = vmatprep.subr.bf16.mxu0 %v29094_v0  ;;  %20204 = vmatprep.mubr.msk.bf16.mxu0 %vm23676_vm0, %v29094_v0  ;;  %v21054_v3 = vld [vmem:[%s29083_s1 + $0x10] sm:$0xff]   ;;  %v21055_v4 = vld [vmem:[%s29083_s1 + $0x18] sm:$0xff]   ;;  %v21056_v5 = vld [vmem:[%s29083_s1 + $0x20] sm:$0xff]   ;;  %vm2388_vm1 = vsmask.f32 7424  ;;  %vm2445_vm3 = vcmask 1046528  }
  0x29   :  { %20189 = vmatpush3.bf16.msra.mxu0 %v21052_v1  ;;  %v21057_v6 = vld [vmem:[%s29083_s1 + $0x28] sm:$0xff]   ;;  %v21058_v7 = vld [vmem:[%s29083_s1 + $0x30] sm:$0xff]   ;;  %v21059_v8 = vld [vmem:[%s29083_s1 + $0x38] sm:$0xff]   ;;  %vm2462_vm2 = vsmask.f32 4352  ;;  %vm2567_vm4 = vcmask 1044480  }
  0x2a   :  { %20190 = vmatprep.subr.bf16.mxu0 %v29094_v0  ;;  %v21060_v9 = vld [vmem:[%s29082_s0] sm:$0xff]   ;;  %v21061_v10 = vld [vmem:[%s29082_s0 + $0x8] sm:$0xff]   ;;  %v21062_v11 = vld [vmem:[%s29082_s0 + $0x10] sm:$0xff]   ;;  %vm8987_vm6 = vcmask 1040384   ;;  %vm9230_vm7 = vsmask.f32 256 }
  0x2b   :  { %v21063_v12 = vld [vmem:[%s29082_s0 + $0x18] sm:$0xff]   ;;  %v21064_v13 = vld [vmem:[%s29082_s0 + $0x20] sm:$0xff]   ;;  %v21065_v14 = vld [vmem:[%s29082_s0 + $0x28] sm:$0xff]   ;;  %vm17939_vm8 = vcmask 74752  }
  0x2c   :  { %v21066_v15 = vld [vmem:[%s29082_s0 + $0x30] sm:$0xff]   ;;  %v21067_v16 = vld [vmem:[%s29082_s0 + $0x38] sm:$0xff]   ;;  %v21068_v17 = vld [vmem:[%s29082_s0 + $0x40] sm:$0xff]  }
  0x2d   :  { %20191 = vmatpush3.bf16.msra.mxu0 %v21053_v2  ;;  %v21069_v18 = vld [vmem:[%s29082_s0 + $0x48] sm:$0xff]   ;;  %v21070_v19 = vld [vmem:[%s29082_s0 + $0x50] sm:$0xff]   ;;  %v21071_v20 = vld [vmem:[%s29082_s0 + $0x58] sm:$0xff]  }
  0x2e   :  { %20192 = vmatprep.subr.bf16.mxu0 %v29094_v0  ;;  %v21072_v21 = vld [vmem:[%s29082_s0 + $0x60] sm:$0xff]   ;;  %v21073_v24 = vld [vmem:[%s29082_s0 + $0x68] sm:$0xff]   ;;  %v21077_v25 = vld [vmem:[#allocation5 + $0x14] ss:$8 sps:$4 sm:$0xff]  }
  0x2f   :  { %v21074_v22 = vld [vmem:[#allocation5 + $0x4] ss:$8 sps:$4 sm:$0xff]   ;;  %v21076_v23 = vld [vmem:[#allocation5] ss:$8 sps:$4 sm:$0xff]   ;;  %v21079_v26 = vld [vmem:[#allocation5 + $0x10] ss:$8 sps:$4 sm:$0xff]  }
  0x30   :  { %1753 = vmatprep.subr.bf16.mxu1 %v21074_v22  ;;  %v21080_v27 = vld [vmem:[#allocation5 + $0x24] ss:$8 sps:$4 sm:$0xff]   ;;  %v21082_v28 = vld [vmem:[#allocation5 + $0x20] ss:$8 sps:$4 sm:$0xff]   ;;  %v21083_v29 = vld [vmem:[#allocation5 + $0x34] ss:$8 sps:$4 sm:$0xff]  }
  0x31   :  { %20193 = vmatpush3.bf16.msra.mxu0 %v21054_v3  ;;  %1754 = vmatpush1.bf16.msra.mxu1 %v21076_v23  ;;  %v21085_v30 = vld [vmem:[#allocation5 + $0x30] ss:$8 sps:$4 sm:$0xff]   ;;  %v21086_v31 = vld [vmem:[#allocation5 + $0x44] ss:$8 sps:$4 sm:$0xff]   ;;  %v21088_v32 = vld [vmem:[#allocation5 + $0x40] ss:$8 sps:$4 sm:$0xff]  }
  0x32   :  { %20194 = vmatprep.subr.bf16.mxu0 %v29094_v0  ;;  %1755 = vmatprep.subr.bf16.mxu1 %v21077_v25  ;;  %v21089_v33 = vld [vmem:[#allocation5 + $0x54] ss:$8 sps:$4 sm:$0xff]   ;;  %v21091_v34 = vld [vmem:[#allocation5 + $0x50] ss:$8 sps:$4 sm:$0xff]   ;;  %v21092_v35 = vld [vmem:[#allocation5 + $0x64] ss:$8 sps:$4 sm:$0xff]  }
  0x33   :  { %v21094_v36 = vld [vmem:[#allocation5 + $0x60] ss:$8 sps:$4 sm:$0xff]   ;;  %v21095_v37 = vld [vmem:[#allocation5 + $0x74] ss:$8 sps:$4 sm:$0xff]   ;;  %v21097_v38 = vld [vmem:[#allocation5 + $0x70] ss:$8 sps:$4 sm:$0xff]  }
  0x34   :  { %v21098_v39 = vld [vmem:[#allocation5 + $0x84] ss:$8 sps:$4 sm:$0xff]   ;;  %v21100_v40 = vld [vmem:[#allocation5 + $0x80] ss:$8 sps:$4 sm:$0xff]   ;;  %v21101_v41 = vld [vmem:[#allocation5 + $0x94] ss:$8 sps:$4 sm:$0xff]  }
  0x35   :  { %20195 = vmatpush3.bf16.msra.mxu0 %v21055_v4  ;;  %1756 = vmatpush1.bf16.msra.mxu1 %v21079_v26  ;;  %v21103_v42 = vld [vmem:[#allocation5 + $0x90] ss:$8 sps:$4 sm:$0xff]   ;;  %v21104_v43 = vld [vmem:[#allocation5 + $0xa4] ss:$8 sps:$4 sm:$0xff]   ;;  %v21106_v44 = vld [vmem:[#allocation5 + $0xa0] ss:$8 sps:$4 sm:$0xff]  }
  0x36   :  { %20196 = vmatprep.subr.bf16.mxu0 %v29094_v0  ;;  %1757 = vmatprep.subr.bf16.mxu1 %v21080_v27  ;;  %v21107_v45 = vld [vmem:[#allocation5 + $0xb4] ss:$8 sps:$4 sm:$0xff]   ;;  %v21109_v46 = vld [vmem:[#allocation5 + $0xb0] ss:$8 sps:$4 sm:$0xff]   ;;  %v21110_v47 = vld [vmem:[#allocation5 + $0xc4] ss:$8 sps:$4 sm:$0xff]  }
  0x37   :  { %v21112_v48 = vld [vmem:[#allocation5 + $0xc0] ss:$8 sps:$4 sm:$0xff]   ;;  %v21113_v49 = vld [vmem:[#allocation5 + $0xd4] ss:$8 sps:$4 sm:$0xff]   ;;  %v21115_v50 = vld [vmem:[#allocation5 + $0xd0] ss:$8 sps:$4 sm:$0xff]  }
  0x38   :  { %v21116_v51 = vld [vmem:[#allocation5 + $0xe4] ss:$8 sps:$4 sm:$0xff]   ;;  %v21118_v52 = vld [vmem:[#allocation5 + $0xe0] ss:$8 sps:$4 sm:$0xff]   ;;  %v21119_v53 = vld [vmem:[#allocation5 + $0xf4] ss:$8 sps:$4 sm:$0xff]  }
  0x39   :  { %20197 = vmatpush3.bf16.msra.mxu0 %v21056_v5  ;;  %1758 = vmatpush1.bf16.msra.mxu1 %v21082_v28  ;;  %v21121_v54 = vld [vmem:[#allocation5 + $0xf0] ss:$8 sps:$4 sm:$0xff]   ;;  %v21124_v55 = vld [vmem:[#allocation5 + $0x104] ss:$8 sps:$4 sm:$0xff]   ;;  %v23882_v58 = vld [vmem:[%s29084_s2] ss:$0 sm:$0xff] }
  0x3a   :  { %20198 = vmatprep.subr.bf16.mxu0 %v29094_v0  ;;  %1759 = vmatprep.subr.bf16.mxu1 %v21083_v29  ;;  %v21125_v56 = vld [vmem:[%s29082_s0 + $0x70] sm:$0xff]   ;;  %v21132_v57 = vld [vmem:[%s29082_s0 + $0x78] sm:$0xff]  }
  0x3d   :  { %20199 = vmatpush3.bf16.msra.mxu0 %v21057_v6  ;;  %1760 = vmatpush1.bf16.msra.mxu1 %v21085_v30 }
  0x3e   :  { %20200 = vmatprep.subr.bf16.mxu0 %v29094_v0  ;;  %1761 = vmatprep.subr.bf16.mxu1 %v21086_v31 }
  0x41   :  { %20201 = vmatpush3.bf16.msra.mxu0 %v21058_v7  ;;  %1762 = vmatpush1.bf16.msra.mxu1 %v21088_v32 }
  0x42   :  { %20202 = vmatprep.subr.bf16.mxu0 %v29094_v0  ;;  %1763 = vmatprep.subr.bf16.mxu1 %v21089_v33 }
  0x45   :  { %20203 = vmatpush3.bf16.msra.mxu0 %v21059_v8  ;;  %1764 = vmatpush1.bf16.msra.mxu1 %v21091_v34 }
  0x46   :  { %1765 = vmatprep.subr.bf16.mxu1 %v21092_v35 }
  0x48   :  { %20205 = vmatmul.mubr.bf16.vlgmr.msra.gmra.mrb[0].mxu0 %v21060_v9 }
  0x49   :  { %20208 = vmatprep.mubr.msk.bf16.mxu0 %vm23676_vm0, %v29094_v0  ;;  %1766 = vmatpush1.bf16.msra.mxu1 %v21094_v36 }
  0x4a   :  { %1767 = vmatprep.subr.bf16.mxu1 %v21095_v37 }
  0x4d   :  { %1768 = vmatpush1.bf16.msra.mxu1 %v21097_v38 }
  0x4e   :  { %1769 = vmatprep.subr.bf16.mxu1 %v21098_v39 }
  0x50   :  { %20209 = vmatmul.mubr.bf16.gmra.mrb[4].mxu0 %v21061_v10 }
  0x51   :  { %20212 = vmatprep.mubr.msk.bf16.mxu0 %vm23676_vm0, %v29094_v0  ;;  %1770 = vmatpush1.bf16.msra.mxu1 %v21100_v40 }
  0x52   :  { %1771 = vmatprep.subr.bf16.mxu1 %v21101_v41 }
  0x55   :  { %1772 = vmatpush1.bf16.msra.mxu1 %v21103_v42 }
  0x56   :  { %1773 = vmatprep.subr.bf16.mxu1 %v21104_v43  ;;  %v21165_v43 = vld [vmem:[#allocation5 + $0x1d4] ss:$8 sps:$4 sm:$0xff]  }
  0x58   :  { %20213 = vmatmul.mubr.bf16.gmra.mrb[8].mxu0 %v21062_v11 }
  0x59   :  { %20216 = vmatprep.mubr.msk.bf16.mxu0 %vm23676_vm0, %v29094_v0  ;;  %1774 = vmatpush1.bf16.msra.mxu1 %v21106_v44 }
  0x5a   :  { %1775 = vmatprep.subr.bf16.mxu1 %v21107_v45 }
  0x5d   :  { %1776 = vmatpush1.bf16.msra.mxu1 %v21109_v46 }
  0x5e   :  { %1777 = vmatprep.subr.bf16.mxu1 %v21110_v47 }
  0x60   :  { %20217 = vmatmul.mubr.bf16.gmra.mrb[12].mxu0 %v21063_v12 }
  0x61   :  { %20220 = vmatprep.mubr.msk.bf16.mxu0 %vm23676_vm0, %v29094_v0  ;;  %1778 = vmatpush1.bf16.msra.mxu1 %v21112_v48 }
  0x62   :  { %1779 = vmatprep.subr.bf16.mxu1 %v21113_v49 }
  0x65   :  { %1780 = vmatpush1.bf16.msra.mxu1 %v21115_v50 }
  0x66   :  { %1781 = vmatprep.subr.bf16.mxu1 %v21116_v51 }
  0x68   :  { %20221 = vmatmul.mubr.bf16.gmra.mrb[16].mxu0 %v21064_v13 }
  0x69   :  { %20224 = vmatprep.mubr.msk.bf16.mxu0 %vm23676_vm0, %v29094_v0  ;;  %1782 = vmatpush1.bf16.msra.mxu1 %v21118_v52 }
  0x6a   :  { %1783 = vmatprep.subr.bf16.mxu1 %v21119_v53  ;;  %v21157_v53 = vld [vmem:[#allocation5 + $0x1b0] ss:$8 sps:$4 sm:$0xff]  }
  0x6d   :  { %1784 = vmatpush1.bf16.msra.mxu1 %v21121_v54 }
  0x6e   :  { %1854 = vmatprep.subr.bf16.mxu1 %v21124_v55 }
  0x70   :  { %20225 = vmatmul.mubr.bf16.gmra.mrb[20].mxu0 %v21065_v14 }
  0x71   :  { %20228 = vmatprep.mubr.msk.bf16.mxu0 %vm23676_vm0, %v29094_v0 }
  0x78   :  { %20229 = vmatmul.mubr.bf16.gmra.mrb[24].mxu0 %v21066_v15 }
  0x79   :  { %20232 = vmatprep.mubr.msk.bf16.mxu0 %vm23676_vm0, %v29094_v0 }
  0x80   :  { %20233 = vmatmul.mubr.bf16.gmra.mrb[28].mxu0 %v21067_v16 }
  0x81   :  { %20236 = vmatprep.mubr.msk.bf16.mxu0 %vm23676_vm0, %v29094_v0 }
  0x88   :  { %20237 = vmatmul.mubr.bf16.gmra.mrb[32].mxu0 %v21068_v17 }
  0x89   :  { %20240 = vmatprep.mubr.msk.bf16.mxu0 %vm23676_vm0, %v29094_v0 }
  0x90   :  { %20241 = vmatmul.mubr.bf16.gmra.mrb[36].mxu0 %v21069_v18 }
  0x91   :  { %20244 = vmatprep.mubr.msk.bf16.mxu0 %vm23676_vm0, %v29094_v0 }
  0x98   :  { %20245 = vmatmul.mubr.bf16.gmra.mrb[40].mxu0 %v21070_v19 }
  0x99   :  { %20248 = vmatprep.mubr.msk.bf16.mxu0 %vm23676_vm0, %v29094_v0 }
  0xa0   :  { %20249 = vmatmul.mubr.bf16.gmra.mrb[44].mxu0 %v21071_v20 }
  0xa1   :  { %20252 = vmatprep.mubr.msk.bf16.mxu0 %vm23676_vm0, %v29094_v0 }
  0xa8   :  { %20253 = vmatmul.mubr.bf16.gmra.mrb[48].mxu0 %v21072_v21 }
  0xa9   :  { %20256 = vmatprep.mubr.msk.bf16.mxu0 %vm23676_vm0, %v29094_v0 }
  0xb0   :  { %20257 = vmatmul.mubr.bf16.gmra.mrb[52].mxu0 %v21073_v24 }
  0xb1   :  { %20260 = vmatprep.mubr.msk.bf16.mxu0 %vm23676_vm0, %v29094_v0 }
  0xb8   :  { %20261 = vmatmul.mubr.bf16.gmra.mrb[56].mxu0 %v21125_v56 }
  0xb9   :  { %20264 = vmatprep.mubr.msk.bf16.mxu0 %vm23676_vm0, %v29094_v0 }
  0xc0   :  { %20265 = vmatmul.mubr.bf16.gmra.mrb[60].mxu0 %v21132_v57 }
  0xc1   :  { %20268 = vmatprep.mubr.msk.bf16.mxu0 %vm23676_vm0, %v29094_v0 }
 0x11b   :  { %v402_v59 = vpop.f32.mrb[0].mxu0 }
 0x11c   :  { %v403_v60 = vadd.f32 %v23882_v58, %v402_v59  ;;  %v20206_v61 = vpop.f32.mrb[1].mxu0 }
 0x11d   :  { %v405_v62 = vpop.f32.mrb[2].mxu0 }
 0x11e   :  { %v632_v63 = vmax.f32 %v403_v60, 0.0  ;;  %v406_v1 = vadd.f32 %v23882_v58, %v405_v62  ;;  %v20207_v2 = vpop.f32.mrb[3].mxu0 }
 0x120   :  { %689 = vst [vmem:[#allocation2] sm:$0xff] %v632_v63  ;;  %v23886_v3 = vmax.f32 %v406_v1, 0.0 }
 0x122   :  { %690 = vst [vmem:[#allocation2 + $0x8] sm:$0xff] %v23886_v3  ;;  %v23890_v4 = vpack.c.bf16 %v23886_v3, %v632_v63 }
 0x123   :  { %v410_v5 = vpop.f32.mrb[4].mxu0 }
 0x124   :  { %v411_v6 = vadd.f32 %v23882_v58, %v410_v5  ;;  %v20210_v7 = vpop.f32.mrb[5].mxu0 }
 0x125   :  { %v413_v8 = vpop.f32.mrb[6].mxu0 }
 0x126   :  { %v23893_v9 = vmax.f32 %v411_v6, 0.0  ;;  %v414_v10 = vadd.f32 %v23882_v58, %v413_v8  ;;  %v20211_v11 = vpop.f32.mrb[7].mxu0 }
 0x128   :  { %691 = vst [vmem:[#allocation2 + $0x10] sm:$0xff] %v23893_v9  ;;  %v23897_v12 = vmax.f32 %v414_v10, 0.0  ;;  %v828_v13 = vpack.c.bf16 %v23893_v9, %v23886_v3  ;;  %v21295_v3 = vld [vmem:[%s29087_s5 + $0x20] ss:$16 sps:$4 sm:$0xff]  }
 0x12a   :  { %692 = vst [vmem:[#allocation2 + $0x18] sm:$0xff] %v23897_v12  ;;  %v23904_v14 = vpack.c.bf16 %v23897_v12, %v23893_v9  ;;  %v21297_v9 = vld [vmem:[%s29087_s5 + $0x24] ss:$16 sps:$4 sm:$0xff]  }
 0x12b   :  { %v418_v15 = vpop.f32.mrb[8].mxu0 }
 0x12c   :  { %v419_v16 = vadd.f32 %v23882_v58, %v418_v15  ;;  %v20214_v17 = vpop.f32.mrb[9].mxu0 }
 0x12d   :  { %v421_v18 = vpop.f32.mrb[10].mxu0 }
 0x12e   :  { %v23907_v19 = vmax.f32 %v419_v16, 0.0  ;;  %v422_v20 = vadd.f32 %v23882_v58, %v421_v18  ;;  %v20215_v21 = vpop.f32.mrb[11].mxu0 }
 0x130   :  { %693 = vst [vmem:[#allocation2 + $0x20] sm:$0xff] %v23907_v19  ;;  %v23911_v22 = vmax.f32 %v422_v20, 0.0  ;;  %v829_v23 = vpack.c.bf16 %v23907_v19, %v23897_v12  ;;  %v21237_v12 = vld [vmem:[#allocation5 + $0x354] ss:$8 sps:$4 sm:$0xff]  }
 0x132   :  { %694 = vst [vmem:[#allocation2 + $0x28] sm:$0xff] %v23911_v22  ;;  %v23918_v24 = vpack.c.bf16 %v23911_v22, %v23907_v19  ;;  %v21235_v19 = vld [vmem:[#allocation5 + $0x350] ss:$8 sps:$4 sm:$0xff]  }
 0x133   :  { %v426_v25 = vpop.f32.mrb[12].mxu0 }
 0x134   :  { %v427_v26 = vadd.f32 %v23882_v58, %v426_v25  ;;  %v20218_v27 = vpop.f32.mrb[13].mxu0 }
 0x135   :  { %v429_v28 = vpop.f32.mrb[14].mxu0 }
 0x136   :  { %v23921_v29 = vmax.f32 %v427_v26, 0.0  ;;  %v430_v30 = vadd.f32 %v23882_v58, %v429_v28  ;;  %v20219_v31 = vpop.f32.mrb[15].mxu0 }
 0x138   :  { %695 = vst [vmem:[#allocation2 + $0x30] sm:$0xff] %v23921_v29  ;;  %v23925_v32 = vmax.f32 %v430_v30, 0.0  ;;  %v830_v33 = vpack.c.bf16 %v23921_v29, %v23911_v22  ;;  %v21298_v22 = vld [vmem:[%s29087_s5 + $0x40] ss:$16 sps:$4 sm:$0xff]  }
 0x13a   :  { %696 = vst [vmem:[#allocation2 + $0x38] sm:$0xff] %v23925_v32  ;;  %v23932_v34 = vpack.c.bf16 %v23925_v32, %v23921_v29  ;;  %v21300_v29 = vld [vmem:[%s29087_s5 + $0x44] ss:$16 sps:$4 sm:$0xff]  }
 0x13b   :  { %v434_v35 = vpop.f32.mrb[16].mxu0 }
 0x13c   :  { %v435_v36 = vadd.f32 %v23882_v58, %v434_v35  ;;  %v20222_v37 = vpop.f32.mrb[17].mxu0 }
 0x13d   :  { %v437_v38 = vpop.f32.mrb[18].mxu0 }
 0x13e   :  { %v23935_v39 = vmax.f32 %v435_v36, 0.0  ;;  %v438_v40 = vadd.f32 %v23882_v58, %v437_v38  ;;  %v20223_v41 = vpop.f32.mrb[19].mxu0 }
 0x140   :  { %697 = vst [vmem:[#allocation2 + $0x40] sm:$0xff] %v23935_v39  ;;  %v23939_v42 = vmax.f32 %v438_v40, 0.0 }
 0x142   :  { %698 = vst [vmem:[#allocation2 + $0x48] sm:$0xff] %v23939_v42  ;;  %v23946_v44 = vpack.c.bf16 %v23939_v42, %v23935_v39 }
 0x143   :  { %v442_v45 = vpop.f32.mrb[20].mxu0 }
 0x144   :  { %v443_v46 = vadd.f32 %v23882_v58, %v442_v45  ;;  %v20226_v47 = vpop.f32.mrb[21].mxu0  ;;  %v21122_v45 = vld [vmem:[#allocation5 + $0x100] ss:$8 sps:$4 sm:$0xff]  }
 0x145   :  { %v445_v48 = vpop.f32.mrb[22].mxu0 }
 0x146   :  { %v23949_v49 = vmax.f32 %v443_v46, 0.0  ;;  %v446_v50 = vadd.f32 %v23882_v58, %v445_v48  ;;  %v20227_v51 = vpop.f32.mrb[23].mxu0 }
 0x148   :  { %699 = vst [vmem:[#allocation2 + $0x50] sm:$0xff] %v23949_v49  ;;  %v643_v52 = vmax.f32 %v446_v50, 0.0 }
 0x14a   :  { %700 = vst [vmem:[#allocation2 + $0x58] sm:$0xff] %v643_v52  ;;  %v23956_v54 = vpack.c.bf16 %v643_v52, %v23949_v49  ;;  %v21128_v52 = vld [vmem:[#allocation5 + $0x114] ss:$8 sps:$4 sm:$0xff]  }
 0x14b   :  { %v450_v55 = vpop.f32.mrb[24].mxu0 }
 0x14c   :  { %v451_v56 = vadd.f32 %v23882_v58, %v450_v55  ;;  %v20230_v57 = vpop.f32.mrb[25].mxu0 }
 0x14d   :  { %v453_v59 = vpop.f32.mrb[26].mxu0 }
 0x14e   :  { %v644_v60 = vmax.f32 %v451_v56, 0.0  ;;  %v454_v61 = vadd.f32 %v23882_v58, %v453_v59  ;;  %v20231_v62 = vpop.f32.mrb[27].mxu0 }
 0x14f   :  { %v21131_v62 = vld [vmem:[#allocation5 + $0x124] ss:$8 sps:$4 sm:$0xff]  }
 0x150   :  { %701 = vst [vmem:[#allocation2 + $0x60] sm:$0xff] %v644_v60  ;;  %v645_v63 = vmax.f32 %v454_v61, 0.0  ;;  %v21126_v61 = vld [vmem:[#allocation5 + $0x110] ss:$8 sps:$4 sm:$0xff]  }
 0x152   :  { %702 = vst [vmem:[#allocation2 + $0x68] sm:$0xff] %v645_v63 }
 0x153   :  { %v458_v1 = vpop.f32.mrb[28].mxu0 }
 0x154   :  { %v459_v2 = vadd.f32 %v23882_v58, %v458_v1  ;;  %v20234_v5 = vpop.f32.mrb[29].mxu0 }
 0x155   :  { %v461_v6 = vpop.f32.mrb[30].mxu0 }
 0x156   :  { %v646_v7 = vmax.f32 %v459_v2, 0.0  ;;  %v462_v8 = vadd.f32 %v23882_v58, %v461_v6  ;;  %v20235_v10 = vpop.f32.mrb[31].mxu0  ;;  %v21129_v6 = vld [vmem:[#allocation5 + $0x120] ss:$8 sps:$4 sm:$0xff]  }
 0x158   :  { %703 = vst [vmem:[#allocation2 + $0x70] sm:$0xff] %v646_v7  ;;  %v647_v11 = vmax.f32 %v462_v8, 0.0 }
 0x15a   :  { %704 = vst [vmem:[#allocation2 + $0x78] sm:$0xff] %v647_v11 }
 0x15b   :  { %v466_v15 = vpop.f32.mrb[32].mxu0 }
 0x15c   :  { %v467_v16 = vadd.f32 %v23882_v58, %v466_v15  ;;  %v20238_v17 = vpop.f32.mrb[33].mxu0 }
 0x15d   :  { %v469_v18 = vpop.f32.mrb[34].mxu0 }
 0x15e   :  { %v23963_v20 = vmax.f32 %v467_v16, 0.0  ;;  %v470_v21 = vadd.f32 %v23882_v58, %v469_v18  ;;  %v20239_v25 = vpop.f32.mrb[35].mxu0 }
 0x160   :  { %705 = vst [vmem:[#allocation2 + $0x80] sm:$0xff] %v23963_v20  ;;  %v23967_v26 = vmax.f32 %v470_v21, 0.0  ;;  %v23970_v27 = vpack.c.bf16 %v23963_v20, %v647_v11  ;;  %v21135_v11 = vld [vmem:[#allocation5 + $0x134] ss:$8 sps:$4 sm:$0xff]  }
 0x161   :  { %v766_v37 = vld [vmem:[#allocation2 + $0x71] sm:$0xff] }
 0x162   :  { %706 = vst [vmem:[#allocation2 + $0x88] sm:$0xff] %v23967_v26 }
 0x163   :  { %v474_v30 = vpop.f32.mrb[36].mxu0 }
 0x164   :  { %v475_v31 = vadd.f32 %v23882_v58, %v474_v30  ;;  %v20242_v35 = vpop.f32.mrb[37].mxu0  ;;  %v21133_v30 = vld [vmem:[#allocation5 + $0x130] ss:$8 sps:$4 sm:$0xff]  }
 0x165   :  { %v477_v36 = vpop.f32.mrb[38].mxu0 }
 0x166   :  { %v23976_v38 = vmax.f32 %v475_v31, 0.0  ;;  %v478_v40 = vadd.f32 %v23882_v58, %v477_v36  ;;  %v20243_v41 = vpop.f32.mrb[39].mxu0  ;;  %v21138_v31 = vld [vmem:[#allocation5 + $0x144] ss:$8 sps:$4 sm:$0xff]  }
 0x167   :  { %v23979_v46 = vld [vmem:[#allocation2 + $0x79] sm:$0xff] }
 0x168   :  { %707 = vst [vmem:[#allocation2 + $0x90] sm:$0xff] %v23976_v38  ;;  %v23982_v47 = vmax.f32 %v478_v40, 0.0  ;;  %v779_v48 = vpack.c.bf16 %v23979_v46, %v766_v37  ;;  %v820_v50 = vpack.c.bf16 %v23976_v38, %v23967_v26  ;;  %v21136_v41 = vld [vmem:[#allocation5 + $0x140] ss:$8 sps:$4 sm:$0xff]  }
 0x169   :  { %v23987_v51 = vld [vmem:[#allocation2 + $0x81] sm:$0xff] }
 0x16a   :  { %708 = vst [vmem:[#allocation2 + $0x98] sm:$0xff] %v23982_v47  ;;  %v837_v55 = vpack.c.bf16 %v23987_v51, %v23979_v46  ;;  %1785 = vmatprep.mubr.bf16.mxu1 %v779_v48  ;;  %v21220_v46 = vld [vmem:[#allocation5 + $0x300] ss:$8 sps:$4 sm:$0xff]  }
 0x16b   :  { %v482_v57 = vpop.f32.mrb[40].mxu0  ;;  %1786 = vmatmul.mubr.bf16.vlgmr.msra.gmra.mrb[0].mxu1 %v23890_v4 }
 0x16c   :  { %v483_v59 = vadd.f32 %v23882_v58, %v482_v57  ;;  %1855 = vmatpush1.bf16.msra.mxu1 %v21122_v45  ;;  %v20246_v60 = vpop.f32.mrb[41].mxu0 }
 0x16d   :  { %v485_v63 = vpop.f32.mrb[42].mxu0  ;;  %1856 = vmatprep.subr.bf16.mxu1 %v21128_v52 }
 0x16e   :  { %v23996_v1 = vmax.f32 %v483_v59, 0.0  ;;  %v486_v2 = vadd.f32 %v23882_v58, %v485_v63  ;;  %v20247_v5 = vpop.f32.mrb[43].mxu0  ;;  %v21141_v59 = vld [vmem:[#allocation5 + $0x154] ss:$8 sps:$4 sm:$0xff]  }
 0x16f   :  { %v23999_v7 = vld [vmem:[#allocation2 + $0x89] sm:$0xff] }
 0x170   :  { %709 = vst [vmem:[#allocation2 + $0xa0] sm:$0xff] %v23996_v1  ;;  %v24002_v8 = vmax.f32 %v486_v2, 0.0  ;;  %1857 = vmatpush1.bf16.msra.mxu1 %v21126_v61  ;;  %v780_v4 = vpack.c.bf16 %v23999_v7, %v23987_v51  ;;  %v821_v10 = vpack.c.bf16 %v23996_v1, %v23982_v47  ;;  %v21225_v51 = vld [vmem:[#allocation5 + $0x314] ss:$8 sps:$4 sm:$0xff]  }
 0x171   :  { %1858 = vmatprep.subr.bf16.mxu1 %v21131_v62  ;;  %v24008_v15 = vld [vmem:[#allocation2 + $0x91] sm:$0xff]  ;;  %v21148_v62 = vld [vmem:[#allocation5 + $0x180] ss:$8 sps:$4 sm:$0xff]  }
 0x172   :  { %710 = vst [vmem:[#allocation2 + $0xa8] sm:$0xff] %v24002_v8  ;;  %1795 = vmatprep.mubr.bf16.mxu1 %v780_v4  ;;  %v838_v16 = vpack.c.bf16 %v24008_v15, %v23999_v7  ;;  %v21144_v4 = vld [vmem:[#allocation5 + $0x164] ss:$8 sps:$4 sm:$0xff]  }
 0x173   :  { %v490_v18 = vpop.f32.mrb[44].mxu0  ;;  %1796 = vmatmul.mubr.bf16.gmra.mrb[4].mxu1 %v23904_v14 }
 0x174   :  { %v491_v21 = vadd.f32 %v23882_v58, %v490_v18  ;;  %1859 = vmatpush1.bf16.msra.mxu1 %v21129_v6  ;;  %v20250_v25 = vpop.f32.mrb[45].mxu0  ;;  %v21139_v6 = vld [vmem:[#allocation5 + $0x150] ss:$8 sps:$4 sm:$0xff]  }
 0x175   :  { %v493_v35 = vpop.f32.mrb[46].mxu0  ;;  %1860 = vmatprep.subr.bf16.mxu1 %v21135_v11 }
 0x176   :  { %v24017_v36 = vmax.f32 %v491_v21, 0.0  ;;  %v494_v37 = vadd.f32 %v23882_v58, %v493_v35  ;;  %v20251_v40 = vpop.f32.mrb[47].mxu0 }
 0x177   :  { %v24020_v45 = vld [vmem:[#allocation2 + $0x99] sm:$0xff] }
 0x178   :  { %711 = vst [vmem:[#allocation2 + $0xb0] sm:$0xff] %v24017_v36  ;;  %v24023_v48 = vmax.f32 %v494_v37, 0.0  ;;  %1861 = vmatpush1.bf16.msra.mxu1 %v21133_v30  ;;  %v781_v52 = vpack.c.bf16 %v24020_v45, %v24008_v15  ;;  %v822_v57 = vpack.c.bf16 %v24017_v36, %v24002_v8  ;;  %v21142_v30 = vld [vmem:[#allocation5 + $0x160] ss:$8 sps:$4 sm:$0xff]  }
 0x179   :  { %1862 = vmatprep.subr.bf16.mxu1 %v21138_v31  ;;  %v24029_v60 = vld [vmem:[#allocation2 + $0xa1] sm:$0xff] }
 0x17a   :  { %712 = vst [vmem:[#allocation2 + $0xb8] sm:$0xff] %v24023_v48  ;;  %1805 = vmatprep.mubr.bf16.mxu1 %v781_v52  ;;  %v839_v61 = vpack.c.bf16 %v24029_v60, %v24020_v45  ;;  %v21238_v15 = vld [vmem:[#allocation5 + $0x360] ss:$8 sps:$4 sm:$0xff]   ;;  %v21241_v45 = vld [vmem:[#allocation5 + $0x370] ss:$8 sps:$4 sm:$0xff]  }
 0x17b   :  { %v498_v63 = vpop.f32.mrb[48].mxu0  ;;  %1806 = vmatmul.mubr.bf16.gmra.mrb[8].mxu1 %v23918_v24 }
 0x17c   :  { %v499_v2 = vadd.f32 %v23882_v58, %v498_v63  ;;  %1863 = vmatpush1.bf16.msra.mxu1 %v21136_v41  ;;  %v20254_v5 = vpop.f32.mrb[49].mxu0  ;;  %v21147_v41 = vld [vmem:[#allocation5 + $0x174] ss:$8 sps:$4 sm:$0xff]  }
 0x17d   :  { %v501_v11 = vpop.f32.mrb[50].mxu0  ;;  %1864 = vmatprep.subr.bf16.mxu1 %v21141_v59 }
 0x17e   :  { %v24038_v18 = vmax.f32 %v499_v2, 0.0  ;;  %v502_v21 = vadd.f32 %v23882_v58, %v501_v11  ;;  %v20255_v25 = vpop.f32.mrb[51].mxu0  ;;  %v21150_v11 = vld [vmem:[#allocation5 + $0x184] ss:$8 sps:$4 sm:$0xff]  }
 0x17f   :  { %v24041_v31 = vld [vmem:[#allocation2 + $0xa9] sm:$0xff] }
 0x180   :  { %713 = vst [vmem:[#allocation2 + $0xc0] sm:$0xff] %v24038_v18  ;;  %v24044_v35 = vmax.f32 %v502_v21, 0.0  ;;  %1865 = vmatpush1.bf16.msra.mxu1 %v21139_v6  ;;  %v782_v37 = vpack.c.bf16 %v24041_v31, %v24029_v60  ;;  %v823_v40 = vpack.c.bf16 %v24038_v18, %v24023_v48  ;;  %v29128_v60 = vpack.c.bf16 %v23935_v39, %v23925_v32  ;;  %v21249_v32 = vld [vmem:[#allocation5 + $0x394] ss:$8 sps:$4 sm:$0xff]  }
 0x181   :  { %1866 = vmatprep.subr.bf16.mxu1 %v21144_v4  ;;  %v24050_v52 = vld [vmem:[#allocation2 + $0xb1] sm:$0xff] }
 0x182   :  { %714 = vst [vmem:[#allocation2 + $0xc8] sm:$0xff] %v24044_v35  ;;  %1815 = vmatprep.mubr.bf16.mxu1 %v782_v37  ;;  %v21145_v4 = vld [vmem:[#allocation5 + $0x170] ss:$8 sps:$4 sm:$0xff]   ;;  %v29127_v7 = vpack.c.bf16 %v24050_v52, %v24041_v31 }
 0x183   :  { %v506_v2 = vpop.f32.mrb[52].mxu0  ;;  %1816 = vmatmul.mubr.bf16.gmra.mrb[12].mxu1 %v23932_v34 }
 0x184   :  { %v507_v5 = vadd.f32 %v23882_v58, %v506_v2  ;;  %1867 = vmatpush1.bf16.msra.mxu1 %v21142_v30  ;;  %v20258_v6 = vpop.f32.mrb[53].mxu0 }
 0x185   :  { %v509_v21 = vpop.f32.mrb[54].mxu0  ;;  %1868 = vmatprep.subr.bf16.mxu1 %v21147_v41  ;;  %v21153_v41 = vld [vmem:[#allocation5 + $0x194] ss:$8 sps:$4 sm:$0xff]   ;;  %v21151_v6 = vld [vmem:[#allocation5 + $0x190] ss:$8 sps:$4 sm:$0xff]  }
 0x186   :  { %v24059_v25 = vmax.f32 %v507_v5, 0.0  ;;  %v510_v37 = vadd.f32 %v23882_v58, %v509_v21  ;;  %v20259_v17 = vpop.f32.mrb[55].mxu0  ;;  %v21154_v21 = vld [vmem:[#allocation5 + $0x1a0] ss:$8 sps:$4 sm:$0xff]  }
 0x187   :  { %v24062_v56 = vld [vmem:[#allocation2 + $0xb9] sm:$0xff] }
 0x188   :  { %715 = vst [vmem:[#allocation2 + $0xd0] sm:$0xff] %v24059_v25  ;;  %v659_v63 = vmax.f32 %v510_v37, 0.0  ;;  %1869 = vmatpush1.bf16.msra.mxu1 %v21145_v4  ;;  %v783_v30 = vpack.c.bf16 %v24062_v56, %v24050_v52  ;;  %v824_v2 = vpack.c.bf16 %v24059_v25, %v24044_v35  ;;  %v21156_v4 = vld [vmem:[#allocation5 + $0x1a4] ss:$8 sps:$4 sm:$0xff]   ;;  %v21160_v58 = vld [vmem:[#allocation5 + $0x1c0] ss:$8 sps:$4 sm:$0xff]  }
 0x189   :  { %1870 = vmatprep.subr.bf16.mxu1 %v21150_v11  ;;  %v24069_v5 = vld [vmem:[#allocation2 + $0xc1] sm:$0xff] }
 0x18a   :  { %716 = vst [vmem:[#allocation2 + $0xd8] sm:$0xff] %v659_v63  ;;  %1825 = vmatprep.mubr.bf16.mxu1 %v783_v30  ;;  %v24074_v17 = vpack.c.bf16 %v659_v63, %v24059_v25  ;;  %v21159_v30 = vld [vmem:[#allocation5 + $0x1b4] ss:$8 sps:$4 sm:$0xff]   ;;  %v21162_v63 = vld [vmem:[#allocation5 + $0x1c4] ss:$8 sps:$4 sm:$0xff]  }
 0x18b   :  { %1826 = vmatmul.mubr.bf16.gmra.mrb[16].mxu1 %v23946_v44  ;;  %v21205_v25 = vld [vmem:[#allocation5 + $0x2b0] ss:$8 sps:$4 sm:$0xff]   ;;  %v21244_v52 = vld [vmem:[#allocation5 + $0x380] ss:$8 sps:$4 sm:$0xff]  }
 0x18c   :  { %1871 = vmatpush1.bf16.msra.mxu1 %v21148_v62  ;;  %v758_v62 = vld [vmem:[#allocation2 + $0x60] sm:$0x1] }
 0x18d   :  { %1872 = vmatprep.subr.bf16.mxu1 %v21153_v41  ;;  %v765_v41 = vpack.c.bf16 %v758_v62, %v758_v62 }
 0x18f   :  { %v777_v37 = vld [vmem:[#allocation2 + $0xc9] sm:$0xff]  ;;  %v778_v11 = vld [vmem:[#allocation2 + $0xd1] sm:$0x1] }
 0x190   :  { %1873 = vmatpush1.bf16.msra.mxu1 %v21151_v6  ;;  %v784_v28 = vpack.c.bf16 %v777_v37, %v24069_v5  ;;  %v785_v0 = vpack.c.bf16 %v778_v11, %v778_v11  ;;  %v21163_v6 = vld [vmem:[#allocation5 + $0x1d0] ss:$8 sps:$4 sm:$0xff]   ;;  %v21171_v37 = vld [vmem:[#allocation5 + $0x1f4] ss:$8 sps:$4 sm:$0xff]   ;;  %v21174_v11 = vld [vmem:[#allocation5 + $0x204] ss:$8 sps:$4 sm:$0xff]  }
 0x191   :  { %1874 = vmatprep.subr.bf16.mxu1 %v21156_v4  ;;  %v21168_v4 = vld [vmem:[#allocation5 + $0x1e4] ss:$8 sps:$4 sm:$0xff]   ;;  %v835_v31 = vld [vmem:[#allocation2 + $0xd1] sm:$0xff] }
 0x192   :  { %1835 = vmatprep.mubr.bf16.mxu1 %v784_v28  ;;  %v21166_v28 = vld [vmem:[#allocation5 + $0x1e0] ss:$8 sps:$4 sm:$0xff]  }
 0x193   :  { %1836 = vmatmul.mubr.bf16.gmra.mrb[20].mxu1 %v23956_v54  ;;  %v23559_v39 = vld [vmem:[#allocation2 + $0xc9] sm:$0xff] }
 0x194   :  { %1875 = vmatpush1.bf16.msra.mxu1 %v21154_v21  ;;  %1845 = vmatprep.mubr.bf16.mxu1 %v785_v0  ;;  %v21169_v0 = vld [vmem:[#allocation5 + $0x1f0] ss:$8 sps:$4 sm:$0xff]  }
 0x195   :  { %1876 = vmatprep.subr.bf16.mxu1 %v21159_v30  ;;  %v787_v21 = vld [vmem:[#allocation2 + $0x9] sm:$0xff] }
 0x196   :  { %v21172_v30 = vld [vmem:[#allocation5 + $0x200] ss:$8 sps:$4 sm:$0xff]  }
 0x198   :  { %1877 = vmatpush1.bf16.msra.mxu1 %v21157_v53  ;;  %v786_v53 = vld [vmem:[#allocation2 + $0x1] sm:$0xff] }
 0x199   :  { %1878 = vmatprep.subr.bf16.mxu1 %v21162_v63  ;;  %v21177_v63 = vld [vmem:[#allocation5 + $0x214] ss:$8 sps:$4 sm:$0xff]   ;;  %v799_v62 = vpack.c.bf16 %v787_v21, %v786_v53  ;;  %v21186_v21 = vld [vmem:[#allocation5 + $0x244] ss:$8 sps:$4 sm:$0xff]  }
 0x19a   :  { %v21189_v53 = vld [vmem:[#allocation5 + $0x254] ss:$8 sps:$4 sm:$0xff]  }
 0x19b   :  { %1846 = vmatmul.mubr.bf16.gmra.mrb[24].mxu1 %v765_v41  ;;  %v788_v41 = vld [vmem:[#allocation2 + $0x11] sm:$0xff] }
 0x19c   :  { %1879 = vmatpush1.bf16.msra.mxu1 %v21160_v58  ;;  %1886 = vmatprep.mubr.bf16.mxu1 %v23970_v27  ;;  %v21175_v27 = vld [vmem:[#allocation5 + $0x210] ss:$8 sps:$4 sm:$0xff]   ;;  %v21180_v58 = vld [vmem:[#allocation5 + $0x224] ss:$8 sps:$4 sm:$0xff]  }
 0x19d   :  { %1880 = vmatprep.subr.bf16.mxu1 %v21165_v43  ;;  %v789_v43 = vld [vmem:[#allocation2 + $0x19] sm:$0xff] }
 0x1a0   :  { %1881 = vmatpush1.bf16.msra.mxu1 %v21163_v6  ;;  %v21178_v6 = vld [vmem:[#allocation5 + $0x220] ss:$8 sps:$4 sm:$0xff]  }
 0x1a1   :  { %1882 = vmatprep.subr.bf16.mxu1 %v21168_v4  ;;  %v21183_v4 = vld [vmem:[#allocation5 + $0x234] ss:$8 sps:$4 sm:$0xff]  }
 0x1a4   :  { %1883 = vmatpush1.bf16.msra.mxu1 %v21166_v28  ;;  %v800_v28 = vpack.c.bf16 %v789_v43, %v788_v41  ;;  %v21190_v43 = vld [vmem:[#allocation5 + $0x260] ss:$8 sps:$4 sm:$0xff]  }
 0x1a5   :  { %1884 = vmatprep.subr.bf16.mxu1 %v21171_v37  ;;  %v21181_v37 = vld [vmem:[#allocation5 + $0x230] ss:$8 sps:$4 sm:$0xff]  }
 0x1a8   :  { %1885 = vmatpush1.bf16.msra.mxu1 %v21169_v0  ;;  %v791_v0 = vld [vmem:[#allocation2 + $0x29] sm:$0xff] }
 0x1a9   :  { %1955 = vmatprep.subr.bf16.mxu1 %v21174_v11  ;;  %v21184_v11 = vld [vmem:[#allocation5 + $0x240] ss:$8 sps:$4 sm:$0xff]  }
 0x1ab   :  { %1887 = vmatmul.mubr.bf16.vlgmr.msra.gmra.mrb[0].mxu1 %v799_v62  ;;  %v793_v62 = vld [vmem:[#allocation2 + $0x39] sm:$0xff] }
 0x1ac   :  { %1896 = vmatprep.mubr.bf16.mxu1 %v820_v50  ;;  %1956 = vmatpush1.bf16.msra.mxu1 %v21172_v30  ;;  %v790_v50 = vld [vmem:[#allocation2 + $0x21] sm:$0xff] }
 0x1ad   :  { %1957 = vmatprep.subr.bf16.mxu1 %v21177_v63  ;;  %v801_v30 = vpack.c.bf16 %v791_v0, %v790_v50  ;;  %v21187_v63 = vld [vmem:[#allocation5 + $0x250] ss:$8 sps:$4 sm:$0xff]   ;;  %v794_v50 = vld [vmem:[#allocation2 + $0x41] sm:$0xff] }
 0x1b0   :  { %1958 = vmatpush1.bf16.msra.mxu1 %v21175_v27  ;;  %v21192_v27 = vld [vmem:[#allocation5 + $0x264] ss:$8 sps:$4 sm:$0xff]  }
 0x1b1   :  { %1959 = vmatprep.subr.bf16.mxu1 %v21180_v58  ;;  %v21195_v58 = vld [vmem:[#allocation5 + $0x274] ss:$8 sps:$4 sm:$0xff]  }
 0x1b3   :  { %1897 = vmatmul.mubr.bf16.gmra.mrb[4].mxu1 %v800_v28  ;;  %v21198_v28 = vld [vmem:[#allocation5 + $0x284] ss:$8 sps:$4 sm:$0xff]  }
 0x1b4   :  { %1906 = vmatprep.mubr.bf16.mxu1 %v821_v10  ;;  %1960 = vmatpush1.bf16.msra.mxu1 %v21178_v6  ;;  %v792_v10 = vld [vmem:[#allocation2 + $0x31] sm:$0xff] }
 0x1b5   :  { %1961 = vmatprep.subr.bf16.mxu1 %v21183_v4  ;;  %v802_v41 = vpack.c.bf16 %v793_v62, %v792_v10  ;;  %v21193_v6 = vld [vmem:[#allocation5 + $0x270] ss:$8 sps:$4 sm:$0xff]  }
 0x1b6   :  { %v795_v4 = vld [vmem:[#allocation2 + $0x49] sm:$0xff] }
 0x1b8   :  { %1962 = vmatpush1.bf16.msra.mxu1 %v21181_v37  ;;  %v23558_v37 = vld [vmem:[%s29084_s2] ss:$0 sm:$0xff] }
 0x1b9   :  { %1963 = vmatprep.subr.bf16.mxu1 %v21186_v21 }
 0x1bb   :  { %1907 = vmatmul.mubr.bf16.gmra.mrb[8].mxu1 %v801_v30  ;;  %v21201_v30 = vld [vmem:[#allocation5 + $0x294] ss:$8 sps:$4 sm:$0xff]  }
 0x1bc   :  { %1916 = vmatprep.mubr.bf16.mxu1 %v822_v57  ;;  %1964 = vmatpush1.bf16.msra.mxu1 %v21184_v11  ;;  %v514_v57 = vpop.f32.mrb[56].mxu0  ;;  %v21196_v11 = vld [vmem:[#allocation5 + $0x280] ss:$8 sps:$4 sm:$0xff]  }
 0x1bd   :  { %1965 = vmatprep.subr.bf16.mxu1 %v21189_v53  ;;  %v515_v0 = vadd.f32 %v23558_v37, %v514_v57  ;;  %v20262_v21 = vpop.f32.mrb[57].mxu0 }
 0x1be   :  { %v517_v53 = vpop.f32.mrb[58].mxu0  ;;  %v21204_v21 = vld [vmem:[#allocation5 + $0x2a4] ss:$8 sps:$4 sm:$0xff]  }
 0x1bf   :  { %v518_v62 = vadd.f32 %v23558_v37, %v517_v53 }
 0x1c0   :  { %1966 = vmatpush1.bf16.msra.mxu1 %v21187_v63  ;;  %v660_v63 = vmax.f32 %v515_v0, 0.0  ;;  %v797_v0 = vld [vmem:[#allocation2 + $0x59] sm:$0xff] }
 0x1c1   :  { %1967 = vmatprep.subr.bf16.mxu1 %v21192_v27  ;;  %v20263_v27 = vpop.f32.mrb[59].mxu0  ;;  %v661_v10 = vmax.f32 %v518_v62, 0.0 }
 0x1c2   :  { %717 = vst [vmem:[#allocation2 + $0xe0] sm:$0xff] %v660_v63  ;;  %v21202_v63 = vld [vmem:[#allocation5 + $0x2a0] ss:$8 sps:$4 sm:$0xff]  }
 0x1c3   :  { %1917 = vmatmul.mubr.bf16.gmra.mrb[12].mxu1 %v802_v41  ;;  %718 = vst [vmem:[#allocation2 + $0xe8] sm:$0xff] %v661_v10 }
 0x1c4   :  { %1926 = vmatprep.mubr.bf16.mxu1 %v823_v40  ;;  %1968 = vmatpush1.bf16.msra.mxu1 %v21190_v43  ;;  %v803_v40 = vpack.c.bf16 %v795_v4, %v794_v50  ;;  %v522_v43 = vpop.f32.mrb[60].mxu0  ;;  %v796_v50 = vld [vmem:[#allocation2 + $0x51] sm:$0xff] }
 0x1c5   :  { %1969 = vmatprep.subr.bf16.mxu1 %v21195_v58  ;;  %v21199_v58 = vld [vmem:[#allocation5 + $0x290] ss:$8 sps:$4 sm:$0xff]   ;;  %v523_v41 = vadd.f32 %v23558_v37, %v522_v43  ;;  %v20266_v59 = vpop.f32.mrb[61].mxu0  ;;  %v804_v27 = vpack.c.bf16 %v797_v0, %v796_v50  ;;  %v21231_v50 = vld [vmem:[#allocation5 + $0x334] ss:$8 sps:$4 sm:$0xff]  }
 0x1c6   :  { %v525_v57 = vpop.f32.mrb[62].mxu0  ;;  %v21207_v59 = vld [vmem:[#allocation5 + $0x2b4] ss:$8 sps:$4 sm:$0xff]   ;;  %v21211_v43 = vld [vmem:[#allocation5 + $0x2d0] ss:$8 sps:$4 sm:$0xff]  }
 0x1c7   :  { %v662_v53 = vmax.f32 %v523_v41, 0.0  ;;  %v20267_v4 = vpop.f32.mrb[63].mxu0  ;;  %v21216_v41 = vld [vmem:[#allocation5 + $0x2e4] ss:$8 sps:$4 sm:$0xff]   ;;  %v21217_v0 = vld [vmem:[#allocation5 + $0x2f0] ss:$8 sps:$4 sm:$0xff]  }
 0x1c8   :  { %1970 = vmatpush1.bf16.msra.mxu1 %v21193_v6  ;;  %v526_v6 = vadd.f32 %v23558_v37, %v525_v57  ;;  %v21208_v37 = vld [vmem:[#allocation5 + $0x2c0] ss:$8 sps:$4 sm:$0xff]   ;;  %v21219_v57 = vld [vmem:[#allocation5 + $0x2f4] ss:$8 sps:$4 sm:$0xff]   ;;  %v21228_v4 = vld [vmem:[#allocation5 + $0x324] ss:$8 sps:$4 sm:$0xff]  }
 0x1c9   :  { %1971 = vmatprep.subr.bf16.mxu1 %v21198_v28  ;;  %v818_v28 = vld [vmem:[#allocation2 + $0xd8] sm:$0x1]  ;;  %719 = vst [vmem:[#allocation2 + $0xf0] sm:$0xff] %v662_v53  ;;  %v21292_v53 = vld [vmem:[%s29087_s5] ss:$16 sps:$4 sm:$0xff]  }
 0x1ca   :  { %v663_v62 = vmax.f32 %v526_v6, 0.0  ;;  %v21294_v6 = vld [vmem:[%s29087_s5 + $0x4] ss:$16 sps:$4 sm:$0xff]  }
 0x1cb   :  { %1927 = vmatmul.mubr.bf16.gmra.mrb[16].mxu1 %v803_v40  ;;  %v825_v40 = vpack.c.bf16 %v818_v28, %v818_v28  ;;  %6110 = vmatprep.subr.bf16.mxu0 %v21294_v6  ;;  %v21226_v28 = vld [vmem:[#allocation5 + $0x320] ss:$8 sps:$4 sm:$0xff]  }
 0x1cc   :  { %1936 = vmatprep.mubr.bf16.mxu1 %v824_v2  ;;  %1972 = vmatpush1.bf16.msra.mxu1 %v21196_v11  ;;  %720 = vst [vmem:[#allocation2 + $0xf8] sm:$0xff] %v663_v62  ;;  %v21210_v2 = vld [vmem:[#allocation5 + $0x2c4] ss:$8 sps:$4 sm:$0xff]   ;;  %v798_v11 = vld [vmem:[#allocation2 + $0x61] sm:$0x1] }
 0x1cd   :  { %1973 = vmatprep.subr.bf16.mxu1 %v21201_v30  ;;  %v21213_v30 = vld [vmem:[#allocation5 + $0x2d4] ss:$8 sps:$4 sm:$0xff]   ;;  %v805_v10 = vpack.c.bf16 %v798_v11, %v798_v11  ;;  %6111 = vmatpush1.bf16.msra.mxu0 %v21292_v53  ;;  %v21234_v62 = vld [vmem:[#allocation5 + $0x344] ss:$8 sps:$4 sm:$0xff]   ;;  %v21256_v6 = vld [vmem:[#allocation5 + $0x3c0] ss:$8 sps:$4 sm:$0xff]  }
 0x1ce   :  { %6112 = vmatprep.subr.bf16.mxu0 %v21297_v9  ;;  %v21255_v11 = vld [vmem:[#allocation5 + $0x3b4] ss:$8 sps:$4 sm:$0xff]   ;;  %v21319_v53 = vld [vmem:[%s29082_s0 + $0x80] sm:$0xff]  }
 0x1cf   :  { %20269 = vmatmul.mubr.bf16.gmra.mrb[64].mxu0 %v21319_v53  ;;  %v21310_v9 = vld [vmem:[%s29087_s5 + $0xc0] ss:$16 sps:$4 sm:$0xff]   ;;  %v21374_v53 = vld [vmem:[%s29087_s5 + $0x1c4] ss:$16 sps:$4 sm:$0xff]  }
 0x1d0   :  { %1974 = vmatpush1.bf16.msra.mxu1 %v21199_v58  ;;  %v21214_v58 = vld [vmem:[#allocation5 + $0x2e0] ss:$8 sps:$4 sm:$0xff]  }
 0x1d1   :  { %1975 = vmatprep.subr.bf16.mxu1 %v21204_v21  ;;  %v21222_v21 = vld [vmem:[#allocation5 + $0x304] ss:$8 sps:$4 sm:$0xff]   ;;  %6113 = vmatpush1.bf16.msra.mxu0 %v21295_v3 }
 0x1d2   :  { %6114 = vmatprep.subr.bf16.mxu0 %v21300_v29  ;;  %v21320_v3 = vld [vmem:[%s29082_s0 + $0x88] sm:$0xff]   ;;  %v21273_v29 = vld [vmem:[#allocation5 + $0x414] ss:$8 sps:$4 sm:$0xff]  }
 0x1d3   :  { %1937 = vmatmul.mubr.bf16.gmra.mrb[20].mxu1 %v804_v27  ;;  %v21247_v27 = vld [vmem:[#allocation5 + $0x390] ss:$8 sps:$4 sm:$0xff]  }
 0x1d4   :  { %1946 = vmatprep.mubr.bf16.mxu1 %v825_v40  ;;  %1976 = vmatpush1.bf16.msra.mxu1 %v21202_v63  ;;  %v21229_v63 = vld [vmem:[#allocation5 + $0x330] ss:$8 sps:$4 sm:$0xff]   ;;  %v29130_v40 = vpack.c.bf16 %v23949_v49, %v23939_v42  ;;  %v21303_v42 = vld [vmem:[%s29087_s5 + $0x64] ss:$16 sps:$4 sm:$0xff]  }
 0x1d5   :  { %1977 = vmatprep.subr.bf16.mxu1 %v21207_v59  ;;  %6115 = vmatpush1.bf16.msra.mxu0 %v21298_v22  ;;  %v842_v59 = vpack.c.bf16 %v835_v31, %v23559_v39  ;;  %v21253_v49 = vld [vmem:[#allocation5 + $0x3b0] ss:$8 sps:$4 sm:$0xff]   ;;  %v21268_v22 = vld [vmem:[#allocation5 + $0x400] ss:$8 sps:$4 sm:$0xff]   ;;  %v21276_v39 = vld [vmem:[#allocation5 + $0x424] ss:$8 sps:$4 sm:$0xff]  }
 0x1d6   :  { %6116 = vmatprep.subr.bf16.mxu0 %v21303_v42  ;;  %v29134_v42 = vpack.c.bf16 %v24002_v8, %v23996_v1  ;;  %v21358_v1 = vld [vmem:[%s29087_s5 + $0x1a0] ss:$16 sps:$4 sm:$0xff]  }
 0x1d8   :  { %1978 = vmatpush1.bf16.msra.mxu1 %v21205_v25  ;;  %v21252_v25 = vld [vmem:[#allocation5 + $0x3a4] ss:$8 sps:$4 sm:$0xff]  }
 0x1d9   :  { %1979 = vmatprep.subr.bf16.mxu1 %v21210_v2  ;;  %v21250_v2 = vld [vmem:[#allocation5 + $0x3a0] ss:$8 sps:$4 sm:$0xff]  }
 0x1db   :  { %1947 = vmatmul.mubr.bf16.gmra.mrb[24].mxu1 %v805_v10 }
 0x1dc   :  { %1980 = vmatpush1.bf16.msra.mxu1 %v21208_v37  ;;  %1987 = vmatprep.mubr.bf16.mxu1 %v837_v55  ;;  %v21223_v55 = vld [vmem:[#allocation5 + $0x310] ss:$8 sps:$4 sm:$0xff]  }
 0x1dd   :  { %1981 = vmatprep.subr.bf16.mxu1 %v21213_v30  ;;  %v23560_v37 = vld [vmem:[#allocation2 + $0x58] sm:$0xff] }
 0x1e0   :  { %1982 = vmatpush1.bf16.msra.mxu1 %v21211_v43  ;;  %v21301_v43 = vld [vmem:[%s29087_s5 + $0x60] ss:$16 sps:$4 sm:$0xff]  }
 0x1e1   :  { %1983 = vmatprep.subr.bf16.mxu1 %v21216_v41  ;;  %v21306_v41 = vld [vmem:[%s29087_s5 + $0x84] ss:$16 sps:$4 sm:$0xff]   ;;  %6117 = vmatpush1.bf16.msra.mxu0 %v21301_v43 }
 0x1e2   :  { %6118 = vmatprep.subr.bf16.mxu0 %v21306_v41  ;;  %v21329_v43 = vld [vmem:[%s29082_s0 + $0xa0] sm:$0xff]  }
 0x1e3   :  { %v21342_v41 = vld [vmem:[%s29087_s5 + $0x180] ss:$16 sps:$4 sm:$0xff]  }
 0x1e4   :  { %1984 = vmatpush1.bf16.msra.mxu1 %v21214_v58  ;;  %v21258_v58 = vld [vmem:[#allocation5 + $0x3c4] ss:$8 sps:$4 sm:$0xff]  }
 0x1e5   :  { %1985 = vmatprep.subr.bf16.mxu1 %v21219_v57  ;;  %v827_v57 = vld [vmem:[#allocation2 + $0x68] sm:$0x1] }
 0x1e8   :  { %1986 = vmatpush1.bf16.msra.mxu1 %v21217_v0  ;;  %v21304_v0 = vld [vmem:[%s29087_s5 + $0x80] ss:$16 sps:$4 sm:$0xff]  }
 0x1e9   :  { %2056 = vmatprep.subr.bf16.mxu1 %v21222_v21  ;;  %v21309_v21 = vld [vmem:[%s29087_s5 + $0xa4] ss:$16 sps:$4 sm:$0xff]   ;;  %6119 = vmatpush1.bf16.msra.mxu0 %v21304_v0  ;;  %v21280_v0 = vld [vmem:[#allocation5 + $0x440] ss:$8 sps:$4 sm:$0xff]  }
 0x1ea   :  { %6120 = vmatprep.subr.bf16.mxu0 %v21309_v21  ;;  %v21285_v21 = vld [vmem:[#allocation5 + $0x454] ss:$8 sps:$4 sm:$0xff]  }
 0x1eb   :  { %1988 = vmatmul.mubr.bf16.vlgmr.msra.gmra.mrb[0].mxu1 %v828_v13  ;;  %v21232_v13 = vld [vmem:[#allocation5 + $0x340] ss:$8 sps:$4 sm:$0xff]  }
 0x1ec   :  { %1997 = vmatprep.mubr.bf16.mxu1 %v838_v16  ;;  %2057 = vmatpush1.bf16.msra.mxu1 %v21220_v46  ;;  %v21243_v16 = vld [vmem:[#allocation5 + $0x374] ss:$8 sps:$4 sm:$0xff]   ;;  %v834_v46 = vpack.c.bf16 %v827_v57, %v827_v57 }
 0x1ed   :  { %2058 = vmatprep.subr.bf16.mxu1 %v21225_v51  ;;  %v21261_v51 = vld [vmem:[#allocation5 + $0x3d4] ss:$8 sps:$4 sm:$0xff]  }
 0x1ee   :  { %v848_v57 = vld [vmem:[#allocation2 + $0x2f] sm:$0xff] }
 0x1f0   :  { %2059 = vmatpush1.bf16.msra.mxu1 %v21223_v55  ;;  %v21307_v55 = vld [vmem:[%s29087_s5 + $0xa0] ss:$16 sps:$4 sm:$0xff]  }
 0x1f1   :  { %2060 = vmatprep.subr.bf16.mxu1 %v21228_v4  ;;  %v29131_v4 = vmov 0.0   ;;  %6121 = vmatpush1.bf16.msra.mxu0 %v21307_v55  ;;  %v29135_v55 = vpack.c.bf16 %v24023_v48, %v24017_v36  ;;  %v21334_v36 = vld [vmem:[%s29082_s0 + $0xb0] sm:$0xff]   ;;  %v21337_v48 = vld [vmem:[%s29087_s5 + $0xc] ss:$16 sps:$4 sm:$0xff]  }
 0x1f2   :  { %20272 = vmatprep.mubr.msk.bf16.mxu0 %vm23676_vm0, %v29131_v4 }
 0x1f3   :  { %1998 = vmatmul.mubr.bf16.gmra.mrb[4].mxu1 %v829_v23  ;;  %v21240_v23 = vld [vmem:[#allocation5 + $0x364] ss:$8 sps:$4 sm:$0xff]   ;;  %20273 = vmatmul.mubr.bf16.gmra.mrb[68].mxu0 %v21320_v3  ;;  %v21291_v3 = vld [vmem:[#allocation5 + $0x474] ss:$8 sps:$4 sm:$0xff]  }
 0x1f4   :  { %2007 = vmatprep.mubr.bf16.mxu1 %v839_v61  ;;  %2061 = vmatpush1.bf16.msra.mxu1 %v21226_v28  ;;  %v21246_v61 = vld [vmem:[#allocation5 + $0x384] ss:$8 sps:$4 sm:$0xff]  }
 0x1f5   :  { %2062 = vmatprep.subr.bf16.mxu1 %v21231_v50  ;;  %v21312_v28 = vld [vmem:[%s29087_s5 + $0xc4] ss:$16 sps:$4 sm:$0xff]   ;;  %v29132_v50 = vpack.c.bf16 %v23967_v26, %v23963_v20  ;;  %v21262_v20 = vld [vmem:[#allocation5 + $0x3e0] ss:$8 sps:$4 sm:$0xff]   ;;  %20276 = vmatprep.mubr.msk.bf16.mxu0 %vm23676_vm0, %v29131_v4 }
 0x1f6   :  { %6122 = vmatprep.subr.bf16.mxu0 %v21312_v28  ;;  %v21267_v26 = vld [vmem:[#allocation5 + $0x3f4] ss:$8 sps:$4 sm:$0xff]   ;;  %v851_v28 = vld [vmem:[#allocation2 + $0x47] sm:$0xff] }
 0x1f7   :  { %6123 = vmatpush1.bf16.msra.mxu0 %v21310_v9 }
 0x1f8   :  { %2063 = vmatpush1.bf16.msra.mxu1 %v21229_v63  ;;  %v21259_v63 = vld [vmem:[#allocation5 + $0x3d0] ss:$8 sps:$4 sm:$0xff]  }
 0x1f9   :  { %2064 = vmatprep.subr.bf16.mxu1 %v21234_v62  ;;  %v21264_v62 = vld [vmem:[#allocation5 + $0x3e4] ss:$8 sps:$4 sm:$0xff]  }
 0x1fb   :  { %2008 = vmatmul.mubr.bf16.gmra.mrb[8].mxu1 %v830_v33  ;;  %v29129_v33 = vpack.c.bf16 %v24069_v5, %v24062_v56  ;;  %v826_v56 = vld [vmem:[#allocation2 + $0x60] sm:$0xff]  ;;  %v836_v5 = vld [vmem:[#allocation2 + $0xd9] sm:$0x1] }
 0x1fc   :  { %2017 = vmatprep.mubr.bf16.mxu1 %v29127_v7  ;;  %2065 = vmatpush1.bf16.msra.mxu1 %v21232_v13  ;;  %v833_v30 = vpack.c.bf16 %v826_v56, %v23560_v37  ;;  %v843_v10 = vpack.c.bf16 %v836_v5, %v836_v5  ;;  %v21315_v13 = vld [vmem:[%s29087_s5 + $0xe4] ss:$16 sps:$4 sm:$0xff]  }
 0x1fd   :  { %2066 = vmatprep.subr.bf16.mxu1 %v21237_v12  ;;  %v21313_v12 = vld [vmem:[%s29087_s5 + $0xe0] ss:$16 sps:$4 sm:$0xff]   ;;  %6124 = vmatprep.subr.bf16.mxu0 %v21315_v13  ;;  %v845_v7 = vld [vmem:[#allocation2 + $0x17] sm:$0xff] }
 0x1fe   :  { %6125 = vmatpush1.bf16.msra.mxu0 %v21313_v12  ;;  %v21333_v56 = vld [vmem:[%s29087_s5 + $0x164] ss:$16 sps:$4 sm:$0xff]   ;;  %v21289_v13 = vld [vmem:[#allocation5 + $0x470] ss:$8 sps:$4 sm:$0xff]  }
 0x1ff   :  { %v846_v5 = vld [vmem:[#allocation2 + $0x1f] sm:$0xff]  ;;  %v852_v12 = vld [vmem:[#allocation2 + $0x4f] sm:$0xff] }
 0x200   :  { %2067 = vmatpush1.bf16.msra.mxu1 %v21235_v19  ;;  %v21318_v19 = vld [vmem:[%s29087_s5 + $0x104] ss:$16 sps:$4 sm:$0xff]  }
 0x201   :  { %2068 = vmatprep.subr.bf16.mxu1 %v21240_v23  ;;  %v21265_v23 = vld [vmem:[#allocation5 + $0x3f0] ss:$8 sps:$4 sm:$0xff]   ;;  %6126 = vmatprep.subr.bf16.mxu0 %v21318_v19  ;;  %v21344_v37 = vld [vmem:[%s29087_s5 + $0x184] ss:$16 sps:$4 sm:$0xff]  }
 0x203   :  { %2018 = vmatmul.mubr.bf16.gmra.mrb[12].mxu1 %v29128_v60  ;;  %v21324_v60 = vld [vmem:[%s29082_s0 + $0x90] sm:$0xff]  }
 0x204   :  { %2027 = vmatprep.mubr.bf16.mxu1 %v29129_v33  ;;  %2069 = vmatpush1.bf16.msra.mxu1 %v21238_v15  ;;  %v21270_v15 = vld [vmem:[#allocation5 + $0x404] ss:$8 sps:$4 sm:$0xff]   ;;  %v21321_v33 = vld [vmem:[%s29087_s5 + $0x120] ss:$16 sps:$4 sm:$0xff]  }
 0x205   :  { %2070 = vmatprep.subr.bf16.mxu1 %v21243_v16  ;;  %v21316_v16 = vld [vmem:[%s29087_s5 + $0x100] ss:$16 sps:$4 sm:$0xff]   ;;  %20277 = vmatmul.mubr.bf16.gmra.mrb[72].mxu0 %v21324_v60  ;;  %v856_v60 = vld [vmem:[#allocation2 + $0x6f] sm:$0x1] }
 0x206   :  { %6127 = vmatpush1.bf16.msra.mxu0 %v21316_v16  ;;  %20280 = vmatprep.mubr.msk.bf16.mxu0 %vm23676_vm0, %v29131_v4 }
 0x208   :  { %2071 = vmatpush1.bf16.msra.mxu1 %v21241_v45  ;;  %v21323_v45 = vld [vmem:[%s29087_s5 + $0x124] ss:$16 sps:$4 sm:$0xff]  }
 0x209   :  { %2072 = vmatprep.subr.bf16.mxu1 %v21246_v61  ;;  %v844_v61 = vld [vmem:[#allocation2 + $0xf] sm:$0xff]  ;;  %6128 = vmatprep.subr.bf16.mxu0 %v21323_v45  ;;  %v21351_v45 = vld [vmem:[%s29082_s0 + $0xc0] sm:$0xff]  }
 0x20a   :  { %v857_v31 = vpack.c.bf16 %v845_v7, %v844_v61  ;;  %6129 = vmatpush1.bf16.msra.mxu0 %v21321_v33  ;;  %v21341_v7 = vld [vmem:[%s29082_s0 + $0xb8] sm:$0xff]   ;;  %v863_v61 = vpack.c.bf16 %v856_v60, %v856_v60 }
 0x20b   :  { %2028 = vmatmul.mubr.bf16.gmra.mrb[16].mxu1 %v29130_v40  ;;  %v847_v40 = vld [vmem:[#allocation2 + $0x27] sm:$0xff] }
 0x20c   :  { %2037 = vmatprep.mubr.bf16.mxu1 %v842_v59  ;;  %2073 = vmatpush1.bf16.msra.mxu1 %v21244_v52  ;;  %v21328_v52 = vld [vmem:[%s29087_s5 + $0x144] ss:$16 sps:$4 sm:$0xff]   ;;  %v21325_v59 = vld [vmem:[%s29082_s0 + $0x98] sm:$0xff]  }
 0x20d   :  { %2074 = vmatprep.subr.bf16.mxu1 %v21249_v32  ;;  %v21271_v32 = vld [vmem:[#allocation5 + $0x410] ss:$8 sps:$4 sm:$0xff]   ;;  %6130 = vmatprep.subr.bf16.mxu0 %v21328_v52  ;;  %v21340_v33 = vld [vmem:[%s29087_s5 + $0x2c] ss:$16 sps:$4 sm:$0xff]  }
 0x20e   :  { %20281 = vmatmul.mubr.bf16.gmra.mrb[76].mxu0 %v21325_v59  ;;  %v21347_v52 = vld [vmem:[%s29087_s5 + $0x4c] ss:$16 sps:$4 sm:$0xff]   ;;  %v21348_v59 = vld [vmem:[%s29087_s5 + $0x68] ss:$16 sps:$4 sm:$0xff]  }
 0x20f   :  { %20284 = vmatprep.mubr.msk.bf16.mxu0 %vm23676_vm0, %v29131_v4 }
 0x210   :  { %2075 = vmatpush1.bf16.msra.mxu1 %v21247_v27  ;;  %v29133_v27 = vpack.c.bf16 %v23982_v47, %v23976_v38  ;;  %v21331_v38 = vld [vmem:[%s29087_s5 + $0x160] ss:$16 sps:$4 sm:$0xff]   ;;  %v858_v47 = vpack.c.bf16 %v847_v40, %v846_v5  ;;  %v21352_v40 = vld [vmem:[%s29087_s5 + $0x88] ss:$16 sps:$4 sm:$0xff]  }
 0x211   :  { %2076 = vmatprep.subr.bf16.mxu1 %v21252_v25  ;;  %v21326_v25 = vld [vmem:[%s29087_s5 + $0x140] ss:$16 sps:$4 sm:$0xff]   ;;  %v21362_v5 = vld [vmem:[%s29087_s5 + $0xc8] ss:$16 sps:$4 sm:$0xff]  }
 0x212   :  { %6131 = vmatpush1.bf16.msra.mxu0 %v21326_v25  ;;  %v21357_v25 = vld [vmem:[%s29087_s5 + $0xac] ss:$16 sps:$4 sm:$0xff]  }
 0x213   :  { %2038 = vmatmul.mubr.bf16.gmra.mrb[20].mxu1 %v833_v30  ;;  %v21277_v30 = vld [vmem:[#allocation5 + $0x430] ss:$8 sps:$4 sm:$0xff]   ;;  %6132 = vmatprep.subr.bf16.mxu0 %v21333_v56  ;;  %v21364_v56 = vld [vmem:[%s29087_s5 + $0xcc] ss:$16 sps:$4 sm:$0xff]  }
 0x214   :  { %2047 = vmatprep.mubr.bf16.mxu1 %v843_v10  ;;  %2077 = vmatpush1.bf16.msra.mxu1 %v21250_v2  ;;  %v21274_v2 = vld [vmem:[#allocation5 + $0x420] ss:$8 sps:$4 sm:$0xff]   ;;  %v21282_v10 = vld [vmem:[#allocation5 + $0x444] ss:$8 sps:$4 sm:$0xff]  }
 0x215   :  { %2078 = vmatprep.subr.bf16.mxu1 %v21255_v11  ;;  %v21279_v11 = vld [vmem:[#allocation5 + $0x434] ss:$8 sps:$4 sm:$0xff]  }
 0x216   :  { %6133 = vmatpush1.bf16.msra.mxu0 %v21331_v38  ;;  %v21369_v38 = vld [vmem:[%s29087_s5 + $0x108] ss:$16 sps:$4 sm:$0xff]  }
 0x217   :  { %6134 = vmatprep.subr.bf16.mxu0 %v21344_v37  ;;  %20285 = vmatmul.mubr.bf16.gmra.mrb[80].mxu0 %v21329_v43  ;;  %v873_v37 = vld [vmem:[#allocation2 + $0x68] sm:$0xff]  ;;  %v874_v43 = vld [vmem:[#allocation2 + $0x70] sm:$0x1] }
 0x218   :  { %2079 = vmatpush1.bf16.msra.mxu1 %v21253_v49  ;;  %v849_v49 = vld [vmem:[#allocation2 + $0x37] sm:$0xff]  ;;  %20288 = vmatprep.mubr.msk.bf16.mxu0 %vm23676_vm0, %v29131_v4 }
 0x219   :  { %2080 = vmatprep.subr.bf16.mxu1 %v21258_v58  ;;  %v21360_v58 = vld [vmem:[%s29087_s5 + $0x1a4] ss:$16 sps:$4 sm:$0xff]   ;;  %v859_v8 = vpack.c.bf16 %v849_v49, %v848_v57  ;;  %v21378_v49 = vld [vmem:[%s29082_s0 + $0xd8] sm:$0xff]  }
 0x21a   :  { %6135 = vmatpush1.bf16.msra.mxu0 %v21342_v41  ;;  %v21379_v41 = vld [vmem:[%s29087_s5 + $0x148] ss:$16 sps:$4 sm:$0xff]  }
 0x21b   :  { %2048 = vmatmul.mubr.bf16.gmra.mrb[24].mxu1 %v834_v46  ;;  %v21288_v46 = vld [vmem:[#allocation5 + $0x464] ss:$8 sps:$4 sm:$0xff]   ;;  %6136 = vmatprep.subr.bf16.mxu0 %v21360_v58  ;;  %v21382_v57 = vld [vmem:[%s29087_s5 + $0x168] ss:$16 sps:$4 sm:$0xff]  }
 0x21c   :  { %2081 = vmatpush1.bf16.msra.mxu1 %v21256_v6  ;;  %2088 = vmatprep.mubr.bf16.mxu1 %v29132_v50  ;;  %v21283_v6 = vld [vmem:[#allocation5 + $0x450] ss:$8 sps:$4 sm:$0xff]   ;;  %v21384_v58 = vld [vmem:[%s29087_s5 + $0x16c] ss:$16 sps:$4 sm:$0xff]  }
 0x21d   :  { %2082 = vmatprep.subr.bf16.mxu1 %v21261_v51  ;;  %v21330_v51 = vld [vmem:[%s29082_s0 + $0xa8] sm:$0xff]   ;;  %v21372_v50 = vld [vmem:[%s29087_s5 + $0x1c0] ss:$16 sps:$4 sm:$0xff]  }
 0x21e   :  { %6137 = vmatpush1.bf16.msra.mxu0 %v21358_v1  ;;  %v21388_v1 = vld [vmem:[%s29082_s0 + $0xe0] ss:$0 sps:$4 sm:$0x11]  }
 0x21f   :  { %6138 = vmatprep.subr.bf16.mxu0 %v21374_v53  ;;  %20289 = vmatmul.mubr.bf16.gmra.mrb[84].mxu0 %v21330_v51  ;;  %v21392_v53 = vld [vmem:[%s29087_s5 + $0x1a8] ss:$16 sps:$4 sm:$0xff]   ;;  %v21397_v51 = vld [vmem:[%s29087_s5 + $0x1cc] ss:$16 sps:$4 sm:$0xff]  }
 0x220   :  { %2083 = vmatpush1.bf16.msra.mxu1 %v21259_v63  ;;  %v850_v63 = vld [vmem:[#allocation2 + $0x3f] sm:$0xff]  ;;  %20292 = vmatprep.mubr.msk.bf16.mxu0 %vm23676_vm0, %v29131_v4 }
 0x221   :  { %2084 = vmatprep.subr.bf16.mxu1 %v21264_v62  ;;  %v21286_v62 = vld [vmem:[#allocation5 + $0x460] ss:$8 sps:$4 sm:$0xff]   ;;  %v860_v9 = vpack.c.bf16 %v851_v28, %v850_v63  ;;  %v21400_v28 = vld [vmem:[%s29087_s5 + $0x1ec] ss:$16 sps:$4 sm:$0xff]   ;;  %v21403_v63 = vld [vmem:[%s29087_s5 + $0x204] ss:$16 sps:$4 sm:$0xff]  }
 0x222   :  { %6139 = vmatpush1.bf16.msra.mxu0 %v21372_v50  ;;  %v21398_v50 = vld [vmem:[%s29087_s5 + $0x1e8] ss:$16 sps:$4 sm:$0xff]  }
 0x224   :  { %2085 = vmatpush1.bf16.msra.mxu1 %v21262_v20  ;;  %v29136_v20 = vpack.c.bf16 %v24044_v35, %v24038_v18  ;;  %v855_v18 = vld [vmem:[#allocation2 + $0x67] sm:$0xff]  ;;  %v854_v35 = vld [vmem:[#allocation2 + $0x5f] sm:$0xff] }
 0x225   :  { %2086 = vmatprep.subr.bf16.mxu1 %v21267_v26  ;;  %v853_v26 = vld [vmem:[#allocation2 + $0x57] sm:$0xff]  ;;  %v862_v16 = vpack.c.bf16 %v855_v18, %v854_v35 }
 0x226   :  { %v861_v19 = vpack.c.bf16 %v853_v26, %v852_v12 }
 0x227   :  { %20293 = vmatmul.mubr.bf16.gmra.mrb[88].mxu0 %v21334_v36 }
 0x228   :  { %2087 = vmatpush1.bf16.msra.mxu1 %v21265_v23  ;;  %20296 = vmatprep.mubr.msk.bf16.mxu0 %vm23676_vm0, %v29131_v4  ;;  %v865_v23 = vld [vmem:[#allocation2 + $0xe0] sm:$0x1] }
 0x229   :  { %2157 = vmatprep.subr.bf16.mxu1 %v21270_v15  ;;  %v872_v15 = vpack.c.bf16 %v865_v23, %v865_v23 }
 0x22b   :  { %2089 = vmatmul.mubr.bf16.vlgmr.msra.gmra.mrb[0].mxu1 %v857_v31  ;;  %v21338_v31 = vld [vmem:[%s29087_s5 + $0x28] ss:$16 sps:$4 sm:$0xff]  }
 0x22c   :  { %2098 = vmatprep.mubr.bf16.mxu1 %v29133_v27  ;;  %2158 = vmatpush1.bf16.msra.mxu1 %v21268_v22  ;;  %v29096_v22 = vmov 0   ;;  %v21354_v27 = vld [vmem:[%s29087_s5 + $0x8c] ss:$16 sps:$4 sm:$0xff]  }
 0x22d   :  { %2159 = vmatprep.subr.bf16.mxu1 %v21273_v29  ;;  %v21335_v29 = vld [vmem:[%s29087_s5 + $0x8] ss:$16 sps:$4 sm:$0xff]  }
 0x22f   :  { %20297 = vmatmul.mubr.bf16.gmra.mrb[92].mxu0 %v21341_v7 }
 0x230   :  { %2160 = vmatpush1.bf16.msra.mxu1 %v21271_v32  ;;  %20300 = vmatprep.mubr.msk.bf16.mxu0 %vm23676_vm0, %v29131_v4  ;;  %v21368_v32 = vld [vmem:[%s29082_s0 + $0xd0] sm:$0xff]  }
 0x231   :  { %2161 = vmatprep.subr.bf16.mxu1 %v21276_v39  ;;  %v21345_v39 = vld [vmem:[%s29087_s5 + $0x48] ss:$16 sps:$4 sm:$0xff]  }
 0x233   :  { %2099 = vmatmul.mubr.bf16.gmra.mrb[4].mxu1 %v858_v47  ;;  %v21377_v47 = vld [vmem:[%s29087_s5 + $0x12c] ss:$16 sps:$4 sm:$0xff]  }
 0x234   :  { %2108 = vmatprep.mubr.bf16.mxu1 %v29134_v42  ;;  %2162 = vmatpush1.bf16.msra.mxu1 %v21274_v2  ;;  %v21367_v2 = vld [vmem:[%s29087_s5 + $0xec] ss:$16 sps:$4 sm:$0xff]   ;;  %v876_v42 = vpack.c.bf16 %v874_v43, %v874_v43 }
 0x235   :  { %2163 = vmatprep.subr.bf16.mxu1 %v21279_v11  ;;  %v21371_v11 = vld [vmem:[%s29087_s5 + $0x10c] ss:$16 sps:$4 sm:$0xff]  }
 0x237   :  { %20301 = vmatmul.mubr.bf16.gmra.mrb[96].mxu0 %v21351_v45 }
 0x238   :  { %2164 = vmatpush1.bf16.msra.mxu1 %v21277_v30  ;;  %20304 = vmatprep.mubr.msk.bf16.mxu0 %vm23676_vm0, %v29131_v4  ;;  %v23561_v30 = vld [vmem:[#allocation2 + $0x60] sm:$0xff] }
 0x239   :  { %2165 = vmatprep.subr.bf16.mxu1 %v21282_v10  ;;  %v875_v10 = vpack.c.bf16 %v873_v37, %v23561_v30 }
 0x23b   :  { %2109 = vmatmul.mubr.bf16.gmra.mrb[8].mxu1 %v859_v8  ;;  %v21394_v8 = vld [vmem:[%s29087_s5 + $0x1ac] ss:$16 sps:$4 sm:$0xff]  }
 0x23c   :  { %2118 = vmatprep.mubr.bf16.mxu1 %v29135_v55  ;;  %2166 = vmatpush1.bf16.msra.mxu1 %v21280_v0  ;;  %v21387_v0 = vld [vmem:[%s29087_s5 + $0x18c] ss:$16 sps:$4 sm:$0xff]   ;;  %v21395_v55 = vld [vmem:[%s29087_s5 + $0x1c8] ss:$16 sps:$4 sm:$0xff]  }
 0x23d   :  { %2167 = vmatprep.subr.bf16.mxu1 %v21285_v21  ;;  %v21385_v21 = vld [vmem:[%s29087_s5 + $0x188] ss:$16 sps:$4 sm:$0xff]  }
 0x240   :  { %2168 = vmatpush1.bf16.msra.mxu1 %v21283_v6  ;;  %v21389_v6 = vld [vmem:[%s29087_s5 + $0x1e0] ss:$16 sps:$4 sm:$0xff]  }
 0x241   :  { %2169 = vmatprep.subr.bf16.mxu1 %v21288_v46  ;;  %v21391_v46 = vld [vmem:[%s29087_s5 + $0x1e4] ss:$16 sps:$4 sm:$0xff]  }
 0x242   :  { %6140 = vmatprep.subr.bf16.mxu0 %v21391_v46 }
 0x243   :  { %2119 = vmatmul.mubr.bf16.gmra.mrb[12].mxu1 %v860_v9  ;;  %6141 = vmatpush1.bf16.msra.mxu0 %v21389_v6 }
 0x244   :  { %2128 = vmatprep.mubr.bf16.mxu1 %v29136_v20  ;;  %2170 = vmatpush1.bf16.msra.mxu1 %v21286_v62  ;;  %v21406_v62 = vld [vmem:[%s29087_s5 + $0x20c] ss:$16 sps:$4 sm:$0xff]  }
 0x245   :  { %2171 = vmatprep.subr.bf16.mxu1 %v21291_v3  ;;  %6171 = vmatprep.subr.bf16.mxu0 %v21403_v63  ;;  %v29098_v3 = vlaneseq }
 0x247   :  { %v24418_v9 = vshrl.u32 %v29098_v3, 7  ;;  %v21566_v3 = vld [vmem:[%s29087_s5 + $0x568] ss:$16 sps:$4 sm:$0xff]  }
 0x248   :  { %2172 = vmatpush1.bf16.msra.mxu1 %v21289_v13  ;;  %v1021_v13 = vld [vmem:[%s29086_s4] sm:$0x3] }
 0x249   :  { %6659 = vmatprep.subr.bf16.mxu1 %v21337_v48  ;;  %29137 = vst [vmem:[#allocation14_spill] sm:$0xff] %v24418_v9  ;;  %v24424_v36 = vsub.s32 0, %v24418_v9  ;;  %v24427_v48 = vsub.s32 1, %v24418_v9 }
 0x24b   :  { %2129 = vmatmul.mubr.bf16.gmra.mrb[16].mxu1 %v861_v19  ;;  %29138 = vst [vmem:[#allocation15_spill] sm:$0xff] %v24424_v36  ;;  %29139 = vst [vmem:[#allocation16_spill] sm:$0xff] %v24427_v48  ;;  %v24430_v20 = vrot.slane %v1021_v13, %v24424_v36  ;;  %v24433_v12 = vrot.slane %v1021_v13, %v24427_v48  ;;  %v24438_v19 = vld [vmem:[%s29084_s2] ss:$0 sm:$0xff] }
 0x24c   :  { %2138 = vmatprep.mubr.bf16.mxu1 %v24074_v17  ;;  %v21361_v17 = vld [vmem:[%s29082_s0 + $0xc8] sm:$0xff]  }
 0x24d   :  { %20305 = vmatmul.mubr.bf16.gmra.mrb[100].mxu0 %v21361_v17 }
 0x24e   :  { %20308 = vmatprep.mubr.msk.bf16.mxu0 %vm23676_vm0, %v29131_v4 }
 0x253   :  { %2139 = vmatmul.mubr.bf16.gmra.mrb[20].mxu1 %v862_v16 }
 0x254   :  { %2148 = vmatprep.mubr.bf16.mxu1 %v872_v15 }
 0x255   :  { %20309 = vmatmul.mubr.bf16.gmra.mrb[104].mxu0 %v21368_v32 }
 0x256   :  { %20312 = vmatprep.mubr.msk.bf16.mxu0 %vm23676_vm0, %v29131_v4 }
 0x25b   :  { %2149 = vmatmul.mubr.bf16.gmra.mrb[24].mxu1 %v863_v61 }
 0x25c   :  { %2189 = vmatprep.mubr.bf16.mxu1 %v29096_v22 }
 0x25d   :  { %20313 = vmatmul.mubr.bf16.gmra.mrb[108].mxu0 %v21378_v49 }
 0x25e   :  { %20316 = vmatprep.mubr.msk.bf16.mxu0 %vm23676_vm0, %v29131_v4  ;;  %v21595_v4 = vld [vmem:[%s29087_s5 + $0x604] ss:$16 sps:$4 sm:$0xff]  }
 0x263   :  { %2190 = vmatmul.mubr.bf16.vlgmr.msra.gmra.mrb[0].mxu1 %v23904_v14  ;;  %v21350_v14 = vld [vmem:[%s29087_s5 + $0x6c] ss:$16 sps:$4 sm:$0xff]  }
 0x264   :  { %2199 = vmatprep.mubr.bf16.mxu1 %v29096_v22  ;;  %6660 = vmatpush1.bf16.msra.mxu1 %v21335_v29 }
 0x265   :  { %6661 = vmatprep.subr.bf16.mxu1 %v21340_v33  ;;  %20317 = vmatmul.mubr.bf16.gmra.mrb[112].mxu0 %v21388_v1 }
 0x268   :  { %6662 = vmatpush1.bf16.msra.mxu1 %v21338_v31 }
 0x269   :  { %6663 = vmatprep.subr.bf16.mxu1 %v21347_v52 }
 0x26b   :  { %2200 = vmatmul.mubr.bf16.gmra.mrb[4].mxu1 %v23918_v24  ;;  %v21355_v24 = vld [vmem:[%s29087_s5 + $0xa8] ss:$16 sps:$4 sm:$0xff]  }
 0x26c   :  { %2209 = vmatprep.mubr.bf16.mxu1 %v29096_v22  ;;  %6664 = vmatpush1.bf16.msra.mxu1 %v21345_v39 }
 0x26d   :  { %6665 = vmatprep.subr.bf16.mxu1 %v21350_v14 }
 0x270   :  { %6666 = vmatpush1.bf16.msra.mxu1 %v21348_v59 }
 0x271   :  { %6667 = vmatprep.subr.bf16.mxu1 %v21354_v27 }
 0x273   :  { %2210 = vmatmul.mubr.bf16.gmra.mrb[8].mxu1 %v23932_v34  ;;  %v21365_v34 = vld [vmem:[%s29087_s5 + $0xe8] ss:$16 sps:$4 sm:$0xff]  }
 0x274   :  { %2219 = vmatprep.mubr.bf16.mxu1 %v29096_v22  ;;  %6668 = vmatpush1.bf16.msra.mxu1 %v21352_v40 }
 0x275   :  { %6669 = vmatprep.subr.bf16.mxu1 %v21357_v25 }
 0x278   :  { %6670 = vmatpush1.bf16.msra.mxu1 %v21355_v24 }
 0x279   :  { %6671 = vmatprep.subr.bf16.mxu1 %v21364_v56 }
 0x27b   :  { %2220 = vmatmul.mubr.bf16.gmra.mrb[12].mxu1 %v23946_v44  ;;  %v21375_v44 = vld [vmem:[%s29087_s5 + $0x128] ss:$16 sps:$4 sm:$0xff]  }
 0x27c   :  { %2229 = vmatprep.mubr.bf16.mxu1 %v29096_v22  ;;  %6672 = vmatpush1.bf16.msra.mxu1 %v21362_v5 }
 0x27d   :  { %6673 = vmatprep.subr.bf16.mxu1 %v21367_v2 }
 0x280   :  { %6674 = vmatpush1.bf16.msra.mxu1 %v21365_v34 }
 0x281   :  { %6675 = vmatprep.subr.bf16.mxu1 %v21371_v11 }
 0x283   :  { %2230 = vmatmul.mubr.bf16.gmra.mrb[16].mxu1 %v23956_v54  ;;  %v21381_v54 = vld [vmem:[%s29087_s5 + $0x14c] ss:$16 sps:$4 sm:$0xff]  }
 0x284   :  { %2239 = vmatprep.mubr.bf16.mxu1 %v29096_v22  ;;  %6676 = vmatpush1.bf16.msra.mxu1 %v21369_v38 }
 0x285   :  { %6677 = vmatprep.subr.bf16.mxu1 %v21377_v47 }
 0x288   :  { %6678 = vmatpush1.bf16.msra.mxu1 %v21375_v44 }
 0x289   :  { %6679 = vmatprep.subr.bf16.mxu1 %v21381_v54 }
 0x28b   :  { %2240 = vmatmul.mubr.bf16.gmra.mrb[20].mxu1 %v875_v10 }
 0x28c   :  { %2249 = vmatprep.mubr.bf16.mxu1 %v29096_v22  ;;  %6680 = vmatpush1.bf16.msra.mxu1 %v21379_v41 }
 0x28d   :  { %6681 = vmatprep.subr.bf16.mxu1 %v21384_v58 }
 0x290   :  { %6682 = vmatpush1.bf16.msra.mxu1 %v21382_v57 }
 0x291   :  { %6683 = vmatprep.subr.bf16.mxu1 %v21387_v0 }
 0x293   :  { %2250 = vmatmul.mubr.bf16.gmra.mrb[24].mxu1 %v876_v42 }
 0x294   :  { %6684 = vmatpush1.bf16.msra.mxu1 %v21385_v21 }
 0x295   :  { %6685 = vmatprep.subr.bf16.mxu1 %v21394_v8 }
 0x298   :  { %6686 = vmatpush1.bf16.msra.mxu1 %v21392_v53 }
 0x299   :  { %6687 = vmatprep.subr.bf16.mxu1 %v21397_v51 }
 0x29c   :  { %6688 = vmatpush1.bf16.msra.mxu1 %v21395_v55 }
 0x29d   :  { %6689 = vmatprep.subr.bf16.mxu1 %v21400_v28 }
 0x2a0   :  { %6690 = vmatpush1.bf16.msra.mxu1 %v21398_v50 }
 0x2a1   :  { %6720 = vmatprep.subr.bf16.mxu1 %v21406_v62 }
 0x2a2   :  { %v530_v26 = vpop.f32.mrb[64].mxu0 }
 0x2a3   :  { %v531_v23 = vadd.f32 %v24438_v19, %v530_v26  ;;  %v20270_v7 = vpop.f32.mrb[65].mxu0 }
 0x2a4   :  { %v533_v18 = vpop.f32.mrb[66].mxu0 }
 0x2a5   :  { %v664_v15 = vmax.f32 %v531_v23, 0.0  ;;  %v534_v16 = vadd.f32 %v24438_v19, %v533_v18  ;;  %v20271_v45 = vpop.f32.mrb[67].mxu0 }
 0x2a7   :  { %721 = vst [vmem:[#allocation2 + $0x100] sm:$0xff] %v664_v15  ;;  %v665_v33 = vmax.f32 %v534_v16, 0.0 }
 0x2a9   :  { %722 = vst [vmem:[#allocation2 + $0x108] sm:$0xff] %v665_v33 }
 0x2c6   :  { %v538_v27 = vpop.f32.mrb[68].mxu0 }
 0x2c7   :  { %v539_v25 = vadd.f32 %v24438_v19, %v538_v27  ;;  %v20274_v24 = vpop.f32.mrb[69].mxu0 }
 0x2c8   :  { %v541_v56 = vpop.f32.mrb[70].mxu0  ;;  %v21409_v24 = vld [vmem:[%s29087_s5 + $0x224] ss:$16 sps:$4 sm:$0xff]  }
 0x2c9   :  { %v666_v2 = vmax.f32 %v539_v25, 0.0  ;;  %v542_v34 = vadd.f32 %v24438_v19, %v541_v56  ;;  %v20275_v11 = vpop.f32.mrb[71].mxu0  ;;  %v21412_v56 = vld [vmem:[%s29087_s5 + $0x22c] ss:$16 sps:$4 sm:$0xff]  }
 0x2cb   :  { %723 = vst [vmem:[#allocation2 + $0x110] sm:$0xff] %v666_v2  ;;  %v667_v30 = vmax.f32 %v542_v34, 0.0 }
 0x2cd   :  { %724 = vst [vmem:[#allocation2 + $0x118] sm:$0xff] %v667_v30 }
 0x2d8   :  { %v546_v58 = vpop.f32.mrb[72].mxu0 }
 0x2d9   :  { %v547_v0 = vadd.f32 %v24438_v19, %v546_v58  ;;  %v20278_v21 = vpop.f32.mrb[73].mxu0 }
 0x2da   :  { %v549_v1 = vpop.f32.mrb[74].mxu0 }
 0x2db   :  { %v668_v53 = vmax.f32 %v547_v0, 0.0  ;;  %v550_v6 = vadd.f32 %v24438_v19, %v549_v1  ;;  %v20279_v55 = vpop.f32.mrb[75].mxu0  ;;  %v21413_v0 = vld [vmem:[%s29087_s5 + $0x240] ss:$16 sps:$4 sm:$0xff]  }
 0x2dd   :  { %725 = vst [vmem:[#allocation2 + $0x120] sm:$0xff] %v668_v53  ;;  %v669_v63 = vmax.f32 %v550_v6, 0.0 }
 0x2df   :  { %726 = vst [vmem:[#allocation2 + $0x128] sm:$0xff] %v669_v63 }
 0x336   :  { %v2191_v35 = vpop.f32.mrb[0].mxu1 }
 0x337   :  { %v20340_v60 = vadd.f32 %v2191_v35, %v24430_v20  ;;  %v2193_v61 = vpop.f32.mrb[1].mxu1  ;;  %v554_v35 = vpop.f32.mrb[76].mxu0 }
 0x338   :  { %v20341_v17 = vadd.f32 %v2193_v61, %v24433_v12  ;;  %v2195_v29 = vpop.f32.mrb[2].mxu1  ;;  %v555_v45 = vadd.f32 %v24438_v19, %v554_v35 }
 0x339   :  { %v2258_v31 = vmax.f32 %v20340_v60, 0.0  ;;  %v20342_v52 = vadd.f32 %v2195_v29, %v24430_v20  ;;  %v2197_v32 = vpop.f32.mrb[3].mxu1  ;;  %v20282_v60 = vpop.f32.mrb[77].mxu0  ;;  %v21401_v29 = vld [vmem:[%s29087_s5 + $0x200] ss:$16 sps:$4 sm:$0xff]  }
 0x33a   :  { %v2259_v39 = vmax.f32 %v20341_v17, 0.0  ;;  %v20343_v14 = vadd.f32 %v2197_v32, %v24433_v12  ;;  %v557_v33 = vpop.f32.mrb[78].mxu0  ;;  %v21404_v32 = vld [vmem:[%s29087_s5 + $0x208] ss:$16 sps:$4 sm:$0xff]  }
 0x33b   :  { %2284 = vst [vmem:[#allocation3] sm:$0x7f] %v2258_v31  ;;  %v2260_v59 = vmax.f32 %v20342_v52, 0.0 }
 0x33c   :  { %2285 = vst [vmem:[#allocation3 + $0x8] sm:$0x7f] %v2259_v39  ;;  %v2261_v40 = vmax.f32 %v20343_v14, 0.0  ;;  %v670_v14 = vmax.f32 %v555_v45, 0.0 }
 0x33d   :  { %2286 = vst [vmem:[#allocation3] sm:$0x80] %v2260_v59  ;;  %v20283_v59 = vpop.f32.mrb[79].mxu0 }
 0x33e   :  { %2287 = vst [vmem:[#allocation3 + $0x8] sm:$0x80] %v2261_v40  ;;  %v2201_v5 = vpop.f32.mrb[4].mxu1  ;;  %727 = vst [vmem:[#allocation2 + $0x130] sm:$0xff] %v670_v14  ;;  %v21427_v14 = vld [vmem:[%s29087_s5 + $0x284] ss:$16 sps:$4 sm:$0xff]  }
 0x33f   :  { %v20344_v38 = vadd.f32 %v2201_v5, %v24430_v20  ;;  %v2203_v47 = vpop.f32.mrb[5].mxu1  ;;  %v558_v5 = vadd.f32 %v24438_v19, %v557_v33  ;;  %v21430_v59 = vld [vmem:[%s29087_s5 + $0x28c] ss:$16 sps:$4 sm:$0xff]  }
 0x340   :  { %v20345_v44 = vadd.f32 %v2203_v47, %v24433_v12  ;;  %v2205_v37 = vpop.f32.mrb[6].mxu1 }
 0x341   :  { %v2262_v10 = vmax.f32 %v20344_v38, 0.0  ;;  %v20346_v43 = vadd.f32 %v2205_v37, %v24430_v20  ;;  %v2207_v42 = vpop.f32.mrb[7].mxu1 }
 0x342   :  { %v2263_v49 = vmax.f32 %v20345_v44, 0.0  ;;  %v20347_v54 = vadd.f32 %v2207_v42, %v24433_v12  ;;  %v671_v44 = vmax.f32 %v558_v5, 0.0  ;;  %v21428_v5 = vld [vmem:[%s29087_s5 + $0x288] ss:$16 sps:$4 sm:$0xff]  }
 0x343   :  { %2288 = vst [vmem:[#allocation3 + $0x10] sm:$0x3f] %v2262_v10  ;;  %v2264_v41 = vmax.f32 %v20346_v43, 0.0  ;;  %v21407_v10 = vld [vmem:[%s29087_s5 + $0x220] ss:$16 sps:$4 sm:$0xff]  }
 0x344   :  { %2289 = vst [vmem:[#allocation3 + $0x18] sm:$0x3f] %v2263_v49  ;;  %v2265_v57 = vmax.f32 %v20347_v54, 0.0  ;;  %v2310_v39 = vld [vmem:[#allocation3] sm:$0xff]  ;;  %v21415_v49 = vld [vmem:[%s29087_s5 + $0x244] ss:$16 sps:$4 sm:$0xff]  }
 0x345   :  { %2290 = vst [vmem:[#allocation3 + $0x10] sm:$0xc0] %v2264_v41  ;;  %v2311_v61 = vld [vmem:[#allocation3 + $0x8] sm:$0xff]  ;;  %v21410_v43 = vld [vmem:[%s29087_s5 + $0x228] ss:$16 sps:$4 sm:$0xff]   ;;  %728 = vst [vmem:[#allocation2 + $0x138] sm:$0xff] %v671_v44 }
 0x346   :  { %2291 = vst [vmem:[#allocation3 + $0x18] sm:$0xc0] %v2265_v57  ;;  %v2211_v8 = vpop.f32.mrb[8].mxu1  ;;  %v21418_v54 = vld [vmem:[%s29087_s5 + $0x24c] ss:$16 sps:$4 sm:$0xff]   ;;  %v562_v57 = vpop.f32.mrb[80].mxu0 }
 0x347   :  { %v20348_v46 = vadd.f32 %v2211_v8, %v24430_v20  ;;  %v2213_v51 = vpop.f32.mrb[9].mxu1  ;;  %v563_v1 = vadd.f32 %v24438_v19, %v562_v57  ;;  %v20286_v8 = vpop.f32.mrb[81].mxu0  ;;  %v2327_v60 = vld [vmem:[#allocation3 + $0x8] sm:$0xfe]  ;;  %v2342_v57 = vld [vmem:[#allocation3] sm:$0x80] }
 0x348   :  { %v20349_v28 = vadd.f32 %v2213_v51, %v24433_v12  ;;  %v2215_v50 = vpop.f32.mrb[10].mxu1  ;;  %v21421_v51 = vld [vmem:[%s29087_s5 + $0x264] ss:$16 sps:$4 sm:$0xff]   ;;  %v565_v55 = vpop.f32.mrb[82].mxu0 }
 0x349   :  { %v2266_v62 = vmax.f32 %v20348_v46, 0.0  ;;  %v20350_v13 = vadd.f32 %v2215_v50, %v24430_v20  ;;  %v2217_v26 = vpop.f32.mrb[11].mxu1  ;;  %v21416_v46 = vld [vmem:[%s29087_s5 + $0x248] ss:$16 sps:$4 sm:$0xff]   ;;  %v2343_v44 = vld [vmem:[#allocation3 + $0x8] sm:$0x80] }
 0x34a   :  { %v2267_v23 = vmax.f32 %v20349_v28, 0.0  ;;  %v20351_v7 = vadd.f32 %v2217_v26, %v24433_v12  ;;  %v566_v26 = vadd.f32 %v24438_v19, %v565_v55 }
 0x34b   :  { %2292 = vst [vmem:[#allocation3 + $0x20] sm:$0x1f] %v2266_v62  ;;  %v2268_v18 = vmax.f32 %v20350_v13, 0.0  ;;  %v21424_v62 = vld [vmem:[%s29087_s5 + $0x26c] ss:$16 sps:$4 sm:$0xff]   ;;  %v672_v13 = vmax.f32 %v563_v1, 0.0 }
 0x34c   :  { %2293 = vst [vmem:[#allocation3 + $0x28] sm:$0x1f] %v2267_v23  ;;  %v2269_v15 = vmax.f32 %v20351_v7, 0.0  ;;  %v24458_v16 = vld [vmem:[#allocation3 + $0x10] sm:$0xff]  ;;  %v20287_v23 = vpop.f32.mrb[83].mxu0 }
 0x34d   :  { %2294 = vst [vmem:[#allocation3 + $0x20] sm:$0xe0] %v2268_v18  ;;  %v24461_v17 = vld [vmem:[#allocation3 + $0x18] sm:$0xff]  ;;  %v2320_v25 = vpack.c.bf16 %v24458_v16, %v2310_v39  ;;  %729 = vst [vmem:[#allocation2 + $0x140] sm:$0xff] %v672_v13 }
 0x34e   :  { %2295 = vst [vmem:[#allocation3 + $0x28] sm:$0xe0] %v2269_v15  ;;  %v2221_v31 = vpop.f32.mrb[12].mxu1  ;;  %v2321_v52 = vpack.c.bf16 %v24461_v17, %v2311_v61  ;;  %v673_v61 = vmax.f32 %v566_v26, 0.0 }
 0x34f   :  { %v20352_v27 = vadd.f32 %v2221_v31, %v24430_v20  ;;  %v2223_v40 = vpop.f32.mrb[13].mxu1  ;;  %v21419_v31 = vld [vmem:[%s29087_s5 + $0x260] ss:$16 sps:$4 sm:$0xff]  }
 0x350   :  { %v20353_v2 = vadd.f32 %v2223_v40, %v24433_v12  ;;  %v2225_v34 = vpop.f32.mrb[14].mxu1  ;;  %6142 = vmatprep.mubr.bf16.mxu0 %v2321_v52  ;;  %6691 = vmatprep.mubr.bf16.mxu1 %v2321_v52  ;;  %v21422_v52 = vld [vmem:[%s29087_s5 + $0x268] ss:$16 sps:$4 sm:$0xff]   ;;  %730 = vst [vmem:[#allocation2 + $0x148] sm:$0xff] %v673_v61  ;;  %v21437_v61 = vld [vmem:[%s29087_s5 + $0x2c0] ss:$16 sps:$4 sm:$0xff]  }
 0x351   :  { %v2270_v11 = vmax.f32 %v20352_v27, 0.0  ;;  %v20354_v38 = vadd.f32 %v2225_v34, %v24430_v20  ;;  %v2227_v47 = vpop.f32.mrb[15].mxu1  ;;  %6143 = vmatmul.mubr.bf16.vlgmr.msra.gmra.mrb[116].mxu0 %v2320_v25  ;;  %6692 = vmatmul.mubr.bf16.vlgmr.msra.gmra.mrb[28].mxu1 %v2320_v25  ;;  %v570_v25 = vpop.f32.mrb[84].mxu0 }
 0x352   :  { %v2271_v37 = vmax.f32 %v20353_v2, 0.0  ;;  %v20355_v30 = vadd.f32 %v2227_v47, %v24433_v12  ;;  %6172 = vmatpush1.bf16.msra.mxu0 %v21401_v29  ;;  %6721 = vmatpush1.bf16.msra.mxu1 %v21404_v32  ;;  %v24531_v32 = vpack.c.bf16 %v24461_v17, %v2327_v60  ;;  %v20290_v2 = vpop.f32.mrb[85].mxu0 }
 0x353   :  { %2296 = vst [vmem:[#allocation3 + $0x30] sm:$0xf] %v2270_v11  ;;  %v2272_v42 = vmax.f32 %v20354_v38, 0.0  ;;  %6173 = vmatprep.subr.bf16.mxu0 %v21409_v24  ;;  %6722 = vmatprep.subr.bf16.mxu1 %v21412_v56  ;;  %v21425_v56 = vld [vmem:[%s29087_s5 + $0x280] ss:$16 sps:$4 sm:$0xff]  }
 0x354   :  { %2297 = vst [vmem:[#allocation3 + $0x38] sm:$0xf] %v2271_v37  ;;  %v2273_v41 = vmax.f32 %v20355_v30, 0.0  ;;  %v24494_v58 = vld [vmem:[#allocation3 + $0x20] sm:$0xff]  ;;  %v21433_v38 = vld [vmem:[%s29087_s5 + $0x2a4] ss:$16 sps:$4 sm:$0xff]  }
 0x355   :  { %2298 = vst [vmem:[#allocation3 + $0x30] sm:$0xf0] %v2272_v42  ;;  %v24499_v21 = vld [vmem:[#allocation3 + $0x28] sm:$0xff]  ;;  %v24504_v53 = vpack.c.bf16 %v24494_v58, %v24458_v16  ;;  %v2404_v47 = vshll.u32 %v24531_v32, 16  ;;  %v24566_v42 = vpack.c.bf16 %v24461_v17, %v2343_v44 }
 0x356   :  { %2299 = vst [vmem:[#allocation3 + $0x38] sm:$0xf0] %v2273_v41  ;;  %6174 = vmatpush1.bf16.msra.mxu0 %v21407_v10  ;;  %6723 = vmatpush1.bf16.msra.mxu1 %v21410_v43  ;;  %v2231_v6 = vpop.f32.mrb[16].mxu1  ;;  %v24514_v28 = vpack.c.bf16 %v24499_v21, %v24461_v17  ;;  %v21436_v43 = vld [vmem:[%s29087_s5 + $0x2ac] ss:$16 sps:$4 sm:$0xff]   ;;  %v24571_v41 = vpop.f32.mrb[86].mxu0 }
 0x357   :  { %v20356_v50 = vadd.f32 %v2231_v6, %v24430_v20  ;;  %v2233_v63 = vpop.f32.mrb[17].mxu1  ;;  %6175 = vmatprep.subr.bf16.mxu0 %v21415_v49  ;;  %6724 = vmatprep.subr.bf16.mxu1 %v21418_v54  ;;  %v21431_v6 = vld [vmem:[%s29087_s5 + $0x2a0] ss:$16 sps:$4 sm:$0xff]   ;;  %v2406_v13 = vrot.slane %v2404_v47, 1 }
 0x358   :  { %v20357_v7 = vadd.f32 %v2233_v63, %v24433_v12  ;;  %v2235_v18 = vpop.f32.mrb[18].mxu1  ;;  %v21439_v63 = vld [vmem:[%s29087_s5 + $0x2c4] ss:$16 sps:$4 sm:$0xff]  }
 0x359   :  { %v2274_v35 = vmax.f32 %v20356_v50, 0.0  ;;  %v20358_v15 = vadd.f32 %v2235_v18, %v24430_v20  ;;  %v2237_v45 = vpop.f32.mrb[19].mxu1  ;;  %v571_v18 = vadd.f32 %v24438_v19, %v570_v25 }
 0x35a   :  { %v2275_v29 = vmax.f32 %v20357_v7, 0.0  ;;  %v20359_v33 = vadd.f32 %v2237_v45, %v24433_v12  ;;  %6176 = vmatpush1.bf16.msra.mxu0 %v21413_v0  ;;  %6725 = vmatpush1.bf16.msra.mxu1 %v21416_v46  ;;  %v21434_v46 = vld [vmem:[%s29087_s5 + $0x2a8] ss:$16 sps:$4 sm:$0xff]  }
 0x35b   :  { %2300 = vst [vmem:[#allocation3 + $0x40] sm:$0x7] %v2274_v35  ;;  %v2276_v39 = vmax.f32 %v20358_v15, 0.0  ;;  %6177 = vmatprep.subr.bf16.mxu0 %v21421_v51  ;;  %6726 = vmatprep.subr.bf16.mxu1 %v21424_v62  ;;  %v24583_v51 = vpack.c.bf16 %v24458_v16, %v2342_v57  ;;  %v21442_v62 = vld [vmem:[%s29087_s5 + $0x2cc] ss:$16 sps:$4 sm:$0xff]   ;;  %v20291_v35 = vpop.f32.mrb[87].mxu0 }
 0x35c   :  { %2301 = vst [vmem:[#allocation3 + $0x48] sm:$0x7] %v2275_v29  ;;  %v2277_v27 = vmax.f32 %v20359_v33, 0.0  ;;  %v24539_v40 = vld [vmem:[#allocation3 + $0x30] sm:$0xff]  ;;  %v2476_v15 = vshrl.u32 %v24566_v42, 16  ;;  %v2402_v33 = vshrl.u32 %v24531_v32, 16 }
 0x35d   :  { %2302 = vst [vmem:[#allocation3 + $0x40] sm:$0xf8] %v2276_v39  ;;  %v24541_v24 = vld [vmem:[#allocation3 + $0x38] sm:$0xff]  ;;  %v24560_v10 = vpack.c.bf16 %v24539_v40, %v24494_v58  ;;  %v21440_v39 = vld [vmem:[%s29087_s5 + $0x2c8] ss:$16 sps:$4 sm:$0xff]  }
 0x35e   :  { %2303 = vst [vmem:[#allocation3 + $0x48] sm:$0xf8] %v2277_v27  ;;  %6178 = vmatpush1.bf16.msra.mxu0 %v21419_v31  ;;  %6727 = vmatpush1.bf16.msra.mxu1 %v21422_v52  ;;  %v2241_v34 = vpop.f32.mrb[20].mxu1  ;;  %v24551_v11 = vpack.c.bf16 %v24541_v24, %v24499_v21  ;;  %v2479_v31 = vshll.u32 %v24566_v42, 16  ;;  %v578_v52 = vpop.f32.mrb[88].mxu0  ;;  %v2467_v27 = vshll.u32 %v24583_v51, 16 }
 0x35f   :  { %v20360_v37 = vadd.f32 %v2241_v34, %v24430_v20  ;;  %v2243_v30 = vpop.f32.mrb[21].mxu1  ;;  %6179 = vmatprep.subr.bf16.mxu0 %v21427_v14  ;;  %6728 = vmatprep.subr.bf16.mxu1 %v21430_v59  ;;  %v2464_v59 = vshrl.u32 %v24583_v51, 16  ;;  %v2413_v2 = vshrl.u32 %v24560_v10, 16  ;;  %v20294_v34 = vpop.f32.mrb[89].mxu0  ;;  %v2397_v57 = vshll.u32 %v24560_v10, 16 }
 0x360   :  { %v20361_v49 = vadd.f32 %v2243_v30, %v24433_v12  ;;  %v2245_v54 = vpop.f32.mrb[22].mxu1  ;;  %6152 = vmatprep.mubr.bf16.mxu0 %v24551_v11  ;;  %6701 = vmatprep.mubr.bf16.mxu1 %v24551_v11  ;;  %v2409_v26 = vshll.u32 %v24551_v11, 16  ;;  %v2421_v14 = vshrl.u32 %v24551_v11, 16  ;;  %v674_v30 = vmax.f32 %v571_v18, 0.0  ;;  %v581_v42 = vpop.f32.mrb[90].mxu0 }
 0x361   :  { %v2278_v0 = vmax.f32 %v20360_v37, 0.0  ;;  %v20362_v1 = vadd.f32 %v2245_v54, %v24430_v20  ;;  %v2247_v8 = vpop.f32.mrb[23].mxu1  ;;  %6153 = vmatmul.mubr.bf16.gmra.mrb[120].mxu0 %v24560_v10  ;;  %6702 = vmatmul.mubr.bf16.gmra.mrb[32].mxu1 %v24560_v10  ;;  %v21448_v37 = vld [vmem:[%s29087_s5 + $0x2ec] ss:$16 sps:$4 sm:$0xff]   ;;  %v2466_v51 = vrot.slane %v2464_v59, 3  ;;  %v579_v35 = vadd.f32 %v24438_v19, %v578_v52 }
 0x362   :  { %v2279_v55 = vmax.f32 %v20361_v49, 0.0  ;;  %v20363_v50 = vadd.f32 %v2247_v8, %v24433_v12  ;;  %6180 = vmatpush1.bf16.msra.mxu0 %v21425_v56  ;;  %6729 = vmatpush1.bf16.msra.mxu1 %v21428_v5  ;;  %v2318_v29 = vld [vmem:[#allocation3 + $0x40] sm:$0x1]  ;;  %v2407_v56 = vor.u32 %v2406_v13, %v2402_v33  ;;  %v24608_v32 = vrot.slane %v2409_v26, 1  ;;  %v21445_v5 = vld [vmem:[%s29087_s5 + $0x2e4] ss:$16 sps:$4 sm:$0xff]  }
 0x363   :  { %2304 = vst [vmem:[#allocation3 + $0x50] sm:$0x3] %v2278_v0  ;;  %v2280_v23 = vmax.f32 %v20362_v1, 0.0  ;;  %6181 = vmatprep.subr.bf16.mxu0 %v21433_v38  ;;  %6730 = vmatprep.subr.bf16.mxu1 %v21436_v43  ;;  %v2319_v7 = vld [vmem:[#allocation3 + $0x48] sm:$0x1]  ;;  %v2324_v44 = vpack.c.bf16 %v2318_v29, %v2318_v29  ;;  %v24618_v43 = vrot.slane %v2476_v15, 3  ;;  %v574_v0 = vadd.f32 %v24438_v19, %v24571_v41 }
 0x364   :  { %2305 = vst [vmem:[#allocation3 + $0x58] sm:$0x3] %v2279_v55  ;;  %v2281_v45 = vmax.f32 %v20363_v50, 0.0  ;;  %v2325_v60 = vpack.c.bf16 %v2319_v7, %v2319_v7  ;;  %v2481_v1 = vrot.slane %v2479_v31, 4  ;;  %v20295_v8 = vpop.f32.mrb[91].mxu0  ;;  %731 = vst [vmem:[#allocation2 + $0x150] sm:$0xff] %v674_v30  ;;  %v582_v15 = vadd.f32 %v24438_v19, %v581_v42 }
 0x365   :  { %2306 = vst [vmem:[#allocation3 + $0x50] sm:$0xfc] %v2280_v23  ;;  %v2469_v55 = vrot.slane %v2467_v27, 4  ;;  %v21446_v41 = vld [vmem:[%s29087_s5 + $0x2e8] ss:$16 sps:$4 sm:$0xff]   ;;  %v675_v13 = vmax.f32 %v574_v0, 0.0 }
 0x366   :  { %2307 = vst [vmem:[#allocation3 + $0x58] sm:$0xfc] %v2281_v45  ;;  %6182 = vmatpush1.bf16.msra.mxu0 %v21431_v6  ;;  %6731 = vmatpush1.bf16.msra.mxu1 %v21434_v46  ;;  %v2251_v25 = vpop.f32.mrb[24].mxu1  ;;  %v21451_v23 = vld [vmem:[%s29087_s5 + $0x304] ss:$16 sps:$4 sm:$0xff]   ;;  %v2484_v18 = vrot.slane %v2409_v26, 4 }
 0x367   :  { %v20364_v38 = vadd.f32 %v2251_v25, %v24430_v20  ;;  %6162 = vmatprep.mubr.bf16.mxu0 %v2325_v60  ;;  %6711 = vmatprep.mubr.bf16.mxu1 %v2325_v60  ;;  %v2253_v47 = vpop.f32.mrb[25].mxu1  ;;  %v21443_v20 = vld [vmem:[%s29087_s5 + $0x2e0] ss:$16 sps:$4 sm:$0xff]   ;;  %v21454_v7 = vld [vmem:[%s29087_s5 + $0x30c] ss:$16 sps:$4 sm:$0xff]   ;;  %732 = vst [vmem:[#allocation2 + $0x158] sm:$0xff] %v675_v13  ;;  %v2482_v60 = vor.u32 %v2481_v1, %v24618_v43 }
 0x368   :  { %v20365_v49 = vadd.f32 %v2253_v47, %v24433_v12  ;;  %v2255_v54 = vpop.f32.mrb[26].mxu1  ;;  %6183 = vmatprep.subr.bf16.mxu0 %v21439_v63  ;;  %6732 = vmatprep.subr.bf16.mxu1 %v21442_v62  ;;  %v2483_v12 = vrot.slane %v2421_v14, 3  ;;  %v2412_v63 = vsel %vm2388_vm1, %v2407_v56, %v24608_v32  ;;  %v2471_v62 = vrot.slane %v2413_v2, 3  ;;  %v2345_v45 = vld [vmem:[#allocation3 + $0x48] sm:$0xff]  ;;  %v24655_v27 = vld [vmem:[#allocation3 + $0x40] sm:$0xff] }
 0x369   :  { %v2282_v6 = vmax.f32 %v20364_v38, 0.0  ;;  %v2256_v46 = vpop.f32.mrb[27].mxu1  ;;  %6163 = vmatmul.mubr.bf16.gmra.mrb[124].mxu0 %v2324_v44  ;;  %6712 = vmatmul.mubr.bf16.gmra.mrb[36].mxu1 %v2324_v44  ;;  %v2472_v29 = vrot.slane %v2397_v57, 4  ;;  %v24650_v33 = vpack.c.bf16 %v2345_v45, %v24541_v24  ;;  %v676_v31 = vmax.f32 %v579_v35, 0.0  ;;  %v21449_v25 = vld [vmem:[%s29087_s5 + $0x300] ss:$16 sps:$4 sm:$0xff]  }
 0x36a   :  { %v2283_v50 = vmax.f32 %v20365_v49, 0.0  ;;  %6184 = vmatpush1.bf16.msra.mxu0 %v21437_v61  ;;  %6733 = vmatpush1.bf16.msra.mxu1 %v21440_v39  ;;  %v586_v61 = vpop.f32.mrb[92].mxu0  ;;  %v24652_v26 = vor.u32 %v2484_v18, %v2483_v12  ;;  %v677_v52 = vmax.f32 %v582_v15, 0.0  ;;  %v21452_v24 = vld [vmem:[%s29087_s5 + $0x308] ss:$16 sps:$4 sm:$0xff]   ;;  %v24667_v38 = vpack.c.bf16 %v24655_v27, %v24539_v40 }
 0x36b   :  { %2308 = vst [vmem:[#allocation3 + $0x60] sm:$0x1] %v2282_v6  ;;  %6203 = vmatprep.mubr.bf16.mxu0 %v2412_v63  ;;  %6752 = vmatprep.mubr.bf16.mxu1 %v2412_v63  ;;  %v587_v39 = vadd.f32 %v24438_v19, %v586_v61  ;;  %v20298_v59 = vpop.f32.mrb[93].mxu0  ;;  %v24663_v34 = vor.u32 %v2472_v29, %v2471_v62  ;;  %v21457_v47 = vld [vmem:[%s29087_s5 + $0x324] ss:$16 sps:$4 sm:$0xff]   ;;  %733 = vst [vmem:[#allocation2 + $0x160] sm:$0xff] %v676_v31 }
 0x36c   :  { %2309 = vst [vmem:[#allocation3 + $0x68] sm:$0x1] %v2283_v50  ;;  %6185 = vmatprep.subr.bf16.mxu0 %v21445_v5  ;;  %6734 = vmatprep.subr.bf16.mxu1 %v21448_v37  ;;  %v589_v56 = vpop.f32.mrb[94].mxu0  ;;  %v2470_v5 = vor.u32 %v2469_v55, %v2466_v51  ;;  %v21460_v44 = vld [vmem:[%s29087_s5 + $0x32c] ss:$16 sps:$4 sm:$0xff]   ;;  %v24677_v37 = vsel %vm2462_vm2, %v2482_v60, %v24652_v26  ;;  %734 = vst [vmem:[#allocation2 + $0x168] sm:$0xff] %v677_v52 }
 0x36d   :  { %v678_v30 = vmax.f32 %v587_v39, 0.0  ;;  %v590_v40 = vadd.f32 %v24438_v19, %v589_v56  ;;  %v20299_v43 = vpop.f32.mrb[95].mxu0  ;;  %v2377_v54 = vld [vmem:[#allocation3 + $0x58] sm:$0xff]  ;;  %v21458_v0 = vld [vmem:[%s29087_s5 + $0x328] ss:$16 sps:$4 sm:$0xff]   ;;  %v29102_v61 = vshll.u32 %v24650_v33, 16 }
 0x36e   :  { %6186 = vmatpush1.bf16.msra.mxu0 %v21443_v20  ;;  %6735 = vmatpush1.bf16.msra.mxu1 %v21446_v41  ;;  %v24682_v42 = vsel %vm2462_vm2, %v2470_v5, %v24663_v34  ;;  %v21455_v20 = vld [vmem:[%s29087_s5 + $0x320] ss:$16 sps:$4 sm:$0xff]   ;;  %v21463_v1 = vld [vmem:[%s29087_s5 + $0x344] ss:$16 sps:$4 sm:$0xff]   ;;  %v21466_v8 = vld [vmem:[%s29087_s5 + $0x34c] ss:$16 sps:$4 sm:$0xff]   ;;  %v24696_v46 = vpack.c.bf16 %v2377_v54, %v2345_v45  ;;  %v2381_v43 = vpack.c.bf16 %v2377_v54, %v2377_v54 }
 0x36f   :  { %6187 = vmatprep.subr.bf16.mxu0 %v21451_v23  ;;  %6736 = vmatprep.subr.bf16.mxu1 %v21454_v7  ;;  %735 = vst [vmem:[#allocation2 + $0x170] sm:$0xff] %v678_v30  ;;  %v679_v49 = vmax.f32 %v590_v40, 0.0  ;;  %v594_v6 = vpop.f32.mrb[96].mxu0  ;;  %v21461_v12 = vld [vmem:[%s29087_s5 + $0x340] ss:$16 sps:$4 sm:$0xff]   ;;  %v29100_v29 = vshrl.u32 %v24650_v33, 16 }
 0x370   :  { %v595_v51 = vadd.f32 %v24438_v19, %v594_v6  ;;  %v20302_v55 = vpop.f32.mrb[97].mxu0  ;;  %v21464_v50 = vld [vmem:[%s29087_s5 + $0x348] ss:$16 sps:$4 sm:$0xff]   ;;  %v21469_v63 = vld [vmem:[%s29087_s5 + $0x364] ss:$16 sps:$4 sm:$0xff]   ;;  %v29099_v56 = vshrl.u32 %v24667_v38, 16 }
 0x371   :  { %736 = vst [vmem:[#allocation2 + $0x178] sm:$0xff] %v679_v49  ;;  %v597_v41 = vpop.f32.mrb[98].mxu0  ;;  %v21472_v62 = vld [vmem:[%s29087_s5 + $0x36c] ss:$16 sps:$4 sm:$0xff]   ;;  %v2375_v18 = vld [vmem:[#allocation3 + $0x18] sm:$0x80] }
 0x372   :  { %6188 = vmatpush1.bf16.msra.mxu0 %v21449_v25  ;;  %6737 = vmatpush1.bf16.msra.mxu1 %v21452_v24  ;;  %v680_v13 = vmax.f32 %v595_v51, 0.0  ;;  %v598_v23 = vadd.f32 %v24438_v19, %v597_v41  ;;  %v20303_v7 = vpop.f32.mrb[99].mxu0  ;;  %v2379_v35 = vpack.c.bf16 %v24499_v21, %v2375_v18  ;;  %v21467_v15 = vld [vmem:[%s29087_s5 + $0x360] ss:$16 sps:$4 sm:$0xff]   ;;  %v21470_v45 = vld [vmem:[%s29087_s5 + $0x368] ss:$16 sps:$4 sm:$0xff]  }
 0x373   :  { %6189 = vmatprep.subr.bf16.mxu0 %v21457_v47  ;;  %6738 = vmatprep.subr.bf16.mxu1 %v21460_v44  ;;  %v2374_v31 = vld [vmem:[#allocation3 + $0x10] sm:$0x80]  ;;  %v21475_v21 = vld [vmem:[%s29087_s5 + $0x384] ss:$16 sps:$4 sm:$0xff]   ;;  %v21473_v25 = vld [vmem:[%s29087_s5 + $0x380] ss:$16 sps:$4 sm:$0xff]  }
 0x374   :  { %737 = vst [vmem:[#allocation2 + $0x180] sm:$0xff] %v680_v13  ;;  %v681_v60 = vmax.f32 %v598_v23, 0.0  ;;  %v2376_v52 = vld [vmem:[#allocation3 + $0x50] sm:$0xff]  ;;  %v2378_v59 = vpack.c.bf16 %v24494_v58, %v2374_v31  ;;  %v602_v24 = vpop.f32.mrb[100].mxu0  ;;  %v2597_v5 = vshrl.u32 %v2379_v35, 16  ;;  %v29101_v58 = vshll.u32 %v24667_v38, 16 }
 0x375   :  { %v21478_v39 = vld [vmem:[%s29087_s5 + $0x38c] ss:$16 sps:$4 sm:$0xff]   ;;  %v21476_v47 = vld [vmem:[%s29087_s5 + $0x388] ss:$16 sps:$4 sm:$0xff]   ;;  %v21481_v44 = vld [vmem:[%s29087_s5 + $0x3a4] ss:$16 sps:$4 sm:$0xff]   ;;  %v603_v30 = vadd.f32 %v24438_v19, %v602_v24  ;;  %v24741_v49 = vpack.c.bf16 %v2376_v52, %v24655_v27 }
 0x376   :  { %6190 = vmatpush1.bf16.msra.mxu0 %v21455_v20  ;;  %6739 = vmatpush1.bf16.msra.mxu1 %v21458_v0  ;;  %738 = vst [vmem:[#allocation2 + $0x188] sm:$0xff] %v681_v60  ;;  %v20306_v40 = vpop.f32.mrb[101].mxu0  ;;  %v21484_v20 = vld [vmem:[%s29087_s5 + $0x3ac] ss:$16 sps:$4 sm:$0xff]   ;;  %v2605_v6 = vrot.slane %v29102_v61, 4  ;;  %v2592_v13 = vrot.slane %v29099_v56, 3 }
 0x377   :  { %6191 = vmatprep.subr.bf16.mxu0 %v21463_v1  ;;  %6740 = vmatprep.subr.bf16.mxu1 %v21466_v8  ;;  %v605_v0 = vpop.f32.mrb[102].mxu0  ;;  %v2600_v1 = vshll.u32 %v2379_v35, 16  ;;  %v2604_v8 = vrot.slane %v29100_v29, 3  ;;  %v2326_v54 = vld [vmem:[#allocation3] sm:$0xfe]  ;;  %v682_v27 = vmax.f32 %v603_v30, 0.0 }
 0x378   :  { %v606_v51 = vadd.f32 %v24438_v19, %v605_v0  ;;  %v20307_v55 = vpop.f32.mrb[103].mxu0  ;;  %v21479_v41 = vld [vmem:[%s29087_s5 + $0x3a0] ss:$16 sps:$4 sm:$0xff]   ;;  %v21482_v60 = vld [vmem:[%s29087_s5 + $0x3a8] ss:$16 sps:$4 sm:$0xff]   ;;  %v2618_v31 = vshrl.u32 %v2381_v43, 16 }
 0x379   :  { %v24759_v23 = vor.u32 %v2605_v6, %v2604_v8  ;;  %v2329_v7 = vld [vmem:[#allocation3 + $0x48] sm:$0x3]  ;;  %739 = vst [vmem:[#allocation2 + $0x190] sm:$0xff] %v682_v27  ;;  %v2602_v35 = vrot.slane %v2600_v1, 4  ;;  %v21493_v1 = vld [vmem:[%s29087_s5 + $0x3e4] ss:$16 sps:$4 sm:$0xff]  }
 0x37a   :  { %6192 = vmatpush1.bf16.msra.mxu0 %v21461_v12  ;;  %6741 = vmatpush1.bf16.msra.mxu1 %v21464_v50  ;;  %v2380_v12 = vpack.c.bf16 %v2376_v52, %v2376_v52  ;;  %v2599_v50 = vrot.slane %v2597_v5, 3  ;;  %v683_v18 = vmax.f32 %v606_v51, 0.0  ;;  %v2621_v52 = vshll.u32 %v2381_v43, 16  ;;  %v610_v43 = vpop.f32.mrb[104].mxu0  ;;  %v21496_v8 = vld [vmem:[%s29087_s5 + $0x3ec] ss:$16 sps:$4 sm:$0xff]  }
 0x37b   :  { %6193 = vmatprep.subr.bf16.mxu0 %v21469_v63  ;;  %6742 = vmatprep.subr.bf16.mxu1 %v21472_v62  ;;  %v2585_v63 = vshrl.u32 %v2378_v59, 16  ;;  %v24755_v62 = vpack.c.bf16 %v24458_v16, %v2326_v54  ;;  %v2593_v16 = vrot.slane %v29101_v58, 4  ;;  %v24779_v40 = vpack.c.bf16 %v2329_v7, %v2329_v7  ;;  %v24794_v55 = vld [vmem:[#allocation2 + $0xf9] sm:$0xff]  ;;  %v2334_v29 = vld [vmem:[#allocation3] sm:$0xfc] }
 0x37c   :  { %740 = vst [vmem:[#allocation2 + $0x198] sm:$0xff] %v683_v18  ;;  %v2612_v5 = vshll.u32 %v2380_v12, 16  ;;  %v24781_v0 = vrot.slane %v2618_v31, 3  ;;  %v611_v6 = vadd.f32 %v24438_v19, %v610_v43  ;;  %v2623_v51 = vrot.slane %v2621_v52, 4 }
 0x37d   :  { %v2392_v30 = vshll.u32 %v24755_v62, 16 }
 0x37e   :  { %6194 = vmatpush1.bf16.msra.mxu0 %v21467_v15  ;;  %6743 = vmatpush1.bf16.msra.mxu1 %v21470_v45  ;;  %v2587_v15 = vrot.slane %v2585_v63, 3  ;;  %v2588_v45 = vshll.u32 %v2378_v59, 16  ;;  %v21490_v59 = vld [vmem:[%s29087_s5 + $0x3cc] ss:$16 sps:$4 sm:$0xff]   ;;  %v2614_v18 = vrot.slane %v2612_v5, 4  ;;  %v684_v31 = vmax.f32 %v611_v6, 0.0 }
 0x37f   :  { %6195 = vmatprep.subr.bf16.mxu0 %v21475_v21  ;;  %6744 = vmatprep.subr.bf16.mxu1 %v21478_v39  ;;  %v2609_v21 = vshrl.u32 %v2380_v12, 16  ;;  %v21487_v39 = vld [vmem:[%s29087_s5 + $0x3c4] ss:$16 sps:$4 sm:$0xff]   ;;  %v20310_v12 = vpop.f32.mrb[105].mxu0  ;;  %v24798_v63 = vld [vmem:[#allocation2 + $0x109] sm:$0xff]  ;;  %v2425_v5 = vshll.u32 %v24779_v40, 16 }
 0x380   :  { %v2590_v24 = vrot.slane %v2588_v45, 4  ;;  %v24804_v45 = vld [vmem:[#allocation2 + $0x119] sm:$0xff]  ;;  %741 = vst [vmem:[#allocation2 + $0x1a0] sm:$0xff] %v684_v31  ;;  %v21571_v12 = vld [vmem:[%s29087_s5 + $0x584] ss:$16 sps:$4 sm:$0xff]  }
 0x381   :  { %v24800_v7 = vrot.slane %v2609_v21, 3  ;;  %v24813_v21 = vld [vmem:[#allocation2 + $0x129] sm:$0xff] }
 0x382   :  { %6196 = vmatpush1.bf16.msra.mxu0 %v21473_v25  ;;  %6745 = vmatpush1.bf16.msra.mxu1 %v21476_v47  ;;  %v2603_v25 = vor.u32 %v2602_v35, %v2599_v50  ;;  %v21485_v47 = vld [vmem:[%s29087_s5 + $0x3c0] ss:$16 sps:$4 sm:$0xff]   ;;  %v2591_v27 = vor.u32 %v2590_v24, %v2587_v15  ;;  %v2328_v15 = vld [vmem:[#allocation3 + $0x40] sm:$0x3] }
 0x383   :  { %6197 = vmatprep.subr.bf16.mxu0 %v21481_v44  ;;  %6746 = vmatprep.subr.bf16.mxu1 %v21484_v20  ;;  %v21488_v44 = vld [vmem:[%s29087_s5 + $0x3c8] ss:$16 sps:$4 sm:$0xff]   ;;  %v2594_v20 = vor.u32 %v2593_v16, %v2592_v13  ;;  %v613_v13 = vpop.f32.mrb[106].mxu0  ;;  %v2615_v43 = vor.u32 %v2614_v18, %v24800_v7  ;;  %v2394_v18 = vrot.slane %v2392_v30, 1  ;;  %v24835_v31 = vpack.c.bf16 %v2328_v15, %v2328_v15 }
 0x384   :  { %v24792_v54 = vsel %vm2462_vm2, %v2603_v25, %v24759_v23  ;;  %v24796_v50 = vld [vmem:[#allocation2 + $0x101] sm:$0xff]  ;;  %v24802_v35 = vld [vmem:[#allocation2 + $0x111] sm:$0xff]  ;;  %v614_v52 = vadd.f32 %v24438_v19, %v613_v13  ;;  %v20311_v25 = vpop.f32.mrb[107].mxu0  ;;  %v2390_v30 = vshrl.u32 %v24755_v62, 16  ;;  %v21508_v62 = vld [vmem:[%s29087_s5 + $0x42c] ss:$16 sps:$4 sm:$0xff]  }
 0x385   :  { %v24806_v16 = vld [vmem:[#allocation2 + $0x121] sm:$0xff]  ;;  %v24815_v24 = vld [vmem:[#allocation2 + $0x131] sm:$0xff]  ;;  %v618_v15 = vpop.f32.mrb[108].mxu0  ;;  %v2427_v25 = vrot.slane %v2425_v5, 1  ;;  %v2417_v22 = vshll.u32 %v24835_v31, 16 }
 0x386   :  { %6198 = vmatpush1.bf16.msra.mxu0 %v21479_v41  ;;  %6747 = vmatpush1.bf16.msra.mxu1 %v21482_v60  ;;  %v24810_v41 = vsel %vm2462_vm2, %v2591_v27, %v2594_v20  ;;  %v2624_v60 = vor.u32 %v2623_v51, %v24781_v0  ;;  %v21491_v51 = vld [vmem:[%s29087_s5 + $0x3e0] ss:$16 sps:$4 sm:$0xff]   ;;  %v21494_v13 = vld [vmem:[%s29087_s5 + $0x3e8] ss:$16 sps:$4 sm:$0xff]  }
 0x387   :  { %6199 = vmatprep.subr.bf16.mxu0 %v21487_v39  ;;  %6748 = vmatprep.subr.bf16.mxu1 %v21490_v59  ;;  %v685_v59 = vmax.f32 %v614_v52, 0.0  ;;  %v21557_v27 = vld [vmem:[%s29087_s5 + $0x540] ss:$16 sps:$4 sm:$0xff]   ;;  %v21578_v39 = vld [vmem:[%s29087_s5 + $0x5a8] ss:$16 sps:$4 sm:$0xff]  }
 0x388   :  { %v24823_v6 = vsel %vm2462_vm2, %v24759_v23, %v2624_v60  ;;  %v24838_v23 = vsel %vm2462_vm2, %v2594_v20, %v2615_v43  ;;  %v2399_v20 = vrot.slane %v2397_v57, 1  ;;  %v619_v60 = vadd.f32 %v24438_v19, %v618_v15  ;;  %v20314_v43 = vpop.f32.mrb[109].mxu0  ;;  %v21505_v57 = vld [vmem:[%s29087_s5 + $0x424] ss:$16 sps:$4 sm:$0xff]  }
 0x389   :  { %742 = vst [vmem:[#allocation2 + $0x1a8] sm:$0xff] %v685_v59  ;;  %v2395_v59 = vor.u32 %v2394_v18, %v2390_v30  ;;  %v621_v52 = vpop.f32.mrb[110].mxu0  ;;  %v2423_v19 = vor.u32 %v2421_v14, %v24608_v32  ;;  %v21503_v14 = vld [vmem:[%s29087_s5 + $0x420] ss:$16 sps:$4 sm:$0xff]   ;;  %v21506_v32 = vld [vmem:[%s29087_s5 + $0x428] ss:$16 sps:$4 sm:$0xff]  }
 0x38a   :  { %6200 = vmatpush1.bf16.msra.mxu0 %v21485_v47  ;;  %6749 = vmatpush1.bf16.msra.mxu1 %v21488_v44  ;;  %v21499_v47 = vld [vmem:[%s29087_s5 + $0x404] ss:$16 sps:$4 sm:$0xff]   ;;  %v21502_v44 = vld [vmem:[%s29087_s5 + $0x40c] ss:$16 sps:$4 sm:$0xff]   ;;  %v686_v5 = vmax.f32 %v619_v60, 0.0  ;;  %v20315_v18 = vpop.f32.mrb[111].mxu0  ;;  %v2415_v43 = vor.u32 %v2413_v2, %v2399_v20 }
 0x38b   :  { %6201 = vmatprep.subr.bf16.mxu0 %v21493_v1  ;;  %6750 = vmatprep.subr.bf16.mxu1 %v21496_v8  ;;  %v21497_v1 = vld [vmem:[%s29087_s5 + $0x400] ss:$16 sps:$4 sm:$0xff]   ;;  %v21500_v8 = vld [vmem:[%s29087_s5 + $0x408] ss:$16 sps:$4 sm:$0xff]   ;;  %v2400_v30 = vsel %vm2388_vm1, %v2395_v59, %v2399_v20  ;;  %v2428_v15 = vsel %vm2388_vm1, %v2423_v19, %v2427_v25  ;;  %v626_v60 = vpop.f32.mrb[112].mxu0  ;;  %v2431_v19 = vshrl.u32 %v24779_v40, 16 }
 0x38c   :  { %743 = vst [vmem:[#allocation2 + $0x1b0] sm:$0xff] %v686_v5  ;;  %v21512_v25 = vld [vmem:[%s29087_s5 + $0x448] ss:$16 sps:$4 sm:$0xff]   ;;  %v21520_v59 = vld [vmem:[%s29087_s5 + $0x46c] ss:$16 sps:$4 sm:$0xff]  }
 0x38d   :  { %v2335_v5 = vld [vmem:[#allocation3 + $0x8] sm:$0xfc]  ;;  %v21518_v40 = vld [vmem:[%s29087_s5 + $0x468] ss:$16 sps:$4 sm:$0xff]  }
 0x38e   :  { %6202 = vmatpush1.bf16.msra.mxu0 %v21491_v51  ;;  %6751 = vmatpush1.bf16.msra.mxu1 %v21494_v13  ;;  %v23563_v51 = vld [vmem:[%s29084_s2] ss:$0 sm:$0xff] }
 0x38f   :  { %6232 = vmatprep.subr.bf16.mxu0 %v21499_v47  ;;  %6781 = vmatprep.subr.bf16.mxu1 %v21502_v44  ;;  %v622_v13 = vadd.f32 %v23563_v51, %v621_v52  ;;  %v21511_v52 = vld [vmem:[%s29087_s5 + $0x444] ss:$16 sps:$4 sm:$0xff]   ;;  %v2419_v44 = vrot.slane %v2417_v22, 1 }
 0x390   :  { %v21517_v22 = vld [vmem:[%s29087_s5 + $0x464] ss:$16 sps:$4 sm:$0xff]  }
 0x391   :  { %6204 = vmatmul.mubr.bf16.vlgmr.msra.gmra.mrb[116].mxu0 %v2400_v30  ;;  %6753 = vmatmul.mubr.bf16.vlgmr.msra.gmra.mrb[28].mxu1 %v2400_v30  ;;  %v687_v47 = vmax.f32 %v622_v13, 0.0  ;;  %v2420_v18 = vsel %vm2388_vm1, %v2415_v43, %v2419_v44  ;;  %v2339_v30 = vpack.c.bf16 %v24461_v17, %v2335_v5  ;;  %v24916_v17 = vld [vmem:[#allocation2 + $0x162] sm:$0xff]  ;;  %v29103_v44 = vrot.slane %v24551_v11, 1  ;;  %v21532_v43 = vld [vmem:[%s29087_s5 + $0x4ac] ss:$16 sps:$4 sm:$0xff]   ;;  %v24951_v5 = vld [vmem:[#allocation2 + $0x172] sm:$0xff] }
 0x392   :  { %6213 = vmatprep.mubr.bf16.mxu0 %v2428_v15  ;;  %6233 = vmatpush1.bf16.msra.mxu0 %v21497_v1  ;;  %v21514_v1 = vld [vmem:[%s29087_s5 + $0x44c] ss:$16 sps:$4 sm:$0xff]  }
 0x393   :  { %6762 = vmatprep.mubr.bf16.mxu1 %v2428_v15  ;;  %6782 = vmatpush1.bf16.msra.mxu1 %v21500_v8  ;;  %744 = vst [vmem:[#allocation2 + $0x1b8] sm:$0xff] %v687_v47  ;;  %v21509_v8 = vld [vmem:[%s29087_s5 + $0x440] ss:$16 sps:$4 sm:$0xff]   ;;  %v21523_v15 = vld [vmem:[%s29087_s5 + $0x484] ss:$16 sps:$4 sm:$0xff]  }
 0x394   :  { %6234 = vmatprep.subr.bf16.mxu0 %v21505_v57  ;;  %6783 = vmatprep.subr.bf16.mxu1 %v21508_v62  ;;  %v627_v57 = vadd.f32 %v23563_v51, %v626_v60  ;;  %v20318_v62 = vpop.f32.mrb[113].mxu0  ;;  %v21515_v51 = vld [vmem:[%s29087_s5 + $0x460] ss:$16 sps:$4 sm:$0xff]   ;;  %v21529_v60 = vld [vmem:[%s29087_s5 + $0x4a4] ss:$16 sps:$4 sm:$0xff]  }
 0x395   :  { %v629_v13 = vpop.f32.mrb[114].mxu0  ;;  %v24911_v47 = vld [vmem:[#allocation2 + $0x15a] sm:$0xff]  ;;  %v21535_v62 = vld [vmem:[%s29087_s5 + $0x4c4] ss:$16 sps:$4 sm:$0xff]   ;;  %v25089_v56 = vld [vmem:[#allocation2 + $0x1a9] sm:$0xff] }
 0x396   :  { %6235 = vmatpush1.bf16.msra.mxu0 %v21503_v14  ;;  %v688_v2 = vmax.f32 %v627_v57, 0.0  ;;  %v20319_v20 = vpop.f32.mrb[115].mxu0  ;;  %v21526_v14 = vld [vmem:[%s29087_s5 + $0x48c] ss:$16 sps:$4 sm:$0xff]   ;;  %v24953_v13 = vld [vmem:[#allocation2 + $0x161] sm:$0xff] }
 0x397   :  { %6784 = vmatpush1.bf16.msra.mxu1 %v21506_v32  ;;  %6236 = vmatprep.subr.bf16.mxu0 %v21511_v52  ;;  %v21521_v32 = vld [vmem:[%s29087_s5 + $0x480] ss:$16 sps:$4 sm:$0xff]   ;;  %v21524_v52 = vld [vmem:[%s29087_s5 + $0x488] ss:$16 sps:$4 sm:$0xff]  }
 0x398   :  { %6785 = vmatprep.subr.bf16.mxu1 %v21514_v1  ;;  %745 = vst [vmem:[#allocation2 + $0x1c0] sm:$0x3] %v688_v2  ;;  %v24943_v57 = vld [vmem:[#allocation2 + $0x16a] sm:$0xff]  ;;  %v25087_v1 = vld [vmem:[#allocation2 + $0x1a1] sm:$0xff] }
 0x399   :  { %6214 = vmatmul.mubr.bf16.gmra.mrb[120].mxu0 %v2420_v18  ;;  %6763 = vmatmul.mubr.bf16.gmra.mrb[32].mxu1 %v2420_v18  ;;  %v24955_v18 = vld [vmem:[#allocation2 + $0x169] sm:$0xff] }
 0x39a   :  { %6223 = vmatprep.mubr.bf16.mxu0 %v2431_v19  ;;  %6237 = vmatpush1.bf16.msra.mxu0 %v21509_v8  ;;  %v2429_v8 = vshrl.u32 %v24835_v31, 16  ;;  %v21527_v31 = vld [vmem:[%s29087_s5 + $0x4a0] ss:$16 sps:$4 sm:$0xff]  }
 0x39b   :  { %6772 = vmatprep.mubr.bf16.mxu1 %v2431_v19  ;;  %6786 = vmatpush1.bf16.msra.mxu1 %v21512_v25  ;;  %v2449_v25 = vrot.slane %v2339_v30, 1  ;;  %v21538_v19 = vld [vmem:[%s29087_s5 + $0x4cc] ss:$16 sps:$4 sm:$0xff]   ;;  %v21533_v20 = vld [vmem:[%s29087_s5 + $0x4c0] ss:$16 sps:$4 sm:$0xff]  }
 0x39c   :  { %6238 = vmatprep.subr.bf16.mxu0 %v21517_v22  ;;  %6787 = vmatprep.subr.bf16.mxu1 %v21520_v59  ;;  %v21530_v59 = vld [vmem:[%s29087_s5 + $0x4a8] ss:$16 sps:$4 sm:$0xff]   ;;  %v21541_v30 = vld [vmem:[%s29087_s5 + $0x4e4] ss:$16 sps:$4 sm:$0xff]   ;;  %v21569_v2 = vld [vmem:[%s29087_s5 + $0x580] ss:$16 sps:$4 sm:$0xff]  }
 0x39d   :  { %v2451_v22 = vsel %vm2445_vm3, %v2449_v25, %v29103_v44  ;;  %v24985_v25 = vld [vmem:[#allocation2 + $0x17a] sm:$0xff] }
 0x39e   :  { %6239 = vmatpush1.bf16.msra.mxu0 %v21515_v51  ;;  %v21536_v51 = vld [vmem:[%s29087_s5 + $0x4c8] ss:$16 sps:$4 sm:$0xff]   ;;  %v21587_v44 = vld [vmem:[%s29087_s5 + $0x5e0] ss:$16 sps:$4 sm:$0xff]  }
 0x39f   :  { %6788 = vmatpush1.bf16.msra.mxu1 %v21518_v40  ;;  %6240 = vmatprep.subr.bf16.mxu0 %v21523_v15  ;;  %v21544_v15 = vld [vmem:[%s29087_s5 + $0x4ec] ss:$16 sps:$4 sm:$0xff]  }
 0x3a0   :  { %6789 = vmatprep.subr.bf16.mxu1 %v21526_v14  ;;  %v21539_v14 = vld [vmem:[%s29087_s5 + $0x4e0] ss:$16 sps:$4 sm:$0xff]  }
 0x3a1   :  { %6224 = vmatmul.mubr.bf16.gmra.mrb[124].mxu0 %v2429_v8  ;;  %6773 = vmatmul.mubr.bf16.gmra.mrb[36].mxu1 %v2429_v8  ;;  %v21550_v8 = vld [vmem:[%s29087_s5 + $0x50c] ss:$16 sps:$4 sm:$0xff]  }
 0x3a2   :  { %6241 = vmatpush1.bf16.msra.mxu0 %v21521_v32  ;;  %6264 = vmatprep.mubr.bf16.mxu0 %v2451_v22  ;;  %v21542_v32 = vld [vmem:[%s29087_s5 + $0x4e8] ss:$16 sps:$4 sm:$0xff]  }
 0x3a3   :  { %6790 = vmatpush1.bf16.msra.mxu1 %v21524_v52  ;;  %6813 = vmatprep.mubr.bf16.mxu1 %v2451_v22  ;;  %v21547_v52 = vld [vmem:[%s29087_s5 + $0x504] ss:$16 sps:$4 sm:$0xff]   ;;  %v24991_v22 = vld [vmem:[#allocation2 + $0x179] sm:$0xff]  ;;  %v25027_v40 = vld [vmem:[#allocation2 + $0x189] sm:$0xff] }
 0x3a4   :  { %6242 = vmatprep.subr.bf16.mxu0 %v21529_v60  ;;  %6791 = vmatprep.subr.bf16.mxu1 %v21532_v43  ;;  %v24987_v60 = vld [vmem:[#allocation2 + $0x182] sm:$0xff]  ;;  %v24989_v43 = vld [vmem:[#allocation2 + $0x171] sm:$0xff] }
 0x3a6   :  { %6243 = vmatpush1.bf16.msra.mxu0 %v21527_v31  ;;  %v25063_v31 = vld [vmem:[#allocation2 + $0x199] sm:$0xff] }
 0x3a7   :  { %6792 = vmatpush1.bf16.msra.mxu1 %v21530_v59  ;;  %6244 = vmatprep.subr.bf16.mxu0 %v21535_v62  ;;  %v21545_v62 = vld [vmem:[%s29087_s5 + $0x500] ss:$16 sps:$4 sm:$0xff]   ;;  %v21559_v59 = vld [vmem:[%s29087_s5 + $0x544] ss:$16 sps:$4 sm:$0xff]  }
 0x3a8   :  { %6793 = vmatprep.subr.bf16.mxu1 %v21538_v19  ;;  %v21548_v19 = vld [vmem:[%s29087_s5 + $0x508] ss:$16 sps:$4 sm:$0xff]  }
 0x3aa   :  { %6245 = vmatpush1.bf16.msra.mxu0 %v21533_v20  ;;  %v21553_v20 = vld [vmem:[%s29087_s5 + $0x524] ss:$16 sps:$4 sm:$0xff]  }
 0x3ab   :  { %6794 = vmatpush1.bf16.msra.mxu1 %v21536_v51  ;;  %6246 = vmatprep.subr.bf16.mxu0 %v21541_v30  ;;  %v21556_v51 = vld [vmem:[%s29087_s5 + $0x52c] ss:$16 sps:$4 sm:$0xff]   ;;  %v21551_v30 = vld [vmem:[%s29087_s5 + $0x520] ss:$16 sps:$4 sm:$0xff]  }
 0x3ac   :  { %6795 = vmatprep.subr.bf16.mxu1 %v21544_v15  ;;  %v21554_v15 = vld [vmem:[%s29087_s5 + $0x528] ss:$16 sps:$4 sm:$0xff]  }
 0x3ae   :  { %6247 = vmatpush1.bf16.msra.mxu0 %v21539_v14  ;;  %v21562_v14 = vld [vmem:[%s29087_s5 + $0x54c] ss:$16 sps:$4 sm:$0xff]  }
 0x3af   :  { %6796 = vmatpush1.bf16.msra.mxu1 %v21542_v32  ;;  %6248 = vmatprep.subr.bf16.mxu0 %v21547_v52  ;;  %v25021_v32 = vld [vmem:[#allocation2 + $0x18a] sm:$0xff]  ;;  %v25023_v52 = vld [vmem:[#allocation2 + $0x192] sm:$0xff] }
 0x3b0   :  { %6797 = vmatprep.subr.bf16.mxu1 %v21550_v8  ;;  %v25025_v8 = vld [vmem:[#allocation2 + $0x181] sm:$0xff] }
 0x3b2   :  { %6249 = vmatpush1.bf16.msra.mxu0 %v21545_v62  ;;  %v21563_v62 = vld [vmem:[%s29087_s5 + $0x560] ss:$16 sps:$4 sm:$0xff]  }
 0x3b3   :  { %6798 = vmatpush1.bf16.msra.mxu1 %v21548_v19  ;;  %6250 = vmatprep.subr.bf16.mxu0 %v21553_v20  ;;  %v21560_v19 = vld [vmem:[%s29087_s5 + $0x548] ss:$16 sps:$4 sm:$0xff]   ;;  %v21565_v20 = vld [vmem:[%s29087_s5 + $0x564] ss:$16 sps:$4 sm:$0xff]  }
 0x3b4   :  { %6799 = vmatprep.subr.bf16.mxu1 %v21556_v51  ;;  %v21568_v51 = vld [vmem:[%s29087_s5 + $0x56c] ss:$16 sps:$4 sm:$0xff]  }
 0x3b6   :  { %6251 = vmatpush1.bf16.msra.mxu0 %v21551_v30  ;;  %v21574_v30 = vld [vmem:[%s29087_s5 + $0x58c] ss:$16 sps:$4 sm:$0xff]  }
 0x3b7   :  { %6800 = vmatpush1.bf16.msra.mxu1 %v21554_v15  ;;  %6252 = vmatprep.subr.bf16.mxu0 %v21559_v59  ;;  %v25057_v15 = vld [vmem:[#allocation2 + $0x19a] sm:$0xff]  ;;  %v25059_v59 = vld [vmem:[#allocation2 + $0x1a2] sm:$0xff] }
 0x3b8   :  { %6801 = vmatprep.subr.bf16.mxu1 %v21562_v14  ;;  %v25061_v14 = vld [vmem:[#allocation2 + $0x191] sm:$0xff] }
 0x3ba   :  { %6253 = vmatpush1.bf16.msra.mxu0 %v21557_v27  ;;  %v21575_v27 = vld [vmem:[%s29087_s5 + $0x5a0] ss:$16 sps:$4 sm:$0xff]  }
 0x3bb   :  { %6802 = vmatpush1.bf16.msra.mxu1 %v21560_v19  ;;  %6254 = vmatprep.subr.bf16.mxu0 %v21565_v20  ;;  %v21572_v19 = vld [vmem:[%s29087_s5 + $0x588] ss:$16 sps:$4 sm:$0xff]   ;;  %v21577_v20 = vld [vmem:[%s29087_s5 + $0x5a4] ss:$16 sps:$4 sm:$0xff]  }
 0x3bc   :  { %6803 = vmatprep.subr.bf16.mxu1 %v21568_v51  ;;  %v21580_v51 = vld [vmem:[%s29087_s5 + $0x5ac] ss:$16 sps:$4 sm:$0xff]  }
 0x3be   :  { %6255 = vmatpush1.bf16.msra.mxu0 %v21563_v62  ;;  %v21581_v62 = vld [vmem:[%s29087_s5 + $0x5c0] ss:$16 sps:$4 sm:$0xff]  }
 0x3bf   :  { %6804 = vmatpush1.bf16.msra.mxu1 %v21566_v3  ;;  %6256 = vmatprep.subr.bf16.mxu0 %v21571_v12  ;;  %v21583_v3 = vld [vmem:[%s29087_s5 + $0x5c4] ss:$16 sps:$4 sm:$0xff]   ;;  %v21586_v12 = vld [vmem:[%s29087_s5 + $0x5cc] ss:$16 sps:$4 sm:$0xff]  }
 0x3c0   :  { %6805 = vmatprep.subr.bf16.mxu1 %v21574_v30  ;;  %v21584_v30 = vld [vmem:[%s29087_s5 + $0x5c8] ss:$16 sps:$4 sm:$0xff]  }
 0x3c2   :  { %6257 = vmatpush1.bf16.msra.mxu0 %v21569_v2  ;;  %v2337_v2 = vld [vmem:[#allocation3 + $0x48] sm:$0x7] }
 0x3c3   :  { %6806 = vmatpush1.bf16.msra.mxu1 %v21572_v19  ;;  %6258 = vmatprep.subr.bf16.mxu0 %v21577_v20  ;;  %v21589_v19 = vld [vmem:[%s29087_s5 + $0x5e4] ss:$16 sps:$4 sm:$0xff]   ;;  %v21592_v20 = vld [vmem:[%s29087_s5 + $0x5ec] ss:$16 sps:$4 sm:$0xff]   ;;  %v2341_v61 = vpack.c.bf16 %v2337_v2, %v2337_v2 }
 0x3c4   :  { %6807 = vmatprep.subr.bf16.mxu1 %v21580_v51  ;;  %v23564_v51 = vld [vmem:[#allocation3 + $0x10] sm:$0xff] }
 0x3c5   :  { %v2338_v58 = vpack.c.bf16 %v23564_v51, %v2334_v29  ;;  %v21598_v29 = vld [vmem:[%s29087_s5 + $0x60c] ss:$16 sps:$4 sm:$0xff]   ;;  %v2454_v2 = vrot.slane %v2341_v61, 1 }
 0x3c6   :  { %6259 = vmatpush1.bf16.msra.mxu0 %v21575_v27  ;;  %v21590_v27 = vld [vmem:[%s29087_s5 + $0x5e8] ss:$16 sps:$4 sm:$0xff]  }
 0x3c7   :  { %6808 = vmatpush1.bf16.msra.mxu1 %v21578_v39  ;;  %6260 = vmatprep.subr.bf16.mxu0 %v21583_v3  ;;  %v2447_v39 = vrot.slane %v24560_v10, 1  ;;  %v2446_v3 = vrot.slane %v2338_v58, 1  ;;  %v21604_v58 = vld [vmem:[%s29087_s5 + $0x62c] ss:$16 sps:$4 sm:$0xff]  }
 0x3c8   :  { %6809 = vmatprep.subr.bf16.mxu1 %v21586_v12  ;;  %v21593_v12 = vld [vmem:[%s29087_s5 + $0x600] ss:$16 sps:$4 sm:$0xff]  }
 0x3ca   :  { %6261 = vmatpush1.bf16.msra.mxu0 %v21581_v62  ;;  %v2336_v62 = vld [vmem:[#allocation3 + $0x40] sm:$0x7] }
 0x3cb   :  { %6810 = vmatpush1.bf16.msra.mxu1 %v21584_v30  ;;  %6262 = vmatprep.subr.bf16.mxu0 %v21589_v19  ;;  %v21596_v30 = vld [vmem:[%s29087_s5 + $0x608] ss:$16 sps:$4 sm:$0xff]   ;;  %v21601_v19 = vld [vmem:[%s29087_s5 + $0x624] ss:$16 sps:$4 sm:$0xff]   ;;  %v2340_v61 = vpack.c.bf16 %v2336_v62, %v2336_v62  ;;  %v21610_v62 = vld [vmem:[%s29087_s5 + $0x64c] ss:$16 sps:$4 sm:$0xff]  }
 0x3cc   :  { %6811 = vmatprep.subr.bf16.mxu1 %v21592_v20  ;;  %v2448_v20 = vsel %vm2445_vm3, %v2446_v3, %v2447_v39 }
 0x3cd   :  { %v2452_v3 = vrot.slane %v2340_v61, 1  ;;  %v21614_v61 = vld [vmem:[%s29087_s5 + $0x668] ss:$16 sps:$4 sm:$0xff]  }
 0x3ce   :  { %6263 = vmatpush1.bf16.msra.mxu0 %v21587_v44  ;;  %v29140_v44 = vrot.slane %v24551_v11, 1 }
 0x3cf   :  { %6812 = vmatpush1.bf16.msra.mxu1 %v21590_v27  ;;  %6293 = vmatprep.subr.bf16.mxu0 %v21595_v4  ;;  %v21599_v27 = vld [vmem:[%s29087_s5 + $0x620] ss:$16 sps:$4 sm:$0xff]   ;;  %v21602_v4 = vld [vmem:[%s29087_s5 + $0x628] ss:$16 sps:$4 sm:$0xff]  }
 0x3d0   :  { %6842 = vmatprep.subr.bf16.mxu1 %v21598_v29  ;;  %v2455_v51 = vsel %vm2445_vm3, %v29140_v44, %v2454_v2  ;;  %v21607_v29 = vld [vmem:[%s29087_s5 + $0x644] ss:$16 sps:$4 sm:$0xff]  }
 0x3d1   :  { %6265 = vmatmul.mubr.bf16.vlgmr.msra.gmra.mrb[116].mxu0 %v2448_v20  ;;  %v21613_v44 = vld [vmem:[%s29087_s5 + $0x664] ss:$16 sps:$4 sm:$0xff]  }
 0x3d2   :  { %6814 = vmatmul.mubr.bf16.vlgmr.msra.gmra.mrb[28].mxu1 %v2448_v20  ;;  %6274 = vmatprep.mubr.bf16.mxu0 %v2455_v51  ;;  %v21608_v20 = vld [vmem:[%s29087_s5 + $0x648] ss:$16 sps:$4 sm:$0xff]  }
 0x3d3   :  { %6294 = vmatpush1.bf16.msra.mxu0 %v21593_v12  ;;  %6823 = vmatprep.mubr.bf16.mxu1 %v2455_v51  ;;  %v21605_v12 = vld [vmem:[%s29087_s5 + $0x640] ss:$16 sps:$4 sm:$0xff]   ;;  %v21622_v51 = vld [vmem:[%s29087_s5 + $0x68c] ss:$16 sps:$4 sm:$0xff]  }
 0x3d4   :  { %6843 = vmatpush1.bf16.msra.mxu1 %v21596_v30  ;;  %6295 = vmatprep.subr.bf16.mxu0 %v21601_v19  ;;  %v21616_v30 = vld [vmem:[%s29087_s5 + $0x66c] ss:$16 sps:$4 sm:$0xff]   ;;  %v2453_v19 = vsel %vm2445_vm3, %v2447_v39, %v2452_v3  ;;  %v21619_v39 = vld [vmem:[%s29087_s5 + $0x684] ss:$16 sps:$4 sm:$0xff]  }
 0x3d5   :  { %6844 = vmatprep.subr.bf16.mxu1 %v21604_v58  ;;  %v21611_v58 = vld [vmem:[%s29087_s5 + $0x660] ss:$16 sps:$4 sm:$0xff]  }
 0x3d7   :  { %6296 = vmatpush1.bf16.msra.mxu0 %v21599_v27  ;;  %v21620_v27 = vld [vmem:[%s29087_s5 + $0x688] ss:$16 sps:$4 sm:$0xff]  }
 0x3d8   :  { %6845 = vmatpush1.bf16.msra.mxu1 %v21602_v4  ;;  %6297 = vmatprep.subr.bf16.mxu0 %v21607_v29  ;;  %v21625_v4 = vld [vmem:[%s29087_s5 + $0x6a4] ss:$16 sps:$4 sm:$0xff]   ;;  %v21628_v29 = vld [vmem:[%s29087_s5 + $0x6ac] ss:$16 sps:$4 sm:$0xff]  }
 0x3d9   :  { %6275 = vmatmul.mubr.bf16.gmra.mrb[120].mxu0 %v2453_v19  ;;  %6846 = vmatprep.subr.bf16.mxu1 %v21610_v62  ;;  %v21623_v62 = vld [vmem:[%s29087_s5 + $0x6a0] ss:$16 sps:$4 sm:$0xff]  }
 0x3da   :  { %6824 = vmatmul.mubr.bf16.gmra.mrb[32].mxu1 %v2453_v19  ;;  %6284 = vmatprep.mubr.bf16.mxu0 %v2454_v2  ;;  %v21640_v19 = vld [vmem:[%s29087_s5 + $0x6ec] ss:$16 sps:$4 sm:$0xff]  }
 0x3db   :  { %6298 = vmatpush1.bf16.msra.mxu0 %v21605_v12  ;;  %6833 = vmatprep.mubr.bf16.mxu1 %v2454_v2  ;;  %v21617_v2 = vld [vmem:[%s29087_s5 + $0x680] ss:$16 sps:$4 sm:$0xff]   ;;  %v21626_v12 = vld [vmem:[%s29087_s5 + $0x6a8] ss:$16 sps:$4 sm:$0xff]  }
 0x3dc   :  { %6847 = vmatpush1.bf16.msra.mxu1 %v21608_v20  ;;  %6299 = vmatprep.subr.bf16.mxu0 %v21613_v44  ;;  %v21631_v20 = vld [vmem:[%s29087_s5 + $0x6c4] ss:$16 sps:$4 sm:$0xff]   ;;  %v21632_v44 = vld [vmem:[%s29087_s5 + $0x6c8] ss:$16 sps:$4 sm:$0xff]  }
 0x3dd   :  { %6848 = vmatprep.subr.bf16.mxu1 %v21616_v30  ;;  %v21637_v30 = vld [vmem:[%s29087_s5 + $0x6e4] ss:$16 sps:$4 sm:$0xff]  }
 0x3df   :  { %6300 = vmatpush1.bf16.msra.mxu0 %v21611_v58  ;;  %v21635_v58 = vld [vmem:[%s29087_s5 + $0x6e0] ss:$16 sps:$4 sm:$0xff]  }
 0x3e0   :  { %6849 = vmatpush1.bf16.msra.mxu1 %v21614_v61  ;;  %6301 = vmatprep.subr.bf16.mxu0 %v21619_v39  ;;  %v21638_v61 = vld [vmem:[%s29087_s5 + $0x6e8] ss:$16 sps:$4 sm:$0xff]   ;;  %v21643_v39 = vld [vmem:[%s29087_s5 + $0x704] ss:$16 sps:$4 sm:$0xff]  }
 0x3e1   :  { %6285 = vmatmul.mubr.bf16.gmra.mrb[124].mxu0 %v2452_v3  ;;  %6850 = vmatprep.subr.bf16.mxu1 %v21622_v51  ;;  %v21646_v51 = vld [vmem:[%s29087_s5 + $0x70c] ss:$16 sps:$4 sm:$0xff]  }
 0x3e2   :  { %6834 = vmatmul.mubr.bf16.gmra.mrb[36].mxu1 %v2452_v3  ;;  %6325 = vmatprep.mubr.bf16.mxu0 %v24677_v37  ;;  %v21634_v3 = vld [vmem:[%s29087_s5 + $0x6cc] ss:$16 sps:$4 sm:$0xff]  }
 0x3e3   :  { %6302 = vmatpush1.bf16.msra.mxu0 %v21617_v2  ;;  %6874 = vmatprep.mubr.bf16.mxu1 %v24677_v37  ;;  %v21629_v37 = vld [vmem:[%s29087_s5 + $0x6c0] ss:$16 sps:$4 sm:$0xff]  }
 0x3e4   :  { %6851 = vmatpush1.bf16.msra.mxu1 %v21620_v27  ;;  %6303 = vmatprep.subr.bf16.mxu0 %v21625_v4  ;;  %v21641_v2 = vld [vmem:[%s29087_s5 + $0x700] ss:$16 sps:$4 sm:$0xff]   ;;  %v21644_v27 = vld [vmem:[%s29087_s5 + $0x708] ss:$16 sps:$4 sm:$0xff]   ;;  %v21649_v4 = vld [vmem:[%s29087_s5 + $0x724] ss:$16 sps:$4 sm:$0xff]  }
 0x3e5   :  { %6852 = vmatprep.subr.bf16.mxu1 %v21628_v29  ;;  %v21652_v29 = vld [vmem:[%s29087_s5 + $0x72c] ss:$16 sps:$4 sm:$0xff]  }
 0x3e7   :  { %6304 = vmatpush1.bf16.msra.mxu0 %v21623_v62  ;;  %v21647_v62 = vld [vmem:[%s29087_s5 + $0x720] ss:$16 sps:$4 sm:$0xff]  }
 0x3e8   :  { %6853 = vmatpush1.bf16.msra.mxu1 %v21626_v12  ;;  %6305 = vmatprep.subr.bf16.mxu0 %v21631_v20  ;;  %v21650_v12 = vld [vmem:[%s29087_s5 + $0x728] ss:$16 sps:$4 sm:$0xff]   ;;  %v21655_v20 = vld [vmem:[%s29087_s5 + $0x744] ss:$16 sps:$4 sm:$0xff]  }
 0x3e9   :  { %6854 = vmatprep.subr.bf16.mxu1 %v21634_v3  ;;  %v21658_v3 = vld [vmem:[%s29087_s5 + $0x74c] ss:$16 sps:$4 sm:$0xff]  }
 0x3eb   :  { %6306 = vmatpush1.bf16.msra.mxu0 %v21629_v37  ;;  %v21653_v37 = vld [vmem:[%s29087_s5 + $0x740] ss:$16 sps:$4 sm:$0xff]  }
 0x3ec   :  { %6855 = vmatpush1.bf16.msra.mxu1 %v21632_v44  ;;  %6307 = vmatprep.subr.bf16.mxu0 %v21637_v30  ;;  %v21656_v44 = vld [vmem:[%s29087_s5 + $0x748] ss:$16 sps:$4 sm:$0xff]   ;;  %v21661_v30 = vld [vmem:[%s29087_s5 + $0x764] ss:$16 sps:$4 sm:$0xff]  }
 0x3ed   :  { %6856 = vmatprep.subr.bf16.mxu1 %v21640_v19  ;;  %v21664_v19 = vld [vmem:[%s29087_s5 + $0x76c] ss:$16 sps:$4 sm:$0xff]  }
 0x3ef   :  { %6308 = vmatpush1.bf16.msra.mxu0 %v21635_v58  ;;  %v21659_v58 = vld [vmem:[%s29087_s5 + $0x760] ss:$16 sps:$4 sm:$0xff]  }
 0x3f0   :  { %6857 = vmatpush1.bf16.msra.mxu1 %v21638_v61  ;;  %6309 = vmatprep.subr.bf16.mxu0 %v21643_v39  ;;  %v21662_v61 = vld [vmem:[%s29087_s5 + $0x768] ss:$16 sps:$4 sm:$0xff]   ;;  %v21667_v39 = vld [vmem:[%s29087_s5 + $0x784] ss:$16 sps:$4 sm:$0xff]  }
 0x3f1   :  { %6858 = vmatprep.subr.bf16.mxu1 %v21646_v51  ;;  %v21670_v51 = vld [vmem:[%s29087_s5 + $0x78c] ss:$16 sps:$4 sm:$0xff]  }
 0x3f3   :  { %6310 = vmatpush1.bf16.msra.mxu0 %v21641_v2  ;;  %v21665_v2 = vld [vmem:[%s29087_s5 + $0x780] ss:$16 sps:$4 sm:$0xff]  }
 0x3f4   :  { %6859 = vmatpush1.bf16.msra.mxu1 %v21644_v27  ;;  %6311 = vmatprep.subr.bf16.mxu0 %v21649_v4  ;;  %v21668_v27 = vld [vmem:[%s29087_s5 + $0x788] ss:$16 sps:$4 sm:$0xff]   ;;  %v21673_v4 = vld [vmem:[%s29087_s5 + $0x7a4] ss:$16 sps:$4 sm:$0xff]  }
 0x3f5   :  { %6860 = vmatprep.subr.bf16.mxu1 %v21652_v29  ;;  %v21676_v29 = vld [vmem:[%s29087_s5 + $0x7ac] ss:$16 sps:$4 sm:$0xff]  }
 0x3f7   :  { %6312 = vmatpush1.bf16.msra.mxu0 %v21647_v62  ;;  %v23565_v62 = vld [vmem:[#allocation3 + $0x48] sm:$0xff] }
 0x3f8   :  { %6861 = vmatpush1.bf16.msra.mxu1 %v21650_v12  ;;  %6313 = vmatprep.subr.bf16.mxu0 %v21655_v20  ;;  %v2349_v12 = vpack.c.bf16 %v23565_v62, %v23565_v62  ;;  %v21671_v20 = vld [vmem:[%s29087_s5 + $0x7a0] ss:$16 sps:$4 sm:$0xff]  }
 0x3f9   :  { %6862 = vmatprep.subr.bf16.mxu1 %v21658_v3  ;;  %v21674_v3 = vld [vmem:[%s29087_s5 + $0x7a8] ss:$16 sps:$4 sm:$0xff]   ;;  %v21683_v62 = vld [vmem:[%s29087_s5 + $0x7e0] ss:$16 sps:$4 sm:$0xff]  }
 0x3fb   :  { %6314 = vmatpush1.bf16.msra.mxu0 %v21653_v37  ;;  %v21679_v37 = vld [vmem:[%s29087_s5 + $0x7c4] ss:$16 sps:$4 sm:$0xff]  }
 0x3fc   :  { %6863 = vmatpush1.bf16.msra.mxu1 %v21656_v44  ;;  %6315 = vmatprep.subr.bf16.mxu0 %v21661_v30  ;;  %v21682_v44 = vld [vmem:[%s29087_s5 + $0x7cc] ss:$16 sps:$4 sm:$0xff]   ;;  %v2497_v30 = vshrl.u32 %v2349_v12, 16 }
 0x3fd   :  { %6864 = vmatprep.subr.bf16.mxu1 %v21664_v19  ;;  %v2500_v19 = vshll.u32 %v2349_v12, 16  ;;  %v21686_v12 = vld [vmem:[%s29087_s5 + $0x7e8] ss:$16 sps:$4 sm:$0xff]  }
 0x3ff   :  { %6316 = vmatpush1.bf16.msra.mxu0 %v21659_v58  ;;  %v21677_v58 = vld [vmem:[%s29087_s5 + $0x7c0] ss:$16 sps:$4 sm:$0xff]  }
 0x400   :  { %6865 = vmatpush1.bf16.msra.mxu1 %v21662_v61  ;;  %6317 = vmatprep.subr.bf16.mxu0 %v21667_v39  ;;  %v21680_v61 = vld [vmem:[%s29087_s5 + $0x7c8] ss:$16 sps:$4 sm:$0xff]   ;;  %v21685_v39 = vld [vmem:[%s29087_s5 + $0x7e4] ss:$16 sps:$4 sm:$0xff]  }
 0x401   :  { %6866 = vmatprep.subr.bf16.mxu1 %v21670_v51  ;;  %v21688_v51 = vld [vmem:[%s29087_s5 + $0x7ec] ss:$16 sps:$4 sm:$0xff]  }
 0x403   :  { %6318 = vmatpush1.bf16.msra.mxu0 %v21665_v2  ;;  %v23566_v2 = vld [vmem:[#allocation3 + $0x40] sm:$0xff] }
 0x404   :  { %6867 = vmatpush1.bf16.msra.mxu1 %v21668_v27  ;;  %6319 = vmatprep.subr.bf16.mxu0 %v21673_v4  ;;  %v2348_v27 = vpack.c.bf16 %v23566_v2, %v23566_v2  ;;  %v2499_v4 = vrot.slane %v2497_v30, 3 }
 0x405   :  { %6868 = vmatprep.subr.bf16.mxu1 %v21676_v29  ;;  %v2502_v29 = vrot.slane %v2500_v19, 4  ;;  %v21689_v19 = vld [vmem:[%s29087_s5 + $0x800] ss:$16 sps:$4 sm:$0xff]  }
 0x407   :  { %6320 = vmatpush1.bf16.msra.mxu0 %v21671_v20  ;;  %v21691_v20 = vld [vmem:[%s29087_s5 + $0x804] ss:$16 sps:$4 sm:$0xff]   ;;  %v2503_v30 = vor.u32 %v2502_v29, %v2499_v4  ;;  %v21695_v29 = vld [vmem:[%s29087_s5 + $0x820] ss:$16 sps:$4 sm:$0xff]  }
 0x408   :  { %6869 = vmatpush1.bf16.msra.mxu1 %v21674_v3  ;;  %6321 = vmatprep.subr.bf16.mxu0 %v21679_v37  ;;  %v21694_v3 = vld [vmem:[%s29087_s5 + $0x80c] ss:$16 sps:$4 sm:$0xff]   ;;  %v2488_v37 = vshrl.u32 %v2348_v27, 16 }
 0x409   :  { %6870 = vmatprep.subr.bf16.mxu1 %v21682_v44  ;;  %v2491_v44 = vshll.u32 %v2348_v27, 16  ;;  %v2504_v2 = vsel %vm2462_vm2, %v24652_v26, %v2503_v30  ;;  %v21700_v27 = vld [vmem:[%s29087_s5 + $0x82c] ss:$16 sps:$4 sm:$0xff]  }
 0x40a   :  { %v21712_v30 = vld [vmem:[%s29087_s5 + $0x86c] ss:$16 sps:$4 sm:$0xff]  }
 0x40b   :  { %6322 = vmatpush1.bf16.msra.mxu0 %v21677_v58  ;;  %v21692_v58 = vld [vmem:[%s29087_s5 + $0x808] ss:$16 sps:$4 sm:$0xff]  }
 0x40c   :  { %6871 = vmatpush1.bf16.msra.mxu1 %v21680_v61  ;;  %6323 = vmatprep.subr.bf16.mxu0 %v21685_v39  ;;  %v21697_v61 = vld [vmem:[%s29087_s5 + $0x824] ss:$16 sps:$4 sm:$0xff]   ;;  %v2490_v39 = vrot.slane %v2488_v37, 3  ;;  %v21704_v37 = vld [vmem:[%s29087_s5 + $0x848] ss:$16 sps:$4 sm:$0xff]  }
 0x40d   :  { %6872 = vmatprep.subr.bf16.mxu1 %v21688_v51  ;;  %v2493_v51 = vrot.slane %v2491_v44, 4  ;;  %v21709_v44 = vld [vmem:[%s29087_s5 + $0x864] ss:$16 sps:$4 sm:$0xff]  }
 0x40f   :  { %6324 = vmatpush1.bf16.msra.mxu0 %v21683_v62  ;;  %v21698_v62 = vld [vmem:[%s29087_s5 + $0x828] ss:$16 sps:$4 sm:$0xff]   ;;  %v2494_v26 = vor.u32 %v2493_v51, %v2490_v39 }
 0x410   :  { %6873 = vmatpush1.bf16.msra.mxu1 %v21686_v12  ;;  %6354 = vmatprep.subr.bf16.mxu0 %v21691_v20  ;;  %v21703_v12 = vld [vmem:[%s29087_s5 + $0x844] ss:$16 sps:$4 sm:$0xff]   ;;  %v21701_v20 = vld [vmem:[%s29087_s5 + $0x840] ss:$16 sps:$4 sm:$0xff]   ;;  %v21716_v51 = vld [vmem:[%s29087_s5 + $0x888] ss:$16 sps:$4 sm:$0xff]  }
 0x411   :  { %6903 = vmatprep.subr.bf16.mxu1 %v21694_v3  ;;  %v2495_v3 = vsel %vm2462_vm2, %v24663_v34, %v2494_v26  ;;  %v21707_v34 = vld [vmem:[%s29087_s5 + $0x860] ss:$16 sps:$4 sm:$0xff]   ;;  %v21727_v26 = vld [vmem:[%s29087_s5 + $0x8c4] ss:$16 sps:$4 sm:$0xff]  }
 0x412   :  { %6326 = vmatmul.mubr.bf16.vlgmr.msra.gmra.mrb[116].mxu0 %v24682_v42 }
 0x413   :  { %6875 = vmatmul.mubr.bf16.vlgmr.msra.gmra.mrb[28].mxu1 %v24682_v42  ;;  %6335 = vmatprep.mubr.bf16.mxu0 %v2504_v2  ;;  %v21706_v42 = vld [vmem:[%s29087_s5 + $0x84c] ss:$16 sps:$4 sm:$0xff]  }
 0x414   :  { %6355 = vmatpush1.bf16.msra.mxu0 %v21689_v19  ;;  %6884 = vmatprep.mubr.bf16.mxu1 %v2504_v2  ;;  %v21710_v19 = vld [vmem:[%s29087_s5 + $0x868] ss:$16 sps:$4 sm:$0xff]   ;;  %v21721_v2 = vld [vmem:[%s29087_s5 + $0x8a4] ss:$16 sps:$4 sm:$0xff]  }
 0x415   :  { %6904 = vmatpush1.bf16.msra.mxu1 %v21692_v58  ;;  %6356 = vmatprep.subr.bf16.mxu0 %v21697_v61  ;;  %v21715_v58 = vld [vmem:[%s29087_s5 + $0x884] ss:$16 sps:$4 sm:$0xff]   ;;  %v21718_v61 = vld [vmem:[%s29087_s5 + $0x88c] ss:$16 sps:$4 sm:$0xff]  }
 0x416   :  { %6905 = vmatprep.subr.bf16.mxu1 %v21700_v27  ;;  %v21724_v27 = vld [vmem:[%s29087_s5 + $0x8ac] ss:$16 sps:$4 sm:$0xff]  }
 0x418   :  { %6357 = vmatpush1.bf16.msra.mxu0 %v21695_v29  ;;  %v21719_v29 = vld [vmem:[%s29087_s5 + $0x8a0] ss:$16 sps:$4 sm:$0xff]  }
 0x419   :  { %6906 = vmatpush1.bf16.msra.mxu1 %v21698_v62  ;;  %6358 = vmatprep.subr.bf16.mxu0 %v21703_v12  ;;  %v21722_v62 = vld [vmem:[%s29087_s5 + $0x8a8] ss:$16 sps:$4 sm:$0xff]  }
 0x41a   :  { %6336 = vmatmul.mubr.bf16.gmra.mrb[120].mxu0 %v2495_v3  ;;  %6907 = vmatprep.subr.bf16.mxu1 %v21706_v42  ;;  %v21728_v12 = vld [vmem:[%s29087_s5 + $0x8c8] ss:$16 sps:$4 sm:$0xff]   ;;  %v21733_v42 = vld [vmem:[%s29087_s5 + $0x8e4] ss:$16 sps:$4 sm:$0xff]  }
 0x41b   :  { %6885 = vmatmul.mubr.bf16.gmra.mrb[32].mxu1 %v2495_v3  ;;  %6345 = vmatprep.mubr.bf16.mxu0 %v2499_v4  ;;  %v21731_v3 = vld [vmem:[%s29087_s5 + $0x8e0] ss:$16 sps:$4 sm:$0xff]  }
 0x41c   :  { %6359 = vmatpush1.bf16.msra.mxu0 %v21701_v20  ;;  %6894 = vmatprep.mubr.bf16.mxu1 %v2499_v4  ;;  %v21713_v4 = vld [vmem:[%s29087_s5 + $0x880] ss:$16 sps:$4 sm:$0xff]   ;;  %v21736_v20 = vld [vmem:[%s29087_s5 + $0x8ec] ss:$16 sps:$4 sm:$0xff]  }
 0x41d   :  { %6908 = vmatpush1.bf16.msra.mxu1 %v21704_v37  ;;  %6360 = vmatprep.subr.bf16.mxu0 %v21709_v44  ;;  %v21734_v37 = vld [vmem:[%s29087_s5 + $0x8e8] ss:$16 sps:$4 sm:$0xff]   ;;  %v21739_v44 = vld [vmem:[%s29087_s5 + $0x904] ss:$16 sps:$4 sm:$0xff]  }
 0x41e   :  { %6909 = vmatprep.subr.bf16.mxu1 %v21712_v30  ;;  %v21742_v30 = vld [vmem:[%s29087_s5 + $0x90c] ss:$16 sps:$4 sm:$0xff]  }
 0x420   :  { %6361 = vmatpush1.bf16.msra.mxu0 %v21707_v34  ;;  %v21737_v34 = vld [vmem:[%s29087_s5 + $0x900] ss:$16 sps:$4 sm:$0xff]  }
 0x421   :  { %6910 = vmatpush1.bf16.msra.mxu1 %v21710_v19  ;;  %6362 = vmatprep.subr.bf16.mxu0 %v21715_v58  ;;  %v21740_v19 = vld [vmem:[%s29087_s5 + $0x908] ss:$16 sps:$4 sm:$0xff]   ;;  %v21745_v58 = vld [vmem:[%s29087_s5 + $0x924] ss:$16 sps:$4 sm:$0xff]  }
 0x422   :  { %6346 = vmatmul.mubr.bf16.gmra.mrb[124].mxu0 %v2490_v39  ;;  %6911 = vmatprep.subr.bf16.mxu1 %v21718_v61  ;;  %v21748_v61 = vld [vmem:[%s29087_s5 + $0x92c] ss:$16 sps:$4 sm:$0xff]  }
 0x423   :  { %6895 = vmatmul.mubr.bf16.gmra.mrb[36].mxu1 %v2490_v39  ;;  %6386 = vmatprep.mubr.bf16.mxu0 %v24514_v28  ;;  %v21730_v39 = vld [vmem:[%s29087_s5 + $0x8cc] ss:$16 sps:$4 sm:$0xff]  }
 0x424   :  { %6363 = vmatpush1.bf16.msra.mxu0 %v21713_v4  ;;  %6935 = vmatprep.mubr.bf16.mxu1 %v24514_v28  ;;  %v21725_v28 = vld [vmem:[%s29087_s5 + $0x8c0] ss:$16 sps:$4 sm:$0xff]  }
 0x425   :  { %6912 = vmatpush1.bf16.msra.mxu1 %v21716_v51  ;;  %6364 = vmatprep.subr.bf16.mxu0 %v21721_v2  ;;  %v21743_v4 = vld [vmem:[%s29087_s5 + $0x920] ss:$16 sps:$4 sm:$0xff]   ;;  %v21746_v51 = vld [vmem:[%s29087_s5 + $0x928] ss:$16 sps:$4 sm:$0xff]   ;;  %v21751_v2 = vld [vmem:[%s29087_s5 + $0x944] ss:$16 sps:$4 sm:$0xff]  }
 0x426   :  { %6913 = vmatprep.subr.bf16.mxu1 %v21724_v27  ;;  %v21754_v27 = vld [vmem:[%s29087_s5 + $0x94c] ss:$16 sps:$4 sm:$0xff]  }
 0x428   :  { %6365 = vmatpush1.bf16.msra.mxu0 %v21719_v29  ;;  %v21749_v29 = vld [vmem:[%s29087_s5 + $0x940] ss:$16 sps:$4 sm:$0xff]  }
 0x429   :  { %6914 = vmatpush1.bf16.msra.mxu1 %v21722_v62  ;;  %6366 = vmatprep.subr.bf16.mxu0 %v21727_v26  ;;  %v21752_v62 = vld [vmem:[%s29087_s5 + $0x948] ss:$16 sps:$4 sm:$0xff]   ;;  %v21757_v26 = vld [vmem:[%s29087_s5 + $0x964] ss:$16 sps:$4 sm:$0xff]  }
 0x42a   :  { %6915 = vmatprep.subr.bf16.mxu1 %v21730_v39  ;;  %v21760_v39 = vld [vmem:[%s29087_s5 + $0x96c] ss:$16 sps:$4 sm:$0xff]  }
 0x42c   :  { %6367 = vmatpush1.bf16.msra.mxu0 %v21725_v28  ;;  %v21755_v28 = vld [vmem:[%s29087_s5 + $0x960] ss:$16 sps:$4 sm:$0xff]  }
 0x42d   :  { %6916 = vmatpush1.bf16.msra.mxu1 %v21728_v12  ;;  %6368 = vmatprep.subr.bf16.mxu0 %v21733_v42  ;;  %v21758_v12 = vld [vmem:[%s29087_s5 + $0x968] ss:$16 sps:$4 sm:$0xff]   ;;  %v21763_v42 = vld [vmem:[%s29087_s5 + $0x984] ss:$16 sps:$4 sm:$0xff]  }
 0x42e   :  { %6917 = vmatprep.subr.bf16.mxu1 %v21736_v20  ;;  %v21766_v20 = vld [vmem:[%s29087_s5 + $0x98c] ss:$16 sps:$4 sm:$0xff]  }
 0x430   :  { %6369 = vmatpush1.bf16.msra.mxu0 %v21731_v3  ;;  %v21761_v3 = vld [vmem:[%s29087_s5 + $0x980] ss:$16 sps:$4 sm:$0xff]  }
 0x431   :  { %6918 = vmatpush1.bf16.msra.mxu1 %v21734_v37  ;;  %6370 = vmatprep.subr.bf16.mxu0 %v21739_v44  ;;  %v21764_v37 = vld [vmem:[%s29087_s5 + $0x988] ss:$16 sps:$4 sm:$0xff]   ;;  %v21769_v44 = vld [vmem:[%s29087_s5 + $0x9a4] ss:$16 sps:$4 sm:$0xff]  }
 0x432   :  { %6919 = vmatprep.subr.bf16.mxu1 %v21742_v30  ;;  %v21772_v30 = vld [vmem:[%s29087_s5 + $0x9ac] ss:$16 sps:$4 sm:$0xff]  }
 0x434   :  { %6371 = vmatpush1.bf16.msra.mxu0 %v21737_v34  ;;  %v21767_v34 = vld [vmem:[%s29087_s5 + $0x9a0] ss:$16 sps:$4 sm:$0xff]  }
 0x435   :  { %6920 = vmatpush1.bf16.msra.mxu1 %v21740_v19  ;;  %6372 = vmatprep.subr.bf16.mxu0 %v21745_v58  ;;  %v21770_v19 = vld [vmem:[%s29087_s5 + $0x9a8] ss:$16 sps:$4 sm:$0xff]   ;;  %v21775_v58 = vld [vmem:[%s29087_s5 + $0x9c4] ss:$16 sps:$4 sm:$0xff]  }
 0x436   :  { %6921 = vmatprep.subr.bf16.mxu1 %v21748_v61  ;;  %v21778_v61 = vld [vmem:[%s29087_s5 + $0x9cc] ss:$16 sps:$4 sm:$0xff]  }
 0x438   :  { %6373 = vmatpush1.bf16.msra.mxu0 %v21743_v4  ;;  %v21773_v4 = vld [vmem:[%s29087_s5 + $0x9c0] ss:$16 sps:$4 sm:$0xff]  }
 0x439   :  { %6922 = vmatpush1.bf16.msra.mxu1 %v21746_v51  ;;  %6374 = vmatprep.subr.bf16.mxu0 %v21751_v2  ;;  %v21776_v51 = vld [vmem:[%s29087_s5 + $0x9c8] ss:$16 sps:$4 sm:$0xff]   ;;  %v21781_v2 = vld [vmem:[%s29087_s5 + $0x9e4] ss:$16 sps:$4 sm:$0xff]  }
 0x43a   :  { %6923 = vmatprep.subr.bf16.mxu1 %v21754_v27  ;;  %v21784_v27 = vld [vmem:[%s29087_s5 + $0x9ec] ss:$16 sps:$4 sm:$0xff]  }
 0x43c   :  { %6375 = vmatpush1.bf16.msra.mxu0 %v21749_v29  ;;  %v21779_v29 = vld [vmem:[%s29087_s5 + $0x9e0] ss:$16 sps:$4 sm:$0xff]  }
 0x43d   :  { %6924 = vmatpush1.bf16.msra.mxu1 %v21752_v62  ;;  %6376 = vmatprep.subr.bf16.mxu0 %v21757_v26  ;;  %v21782_v62 = vld [vmem:[%s29087_s5 + $0x9e8] ss:$16 sps:$4 sm:$0xff]   ;;  %v21787_v26 = vld [vmem:[%s29087_s5 + $0xa04] ss:$16 sps:$4 sm:$0xff]  }
 0x43e   :  { %6925 = vmatprep.subr.bf16.mxu1 %v21760_v39  ;;  %v21790_v39 = vld [vmem:[%s29087_s5 + $0xa0c] ss:$16 sps:$4 sm:$0xff]  }
 0x440   :  { %6377 = vmatpush1.bf16.msra.mxu0 %v21755_v28  ;;  %v21785_v28 = vld [vmem:[%s29087_s5 + $0xa00] ss:$16 sps:$4 sm:$0xff]  }
 0x441   :  { %6926 = vmatpush1.bf16.msra.mxu1 %v21758_v12  ;;  %6378 = vmatprep.subr.bf16.mxu0 %v21763_v42  ;;  %v21788_v12 = vld [vmem:[%s29087_s5 + $0xa08] ss:$16 sps:$4 sm:$0xff]   ;;  %v21793_v42 = vld [vmem:[%s29087_s5 + $0xa24] ss:$16 sps:$4 sm:$0xff]  }
 0x442   :  { %6927 = vmatprep.subr.bf16.mxu1 %v21766_v20  ;;  %v21796_v20 = vld [vmem:[%s29087_s5 + $0xa2c] ss:$16 sps:$4 sm:$0xff]  }
 0x444   :  { %6379 = vmatpush1.bf16.msra.mxu0 %v21761_v3  ;;  %v2359_v3 = vld [vmem:[#allocation3 + $0x18] sm:$0xfe] }
 0x445   :  { %6928 = vmatpush1.bf16.msra.mxu1 %v21764_v37  ;;  %6380 = vmatprep.subr.bf16.mxu0 %v21769_v44  ;;  %v21791_v37 = vld [vmem:[%s29087_s5 + $0xa20] ss:$16 sps:$4 sm:$0xff]  }
 0x446   :  { %6929 = vmatprep.subr.bf16.mxu1 %v21772_v30  ;;  %v25542_v44 = vld [vmem:[#allocation3 + $0x28] sm:$0xff] }
 0x447   :  { %v2363_v30 = vpack.c.bf16 %v25542_v44, %v2359_v3  ;;  %v29141_v3 = vshll.u32 %v24650_v33, 16 }
 0x448   :  { %6381 = vmatpush1.bf16.msra.mxu0 %v21767_v34  ;;  %v21799_v34 = vld [vmem:[%s29087_s5 + $0xa44] ss:$16 sps:$4 sm:$0xff]  }
 0x449   :  { %6930 = vmatpush1.bf16.msra.mxu1 %v21770_v19  ;;  %6382 = vmatprep.subr.bf16.mxu0 %v21775_v58  ;;  %v21802_v19 = vld [vmem:[%s29087_s5 + $0xa4c] ss:$16 sps:$4 sm:$0xff]   ;;  %v2351_v58 = vld [vmem:[#allocation3 + $0x58] sm:$0x1] }
 0x44a   :  { %6931 = vmatprep.subr.bf16.mxu1 %v21778_v61  ;;  %v21797_v61 = vld [vmem:[%s29087_s5 + $0xa40] ss:$16 sps:$4 sm:$0xff]  }
 0x44c   :  { %6383 = vmatpush1.bf16.msra.mxu0 %v21773_v4  ;;  %v2526_v4 = vshll.u32 %v2363_v30, 16 }
 0x44d   :  { %6932 = vmatpush1.bf16.msra.mxu1 %v21776_v51  ;;  %6384 = vmatprep.subr.bf16.mxu0 %v21781_v2  ;;  %v21800_v51 = vld [vmem:[%s29087_s5 + $0xa48] ss:$16 sps:$4 sm:$0xff]   ;;  %v2357_v2 = vpack.c.bf16 %v2351_v58, %v2351_v58 }
 0x44e   :  { %6933 = vmatprep.subr.bf16.mxu1 %v21784_v27  ;;  %v21805_v27 = vld [vmem:[%s29087_s5 + $0xa64] ss:$16 sps:$4 sm:$0xff]   ;;  %v21812_v58 = vld [vmem:[%s29087_s5 + $0xa88] ss:$16 sps:$4 sm:$0xff]  }
 0x450   :  { %6385 = vmatpush1.bf16.msra.mxu0 %v21779_v29  ;;  %v21808_v29 = vld [vmem:[%s29087_s5 + $0xa6c] ss:$16 sps:$4 sm:$0xff]  }
 0x451   :  { %6934 = vmatpush1.bf16.msra.mxu1 %v21782_v62  ;;  %6415 = vmatprep.subr.bf16.mxu0 %v21787_v26  ;;  %v21803_v62 = vld [vmem:[%s29087_s5 + $0xa60] ss:$16 sps:$4 sm:$0xff]   ;;  %v2528_v26 = vrot.slane %v2526_v4, 1  ;;  %v21820_v4 = vld [vmem:[%s29087_s5 + $0xaac] ss:$16 sps:$4 sm:$0xff]  }
 0x452   :  { %6964 = vmatprep.subr.bf16.mxu1 %v21790_v39  ;;  %v21806_v39 = vld [vmem:[%s29087_s5 + $0xa68] ss:$16 sps:$4 sm:$0xff]  }
 0x453   :  { %6387 = vmatmul.mubr.bf16.vlgmr.msra.gmra.mrb[116].mxu0 %v24504_v53 }
 0x454   :  { %6936 = vmatmul.mubr.bf16.vlgmr.msra.gmra.mrb[28].mxu1 %v24504_v53  ;;  %6396 = vmatprep.mubr.bf16.mxu0 %v24650_v33  ;;  %v21794_v53 = vld [vmem:[%s29087_s5 + $0xa28] ss:$16 sps:$4 sm:$0xff]  }
 0x455   :  { %6416 = vmatpush1.bf16.msra.mxu0 %v21785_v28  ;;  %6945 = vmatprep.mubr.bf16.mxu1 %v24650_v33  ;;  %v2350_v28 = vld [vmem:[#allocation3 + $0x50] sm:$0x1] }
 0x456   :  { %6965 = vmatpush1.bf16.msra.mxu1 %v21788_v12  ;;  %6417 = vmatprep.subr.bf16.mxu0 %v21793_v42  ;;  %v21811_v12 = vld [vmem:[%s29087_s5 + $0xa84] ss:$16 sps:$4 sm:$0xff]   ;;  %v21814_v42 = vld [vmem:[%s29087_s5 + $0xa8c] ss:$16 sps:$4 sm:$0xff]  }
 0x457   :  { %6966 = vmatprep.subr.bf16.mxu1 %v21796_v20  ;;  %v2524_v20 = vshrl.u32 %v2363_v30, 16  ;;  %v21817_v30 = vld [vmem:[%s29087_s5 + $0xaa4] ss:$16 sps:$4 sm:$0xff]  }
 0x459   :  { %6418 = vmatpush1.bf16.msra.mxu0 %v21791_v37  ;;  %v25582_v37 = vrot.slane %v29141_v3, 1  ;;  %v21838_v3 = vld [vmem:[%s29087_s5 + $0xb0c] ss:$16 sps:$4 sm:$0xff]  }
 0x45a   :  { %6967 = vmatpush1.bf16.msra.mxu1 %v21794_v53  ;;  %6419 = vmatprep.subr.bf16.mxu0 %v21799_v34  ;;  %v2356_v53 = vpack.c.bf16 %v2350_v28, %v2350_v28  ;;  %v21809_v34 = vld [vmem:[%s29087_s5 + $0xa80] ss:$16 sps:$4 sm:$0xff]   ;;  %v21832_v28 = vld [vmem:[%s29087_s5 + $0xaec] ss:$16 sps:$4 sm:$0xff]  }
 0x45b   :  { %6397 = vmatmul.mubr.bf16.gmra.mrb[120].mxu0 %v24667_v38  ;;  %6968 = vmatprep.subr.bf16.mxu1 %v21802_v19  ;;  %v2529_v19 = vor.u32 %v2528_v26, %v2524_v20  ;;  %v21824_v26 = vld [vmem:[%s29087_s5 + $0xac8] ss:$16 sps:$4 sm:$0xff]   ;;  %v21835_v20 = vld [vmem:[%s29087_s5 + $0xb04] ss:$16 sps:$4 sm:$0xff]  }
 0x45c   :  { %6946 = vmatmul.mubr.bf16.gmra.mrb[32].mxu1 %v24667_v38  ;;  %6406 = vmatprep.mubr.bf16.mxu0 %v2357_v2 }
 0x45d   :  { %6420 = vmatpush1.bf16.msra.mxu0 %v21797_v61  ;;  %6955 = vmatprep.mubr.bf16.mxu1 %v2357_v2  ;;  %v2534_v61 = vsel %vm2388_vm1, %v2529_v19, %v25582_v37  ;;  %v21818_v2 = vld [vmem:[%s29087_s5 + $0xaa8] ss:$16 sps:$4 sm:$0xff]   ;;  %v21841_v19 = vld [vmem:[%s29087_s5 + $0xb24] ss:$16 sps:$4 sm:$0xff]  }
 0x45e   :  { %6969 = vmatpush1.bf16.msra.mxu1 %v21800_v51  ;;  %6421 = vmatprep.subr.bf16.mxu0 %v21805_v27  ;;  %v21815_v51 = vld [vmem:[%s29087_s5 + $0xaa0] ss:$16 sps:$4 sm:$0xff]   ;;  %v21823_v27 = vld [vmem:[%s29087_s5 + $0xac4] ss:$16 sps:$4 sm:$0xff]  }
 0x45f   :  { %6970 = vmatprep.subr.bf16.mxu1 %v21808_v29  ;;  %v21826_v29 = vld [vmem:[%s29087_s5 + $0xacc] ss:$16 sps:$4 sm:$0xff]  }
 0x461   :  { %6422 = vmatpush1.bf16.msra.mxu0 %v21803_v62  ;;  %v21821_v62 = vld [vmem:[%s29087_s5 + $0xac0] ss:$16 sps:$4 sm:$0xff]  }
 0x462   :  { %6971 = vmatpush1.bf16.msra.mxu1 %v21806_v39  ;;  %6423 = vmatprep.subr.bf16.mxu0 %v21811_v12  ;;  %v21829_v39 = vld [vmem:[%s29087_s5 + $0xae4] ss:$16 sps:$4 sm:$0xff]   ;;  %v21827_v12 = vld [vmem:[%s29087_s5 + $0xae0] ss:$16 sps:$4 sm:$0xff]  }
 0x463   :  { %6407 = vmatmul.mubr.bf16.gmra.mrb[124].mxu0 %v2356_v53  ;;  %6972 = vmatprep.subr.bf16.mxu1 %v21814_v42  ;;  %v21830_v42 = vld [vmem:[%s29087_s5 + $0xae8] ss:$16 sps:$4 sm:$0xff]  }
 0x464   :  { %6956 = vmatmul.mubr.bf16.gmra.mrb[36].mxu1 %v2356_v53  ;;  %6447 = vmatprep.mubr.bf16.mxu0 %v2534_v61  ;;  %v21833_v53 = vld [vmem:[%s29087_s5 + $0xb00] ss:$16 sps:$4 sm:$0xff]  }
 0x465   :  { %6424 = vmatpush1.bf16.msra.mxu0 %v21809_v34  ;;  %6996 = vmatprep.mubr.bf16.mxu1 %v2534_v61  ;;  %v21836_v34 = vld [vmem:[%s29087_s5 + $0xb08] ss:$16 sps:$4 sm:$0xff]  }
 0x466   :  { %6973 = vmatpush1.bf16.msra.mxu1 %v21812_v58  ;;  %6425 = vmatprep.subr.bf16.mxu0 %v21817_v30  ;;  %v21844_v58 = vld [vmem:[%s29087_s5 + $0xb2c] ss:$16 sps:$4 sm:$0xff]   ;;  %v21839_v30 = vld [vmem:[%s29087_s5 + $0xb20] ss:$16 sps:$4 sm:$0xff]   ;;  %v21842_v61 = vld [vmem:[%s29087_s5 + $0xb28] ss:$16 sps:$4 sm:$0xff]  }
 0x467   :  { %6974 = vmatprep.subr.bf16.mxu1 %v21820_v4  ;;  %v21847_v4 = vld [vmem:[%s29087_s5 + $0xb44] ss:$16 sps:$4 sm:$0xff]  }
 0x469   :  { %6426 = vmatpush1.bf16.msra.mxu0 %v21815_v51  ;;  %v21850_v51 = vld [vmem:[%s29087_s5 + $0xb4c] ss:$16 sps:$4 sm:$0xff]  }
 0x46a   :  { %6975 = vmatpush1.bf16.msra.mxu1 %v21818_v2  ;;  %6427 = vmatprep.subr.bf16.mxu0 %v21823_v27  ;;  %v21845_v2 = vld [vmem:[%s29087_s5 + $0xb40] ss:$16 sps:$4 sm:$0xff]   ;;  %v21848_v27 = vld [vmem:[%s29087_s5 + $0xb48] ss:$16 sps:$4 sm:$0xff]  }
 0x46b   :  { %6976 = vmatprep.subr.bf16.mxu1 %v21826_v29  ;;  %v21853_v29 = vld [vmem:[%s29087_s5 + $0xb64] ss:$16 sps:$4 sm:$0xff]  }
 0x46d   :  { %6428 = vmatpush1.bf16.msra.mxu0 %v21821_v62  ;;  %v21856_v62 = vld [vmem:[%s29087_s5 + $0xb6c] ss:$16 sps:$4 sm:$0xff]  }
 0x46e   :  { %6977 = vmatpush1.bf16.msra.mxu1 %v21824_v26  ;;  %6429 = vmatprep.subr.bf16.mxu0 %v21829_v39  ;;  %v21851_v26 = vld [vmem:[%s29087_s5 + $0xb60] ss:$16 sps:$4 sm:$0xff]   ;;  %v21854_v39 = vld [vmem:[%s29087_s5 + $0xb68] ss:$16 sps:$4 sm:$0xff]  }
 0x46f   :  { %6978 = vmatprep.subr.bf16.mxu1 %v21832_v28  ;;  %v21859_v28 = vld [vmem:[%s29087_s5 + $0xb84] ss:$16 sps:$4 sm:$0xff]  }
 0x471   :  { %6430 = vmatpush1.bf16.msra.mxu0 %v21827_v12  ;;  %v21862_v12 = vld [vmem:[%s29087_s5 + $0xb8c] ss:$16 sps:$4 sm:$0xff]  }
 0x472   :  { %6979 = vmatpush1.bf16.msra.mxu1 %v21830_v42  ;;  %6431 = vmatprep.subr.bf16.mxu0 %v21835_v20  ;;  %v21857_v42 = vld [vmem:[%s29087_s5 + $0xb80] ss:$16 sps:$4 sm:$0xff]   ;;  %v21860_v20 = vld [vmem:[%s29087_s5 + $0xb88] ss:$16 sps:$4 sm:$0xff]  }
 0x473   :  { %6980 = vmatprep.subr.bf16.mxu1 %v21838_v3  ;;  %v21865_v3 = vld [vmem:[%s29087_s5 + $0xba4] ss:$16 sps:$4 sm:$0xff]  }
 0x475   :  { %6432 = vmatpush1.bf16.msra.mxu0 %v21833_v53  ;;  %v21868_v53 = vld [vmem:[%s29087_s5 + $0xbac] ss:$16 sps:$4 sm:$0xff]  }
 0x476   :  { %6981 = vmatpush1.bf16.msra.mxu1 %v21836_v34  ;;  %6433 = vmatprep.subr.bf16.mxu0 %v21841_v19  ;;  %v2358_v34 = vld [vmem:[#allocation3 + $0x10] sm:$0xfe]  ;;  %v21863_v19 = vld [vmem:[%s29087_s5 + $0xba0] ss:$16 sps:$4 sm:$0xff]  }
 0x477   :  { %6982 = vmatprep.subr.bf16.mxu1 %v21844_v58  ;;  %v25697_v58 = vld [vmem:[#allocation3 + $0x20] sm:$0xff] }
 0x479   :  { %6434 = vmatpush1.bf16.msra.mxu0 %v21839_v30  ;;  %v2362_v30 = vpack.c.bf16 %v25697_v58, %v2358_v34  ;;  %v21883_v34 = vld [vmem:[%s29087_s5 + $0xc04] ss:$16 sps:$4 sm:$0xff]  }
 0x47a   :  { %6983 = vmatpush1.bf16.msra.mxu1 %v21842_v61  ;;  %6435 = vmatprep.subr.bf16.mxu0 %v21847_v4  ;;  %v2361_v61 = vld [vmem:[#allocation3 + $0x58] sm:$0x3]  ;;  %v21866_v4 = vld [vmem:[%s29087_s5 + $0xba8] ss:$16 sps:$4 sm:$0xff]  }
 0x47b   :  { %6984 = vmatprep.subr.bf16.mxu1 %v21850_v51  ;;  %v21871_v51 = vld [vmem:[%s29087_s5 + $0xbc4] ss:$16 sps:$4 sm:$0xff]  }
 0x47d   :  { %6436 = vmatpush1.bf16.msra.mxu0 %v21845_v2  ;;  %v21874_v2 = vld [vmem:[%s29087_s5 + $0xbcc] ss:$16 sps:$4 sm:$0xff]  }
 0x47e   :  { %6985 = vmatpush1.bf16.msra.mxu1 %v21848_v27  ;;  %6437 = vmatprep.subr.bf16.mxu0 %v21853_v29  ;;  %v25709_v27 = vpack.c.bf16 %v2361_v61, %v2361_v61  ;;  %v21869_v29 = vld [vmem:[%s29087_s5 + $0xbc0] ss:$16 sps:$4 sm:$0xff]   ;;  %v29142_v61 = vshll.u32 %v24667_v38, 16 }
 0x47f   :  { %6986 = vmatprep.subr.bf16.mxu1 %v21856_v62  ;;  %v2514_v62 = vshll.u32 %v2362_v30, 16 }
 0x481   :  { %6438 = vmatpush1.bf16.msra.mxu0 %v21851_v26  ;;  %v21872_v26 = vld [vmem:[%s29087_s5 + $0xbc8] ss:$16 sps:$4 sm:$0xff]  }
 0x482   :  { %6987 = vmatpush1.bf16.msra.mxu1 %v21854_v39  ;;  %6439 = vmatprep.subr.bf16.mxu0 %v21859_v28  ;;  %v21877_v39 = vld [vmem:[%s29087_s5 + $0xbe4] ss:$16 sps:$4 sm:$0xff]   ;;  %v21880_v28 = vld [vmem:[%s29087_s5 + $0xbec] ss:$16 sps:$4 sm:$0xff]  }
 0x483   :  { %6988 = vmatprep.subr.bf16.mxu1 %v21862_v12  ;;  %v2547_v12 = vshll.u32 %v25709_v27, 16 }
 0x485   :  { %6440 = vmatpush1.bf16.msra.mxu0 %v21857_v42  ;;  %v2360_v42 = vld [vmem:[#allocation3 + $0x50] sm:$0x3] }
 0x486   :  { %6989 = vmatpush1.bf16.msra.mxu1 %v21860_v20  ;;  %6441 = vmatprep.subr.bf16.mxu0 %v21865_v3  ;;  %v21875_v20 = vld [vmem:[%s29087_s5 + $0xbe0] ss:$16 sps:$4 sm:$0xff]   ;;  %v2516_v3 = vrot.slane %v2514_v62, 1 }
 0x487   :  { %6990 = vmatprep.subr.bf16.mxu1 %v21868_v53  ;;  %v21878_v53 = vld [vmem:[%s29087_s5 + $0xbe8] ss:$16 sps:$4 sm:$0xff]  }
 0x489   :  { %6442 = vmatpush1.bf16.msra.mxu0 %v21863_v19  ;;  %v2512_v19 = vshrl.u32 %v2362_v30, 16  ;;  %v29143_v30 = vshrl.u32 %v24650_v33, 16 }
 0x48a   :  { %6991 = vmatpush1.bf16.msra.mxu1 %v21866_v4  ;;  %6443 = vmatprep.subr.bf16.mxu0 %v21871_v51  ;;  %v2521_v4 = vrot.slane %v29142_v61, 1  ;;  %v21886_v51 = vld [vmem:[%s29087_s5 + $0xc0c] ss:$16 sps:$4 sm:$0xff]   ;;  %v21895_v61 = vld [vmem:[%s29087_s5 + $0xc44] ss:$16 sps:$4 sm:$0xff]  }
 0x48b   :  { %6992 = vmatprep.subr.bf16.mxu1 %v21874_v2  ;;  %v25738_v2 = vpack.c.bf16 %v2360_v42, %v2360_v42  ;;  %v2517_v62 = vor.u32 %v2516_v3, %v2512_v19  ;;  %v21884_v42 = vld [vmem:[%s29087_s5 + $0xc08] ss:$16 sps:$4 sm:$0xff]  }
 0x48d   :  { %6444 = vmatpush1.bf16.msra.mxu0 %v21869_v29  ;;  %v2549_v29 = vrot.slane %v2547_v12, 1  ;;  %v21889_v12 = vld [vmem:[%s29087_s5 + $0xc24] ss:$16 sps:$4 sm:$0xff]  }
 0x48e   :  { %6993 = vmatpush1.bf16.msra.mxu1 %v21872_v26  ;;  %6445 = vmatprep.subr.bf16.mxu0 %v21877_v39  ;;  %v21881_v26 = vld [vmem:[%s29087_s5 + $0xc00] ss:$16 sps:$4 sm:$0xff]   ;;  %v2545_v39 = vor.u32 %v29143_v30, %v25582_v37  ;;  %v21892_v37 = vld [vmem:[%s29087_s5 + $0xc2c] ss:$16 sps:$4 sm:$0xff]  }
 0x48f   :  { %6994 = vmatprep.subr.bf16.mxu1 %v21880_v28  ;;  %v2522_v28 = vsel %vm2388_vm1, %v2517_v62, %v2521_v4 }
 0x490   :  { %v2550_v3 = vsel %vm2388_vm1, %v2545_v39, %v2549_v29  ;;  %v29144_v29 = vshrl.u32 %v24667_v38, 16  ;;  %v21896_v39 = vld [vmem:[%s29087_s5 + $0xc48] ss:$16 sps:$4 sm:$0xff]  }
 0x491   :  { %6446 = vmatpush1.bf16.msra.mxu0 %v21875_v20  ;;  %v2539_v20 = vshll.u32 %v25738_v2, 16 }
 0x492   :  { %6995 = vmatpush1.bf16.msra.mxu1 %v21878_v53  ;;  %6476 = vmatprep.subr.bf16.mxu0 %v21883_v34  ;;  %v21887_v53 = vld [vmem:[%s29087_s5 + $0xc20] ss:$16 sps:$4 sm:$0xff]   ;;  %v21890_v34 = vld [vmem:[%s29087_s5 + $0xc28] ss:$16 sps:$4 sm:$0xff]   ;;  %v2537_v62 = vor.u32 %v29144_v29, %v2521_v4  ;;  %v21904_v4 = vld [vmem:[%s29087_s5 + $0xc6c] ss:$16 sps:$4 sm:$0xff]  }
 0x493   :  { %7025 = vmatprep.subr.bf16.mxu1 %v21886_v51  ;;  %v2541_v19 = vrot.slane %v2539_v20, 1  ;;  %v21898_v51 = vld [vmem:[%s29087_s5 + $0xc4c] ss:$16 sps:$4 sm:$0xff]   ;;  %v21899_v20 = vld [vmem:[%s29087_s5 + $0xc60] ss:$16 sps:$4 sm:$0xff]  }
 0x494   :  { %6448 = vmatmul.mubr.bf16.vlgmr.msra.gmra.mrb[116].mxu0 %v2522_v28  ;;  %v21913_v29 = vld [vmem:[%s29087_s5 + $0xca4] ss:$16 sps:$4 sm:$0xff]  }
 0x495   :  { %6997 = vmatmul.mubr.bf16.vlgmr.msra.gmra.mrb[28].mxu1 %v2522_v28  ;;  %6457 = vmatprep.mubr.bf16.mxu0 %v2550_v3  ;;  %v2542_v30 = vsel %vm2388_vm1, %v2537_v62, %v2541_v19  ;;  %v2553_v28 = vshrl.u32 %v25709_v27, 16  ;;  %v21905_v19 = vld [vmem:[%s29087_s5 + $0xc80] ss:$16 sps:$4 sm:$0xff]   ;;  %v21916_v62 = vld [vmem:[%s29087_s5 + $0xcac] ss:$16 sps:$4 sm:$0xff]  }
 0x496   :  { %6477 = vmatpush1.bf16.msra.mxu0 %v21881_v26  ;;  %7006 = vmatprep.mubr.bf16.mxu1 %v2550_v3  ;;  %v21893_v26 = vld [vmem:[%s29087_s5 + $0xc40] ss:$16 sps:$4 sm:$0xff]   ;;  %v21902_v3 = vld [vmem:[%s29087_s5 + $0xc68] ss:$16 sps:$4 sm:$0xff]  }
 0x497   :  { %7026 = vmatpush1.bf16.msra.mxu1 %v21884_v42  ;;  %6478 = vmatprep.subr.bf16.mxu0 %v21889_v12  ;;  %v21901_v42 = vld [vmem:[%s29087_s5 + $0xc64] ss:$16 sps:$4 sm:$0xff]  }
 0x498   :  { %7027 = vmatprep.subr.bf16.mxu1 %v21892_v37  ;;  %v2367_v12 = vld [vmem:[#allocation3 + $0x18] sm:$0xc0] }
 0x499   :  { %v2371_v27 = vpack.c.bf16 %v25542_v44, %v2367_v12  ;;  %v21907_v37 = vld [vmem:[%s29087_s5 + $0xc84] ss:$16 sps:$4 sm:$0xff]   ;;  %v2551_v44 = vshrl.u32 %v25738_v2, 16 }
 0x49a   :  { %6479 = vmatpush1.bf16.msra.mxu0 %v21887_v53  ;;  %v21910_v53 = vld [vmem:[%s29087_s5 + $0xc8c] ss:$16 sps:$4 sm:$0xff]   ;;  %v21925_v12 = vld [vmem:[%s29087_s5 + $0xce4] ss:$16 sps:$4 sm:$0xff]  }
 0x49b   :  { %7028 = vmatpush1.bf16.msra.mxu1 %v21890_v34  ;;  %6480 = vmatprep.subr.bf16.mxu0 %v21895_v61  ;;  %v2572_v34 = vrot.slane %v24650_v33, 3  ;;  %v2571_v61 = vrot.slane %v2371_v27, 3  ;;  %v21923_v27 = vld [vmem:[%s29087_s5 + $0xce0] ss:$16 sps:$4 sm:$0xff]   ;;  %v21986_v33 = vld [vmem:[%s29087_s5 + $0xe28] ss:$16 sps:$4 sm:$0xff]  }
 0x49c   :  { %6458 = vmatmul.mubr.bf16.gmra.mrb[120].mxu0 %v2542_v30  ;;  %7029 = vmatprep.subr.bf16.mxu1 %v21898_v51  ;;  %v21908_v51 = vld [vmem:[%s29087_s5 + $0xc88] ss:$16 sps:$4 sm:$0xff]  }
 0x49d   :  { %7007 = vmatmul.mubr.bf16.gmra.mrb[32].mxu1 %v2542_v30  ;;  %6467 = vmatprep.mubr.bf16.mxu0 %v2553_v28  ;;  %v2573_v2 = vsel %vm2567_vm4, %v2571_v61, %v2572_v34  ;;  %v21914_v30 = vld [vmem:[%s29087_s5 + $0xca8] ss:$16 sps:$4 sm:$0xff]   ;;  %v21937_v61 = vld [vmem:[%s29087_s5 + $0xd24] ss:$16 sps:$4 sm:$0xff]  }
 0x49e   :  { %6481 = vmatpush1.bf16.msra.mxu0 %v21893_v26  ;;  %7016 = vmatprep.mubr.bf16.mxu1 %v2553_v28  ;;  %v21911_v26 = vld [vmem:[%s29087_s5 + $0xca0] ss:$16 sps:$4 sm:$0xff]   ;;  %v21922_v28 = vld [vmem:[%s29087_s5 + $0xccc] ss:$16 sps:$4 sm:$0xff]  }
 0x49f   :  { %7030 = vmatpush1.bf16.msra.mxu1 %v21896_v39  ;;  %6482 = vmatprep.subr.bf16.mxu0 %v21901_v42  ;;  %v21919_v39 = vld [vmem:[%s29087_s5 + $0xcc4] ss:$16 sps:$4 sm:$0xff]   ;;  %v21917_v42 = vld [vmem:[%s29087_s5 + $0xcc0] ss:$16 sps:$4 sm:$0xff]  }
 0x4a0   :  { %7031 = vmatprep.subr.bf16.mxu1 %v21904_v4  ;;  %v21920_v4 = vld [vmem:[%s29087_s5 + $0xcc8] ss:$16 sps:$4 sm:$0xff]  }
 0x4a2   :  { %6483 = vmatpush1.bf16.msra.mxu0 %v21899_v20  ;;  %v21928_v20 = vld [vmem:[%s29087_s5 + $0xcec] ss:$16 sps:$4 sm:$0xff]  }
 0x4a3   :  { %7032 = vmatpush1.bf16.msra.mxu1 %v21902_v3  ;;  %6484 = vmatprep.subr.bf16.mxu0 %v21907_v37  ;;  %v21926_v3 = vld [vmem:[%s29087_s5 + $0xce8] ss:$16 sps:$4 sm:$0xff]   ;;  %v21931_v37 = vld [vmem:[%s29087_s5 + $0xd04] ss:$16 sps:$4 sm:$0xff]  }
 0x4a4   :  { %6468 = vmatmul.mubr.bf16.gmra.mrb[124].mxu0 %v2551_v44  ;;  %7033 = vmatprep.subr.bf16.mxu1 %v21910_v53  ;;  %v21934_v53 = vld [vmem:[%s29087_s5 + $0xd0c] ss:$16 sps:$4 sm:$0xff]  }
 0x4a5   :  { %7017 = vmatmul.mubr.bf16.gmra.mrb[36].mxu1 %v2551_v44  ;;  %6508 = vmatprep.mubr.bf16.mxu0 %v2573_v2  ;;  %v21929_v44 = vld [vmem:[%s29087_s5 + $0xd00] ss:$16 sps:$4 sm:$0xff]  }
 0x4a6   :  { %6485 = vmatpush1.bf16.msra.mxu0 %v21905_v19  ;;  %7057 = vmatprep.mubr.bf16.mxu1 %v2573_v2  ;;  %v21932_v19 = vld [vmem:[%s29087_s5 + $0xd08] ss:$16 sps:$4 sm:$0xff]  }
 0x4a7   :  { %7034 = vmatpush1.bf16.msra.mxu1 %v21908_v51  ;;  %6486 = vmatprep.subr.bf16.mxu0 %v21913_v29  ;;  %v21940_v51 = vld [vmem:[%s29087_s5 + $0xd2c] ss:$16 sps:$4 sm:$0xff]   ;;  %v21935_v29 = vld [vmem:[%s29087_s5 + $0xd20] ss:$16 sps:$4 sm:$0xff]   ;;  %v21938_v2 = vld [vmem:[%s29087_s5 + $0xd28] ss:$16 sps:$4 sm:$0xff]  }
 0x4a8   :  { %7035 = vmatprep.subr.bf16.mxu1 %v21916_v62  ;;  %v21943_v62 = vld [vmem:[%s29087_s5 + $0xd44] ss:$16 sps:$4 sm:$0xff]  }
 0x4aa   :  { %6487 = vmatpush1.bf16.msra.mxu0 %v21911_v26  ;;  %v21946_v26 = vld [vmem:[%s29087_s5 + $0xd4c] ss:$16 sps:$4 sm:$0xff]  }
 0x4ab   :  { %7036 = vmatpush1.bf16.msra.mxu1 %v21914_v30  ;;  %6488 = vmatprep.subr.bf16.mxu0 %v21919_v39  ;;  %v21941_v30 = vld [vmem:[%s29087_s5 + $0xd40] ss:$16 sps:$4 sm:$0xff]   ;;  %v21944_v39 = vld [vmem:[%s29087_s5 + $0xd48] ss:$16 sps:$4 sm:$0xff]  }
 0x4ac   :  { %7037 = vmatprep.subr.bf16.mxu1 %v21922_v28  ;;  %v21949_v28 = vld [vmem:[%s29087_s5 + $0xd64] ss:$16 sps:$4 sm:$0xff]  }
 0x4ae   :  { %6489 = vmatpush1.bf16.msra.mxu0 %v21917_v42  ;;  %v21952_v42 = vld [vmem:[%s29087_s5 + $0xd6c] ss:$16 sps:$4 sm:$0xff]  }
 0x4af   :  { %7038 = vmatpush1.bf16.msra.mxu1 %v21920_v4  ;;  %6490 = vmatprep.subr.bf16.mxu0 %v21925_v12  ;;  %v21947_v4 = vld [vmem:[%s29087_s5 + $0xd60] ss:$16 sps:$4 sm:$0xff]   ;;  %v21950_v12 = vld [vmem:[%s29087_s5 + $0xd68] ss:$16 sps:$4 sm:$0xff]  }
 0x4b0   :  { %7039 = vmatprep.subr.bf16.mxu1 %v21928_v20  ;;  %v21955_v20 = vld [vmem:[%s29087_s5 + $0xd84] ss:$16 sps:$4 sm:$0xff]  }
 0x4b2   :  { %6491 = vmatpush1.bf16.msra.mxu0 %v21923_v27  ;;  %v21958_v27 = vld [vmem:[%s29087_s5 + $0xd8c] ss:$16 sps:$4 sm:$0xff]  }
 0x4b3   :  { %7040 = vmatpush1.bf16.msra.mxu1 %v21926_v3  ;;  %6492 = vmatprep.subr.bf16.mxu0 %v21931_v37  ;;  %v21953_v3 = vld [vmem:[%s29087_s5 + $0xd80] ss:$16 sps:$4 sm:$0xff]   ;;  %v21956_v37 = vld [vmem:[%s29087_s5 + $0xd88] ss:$16 sps:$4 sm:$0xff]  }
 0x4b4   :  { %7041 = vmatprep.subr.bf16.mxu1 %v21934_v53  ;;  %v21961_v53 = vld [vmem:[%s29087_s5 + $0xda4] ss:$16 sps:$4 sm:$0xff]  }
 0x4b6   :  { %6493 = vmatpush1.bf16.msra.mxu0 %v21929_v44  ;;  %v21964_v44 = vld [vmem:[%s29087_s5 + $0xdac] ss:$16 sps:$4 sm:$0xff]  }
 0x4b7   :  { %7042 = vmatpush1.bf16.msra.mxu1 %v21932_v19  ;;  %6494 = vmatprep.subr.bf16.mxu0 %v21937_v61  ;;  %v21959_v19 = vld [vmem:[%s29087_s5 + $0xda0] ss:$16 sps:$4 sm:$0xff]   ;;  %v21962_v61 = vld [vmem:[%s29087_s5 + $0xda8] ss:$16 sps:$4 sm:$0xff]  }
 0x4b8   :  { %7043 = vmatprep.subr.bf16.mxu1 %v21940_v51  ;;  %v21967_v51 = vld [vmem:[%s29087_s5 + $0xdc4] ss:$16 sps:$4 sm:$0xff]  }
 0x4ba   :  { %6495 = vmatpush1.bf16.msra.mxu0 %v21935_v29  ;;  %v21970_v29 = vld [vmem:[%s29087_s5 + $0xdcc] ss:$16 sps:$4 sm:$0xff]  }
 0x4bb   :  { %7044 = vmatpush1.bf16.msra.mxu1 %v21938_v2  ;;  %6496 = vmatprep.subr.bf16.mxu0 %v21943_v62  ;;  %v21965_v2 = vld [vmem:[%s29087_s5 + $0xdc0] ss:$16 sps:$4 sm:$0xff]  }
 0x4bc   :  { %7045 = vmatprep.subr.bf16.mxu1 %v21946_v26  ;;  %v2369_v62 = vld [vmem:[#allocation3 + $0x58] sm:$0x7f]  ;;  %v21968_v26 = vld [vmem:[%s29087_s5 + $0xdc8] ss:$16 sps:$4 sm:$0xff]  }
 0x4be   :  { %6497 = vmatpush1.bf16.msra.mxu0 %v21941_v30  ;;  %v21973_v30 = vld [vmem:[%s29087_s5 + $0xde4] ss:$16 sps:$4 sm:$0xff]  }
 0x4bf   :  { %7046 = vmatpush1.bf16.msra.mxu1 %v21944_v39  ;;  %6498 = vmatprep.subr.bf16.mxu0 %v21949_v28  ;;  %v21976_v39 = vld [vmem:[%s29087_s5 + $0xdec] ss:$16 sps:$4 sm:$0xff]  }
 0x4c0   :  { %7047 = vmatprep.subr.bf16.mxu1 %v21952_v42  ;;  %v2366_v28 = vld [vmem:[#allocation3 + $0x10] sm:$0xc0]  ;;  %v2373_v42 = vpack.c.bf16 %v2369_v62, %v2369_v62 }
 0x4c1   :  { %v21988_v62 = vld [vmem:[%s29087_s5 + $0xe2c] ss:$16 sps:$4 sm:$0xff]  }
 0x4c2   :  { %6499 = vmatpush1.bf16.msra.mxu0 %v21947_v4  ;;  %v21971_v4 = vld [vmem:[%s29087_s5 + $0xde0] ss:$16 sps:$4 sm:$0xff]  }
 0x4c3   :  { %7048 = vmatpush1.bf16.msra.mxu1 %v21950_v12  ;;  %6500 = vmatprep.subr.bf16.mxu0 %v21955_v20  ;;  %v2370_v12 = vpack.c.bf16 %v25697_v58, %v2366_v28  ;;  %v21974_v20 = vld [vmem:[%s29087_s5 + $0xde8] ss:$16 sps:$4 sm:$0xff]   ;;  %v21989_v28 = vld [vmem:[%s29087_s5 + $0xe40] ss:$16 sps:$4 sm:$0xff]  }
 0x4c4   :  { %7049 = vmatprep.subr.bf16.mxu1 %v21958_v27  ;;  %v21979_v27 = vld [vmem:[%s29087_s5 + $0xe04] ss:$16 sps:$4 sm:$0xff]  }
 0x4c5   :  { %v2568_v58 = vrot.slane %v2370_v12, 3  ;;  %v21997_v12 = vld [vmem:[%s29087_s5 + $0xe64] ss:$16 sps:$4 sm:$0xff]  }
 0x4c6   :  { %6501 = vmatpush1.bf16.msra.mxu0 %v21953_v3  ;;  %v2569_v3 = vrot.slane %v24667_v38, 3  ;;  %v21980_v38 = vld [vmem:[%s29087_s5 + $0xe08] ss:$16 sps:$4 sm:$0xff]  }
 0x4c7   :  { %7050 = vmatpush1.bf16.msra.mxu1 %v21956_v37  ;;  %6502 = vmatprep.subr.bf16.mxu0 %v21961_v53  ;;  %v21982_v37 = vld [vmem:[%s29087_s5 + $0xe0c] ss:$16 sps:$4 sm:$0xff]   ;;  %v2576_v53 = vrot.slane %v2373_v42, 3 }
 0x4c8   :  { %7051 = vmatprep.subr.bf16.mxu1 %v21964_v44  ;;  %v2368_v44 = vld [vmem:[#allocation3 + $0x50] sm:$0x7f] }
 0x4ca   :  { %6503 = vmatpush1.bf16.msra.mxu0 %v21959_v19  ;;  %v21977_v19 = vld [vmem:[%s29087_s5 + $0xe00] ss:$16 sps:$4 sm:$0xff]  }
 0x4cb   :  { %7052 = vmatpush1.bf16.msra.mxu1 %v21962_v61  ;;  %6504 = vmatprep.subr.bf16.mxu0 %v21967_v51  ;;  %v2570_v61 = vsel %vm2567_vm4, %v2568_v58, %v2569_v3  ;;  %v21985_v51 = vld [vmem:[%s29087_s5 + $0xe24] ss:$16 sps:$4 sm:$0xff]   ;;  %v22004_v58 = vld [vmem:[%s29087_s5 + $0xe88] ss:$16 sps:$4 sm:$0xff]  }
 0x4cc   :  { %7053 = vmatprep.subr.bf16.mxu1 %v21970_v29  ;;  %v2372_v29 = vpack.c.bf16 %v2368_v44, %v2368_v44  ;;  %v22006_v44 = vld [vmem:[%s29087_s5 + $0xe8c] ss:$16 sps:$4 sm:$0xff]  }
 0x4ce   :  { %6505 = vmatpush1.bf16.msra.mxu0 %v21965_v2  ;;  %v2577_v2 = vsel %vm2567_vm4, %v2572_v34, %v2576_v53  ;;  %v21991_v34 = vld [vmem:[%s29087_s5 + $0xe44] ss:$16 sps:$4 sm:$0xff]  }
 0x4cf   :  { %7054 = vmatpush1.bf16.msra.mxu1 %v21968_v26  ;;  %6506 = vmatprep.subr.bf16.mxu0 %v21973_v30  ;;  %v21983_v26 = vld [vmem:[%s29087_s5 + $0xe20] ss:$16 sps:$4 sm:$0xff]   ;;  %v2574_v30 = vrot.slane %v2372_v29, 3  ;;  %v22015_v29 = vld [vmem:[%s29087_s5 + $0xec4] ss:$16 sps:$4 sm:$0xff]  }
 0x4d0   :  { %7055 = vmatprep.subr.bf16.mxu1 %v21976_v39  ;;  %v21994_v39 = vld [vmem:[%s29087_s5 + $0xe4c] ss:$16 sps:$4 sm:$0xff]  }
 0x4d1   :  { %v2575_v42 = vsel %vm2567_vm4, %v2569_v3, %v2574_v30  ;;  %v21998_v3 = vld [vmem:[%s29087_s5 + $0xe68] ss:$16 sps:$4 sm:$0xff]  }
 0x4d2   :  { %6507 = vmatpush1.bf16.msra.mxu0 %v21971_v4  ;;  %v21992_v4 = vld [vmem:[%s29087_s5 + $0xe48] ss:$16 sps:$4 sm:$0xff]  }
 0x4d3   :  { %7056 = vmatpush1.bf16.msra.mxu1 %v21974_v20  ;;  %6537 = vmatprep.subr.bf16.mxu0 %v21979_v27  ;;  %v22000_v20 = vld [vmem:[%s29087_s5 + $0xe6c] ss:$16 sps:$4 sm:$0xff]   ;;  %v21995_v27 = vld [vmem:[%s29087_s5 + $0xe60] ss:$16 sps:$4 sm:$0xff]  }
 0x4d4   :  { %7086 = vmatprep.subr.bf16.mxu1 %v21982_v37  ;;  %v22003_v37 = vld [vmem:[%s29087_s5 + $0xe84] ss:$16 sps:$4 sm:$0xff]  }
 0x4d5   :  { %6509 = vmatmul.mubr.bf16.vlgmr.msra.gmra.mrb[116].mxu0 %v2570_v61 }
 0x4d6   :  { %7058 = vmatmul.mubr.bf16.vlgmr.msra.gmra.mrb[28].mxu1 %v2570_v61  ;;  %6518 = vmatprep.mubr.bf16.mxu0 %v2577_v2  ;;  %v22012_v61 = vld [vmem:[%s29087_s5 + $0xeac] ss:$16 sps:$4 sm:$0xff]  }
 0x4d7   :  { %6538 = vmatpush1.bf16.msra.mxu0 %v21977_v19  ;;  %7067 = vmatprep.mubr.bf16.mxu1 %v2577_v2  ;;  %v22009_v19 = vld [vmem:[%s29087_s5 + $0xea4] ss:$16 sps:$4 sm:$0xff]   ;;  %v22018_v2 = vld [vmem:[%s29087_s5 + $0xecc] ss:$16 sps:$4 sm:$0xff]  }
 0x4d8   :  { %7087 = vmatpush1.bf16.msra.mxu1 %v21980_v38  ;;  %6539 = vmatprep.subr.bf16.mxu0 %v21985_v51  ;;  %v22007_v38 = vld [vmem:[%s29087_s5 + $0xea0] ss:$16 sps:$4 sm:$0xff]   ;;  %v22010_v51 = vld [vmem:[%s29087_s5 + $0xea8] ss:$16 sps:$4 sm:$0xff]  }
 0x4d9   :  { %7088 = vmatprep.subr.bf16.mxu1 %v21988_v62  ;;  %v22016_v62 = vld [vmem:[%s29087_s5 + $0xec8] ss:$16 sps:$4 sm:$0xff]  }
 0x4db   :  { %6540 = vmatpush1.bf16.msra.mxu0 %v21983_v26  ;;  %v22021_v26 = vld [vmem:[%s29087_s5 + $0xee4] ss:$16 sps:$4 sm:$0xff]  }
 0x4dc   :  { %7089 = vmatpush1.bf16.msra.mxu1 %v21986_v33  ;;  %6541 = vmatprep.subr.bf16.mxu0 %v21991_v34  ;;  %v22024_v33 = vld [vmem:[%s29087_s5 + $0xeec] ss:$16 sps:$4 sm:$0xff]   ;;  %v22022_v34 = vld [vmem:[%s29087_s5 + $0xee8] ss:$16 sps:$4 sm:$0xff]  }
 0x4dd   :  { %6519 = vmatmul.mubr.bf16.gmra.mrb[120].mxu0 %v2575_v42  ;;  %7090 = vmatprep.subr.bf16.mxu1 %v21994_v39  ;;  %v22027_v39 = vld [vmem:[%s29087_s5 + $0xf04] ss:$16 sps:$4 sm:$0xff]  }
 0x4de   :  { %7068 = vmatmul.mubr.bf16.gmra.mrb[32].mxu1 %v2575_v42  ;;  %6528 = vmatprep.mubr.bf16.mxu0 %v2576_v53  ;;  %v22025_v42 = vld [vmem:[%s29087_s5 + $0xf00] ss:$16 sps:$4 sm:$0xff]  }
 0x4df   :  { %6542 = vmatpush1.bf16.msra.mxu0 %v21989_v28  ;;  %7077 = vmatprep.mubr.bf16.mxu1 %v2576_v53  ;;  %v22001_v53 = vld [vmem:[%s29087_s5 + $0xe80] ss:$16 sps:$4 sm:$0xff]   ;;  %v22030_v28 = vld [vmem:[%s29087_s5 + $0xf0c] ss:$16 sps:$4 sm:$0xff]  }
 0x4e0   :  { %7091 = vmatpush1.bf16.msra.mxu1 %v21992_v4  ;;  %6543 = vmatprep.subr.bf16.mxu0 %v21997_v12  ;;  %v22028_v4 = vld [vmem:[%s29087_s5 + $0xf08] ss:$16 sps:$4 sm:$0xff]   ;;  %v22033_v12 = vld [vmem:[%s29087_s5 + $0xf24] ss:$16 sps:$4 sm:$0xff]  }
 0x4e1   :  { %7092 = vmatprep.subr.bf16.mxu1 %v22000_v20  ;;  %v22036_v20 = vld [vmem:[%s29087_s5 + $0xf2c] ss:$16 sps:$4 sm:$0xff]  }
 0x4e3   :  { %6544 = vmatpush1.bf16.msra.mxu0 %v21995_v27  ;;  %v22031_v27 = vld [vmem:[%s29087_s5 + $0xf20] ss:$16 sps:$4 sm:$0xff]  }
 0x4e4   :  { %7093 = vmatpush1.bf16.msra.mxu1 %v21998_v3  ;;  %6545 = vmatprep.subr.bf16.mxu0 %v22003_v37  ;;  %v22034_v3 = vld [vmem:[%s29087_s5 + $0xf28] ss:$16 sps:$4 sm:$0xff]   ;;  %v22039_v37 = vld [vmem:[%s29087_s5 + $0xf44] ss:$16 sps:$4 sm:$0xff]  }
 0x4e5   :  { %6529 = vmatmul.mubr.bf16.gmra.mrb[124].mxu0 %v2574_v30  ;;  %7094 = vmatprep.subr.bf16.mxu1 %v22006_v44  ;;  %v22042_v44 = vld [vmem:[%s29087_s5 + $0xf4c] ss:$16 sps:$4 sm:$0xff]  }
 0x4e6   :  { %7078 = vmatmul.mubr.bf16.gmra.mrb[36].mxu1 %v2574_v30  ;;  %6569 = vmatprep.mubr.bf16.mxu0 %v24792_v54  ;;  %v22019_v30 = vld [vmem:[%s29087_s5 + $0xee0] ss:$16 sps:$4 sm:$0xff]  }
 0x4e7   :  { %6546 = vmatpush1.bf16.msra.mxu0 %v22001_v53  ;;  %7118 = vmatprep.mubr.bf16.mxu1 %v24792_v54  ;;  %v22013_v54 = vld [vmem:[%s29087_s5 + $0xec0] ss:$16 sps:$4 sm:$0xff]  }
 0x4e8   :  { %7095 = vmatpush1.bf16.msra.mxu1 %v22004_v58  ;;  %6547 = vmatprep.subr.bf16.mxu0 %v22009_v19  ;;  %v22037_v53 = vld [vmem:[%s29087_s5 + $0xf40] ss:$16 sps:$4 sm:$0xff]   ;;  %v22040_v58 = vld [vmem:[%s29087_s5 + $0xf48] ss:$16 sps:$4 sm:$0xff]   ;;  %v22045_v19 = vld [vmem:[%s29087_s5 + $0xf64] ss:$16 sps:$4 sm:$0xff]  }
 0x4e9   :  { %7096 = vmatprep.subr.bf16.mxu1 %v22012_v61  ;;  %v22048_v61 = vld [vmem:[%s29087_s5 + $0xf6c] ss:$16 sps:$4 sm:$0xff]  }
 0x4eb   :  { %6548 = vmatpush1.bf16.msra.mxu0 %v22007_v38  ;;  %v22043_v38 = vld [vmem:[%s29087_s5 + $0xf60] ss:$16 sps:$4 sm:$0xff]  }
 0x4ec   :  { %7097 = vmatpush1.bf16.msra.mxu1 %v22010_v51  ;;  %6549 = vmatprep.subr.bf16.mxu0 %v22015_v29  ;;  %v22046_v51 = vld [vmem:[%s29087_s5 + $0xf68] ss:$16 sps:$4 sm:$0xff]   ;;  %v22051_v29 = vld [vmem:[%s29087_s5 + $0xf84] ss:$16 sps:$4 sm:$0xff]  }
 0x4ed   :  { %7098 = vmatprep.subr.bf16.mxu1 %v22018_v2  ;;  %v22054_v2 = vld [vmem:[%s29087_s5 + $0xf8c] ss:$16 sps:$4 sm:$0xff]  }
 0x4ef   :  { %6550 = vmatpush1.bf16.msra.mxu0 %v22013_v54  ;;  %v22049_v54 = vld [vmem:[%s29087_s5 + $0xf80] ss:$16 sps:$4 sm:$0xff]  }
 0x4f0   :  { %7099 = vmatpush1.bf16.msra.mxu1 %v22016_v62  ;;  %6551 = vmatprep.subr.bf16.mxu0 %v22021_v26  ;;  %v22052_v62 = vld [vmem:[%s29087_s5 + $0xf88] ss:$16 sps:$4 sm:$0xff]   ;;  %v22057_v26 = vld [vmem:[%s29087_s5 + $0xfa4] ss:$16 sps:$4 sm:$0xff]  }
 0x4f1   :  { %7100 = vmatprep.subr.bf16.mxu1 %v22024_v33  ;;  %v22060_v33 = vld [vmem:[%s29087_s5 + $0xfac] ss:$16 sps:$4 sm:$0xff]  }
 0x4f3   :  { %6552 = vmatpush1.bf16.msra.mxu0 %v22019_v30  ;;  %v22055_v30 = vld [vmem:[%s29087_s5 + $0xfa0] ss:$16 sps:$4 sm:$0xff]  }
 0x4f4   :  { %7101 = vmatpush1.bf16.msra.mxu1 %v22022_v34  ;;  %6553 = vmatprep.subr.bf16.mxu0 %v22027_v39  ;;  %v22058_v34 = vld [vmem:[%s29087_s5 + $0xfa8] ss:$16 sps:$4 sm:$0xff]   ;;  %v22063_v39 = vld [vmem:[%s29087_s5 + $0xfc4] ss:$16 sps:$4 sm:$0xff]  }
 0x4f5   :  { %7102 = vmatprep.subr.bf16.mxu1 %v22030_v28  ;;  %v22066_v28 = vld [vmem:[%s29087_s5 + $0xfcc] ss:$16 sps:$4 sm:$0xff]  }
 0x4f7   :  { %6554 = vmatpush1.bf16.msra.mxu0 %v22025_v42  ;;  %v22061_v42 = vld [vmem:[%s29087_s5 + $0xfc0] ss:$16 sps:$4 sm:$0xff]  }
 0x4f8   :  { %7103 = vmatpush1.bf16.msra.mxu1 %v22028_v4  ;;  %6555 = vmatprep.subr.bf16.mxu0 %v22033_v12  ;;  %v22064_v4 = vld [vmem:[%s29087_s5 + $0xfc8] ss:$16 sps:$4 sm:$0xff]   ;;  %v22069_v12 = vld [vmem:[%s29087_s5 + $0xfe4] ss:$16 sps:$4 sm:$0xff]  }
 0x4f9   :  { %7104 = vmatprep.subr.bf16.mxu1 %v22036_v20  ;;  %v22072_v20 = vld [vmem:[%s29087_s5 + $0xfec] ss:$16 sps:$4 sm:$0xff]  }
 0x4fb   :  { %6556 = vmatpush1.bf16.msra.mxu0 %v22031_v27  ;;  %v22067_v27 = vld [vmem:[%s29087_s5 + $0xfe0] ss:$16 sps:$4 sm:$0xff]  }
 0x4fc   :  { %7105 = vmatpush1.bf16.msra.mxu1 %v22034_v3  ;;  %6557 = vmatprep.subr.bf16.mxu0 %v22039_v37  ;;  %v22070_v3 = vld [vmem:[%s29087_s5 + $0xfe8] ss:$16 sps:$4 sm:$0xff]   ;;  %v22075_v37 = vld [vmem:[%s29087_s5 + $0x1004] ss:$16 sps:$4 sm:$0xff]  }
 0x4fd   :  { %7106 = vmatprep.subr.bf16.mxu1 %v22042_v44  ;;  %v22078_v44 = vld [vmem:[%s29087_s5 + $0x100c] ss:$16 sps:$4 sm:$0xff]  }
 0x4ff   :  { %6558 = vmatpush1.bf16.msra.mxu0 %v22037_v53  ;;  %v22073_v53 = vld [vmem:[%s29087_s5 + $0x1000] ss:$16 sps:$4 sm:$0xff]  }
 0x500   :  { %7107 = vmatpush1.bf16.msra.mxu1 %v22040_v58  ;;  %6559 = vmatprep.subr.bf16.mxu0 %v22045_v19  ;;  %v22076_v58 = vld [vmem:[%s29087_s5 + $0x1008] ss:$16 sps:$4 sm:$0xff]   ;;  %v22081_v19 = vld [vmem:[%s29087_s5 + $0x1024] ss:$16 sps:$4 sm:$0xff]  }
 0x501   :  { %7108 = vmatprep.subr.bf16.mxu1 %v22048_v61  ;;  %v22084_v61 = vld [vmem:[%s29087_s5 + $0x102c] ss:$16 sps:$4 sm:$0xff]  }
 0x503   :  { %6560 = vmatpush1.bf16.msra.mxu0 %v22043_v38  ;;  %v22079_v38 = vld [vmem:[%s29087_s5 + $0x1020] ss:$16 sps:$4 sm:$0xff]  }
 0x504   :  { %7109 = vmatpush1.bf16.msra.mxu1 %v22046_v51  ;;  %6561 = vmatprep.subr.bf16.mxu0 %v22051_v29  ;;  %v22082_v51 = vld [vmem:[%s29087_s5 + $0x1028] ss:$16 sps:$4 sm:$0xff]   ;;  %v22087_v29 = vld [vmem:[%s29087_s5 + $0x1044] ss:$16 sps:$4 sm:$0xff]  }
 0x505   :  { %7110 = vmatprep.subr.bf16.mxu1 %v22054_v2  ;;  %v22088_v2 = vld [vmem:[%s29087_s5 + $0x1048] ss:$16 sps:$4 sm:$0xff]  }
 0x507   :  { %6562 = vmatpush1.bf16.msra.mxu0 %v22049_v54  ;;  %v22093_v54 = vld [vmem:[%s29087_s5 + $0x1064] ss:$16 sps:$4 sm:$0xff]  }
 0x508   :  { %7111 = vmatpush1.bf16.msra.mxu1 %v22052_v62  ;;  %6563 = vmatprep.subr.bf16.mxu0 %v22057_v26  ;;  %v22096_v62 = vld [vmem:[%s29087_s5 + $0x106c] ss:$16 sps:$4 sm:$0xff]   ;;  %v22091_v26 = vld [vmem:[%s29087_s5 + $0x1060] ss:$16 sps:$4 sm:$0xff]  }
 0x509   :  { %7112 = vmatprep.subr.bf16.mxu1 %v22060_v33  ;;  %v22094_v33 = vld [vmem:[%s29087_s5 + $0x1068] ss:$16 sps:$4 sm:$0xff]  }
 0x50b   :  { %6564 = vmatpush1.bf16.msra.mxu0 %v22055_v30  ;;  %v22099_v30 = vld [vmem:[%s29087_s5 + $0x1084] ss:$16 sps:$4 sm:$0xff]  }
 0x50c   :  { %7113 = vmatpush1.bf16.msra.mxu1 %v22058_v34  ;;  %6565 = vmatprep.subr.bf16.mxu0 %v22063_v39  ;;  %v22100_v34 = vld [vmem:[%s29087_s5 + $0x1088] ss:$16 sps:$4 sm:$0xff]   ;;  %v22105_v39 = vld [vmem:[%s29087_s5 + $0x10a4] ss:$16 sps:$4 sm:$0xff]  }
 0x50d   :  { %7114 = vmatprep.subr.bf16.mxu1 %v22066_v28  ;;  %v22108_v28 = vld [vmem:[%s29087_s5 + $0x10ac] ss:$16 sps:$4 sm:$0xff]  }
 0x50f   :  { %6566 = vmatpush1.bf16.msra.mxu0 %v22061_v42  ;;  %v22103_v42 = vld [vmem:[%s29087_s5 + $0x10a0] ss:$16 sps:$4 sm:$0xff]  }
 0x510   :  { %7115 = vmatpush1.bf16.msra.mxu1 %v22064_v4  ;;  %6567 = vmatprep.subr.bf16.mxu0 %v22069_v12  ;;  %v22106_v4 = vld [vmem:[%s29087_s5 + $0x10a8] ss:$16 sps:$4 sm:$0xff]   ;;  %v22111_v12 = vld [vmem:[%s29087_s5 + $0x10c4] ss:$16 sps:$4 sm:$0xff]  }
 0x511   :  { %7116 = vmatprep.subr.bf16.mxu1 %v22072_v20  ;;  %v22112_v20 = vld [vmem:[%s29087_s5 + $0x10c8] ss:$16 sps:$4 sm:$0xff]  }
 0x513   :  { %6568 = vmatpush1.bf16.msra.mxu0 %v22067_v27  ;;  %v22117_v27 = vld [vmem:[%s29087_s5 + $0x10e4] ss:$16 sps:$4 sm:$0xff]  }
 0x514   :  { %7117 = vmatpush1.bf16.msra.mxu1 %v22070_v3  ;;  %6598 = vmatprep.subr.bf16.mxu0 %v22075_v37  ;;  %v22120_v3 = vld [vmem:[%s29087_s5 + $0x10ec] ss:$16 sps:$4 sm:$0xff]   ;;  %v22115_v37 = vld [vmem:[%s29087_s5 + $0x10e0] ss:$16 sps:$4 sm:$0xff]  }
 0x515   :  { %7147 = vmatprep.subr.bf16.mxu1 %v22078_v44  ;;  %v22118_v44 = vld [vmem:[%s29087_s5 + $0x10e8] ss:$16 sps:$4 sm:$0xff]  }
 0x516   :  { %6570 = vmatmul.mubr.bf16.vlgmr.msra.gmra.mrb[116].mxu0 %v24810_v41 }
 0x517   :  { %7119 = vmatmul.mubr.bf16.vlgmr.msra.gmra.mrb[28].mxu1 %v24810_v41  ;;  %6579 = vmatprep.mubr.bf16.mxu0 %v24823_v6  ;;  %v22090_v41 = vld [vmem:[%s29087_s5 + $0x104c] ss:$16 sps:$4 sm:$0xff]  }
 0x518   :  { %6599 = vmatpush1.bf16.msra.mxu0 %v22073_v53  ;;  %7128 = vmatprep.mubr.bf16.mxu1 %v24823_v6  ;;  %v22085_v6 = vld [vmem:[%s29087_s5 + $0x1040] ss:$16 sps:$4 sm:$0xff]   ;;  %v22123_v53 = vld [vmem:[%s29087_s5 + $0x1104] ss:$16 sps:$4 sm:$0xff]  }
 0x519   :  { %7148 = vmatpush1.bf16.msra.mxu1 %v22076_v58  ;;  %6600 = vmatprep.subr.bf16.mxu0 %v22081_v19  ;;  %v22126_v58 = vld [vmem:[%s29087_s5 + $0x110c] ss:$16 sps:$4 sm:$0xff]   ;;  %v22121_v19 = vld [vmem:[%s29087_s5 + $0x1100] ss:$16 sps:$4 sm:$0xff]  }
 0x51a   :  { %7149 = vmatprep.subr.bf16.mxu1 %v22084_v61  ;;  %v22124_v61 = vld [vmem:[%s29087_s5 + $0x1108] ss:$16 sps:$4 sm:$0xff]  }
 0x51c   :  { %6601 = vmatpush1.bf16.msra.mxu0 %v22079_v38  ;;  %v22129_v38 = vld [vmem:[%s29087_s5 + $0x1124] ss:$16 sps:$4 sm:$0xff]  }
 0x51d   :  { %7150 = vmatpush1.bf16.msra.mxu1 %v22082_v51  ;;  %6602 = vmatprep.subr.bf16.mxu0 %v22087_v29  ;;  %v22132_v51 = vld [vmem:[%s29087_s5 + $0x112c] ss:$16 sps:$4 sm:$0xff]   ;;  %v22127_v29 = vld [vmem:[%s29087_s5 + $0x1120] ss:$16 sps:$4 sm:$0xff]  }
 0x51e   :  { %6580 = vmatmul.mubr.bf16.gmra.mrb[120].mxu0 %v24838_v23  ;;  %7151 = vmatprep.subr.bf16.mxu1 %v22090_v41  ;;  %v22130_v41 = vld [vmem:[%s29087_s5 + $0x1128] ss:$16 sps:$4 sm:$0xff]  }
 0x51f   :  { %7129 = vmatmul.mubr.bf16.gmra.mrb[32].mxu1 %v24838_v23  ;;  %6589 = vmatprep.mubr.bf16.mxu0 %v24781_v0  ;;  %v22102_v23 = vld [vmem:[%s29087_s5 + $0x108c] ss:$16 sps:$4 sm:$0xff]  }
 0x520   :  { %6603 = vmatpush1.bf16.msra.mxu0 %v22085_v6  ;;  %7138 = vmatprep.mubr.bf16.mxu1 %v24781_v0  ;;  %v22097_v0 = vld [vmem:[%s29087_s5 + $0x1080] ss:$16 sps:$4 sm:$0xff]   ;;  %v22135_v6 = vld [vmem:[%s29087_s5 + $0x1144] ss:$16 sps:$4 sm:$0xff]  }
 0x521   :  { %7152 = vmatpush1.bf16.msra.mxu1 %v22088_v2  ;;  %6604 = vmatprep.subr.bf16.mxu0 %v22093_v54  ;;  %v22138_v2 = vld [vmem:[%s29087_s5 + $0x114c] ss:$16 sps:$4 sm:$0xff]   ;;  %v22133_v54 = vld [vmem:[%s29087_s5 + $0x1140] ss:$16 sps:$4 sm:$0xff]  }
 0x522   :  { %7153 = vmatprep.subr.bf16.mxu1 %v22096_v62  ;;  %v22136_v62 = vld [vmem:[%s29087_s5 + $0x1148] ss:$16 sps:$4 sm:$0xff]  }
 0x524   :  { %6605 = vmatpush1.bf16.msra.mxu0 %v22091_v26  ;;  %v22141_v26 = vld [vmem:[%s29087_s5 + $0x1164] ss:$16 sps:$4 sm:$0xff]  }
 0x525   :  { %7154 = vmatpush1.bf16.msra.mxu1 %v22094_v33  ;;  %6606 = vmatprep.subr.bf16.mxu0 %v22099_v30  ;;  %v22144_v33 = vld [vmem:[%s29087_s5 + $0x116c] ss:$16 sps:$4 sm:$0xff]   ;;  %v22139_v30 = vld [vmem:[%s29087_s5 + $0x1160] ss:$16 sps:$4 sm:$0xff]  }
 0x526   :  { %6590 = vmatmul.mubr.bf16.gmra.mrb[124].mxu0 %v24800_v7  ;;  %7155 = vmatprep.subr.bf16.mxu1 %v22102_v23  ;;  %v22142_v23 = vld [vmem:[%s29087_s5 + $0x1168] ss:$16 sps:$4 sm:$0xff]  }
 0x527   :  { %7139 = vmatmul.mubr.bf16.gmra.mrb[36].mxu1 %v24800_v7  ;;  %6630 = vmatprep.mubr.bf16.mxu0 %v24551_v11  ;;  %v22114_v7 = vld [vmem:[%s29087_s5 + $0x10cc] ss:$16 sps:$4 sm:$0xff]  }
 0x528   :  { %6607 = vmatpush1.bf16.msra.mxu0 %v22097_v0  ;;  %7179 = vmatprep.mubr.bf16.mxu1 %v24551_v11  ;;  %v22109_v11 = vld [vmem:[%s29087_s5 + $0x10c0] ss:$16 sps:$4 sm:$0xff]   ;;  %v22147_v0 = vld [vmem:[%s29087_s5 + $0x1184] ss:$16 sps:$4 sm:$0xff]  }
 0x529   :  { %7156 = vmatpush1.bf16.msra.mxu1 %v22100_v34  ;;  %6608 = vmatprep.subr.bf16.mxu0 %v22105_v39  ;;  %v22150_v34 = vld [vmem:[%s29087_s5 + $0x118c] ss:$16 sps:$4 sm:$0xff]   ;;  %v22145_v39 = vld [vmem:[%s29087_s5 + $0x1180] ss:$16 sps:$4 sm:$0xff]  }
 0x52a   :  { %7157 = vmatprep.subr.bf16.mxu1 %v22108_v28  ;;  %v22148_v28 = vld [vmem:[%s29087_s5 + $0x1188] ss:$16 sps:$4 sm:$0xff]  }
 0x52c   :  { %6609 = vmatpush1.bf16.msra.mxu0 %v22103_v42  ;;  %v22153_v42 = vld [vmem:[%s29087_s5 + $0x11a4] ss:$16 sps:$4 sm:$0xff]  }
 0x52d   :  { %7158 = vmatpush1.bf16.msra.mxu1 %v22106_v4  ;;  %6610 = vmatprep.subr.bf16.mxu0 %v22111_v12  ;;  %v22156_v4 = vld [vmem:[%s29087_s5 + $0x11ac] ss:$16 sps:$4 sm:$0xff]   ;;  %v22151_v12 = vld [vmem:[%s29087_s5 + $0x11a0] ss:$16 sps:$4 sm:$0xff]  }
 0x52e   :  { %7159 = vmatprep.subr.bf16.mxu1 %v22114_v7  ;;  %v22154_v7 = vld [vmem:[%s29087_s5 + $0x11a8] ss:$16 sps:$4 sm:$0xff]  }
 0x530   :  { %6611 = vmatpush1.bf16.msra.mxu0 %v22109_v11  ;;  %v22159_v11 = vld [vmem:[%s29087_s5 + $0x11c4] ss:$16 sps:$4 sm:$0xff]  }
 0x531   :  { %7160 = vmatpush1.bf16.msra.mxu1 %v22112_v20  ;;  %6612 = vmatprep.subr.bf16.mxu0 %v22117_v27  ;;  %v22162_v20 = vld [vmem:[%s29087_s5 + $0x11cc] ss:$16 sps:$4 sm:$0xff]   ;;  %v22157_v27 = vld [vmem:[%s29087_s5 + $0x11c0] ss:$16 sps:$4 sm:$0xff]  }
 0x532   :  { %7161 = vmatprep.subr.bf16.mxu1 %v22120_v3  ;;  %v22160_v3 = vld [vmem:[%s29087_s5 + $0x11c8] ss:$16 sps:$4 sm:$0xff]  }
 0x534   :  { %6613 = vmatpush1.bf16.msra.mxu0 %v22115_v37  ;;  %v22165_v37 = vld [vmem:[%s29087_s5 + $0x11e4] ss:$16 sps:$4 sm:$0xff]  }
 0x535   :  { %7162 = vmatpush1.bf16.msra.mxu1 %v22118_v44  ;;  %6614 = vmatprep.subr.bf16.mxu0 %v22123_v53  ;;  %v22168_v44 = vld [vmem:[%s29087_s5 + $0x11ec] ss:$16 sps:$4 sm:$0xff]   ;;  %v22163_v53 = vld [vmem:[%s29087_s5 + $0x11e0] ss:$16 sps:$4 sm:$0xff]  }
 0x536   :  { %7163 = vmatprep.subr.bf16.mxu1 %v22126_v58  ;;  %v22166_v58 = vld [vmem:[%s29087_s5 + $0x11e8] ss:$16 sps:$4 sm:$0xff]  }
 0x538   :  { %6615 = vmatpush1.bf16.msra.mxu0 %v22121_v19  ;;  %v22171_v19 = vld [vmem:[#allocation5 + $0x4] ss:$8 sps:$4 sm:$0xff]  }
 0x539   :  { %7164 = vmatpush1.bf16.msra.mxu1 %v22124_v61  ;;  %6616 = vmatprep.subr.bf16.mxu0 %v22129_v38  ;;  %v22169_v61 = vld [vmem:[#allocation5] ss:$8 sps:$4 sm:$0xff]   ;;  %v22174_v38 = vld [vmem:[#allocation5 + $0x14] ss:$8 sps:$4 sm:$0xff]  }
 0x53a   :  { %7165 = vmatprep.subr.bf16.mxu1 %v22132_v51  ;;  %v22172_v51 = vld [vmem:[#allocation5 + $0x10] ss:$8 sps:$4 sm:$0xff]  }
 0x53c   :  { %6617 = vmatpush1.bf16.msra.mxu0 %v22127_v29  ;;  %v22177_v29 = vld [vmem:[#allocation5 + $0x24] ss:$8 sps:$4 sm:$0xff]  }
 0x53d   :  { %7166 = vmatpush1.bf16.msra.mxu1 %v22130_v41  ;;  %6618 = vmatprep.subr.bf16.mxu0 %v22135_v6  ;;  %v2383_v41 = vld [vmem:[#allocation3 + $0x68] sm:$0x1]  ;;  %v22175_v6 = vld [vmem:[#allocation5 + $0x20] ss:$8 sps:$4 sm:$0xff]  }
 0x53e   :  { %7167 = vmatprep.subr.bf16.mxu1 %v22138_v2  ;;  %v2387_v2 = vpack.c.bf16 %v2383_v41, %v2383_v41  ;;  %v22214_v41 = vld [vmem:[#allocation5 + $0xf0] ss:$8 sps:$4 sm:$0xff]  }
 0x540   :  { %6619 = vmatpush1.bf16.msra.mxu0 %v22133_v54  ;;  %v22180_v54 = vld [vmem:[#allocation5 + $0x34] ss:$8 sps:$4 sm:$0xff]  }
 0x541   :  { %7168 = vmatpush1.bf16.msra.mxu1 %v22136_v62  ;;  %6620 = vmatprep.subr.bf16.mxu0 %v22141_v26  ;;  %v22183_v62 = vld [vmem:[#allocation5 + $0x44] ss:$8 sps:$4 sm:$0xff]   ;;  %v7446_v26 = vld [vmem:[#allocation2 + $0x152] sm:$0xff] }
 0x542   :  { %7169 = vmatprep.subr.bf16.mxu1 %v22144_v33 }
 0x544   :  { %6621 = vmatpush1.bf16.msra.mxu0 %v22139_v30  ;;  %v22181_v30 = vld [vmem:[#allocation5 + $0x40] ss:$8 sps:$4 sm:$0xff]  }
 0x545   :  { %7170 = vmatpush1.bf16.msra.mxu1 %v22142_v23  ;;  %6622 = vmatprep.subr.bf16.mxu0 %v22147_v0  ;;  %v23569_v23 = vld [vmem:[#allocation2 + $0x15a] sm:$0xff] }
 0x546   :  { %7171 = vmatprep.subr.bf16.mxu1 %v22150_v34  ;;  %v7459_v0 = vpack.c.bf16 %v23569_v23, %v7446_v26  ;;  %v22186_v34 = vld [vmem:[#allocation5 + $0x54] ss:$8 sps:$4 sm:$0xff]   ;;  %v23570_v26 = vld [vmem:[#allocation2 + $0x162] sm:$0xff]  ;;  %v22220_v23 = vld [vmem:[#allocation5 + $0x110] ss:$8 sps:$4 sm:$0xff]  }
 0x548   :  { %6623 = vmatpush1.bf16.msra.mxu0 %v22145_v39  ;;  %v22189_v39 = vld [vmem:[#allocation5 + $0x64] ss:$8 sps:$4 sm:$0xff]  }
 0x549   :  { %7172 = vmatpush1.bf16.msra.mxu1 %v22148_v28  ;;  %6624 = vmatprep.subr.bf16.mxu0 %v22153_v42  ;;  %v22187_v28 = vld [vmem:[#allocation5 + $0x60] ss:$8 sps:$4 sm:$0xff]   ;;  %v22192_v42 = vld [vmem:[#allocation5 + $0x74] ss:$8 sps:$4 sm:$0xff]  }
 0x54a   :  { %7173 = vmatprep.subr.bf16.mxu1 %v22156_v4  ;;  %v22190_v4 = vld [vmem:[#allocation5 + $0x70] ss:$8 sps:$4 sm:$0xff]  }
 0x54c   :  { %6625 = vmatpush1.bf16.msra.mxu0 %v22151_v12  ;;  %v22195_v12 = vld [vmem:[#allocation5 + $0x84] ss:$8 sps:$4 sm:$0xff]  }
 0x54d   :  { %7174 = vmatpush1.bf16.msra.mxu1 %v22154_v7  ;;  %6626 = vmatprep.subr.bf16.mxu0 %v22159_v11  ;;  %v22193_v7 = vld [vmem:[#allocation5 + $0x80] ss:$8 sps:$4 sm:$0xff]   ;;  %v22198_v11 = vld [vmem:[#allocation5 + $0x94] ss:$8 sps:$4 sm:$0xff]  }
 0x54e   :  { %7175 = vmatprep.subr.bf16.mxu1 %v22162_v20  ;;  %v22196_v20 = vld [vmem:[#allocation5 + $0x90] ss:$8 sps:$4 sm:$0xff]  }
 0x550   :  { %6627 = vmatpush1.bf16.msra.mxu0 %v22157_v27  ;;  %v22201_v27 = vld [vmem:[#allocation5 + $0xa4] ss:$8 sps:$4 sm:$0xff]  }
 0x551   :  { %7176 = vmatpush1.bf16.msra.mxu1 %v22160_v3  ;;  %6628 = vmatprep.subr.bf16.mxu0 %v22165_v37  ;;  %v22199_v3 = vld [vmem:[#allocation5 + $0xa0] ss:$8 sps:$4 sm:$0xff]   ;;  %v22204_v37 = vld [vmem:[#allocation5 + $0xb4] ss:$8 sps:$4 sm:$0xff]  }
 0x552   :  { %7177 = vmatprep.subr.bf16.mxu1 %v22168_v44  ;;  %v22202_v44 = vld [vmem:[#allocation5 + $0xb0] ss:$8 sps:$4 sm:$0xff]  }
 0x554   :  { %6629 = vmatpush1.bf16.msra.mxu0 %v22163_v53  ;;  %v22207_v53 = vld [vmem:[#allocation5 + $0xc4] ss:$8 sps:$4 sm:$0xff]  }
 0x555   :  { %7178 = vmatpush1.bf16.msra.mxu1 %v22166_v58  ;;  %8444 = vmatprep.subr.bf16.mxu0 %v22171_v19  ;;  %v22205_v58 = vld [vmem:[#allocation5 + $0xc0] ss:$8 sps:$4 sm:$0xff]   ;;  %v22210_v19 = vld [vmem:[#allocation5 + $0xd4] ss:$8 sps:$4 sm:$0xff]  }
 0x557   :  { %6631 = vmatmul.mubr.bf16.vlgmr.msra.gmra.mrb[116].mxu0 %v24560_v10 }
 0x558   :  { %7180 = vmatmul.mubr.bf16.vlgmr.msra.gmra.mrb[28].mxu1 %v24560_v10  ;;  %6640 = vmatprep.mubr.bf16.mxu0 %v24696_v46  ;;  %v22178_v10 = vld [vmem:[#allocation5 + $0x30] ss:$8 sps:$4 sm:$0xff]  }
 0x559   :  { %7189 = vmatprep.mubr.bf16.mxu1 %v24696_v46  ;;  %8445 = vmatpush1.bf16.msra.mxu0 %v22169_v61  ;;  %v2382_v46 = vld [vmem:[#allocation3 + $0x60] sm:$0x1]  ;;  %v22208_v61 = vld [vmem:[#allocation5 + $0xd0] ss:$8 sps:$4 sm:$0xff]  }
 0x55a   :  { %8446 = vmatprep.subr.bf16.mxu0 %v22174_v38  ;;  %v2386_v33 = vpack.c.bf16 %v2382_v46, %v2382_v46  ;;  %v22213_v38 = vld [vmem:[#allocation5 + $0xe4] ss:$8 sps:$4 sm:$0xff]  }
 0x55d   :  { %8447 = vmatpush1.bf16.msra.mxu0 %v22172_v51  ;;  %v22211_v51 = vld [vmem:[#allocation5 + $0xe0] ss:$8 sps:$4 sm:$0xff]  }
 0x55e   :  { %8448 = vmatprep.subr.bf16.mxu0 %v22177_v29  ;;  %v22216_v29 = vld [vmem:[#allocation5 + $0xf4] ss:$8 sps:$4 sm:$0xff]  }
 0x55f   :  { %6641 = vmatmul.mubr.bf16.gmra.mrb[120].mxu0 %v24741_v49 }
 0x560   :  { %7190 = vmatmul.mubr.bf16.gmra.mrb[32].mxu1 %v24741_v49  ;;  %6650 = vmatprep.mubr.bf16.mxu0 %v2387_v2  ;;  %v22184_v49 = vld [vmem:[#allocation5 + $0x50] ss:$8 sps:$4 sm:$0xff]  }
 0x561   :  { %7199 = vmatprep.mubr.bf16.mxu1 %v2387_v2  ;;  %8449 = vmatpush1.bf16.msra.mxu0 %v22175_v6  ;;  %v22219_v6 = vld [vmem:[#allocation5 + $0x104] ss:$8 sps:$4 sm:$0xff]  }
 0x562   :  { %8450 = vmatprep.subr.bf16.mxu0 %v22180_v54  ;;  %v7426_v2 = vld [vmem:[#allocation2 + $0xe1] sm:$0xff]  ;;  %v26353_v54 = vld [vmem:[#allocation2 + $0xe9] sm:$0xff] }
 0x563   :  { %v7439_v46 = vpack.c.bf16 %v26353_v54, %v7426_v2 }
 0x565   :  { %8451 = vmatpush1.bf16.msra.mxu0 %v22178_v10  ;;  %v22217_v10 = vld [vmem:[#allocation5 + $0x100] ss:$8 sps:$4 sm:$0xff]  }
 0x566   :  { %8452 = vmatprep.subr.bf16.mxu0 %v22183_v62  ;;  %v22222_v62 = vld [vmem:[#allocation5 + $0x114] ss:$8 sps:$4 sm:$0xff]  }
 0x567   :  { %6651 = vmatmul.mubr.bf16.gmra.mrb[124].mxu0 %v2386_v33 }
 0x568   :  { %7200 = vmatmul.mubr.bf16.gmra.mrb[36].mxu1 %v2386_v33  ;;  %8476 = vmatprep.mubr.bf16.mxu0 %v7459_v0  ;;  %v23571_v33 = vld [vmem:[#allocation2 + $0x16a] sm:$0xff] }
 0x569   :  { %8453 = vmatpush1.bf16.msra.mxu0 %v22181_v30  ;;  %v7460_v30 = vpack.c.bf16 %v23571_v33, %v23570_v26  ;;  %v22225_v0 = vld [vmem:[#allocation5 + $0x124] ss:$8 sps:$4 sm:$0xff]   ;;  %v22238_v33 = vld [vmem:[#allocation5 + $0x170] ss:$8 sps:$4 sm:$0xff]  }
 0x56a   :  { %8454 = vmatprep.subr.bf16.mxu0 %v22186_v34  ;;  %v26356_v34 = vld [vmem:[#allocation2 + $0xf1] sm:$0xff] }
 0x56d   :  { %8455 = vmatpush1.bf16.msra.mxu0 %v22184_v49  ;;  %v22223_v49 = vld [vmem:[#allocation5 + $0x120] ss:$8 sps:$4 sm:$0xff]  }
 0x56e   :  { %8456 = vmatprep.subr.bf16.mxu0 %v22189_v39  ;;  %v23572_v39 = vld [vmem:[#allocation2 + $0xf9] sm:$0xff] }
 0x571   :  { %8457 = vmatpush1.bf16.msra.mxu0 %v22187_v28  ;;  %v26359_v28 = vpack.c.bf16 %v23572_v39, %v26356_v34  ;;  %v23584_v39 = vld [vmem:[#allocation2 + $0x129] sm:$0xff] }
 0x572   :  { %8458 = vmatprep.subr.bf16.mxu0 %v22192_v42  ;;  %v22228_v42 = vld [vmem:[#allocation5 + $0x134] ss:$8 sps:$4 sm:$0xff]  }
 0x575   :  { %8459 = vmatpush1.bf16.msra.mxu0 %v22190_v4  ;;  %v23573_v4 = vld [vmem:[#allocation2 + $0x172] sm:$0xff] }
 0x576   :  { %8460 = vmatprep.subr.bf16.mxu0 %v22195_v12  ;;  %v23574_v12 = vld [vmem:[#allocation2 + $0x17a] sm:$0xff] }
 0x579   :  { %8461 = vmatpush1.bf16.msra.mxu0 %v22193_v7  ;;  %v7461_v7 = vpack.c.bf16 %v23574_v12, %v23573_v4  ;;  %v22246_v4 = vld [vmem:[#allocation5 + $0x194] ss:$8 sps:$4 sm:$0xff]   ;;  %v23585_v12 = vld [vmem:[#allocation2 + $0x1a2] sm:$0xff] }
 0x57a   :  { %8462 = vmatprep.subr.bf16.mxu0 %v22198_v11  ;;  %v22226_v11 = vld [vmem:[#allocation5 + $0x130] ss:$8 sps:$4 sm:$0xff]  }
 0x57d   :  { %8463 = vmatpush1.bf16.msra.mxu0 %v22196_v20  ;;  %v22231_v20 = vld [vmem:[#allocation5 + $0x144] ss:$8 sps:$4 sm:$0xff]  }
 0x57e   :  { %8464 = vmatprep.subr.bf16.mxu0 %v22201_v27  ;;  %v22229_v27 = vld [vmem:[#allocation5 + $0x140] ss:$8 sps:$4 sm:$0xff]  }
 0x581   :  { %8465 = vmatpush1.bf16.msra.mxu0 %v22199_v3  ;;  %v23575_v3 = vld [vmem:[#allocation2 + $0x101] sm:$0xff] }
 0x582   :  { %8466 = vmatprep.subr.bf16.mxu0 %v22204_v37  ;;  %v23576_v37 = vld [vmem:[#allocation2 + $0x109] sm:$0xff] }
 0x585   :  { %8467 = vmatpush1.bf16.msra.mxu0 %v22202_v44  ;;  %v26362_v44 = vpack.c.bf16 %v23576_v37, %v23575_v3  ;;  %v7458_v3 = vld [vmem:[#allocation2 + $0x1b2] sm:$0x1]  ;;  %v22247_v37 = vld [vmem:[#allocation5 + $0x1a0] ss:$8 sps:$4 sm:$0xff]  }
 0x586   :  { %8468 = vmatprep.subr.bf16.mxu0 %v22207_v53  ;;  %v22234_v53 = vld [vmem:[#allocation5 + $0x154] ss:$8 sps:$4 sm:$0xff]  }
 0x589   :  { %8469 = vmatpush1.bf16.msra.mxu0 %v22205_v58  ;;  %v23577_v58 = vld [vmem:[#allocation2 + $0x182] sm:$0xff] }
 0x58a   :  { %8470 = vmatprep.subr.bf16.mxu0 %v22210_v19  ;;  %v23578_v19 = vld [vmem:[#allocation2 + $0x18a] sm:$0xff] }
 0x58d   :  { %8471 = vmatpush1.bf16.msra.mxu0 %v22208_v61  ;;  %v7462_v61 = vpack.c.bf16 %v23578_v19, %v23577_v58  ;;  %v22252_v19 = vld [vmem:[#allocation5 + $0x1b4] ss:$8 sps:$4 sm:$0xff]  }
 0x58e   :  { %8472 = vmatprep.subr.bf16.mxu0 %v22213_v38  ;;  %v22232_v38 = vld [vmem:[#allocation5 + $0x150] ss:$8 sps:$4 sm:$0xff]  }
 0x591   :  { %8473 = vmatpush1.bf16.msra.mxu0 %v22211_v51  ;;  %v22237_v51 = vld [vmem:[#allocation5 + $0x164] ss:$8 sps:$4 sm:$0xff]  }
 0x592   :  { %8474 = vmatprep.subr.bf16.mxu0 %v22216_v29  ;;  %v22235_v29 = vld [vmem:[#allocation5 + $0x160] ss:$8 sps:$4 sm:$0xff]  }
 0x595   :  { %8475 = vmatpush1.bf16.msra.mxu0 %v22214_v41  ;;  %v23579_v41 = vld [vmem:[#allocation2 + $0x111] sm:$0xff] }
 0x596   :  { %8545 = vmatprep.subr.bf16.mxu0 %v22219_v6  ;;  %v23580_v6 = vld [vmem:[#allocation2 + $0x119] sm:$0xff] }
 0x597   :  { %v26365_v2 = vpack.c.bf16 %v23580_v6, %v23579_v41  ;;  %v7486_v41 = vld [vmem:[#allocation2 + $0x159] sm:$0xff] }
 0x598   :  { %8477 = vmatmul.mubr.bf16.vlgmr.msra.gmra.mrb[128].mxu0 %v7439_v46  ;;  %v23581_v46 = vld [vmem:[#allocation2 + $0x192] sm:$0xff]  ;;  %v22253_v6 = vld [vmem:[#allocation5 + $0x1c0] ss:$8 sps:$4 sm:$0xff]  }
 0x599   :  { %8486 = vmatprep.mubr.bf16.mxu0 %v7460_v30  ;;  %8546 = vmatpush1.bf16.msra.mxu0 %v22217_v10  ;;  %v22240_v10 = vld [vmem:[#allocation5 + $0x174] ss:$8 sps:$4 sm:$0xff]   ;;  %v22243_v30 = vld [vmem:[#allocation5 + $0x184] ss:$8 sps:$4 sm:$0xff]  }
 0x59a   :  { %8547 = vmatprep.subr.bf16.mxu0 %v22222_v62  ;;  %v23582_v62 = vld [vmem:[#allocation2 + $0x19a] sm:$0xff] }
 0x59b   :  { %v7463_v26 = vpack.c.bf16 %v23582_v62, %v23581_v46  ;;  %v22258_v46 = vld [vmem:[#allocation5 + $0x1d4] ss:$8 sps:$4 sm:$0xff]   ;;  %v23587_v62 = vld [vmem:[#allocation2 + $0x161] sm:$0xff] }
 0x59d   :  { %8548 = vmatpush1.bf16.msra.mxu0 %v22220_v23  ;;  %v26368_v23 = vld [vmem:[#allocation2 + $0x1aa] sm:$0xff] }
 0x59e   :  { %8549 = vmatprep.subr.bf16.mxu0 %v22225_v0  ;;  %v22241_v0 = vld [vmem:[#allocation5 + $0x180] ss:$8 sps:$4 sm:$0xff]  }
 0x5a0   :  { %8487 = vmatmul.mubr.bf16.gmra.mrb[132].mxu0 %v26359_v28 }
 0x5a1   :  { %8496 = vmatprep.mubr.bf16.mxu0 %v7461_v7  ;;  %8550 = vmatpush1.bf16.msra.mxu0 %v22223_v49  ;;  %v23583_v49 = vld [vmem:[#allocation2 + $0x121] sm:$0xff]  ;;  %v7464_v7 = vpack.c.bf16 %v26368_v23, %v23585_v12 }
 0x5a2   :  { %8551 = vmatprep.subr.bf16.mxu0 %v22228_v42  ;;  %v26370_v42 = vpack.c.bf16 %v23584_v39, %v23583_v49  ;;  %v22264_v49 = vld [vmem:[#allocation5 + $0x1f4] ss:$8 sps:$4 sm:$0xff]   ;;  %v22262_v39 = vld [vmem:[#allocation5 + $0x1f0] ss:$8 sps:$4 sm:$0xff]   ;;  %v7466_v12 = vld [vmem:[#allocation2 + $0xe2] sm:$0xff] }
 0x5a5   :  { %8552 = vmatpush1.bf16.msra.mxu0 %v22226_v11  ;;  %v22244_v11 = vld [vmem:[#allocation5 + $0x190] ss:$8 sps:$4 sm:$0xff]  }
 0x5a6   :  { %8553 = vmatprep.subr.bf16.mxu0 %v22231_v20  ;;  %v22249_v20 = vld [vmem:[#allocation5 + $0x1a4] ss:$8 sps:$4 sm:$0xff]  }
 0x5a8   :  { %8497 = vmatmul.mubr.bf16.gmra.mrb[136].mxu0 %v26362_v44 }
 0x5a9   :  { %8506 = vmatprep.mubr.bf16.mxu0 %v7462_v61  ;;  %8554 = vmatpush1.bf16.msra.mxu0 %v22229_v27  ;;  %v26374_v27 = vld [vmem:[#allocation2 + $0x139] sm:$0xff]  ;;  %v7465_v61 = vpack.c.bf16 %v7458_v3, %v7458_v3 }
 0x5aa   :  { %8555 = vmatprep.subr.bf16.mxu0 %v22234_v53  ;;  %v23586_v53 = vld [vmem:[#allocation2 + $0x131] sm:$0xff] }
 0x5ab   :  { %v26377_v58 = vpack.c.bf16 %v26374_v27, %v23586_v53  ;;  %v22270_v3 = vld [vmem:[#allocation5 + $0x214] ss:$8 sps:$4 sm:$0xff]  }
 0x5ac   :  { %v23589_v53 = vld [vmem:[#allocation2 + $0x171] sm:$0xff] }
 0x5ad   :  { %8556 = vmatpush1.bf16.msra.mxu0 %v22232_v38  ;;  %v22250_v38 = vld [vmem:[#allocation5 + $0x1b0] ss:$8 sps:$4 sm:$0xff]  }
 0x5ae   :  { %8557 = vmatprep.subr.bf16.mxu0 %v22237_v51  ;;  %v22255_v51 = vld [vmem:[#allocation5 + $0x1c4] ss:$8 sps:$4 sm:$0xff]  }
 0x5b0   :  { %8507 = vmatmul.mubr.bf16.gmra.mrb[140].mxu0 %v26365_v2 }
 0x5b1   :  { %8516 = vmatprep.mubr.bf16.mxu0 %v7463_v26  ;;  %8558 = vmatpush1.bf16.msra.mxu0 %v22235_v29  ;;  %v7438_v29 = vld [vmem:[#allocation2 + $0x141] sm:$0x1]  ;;  %v7499_v26 = vpack.c.bf16 %v23587_v62, %v7486_v41 }
 0x5b2   :  { %8559 = vmatprep.subr.bf16.mxu0 %v22240_v10  ;;  %v7445_v10 = vpack.c.bf16 %v7438_v29, %v7438_v29  ;;  %v7469_v29 = vld [vmem:[#allocation2 + $0xfa] sm:$0xff] }
 0x5b3   :  { %v22271_v41 = vld [vmem:[#allocation5 + $0x220] ss:$8 sps:$4 sm:$0xff]  }
 0x5b4   :  { %v23591_v62 = vld [vmem:[#allocation2 + $0x181] sm:$0xff] }
 0x5b5   :  { %8560 = vmatpush1.bf16.msra.mxu0 %v22238_v33  ;;  %v22256_v33 = vld [vmem:[#allocation5 + $0x1d0] ss:$8 sps:$4 sm:$0xff]  }
 0x5b6   :  { %8561 = vmatprep.subr.bf16.mxu0 %v22243_v30  ;;  %v22261_v30 = vld [vmem:[#allocation5 + $0x1e4] ss:$8 sps:$4 sm:$0xff]  }
 0x5b8   :  { %8517 = vmatmul.mubr.bf16.gmra.mrb[144].mxu0 %v26370_v42 }
 0x5b9   :  { %8526 = vmatprep.mubr.bf16.mxu0 %v7464_v7  ;;  %8562 = vmatpush1.bf16.msra.mxu0 %v22241_v0  ;;  %v22259_v0 = vld [vmem:[#allocation5 + $0x1e0] ss:$8 sps:$4 sm:$0xff]  }
 0x5ba   :  { %8563 = vmatprep.subr.bf16.mxu0 %v22246_v4  ;;  %v22267_v4 = vld [vmem:[#allocation5 + $0x204] ss:$8 sps:$4 sm:$0xff]  }
 0x5bb   :  { %v7467_v7 = vld [vmem:[#allocation2 + $0xea] sm:$0xff] }
 0x5bd   :  { %8564 = vmatpush1.bf16.msra.mxu0 %v22244_v11  ;;  %v22265_v11 = vld [vmem:[#allocation5 + $0x200] ss:$8 sps:$4 sm:$0xff]  }
 0x5be   :  { %8565 = vmatprep.subr.bf16.mxu0 %v22249_v20  ;;  %v7479_v20 = vpack.c.bf16 %v7467_v7, %v7466_v12  ;;  %v22282_v12 = vld [vmem:[#allocation5 + $0x254] ss:$8 sps:$4 sm:$0xff]   ;;  %v23592_v7 = vld [vmem:[#allocation2 + $0x189] sm:$0xff] }
 0x5c0   :  { %8527 = vmatmul.mubr.bf16.gmra.mrb[148].mxu0 %v26377_v58 }
 0x5c1   :  { %8536 = vmatprep.mubr.bf16.mxu0 %v7465_v61  ;;  %8566 = vmatpush1.bf16.msra.mxu0 %v22247_v37  ;;  %v23588_v37 = vld [vmem:[#allocation2 + $0x169] sm:$0xff] }
 0x5c2   :  { %8567 = vmatprep.subr.bf16.mxu0 %v22252_v19  ;;  %v7500_v19 = vpack.c.bf16 %v23589_v53, %v23588_v37  ;;  %v22268_v61 = vld [vmem:[#allocation5 + $0x210] ss:$8 sps:$4 sm:$0xff]   ;;  %v22285_v37 = vld [vmem:[#allocation5 + $0x264] ss:$8 sps:$4 sm:$0xff]  }
 0x5c3   :  { %v7472_v53 = vld [vmem:[#allocation2 + $0x112] sm:$0xff] }
 0x5c5   :  { %8568 = vmatpush1.bf16.msra.mxu0 %v22250_v38  ;;  %v22273_v38 = vld [vmem:[#allocation5 + $0x224] ss:$8 sps:$4 sm:$0xff]  }
 0x5c6   :  { %8569 = vmatprep.subr.bf16.mxu0 %v22255_v51  ;;  %v7468_v51 = vld [vmem:[#allocation2 + $0xf2] sm:$0xff] }
 0x5c8   :  { %8537 = vmatmul.mubr.bf16.gmra.mrb[152].mxu0 %v7445_v10  ;;  %v22276_v10 = vld [vmem:[#allocation5 + $0x234] ss:$8 sps:$4 sm:$0xff]  }
 0x5c9   :  { %8570 = vmatpush1.bf16.msra.mxu0 %v22253_v6  ;;  %8577 = vmatprep.mubr.bf16.mxu0 %v7499_v26  ;;  %v7480_v6 = vpack.c.bf16 %v7469_v29, %v7468_v51  ;;  %v22288_v51 = vld [vmem:[#allocation5 + $0x274] ss:$8 sps:$4 sm:$0xff]  }
 0x5ca   :  { %8571 = vmatprep.subr.bf16.mxu0 %v22258_v46  ;;  %v23590_v46 = vld [vmem:[#allocation2 + $0x179] sm:$0xff] }
 0x5cb   :  { %v7501_v26 = vpack.c.bf16 %v23591_v62, %v23590_v46  ;;  %v23594_v29 = vld [vmem:[#allocation2 + $0x199] sm:$0xff]  ;;  %v22291_v46 = vld [vmem:[#allocation5 + $0x284] ss:$8 sps:$4 sm:$0xff]  }
 0x5cc   :  { %v7474_v62 = vld [vmem:[#allocation2 + $0x122] sm:$0xff] }
 0x5cd   :  { %8572 = vmatpush1.bf16.msra.mxu0 %v22256_v33  ;;  %v22274_v33 = vld [vmem:[#allocation5 + $0x230] ss:$8 sps:$4 sm:$0xff]  }
 0x5ce   :  { %8573 = vmatprep.subr.bf16.mxu0 %v22261_v30  ;;  %v22279_v30 = vld [vmem:[#allocation5 + $0x244] ss:$8 sps:$4 sm:$0xff]  }
 0x5d1   :  { %8574 = vmatpush1.bf16.msra.mxu0 %v22259_v0  ;;  %v7470_v0 = vld [vmem:[#allocation2 + $0x102] sm:$0xff] }
 0x5d2   :  { %8575 = vmatprep.subr.bf16.mxu0 %v22264_v49  ;;  %v7471_v49 = vld [vmem:[#allocation2 + $0x10a] sm:$0xff] }
 0x5d5   :  { %8576 = vmatpush1.bf16.msra.mxu0 %v22262_v39  ;;  %v22277_v39 = vld [vmem:[#allocation5 + $0x240] ss:$8 sps:$4 sm:$0xff]  }
 0x5d6   :  { %8646 = vmatprep.subr.bf16.mxu0 %v22267_v4  ;;  %v7481_v4 = vpack.c.bf16 %v7471_v49, %v7470_v0  ;;  %v22294_v49 = vld [vmem:[#allocation5 + $0x294] ss:$8 sps:$4 sm:$0xff]  }
 0x5d8   :  { %8578 = vmatmul.mubr.bf16.vlgmr.msra.gmra.mrb[128].mxu0 %v7479_v20 }
 0x5d9   :  { %8587 = vmatprep.mubr.bf16.mxu0 %v7500_v19  ;;  %8647 = vmatpush1.bf16.msra.mxu0 %v22265_v11  ;;  %v23593_v11 = vld [vmem:[#allocation2 + $0x191] sm:$0xff]  ;;  %v7473_v19 = vld [vmem:[#allocation2 + $0x11a] sm:$0xff] }
 0x5da   :  { %8648 = vmatprep.subr.bf16.mxu0 %v22270_v3  ;;  %v7502_v20 = vpack.c.bf16 %v23593_v11, %v23592_v7  ;;  %v22280_v3 = vld [vmem:[#allocation5 + $0x250] ss:$8 sps:$4 sm:$0xff]   ;;  %v22297_v7 = vld [vmem:[#allocation5 + $0x2a4] ss:$8 sps:$4 sm:$0xff]  }
 0x5db   :  { %v7476_v11 = vld [vmem:[#allocation2 + $0x132] sm:$0xff] }
 0x5dd   :  { %8649 = vmatpush1.bf16.msra.mxu0 %v22268_v61  ;;  %v22283_v61 = vld [vmem:[#allocation5 + $0x260] ss:$8 sps:$4 sm:$0xff]  }
 0x5de   :  { %8650 = vmatprep.subr.bf16.mxu0 %v22273_v38  ;;  %v7482_v38 = vpack.c.bf16 %v7473_v19, %v7472_v53  ;;  %v22300_v19 = vld [vmem:[#allocation5 + $0x2b4] ss:$8 sps:$4 sm:$0xff]  }
 0x5e0   :  { %8588 = vmatmul.mubr.bf16.gmra.mrb[132].mxu0 %v7480_v6 }
 0x5e1   :  { %8597 = vmatprep.mubr.bf16.mxu0 %v7501_v26  ;;  %8651 = vmatpush1.bf16.msra.mxu0 %v22271_v41  ;;  %v23595_v41 = vld [vmem:[#allocation2 + $0x1a1] sm:$0xff]  ;;  %v7475_v26 = vld [vmem:[#allocation2 + $0x12a] sm:$0xff] }
 0x5e2   :  { %8652 = vmatprep.subr.bf16.mxu0 %v22276_v10  ;;  %v7503_v6 = vpack.c.bf16 %v23595_v41, %v23594_v29  ;;  %v22286_v10 = vld [vmem:[#allocation5 + $0x270] ss:$8 sps:$4 sm:$0xff]   ;;  %v7483_v0 = vpack.c.bf16 %v7475_v26, %v7474_v62  ;;  %v7478_v29 = vld [vmem:[#allocation2 + $0x142] sm:$0x1]  ;;  %v22309_v26 = vld [vmem:[#allocation5 + $0x2e4] ss:$8 sps:$4 sm:$0xff]  }
 0x5e3   :  { %v22301_v41 = vld [vmem:[#allocation5 + $0x2c0] ss:$8 sps:$4 sm:$0xff]   ;;  %v22304_v62 = vld [vmem:[#allocation5 + $0x2d0] ss:$8 sps:$4 sm:$0xff]  }
 0x5e5   :  { %8653 = vmatpush1.bf16.msra.mxu0 %v22274_v33  ;;  %v26380_v33 = vld [vmem:[#allocation2 + $0x1b1] sm:$0xff] }
 0x5e6   :  { %8654 = vmatprep.subr.bf16.mxu0 %v22279_v30  ;;  %v22289_v30 = vld [vmem:[#allocation5 + $0x280] ss:$8 sps:$4 sm:$0xff]  }
 0x5e8   :  { %8598 = vmatmul.mubr.bf16.gmra.mrb[136].mxu0 %v7481_v4 }
 0x5e9   :  { %8607 = vmatprep.mubr.bf16.mxu0 %v7502_v20  ;;  %8655 = vmatpush1.bf16.msra.mxu0 %v22277_v39  ;;  %v23596_v39 = vld [vmem:[#allocation2 + $0x1a9] sm:$0xff]  ;;  %v7477_v20 = vld [vmem:[#allocation2 + $0x13a] sm:$0xff] }
 0x5ea   :  { %8656 = vmatprep.subr.bf16.mxu0 %v22282_v12  ;;  %v7504_v4 = vpack.c.bf16 %v26380_v33, %v23596_v39  ;;  %v22292_v12 = vld [vmem:[#allocation5 + $0x290] ss:$8 sps:$4 sm:$0xff]   ;;  %v7484_v53 = vpack.c.bf16 %v7477_v20, %v7476_v11  ;;  %v22315_v39 = vld [vmem:[#allocation5 + $0x304] ss:$8 sps:$4 sm:$0xff]   ;;  %v22319_v20 = vld [vmem:[#allocation5 + $0x320] ss:$8 sps:$4 sm:$0xff]  }
 0x5eb   :  { %v22321_v11 = vld [vmem:[#allocation5 + $0x324] ss:$8 sps:$4 sm:$0xff]  }
 0x5ed   :  { %8657 = vmatpush1.bf16.msra.mxu0 %v22280_v3  ;;  %v7498_v3 = vld [vmem:[#allocation2 + $0x1b9] sm:$0x1] }
 0x5ee   :  { %8658 = vmatprep.subr.bf16.mxu0 %v22285_v37  ;;  %v22295_v37 = vld [vmem:[#allocation5 + $0x2a0] ss:$8 sps:$4 sm:$0xff]  }
 0x5f0   :  { %8608 = vmatmul.mubr.bf16.gmra.mrb[140].mxu0 %v7482_v38  ;;  %v22298_v38 = vld [vmem:[#allocation5 + $0x2b0] ss:$8 sps:$4 sm:$0xff]  }
 0x5f1   :  { %8617 = vmatprep.mubr.bf16.mxu0 %v7503_v6  ;;  %8659 = vmatpush1.bf16.msra.mxu0 %v22283_v61  ;;  %v7505_v61 = vpack.c.bf16 %v7498_v3, %v7498_v3  ;;  %v7485_v6 = vpack.c.bf16 %v7478_v29, %v7478_v29  ;;  %v22324_v3 = vld [vmem:[#allocation5 + $0x334] ss:$8 sps:$4 sm:$0xff]  }
 0x5f2   :  { %8660 = vmatprep.subr.bf16.mxu0 %v22288_v51  ;;  %v22303_v51 = vld [vmem:[#allocation5 + $0x2c4] ss:$8 sps:$4 sm:$0xff]  }
 0x5f5   :  { %8661 = vmatpush1.bf16.msra.mxu0 %v22286_v10  ;;  %v22306_v10 = vld [vmem:[#allocation5 + $0x2d4] ss:$8 sps:$4 sm:$0xff]  }
 0x5f6   :  { %8662 = vmatprep.subr.bf16.mxu0 %v22291_v46  ;;  %v29145_v46 = vpack.c.bf16 %v24916_v17, %v24911_v47  ;;  %v29146_v47 = vpack.c.bf16 %v24951_v5, %v24943_v57  ;;  %v22316_v17 = vld [vmem:[#allocation5 + $0x310] ss:$8 sps:$4 sm:$0xff]   ;;  %v22327_v57 = vld [vmem:[#allocation5 + $0x344] ss:$8 sps:$4 sm:$0xff]   ;;  %v3208_v5 = vld [vmem:[%s29088_s6] sm:$0xf] }
 0x5f7   :  { %v26413_v29 = vrot.slane %v3208_v5, %v24427_v48 }
 0x5f8   :  { %8618 = vmatmul.mubr.bf16.gmra.mrb[144].mxu0 %v7483_v0  ;;  %v22312_v0 = vld [vmem:[#allocation5 + $0x2f4] ss:$8 sps:$4 sm:$0xff]  }
 0x5f9   :  { %8627 = vmatprep.mubr.bf16.mxu0 %v7504_v4  ;;  %8663 = vmatpush1.bf16.msra.mxu0 %v22289_v30  ;;  %v22307_v30 = vld [vmem:[#allocation5 + $0x2e0] ss:$8 sps:$4 sm:$0xff]  }
 0x5fa   :  { %8664 = vmatprep.subr.bf16.mxu0 %v22294_v49  ;;  %v22310_v49 = vld [vmem:[#allocation5 + $0x2f0] ss:$8 sps:$4 sm:$0xff]   ;;  %v22313_v4 = vld [vmem:[#allocation5 + $0x300] ss:$8 sps:$4 sm:$0xff]  }
 0x5fd   :  { %8665 = vmatpush1.bf16.msra.mxu0 %v22292_v12  ;;  %v7508_v12 = vpack.c.bf16 %v26356_v34, %v26353_v54  ;;  %v29148_v54 = vpack.c.bf16 %v24987_v60, %v24985_v25  ;;  %v22322_v34 = vld [vmem:[#allocation5 + $0x330] ss:$8 sps:$4 sm:$0xff]   ;;  %v26403_v25 = vrot.slane %v3208_v5, %v24424_v36  ;;  %v29149_v60 = vpack.c.bf16 %v24802_v35, %v24798_v63  ;;  %v22333_v35 = vld [vmem:[#allocation5 + $0x364] ss:$8 sps:$4 sm:$0xff]  }
 0x5fe   :  { %8666 = vmatprep.subr.bf16.mxu0 %v22297_v7  ;;  %v22318_v7 = vld [vmem:[#allocation5 + $0x314] ss:$8 sps:$4 sm:$0xff]  }
 0x600   :  { %8628 = vmatmul.mubr.bf16.gmra.mrb[148].mxu0 %v7484_v53  ;;  %v29106_v53 = vsub.s32 2, %v24418_v9 }
 0x601   :  { %8637 = vmatprep.mubr.bf16.mxu0 %v7505_v61  ;;  %8667 = vmatpush1.bf16.msra.mxu0 %v22295_v37  ;;  %v29147_v37 = vpack.c.bf16 %v24796_v50, %v24794_v55  ;;  %v23678_v61 = vmov 1966171168   ;;  %v29105_v55 = vsub.s32 3, %v24418_v9  ;;  %v22330_v50 = vld [vmem:[#allocation5 + $0x354] ss:$8 sps:$4 sm:$0xff]  }
 0x602   :  { %8668 = vmatprep.subr.bf16.mxu0 %v22300_v19  ;;  %v22325_v19 = vld [vmem:[#allocation5 + $0x340] ss:$8 sps:$4 sm:$0xff]  }
 0x605   :  { %8669 = vmatpush1.bf16.msra.mxu0 %v22298_v38  ;;  %v7235_v38 = vunpack.c.l.s4 %v23678_v61 }
 0x606   :  { %8670 = vmatprep.subr.bf16.mxu0 %v22303_v51  ;;  %v26410_v51 = vrot.slane %v3208_v5, %v29106_v53 }
 0x608   :  { %8638 = vmatmul.mubr.bf16.gmra.mrb[152].mxu0 %v7485_v6  ;;  %v7236_v6 = vunpack.c.0.s8 %v7235_v38  ;;  %v7515_v38 = vld [vmem:[#allocation2 + $0x1b2] sm:$0xff] }
 0x609   :  { %8671 = vmatpush1.bf16.msra.mxu0 %v22301_v41  ;;  %8678 = vmatprep.mubr.bf16.mxu0 %v29145_v46  ;;  %v29150_v41 = vpack.c.bf16 %v25023_v52, %v25021_v32  ;;  %v22328_v46 = vld [vmem:[#allocation5 + $0x350] ss:$8 sps:$4 sm:$0xff]  }
 0x60a   :  { %8672 = vmatprep.subr.bf16.mxu0 %v22306_v10  ;;  %v26420_v10 = vrot.slane %v3208_v5, %v29105_v55 }
 0x60d   :  { %8673 = vmatpush1.bf16.msra.mxu0 %v22304_v62 }
 0x60e   :  { %8674 = vmatprep.subr.bf16.mxu0 %v22309_v26 }
 0x611   :  { %8675 = vmatpush1.bf16.msra.mxu0 %v22307_v30 }
 0x612   :  { %8676 = vmatprep.subr.bf16.mxu0 %v22312_v0 }
 0x615   :  { %8677 = vmatpush1.bf16.msra.mxu0 %v22310_v49 }
 0x616   :  { %8747 = vmatprep.subr.bf16.mxu0 %v22315_v39 }
 0x618   :  { %8679 = vmatmul.mubr.bf16.vlgmr.msra.gmra.mrb[128].mxu0 %v7508_v12 }
 0x619   :  { %8688 = vmatprep.mubr.bf16.mxu0 %v29146_v47  ;;  %8748 = vmatpush1.bf16.msra.mxu0 %v22313_v4  ;;  %v26426_v4 = vsub.s32 %v7236_v6, %v24418_v9 }
 0x61a   :  { %8749 = vmatprep.subr.bf16.mxu0 %v22318_v7 }
 0x61b   :  { %29151 = vst [vmem:[#allocation17_spill] sm:$0xff] %v26426_v4 }
 0x61d   :  { %8750 = vmatpush1.bf16.msra.mxu0 %v22316_v17 }
 0x61e   :  { %8751 = vmatprep.subr.bf16.mxu0 %v22321_v11  ;;  %v22331_v11 = vld [vmem:[#allocation5 + $0x360] ss:$8 sps:$4 sm:$0xff]  }
 0x620   :  { %8689 = vmatmul.mubr.bf16.gmra.mrb[132].mxu0 %v29147_v37 }
 0x621   :  { %8698 = vmatprep.mubr.bf16.mxu0 %v29148_v54  ;;  %8752 = vmatpush1.bf16.msra.mxu0 %v22319_v20 }
 0x622   :  { %8753 = vmatprep.subr.bf16.mxu0 %v22324_v3 }
 0x625   :  { %8754 = vmatpush1.bf16.msra.mxu0 %v22322_v34 }
 0x626   :  { %8755 = vmatprep.subr.bf16.mxu0 %v22327_v57  ;;  %v22336_v57 = vld [vmem:[#allocation5 + $0x374] ss:$8 sps:$4 sm:$0xff]  }
 0x628   :  { %8699 = vmatmul.mubr.bf16.gmra.mrb[136].mxu0 %v29149_v60 }
 0x629   :  { %8708 = vmatprep.mubr.bf16.mxu0 %v29150_v41  ;;  %8756 = vmatpush1.bf16.msra.mxu0 %v22325_v19 }
 0x62a   :  { %v6632_v63 = vpop.f32.mrb[116].mxu0  ;;  %8757 = vmatprep.subr.bf16.mxu0 %v22330_v50 }
 0x62b   :  { %v20366_v62 = vadd.f32 %v6632_v63, %v26403_v25  ;;  %v7181_v26 = vpop.f32.mrb[28].mxu1  ;;  %v6634_v30 = vpop.f32.mrb[117].mxu0 }
 0x62c   :  { %v20376_v0 = vadd.f32 %v7181_v26, %v26410_v51  ;;  %v20367_v49 = vadd.f32 %v6634_v30, %v26413_v29  ;;  %v7183_v32 = vpop.f32.mrb[29].mxu1  ;;  %v6636_v52 = vpop.f32.mrb[118].mxu0  ;;  %v22334_v30 = vld [vmem:[#allocation5 + $0x370] ss:$8 sps:$4 sm:$0xff]  }
 0x62d   :  { %v7208_v39 = vmax.f32 %v20366_v62, 0.0  ;;  %v20377_v12 = vadd.f32 %v7183_v32, %v26420_v10  ;;  %v20368_v7 = vadd.f32 %v6636_v52, %v26403_v25  ;;  %v7185_v47 = vpop.f32.mrb[30].mxu1  ;;  %8758 = vmatpush1.bf16.msra.mxu0 %v22328_v46  ;;  %v6638_v17 = vpop.f32.mrb[119].mxu0  ;;  %v29152_v46 = vpack.c.bf16 %v24806_v16, %v24804_v45 }
 0x62e   :  { %v7210_v20 = vmax.f32 %v20376_v0, 0.0  ;;  %v7209_v3 = vmax.f32 %v20367_v49, 0.0  ;;  %v20378_v37 = vadd.f32 %v7185_v47, %v26410_v51  ;;  %v20369_v54 = vadd.f32 %v6638_v17, %v26413_v29  ;;  %v7187_v34 = vpop.f32.mrb[31].mxu1  ;;  %8759 = vmatprep.subr.bf16.mxu0 %v22333_v35 }
 0x62f   :  { %v7211_v5 = vmax.f32 %v20377_v12, 0.0  ;;  %v7212_v19 = vmax.f32 %v20368_v7, 0.0  ;;  %v20379_v61 = vadd.f32 %v7187_v34, %v26420_v10  ;;  %v29153_v35 = vpack.c.bf16 %v25059_v59, %v25057_v15 }
 0x630   :  { %v7232_v50 = vcombine.low %v7208_v39, %v7209_v3  ;;  %v7266_v60 = vcombine.high %v7208_v39, %v7209_v3  ;;  %v7214_v41 = vmax.f32 %v20378_v37, 0.0  ;;  %v7213_v6 = vmax.f32 %v20369_v54, 0.0  ;;  %8709 = vmatmul.mubr.bf16.gmra.mrb[140].mxu0 %v29152_v46  ;;  %v22339_v39 = vld [vmem:[#allocation5 + $0x384] ss:$8 sps:$4 sm:$0xff]  }
 0x631   :  { %v7233_v63 = vcombine.low %v7210_v20, %v7211_v5  ;;  %v7267_v62 = vcombine.high %v7210_v20, %v7211_v5  ;;  %v7215_v26 = vmax.f32 %v20379_v61, 0.0  ;;  %8718 = vmatprep.mubr.bf16.mxu0 %v29153_v35  ;;  %8760 = vmatpush1.bf16.msra.mxu0 %v22331_v11  ;;  %v7522_v45 = vpack.c.bf16 %v7515_v38, %v26368_v23 }
 0x632   :  { %v7240_v0 = vrot.slane %v7232_v50, %v26426_v4  ;;  %v7274_v49 = vrot.slane %v7266_v60, %v26426_v4  ;;  %v7297_v32 = vcombine.high %v7212_v19, %v7213_v6  ;;  %v6642_v52 = vpop.f32.mrb[120].mxu0  ;;  %8761 = vmatprep.subr.bf16.mxu0 %v22336_v57  ;;  %v29154_v17 = vlaneseq  ;;  %v22337_v50 = vld [vmem:[#allocation5 + $0x380] ss:$8 sps:$4 sm:$0xff]  }
 0x633   :  { %v7247_v16 = vrot.slane %v7233_v63, %v26426_v4  ;;  %v7281_v12 = vrot.slane %v7267_v62, %v26426_v4  ;;  %v7298_v7 = vcombine.high %v7214_v41, %v7215_v26  ;;  %v20370_v15 = vadd.f32 %v6642_v52, %v26403_v25  ;;  %v7191_v59 = vpop.f32.mrb[32].mxu1  ;;  %v6644_v47 = vpop.f32.mrb[121].mxu0  ;;  %v22342_v62 = vld [vmem:[#allocation5 + $0x394] ss:$8 sps:$4 sm:$0xff]  }
 0x634   :  { %vm26446_vm5 = vcmp.lt.s32.totalorder %v29154_v17, 512  ;;  %v29155_v11 = vmov 0  ;;  %v7305_v20 = vrot.slane %v7297_v32, %v26426_v4  ;;  %v20380_v3 = vadd.f32 %v7191_v59, %v26410_v51  ;;  %v7193_v37 = vpop.f32.mrb[33].mxu1  ;;  %v6646_v54 = vpop.f32.mrb[122].mxu0 }
 0x635   :  { %v29156_v11 = vsel %vm26446_vm5, 4294967295, %v29155_v11  ;;  %v20371_v23 = vadd.f32 %v6644_v47, %v26413_v29  ;;  %v7248_v34 = vcombine.low %v7240_v0, %v7247_v16  ;;  %v7282_v57 = vcombine.low %v7274_v49, %v7281_v12  ;;  %v7195_v61 = vpop.f32.mrb[34].mxu1  ;;  %8762 = vmatpush1.bf16.msra.mxu0 %v22334_v30  ;;  %v6648_v38 = vpop.f32.mrb[123].mxu0  ;;  %v22340_v47 = vld [vmem:[#allocation5 + $0x390] ss:$8 sps:$4 sm:$0xff]  }
 0x636   :  { %29157 = vst [vmem:[#allocation18_spill] sm:$0xff] %v29156_v11  ;;  %v7312_v5 = vrot.slane %v7298_v7, %v26426_v4  ;;  %v7216_v19 = vmax.f32 %v20370_v15, 0.0  ;;  %v7218_v60 = vmax.f32 %v20380_v3, 0.0  ;;  %v20381_v6 = vadd.f32 %v7193_v37, %v26420_v10  ;;  %v7197_v63 = vpop.f32.mrb[35].mxu1  ;;  %8763 = vmatprep.subr.bf16.mxu0 %v22339_v39  ;;  %v26470_v3 = vld [vmem:[#allocation2 + $0x141] sm:$0xff] }
 0x637   :  { %v7217_v41 = vmax.f32 %v20371_v23, 0.0  ;;  %v20372_v46 = vadd.f32 %v6646_v54, %v26403_v25  ;;  %v7255_v26 = vrot.slane %v7248_v34, %v26426_v4  ;;  %v7289_v35 = vrot.slane %v7282_v57, %v26426_v4  ;;  %v22345_v23 = vld [vmem:[#allocation5 + $0x3a4] ss:$8 sps:$4 sm:$0xff]  }
 0x638   :  { %v7313_v0 = vcombine.low %v7305_v20, %v7312_v5  ;;  %v20382_v49 = vadd.f32 %v7195_v61, %v26410_v51  ;;  %v7219_v30 = vmax.f32 %v20381_v6, 0.0  ;;  %v20373_v16 = vadd.f32 %v6648_v38, %v26413_v29 }
 0x639   :  { %v7329_v32 = vcombine.low %v7216_v19, %v7217_v41  ;;  %v7220_v52 = vmax.f32 %v20372_v46, 0.0  ;;  %v29158_v12 = vpack.c.bf16 %v24815_v24, %v24813_v21  ;;  %7261 = vst.msk [vmem:[#allocation4] ss:$2 sm:$0xf] %vm26446_vm5, %v7255_v26  ;;  %v7262_v39 = vcombine.high %v7255_v26, %v7255_v26  ;;  %8764 = vmatpush1.bf16.msra.mxu0 %v22337_v50  ;;  %v7516_v41 = vld [vmem:[#allocation2 + $0x1ba] sm:$0x1] }
 0x63a   :  { %7292 = vst.msk [vmem:[#allocation4 + $0x10] ss:$2 sm:$0xf] %vm26446_vm5, %v7289_v35  ;;  %v7320_v7 = vrot.slane %v7313_v0, %v26426_v4  ;;  %v7222_v15 = vmax.f32 %v20382_v49, 0.0  ;;  %v20383_v59 = vadd.f32 %v7197_v63, %v26420_v10  ;;  %v7330_v20 = vcombine.low %v7218_v60, %v7219_v30  ;;  %v6652_v24 = vpop.f32.mrb[124].mxu0  ;;  %8765 = vmatprep.subr.bf16.mxu0 %v22342_v62 }
 0x63b   :  { %8719 = vmatmul.mubr.bf16.gmra.mrb[144].mxu0 %v29158_v12  ;;  %v7337_v17 = vrot.slane %v7329_v32, %v26426_v4  ;;  %v7221_v21 = vmax.f32 %v20373_v16, 0.0  ;;  %7265 = vst.msk [vmem:[#allocation4 + $0x8] ss:$2 sm:$0xf] %vm26446_vm5, %v7262_v39  ;;  %v20374_v34 = vadd.f32 %v6652_v24, %v26403_v25  ;;  %v7201_v57 = vpop.f32.mrb[36].mxu1  ;;  %v7513_v26 = vpack.c.bf16 %v26470_v3, %v26374_v27 }
 0x63c   :  { %8728 = vmatprep.mubr.bf16.mxu0 %v7522_v45  ;;  %v7321_v37 = vcombine.high %v7320_v7, %v7320_v7  ;;  %v7223_v54 = vmax.f32 %v20383_v59, 0.0  ;;  %v6654_v45 = vpop.f32.mrb[125].mxu0  ;;  %v7344_v5 = vrot.slane %v7330_v20, %v26426_v4  ;;  %v20384_v61 = vadd.f32 %v7201_v57, %v26410_v51  ;;  %v7203_v50 = vpop.f32.mrb[37].mxu1  ;;  %v22343_v35 = vld [vmem:[#allocation5 + $0x3a0] ss:$8 sps:$4 sm:$0xff]  }
 0x63d   :  { %v7364_v19 = vcombine.high %v7220_v52, %v7221_v21  ;;  %v20375_v38 = vadd.f32 %v6654_v45, %v26413_v29  ;;  %v6656_v60 = vpop.f32.mrb[126].mxu0  ;;  %v7224_v46 = vmax.f32 %v20374_v34, 0.0  ;;  %v20385_v63 = vadd.f32 %v7203_v50, %v26420_v10  ;;  %v7205_v25 = vpop.f32.mrb[38].mxu1  ;;  %8766 = vmatpush1.bf16.msra.mxu0 %v22340_v47  ;;  %v22348_v30 = vld [vmem:[#allocation5 + $0x3b4] ss:$8 sps:$4 sm:$0xff]  }
 0x63e   :  { %7324 = vst.msk [vmem:[#allocation4 + $0x18] ss:$2 sm:$0xf] %vm26446_vm5, %v7321_v37  ;;  %v7365_v6 = vcombine.high %v7222_v15, %v7223_v54  ;;  %v6657_v62 = vpop.f32.mrb[127].mxu0  ;;  %v7345_v51 = vcombine.low %v7337_v17, %v7344_v5  ;;  %v7226_v0 = vmax.f32 %v20384_v61, 0.0  ;;  %v7206_v32 = vpop.f32.mrb[39].mxu1  ;;  %8767 = vmatprep.subr.bf16.mxu0 %v22345_v23  ;;  %v7523_v12 = vpack.c.bf16 %v7516_v41, %v7516_v41 }
 0x63f   :  { %v7372_v29 = vrot.slane %v7364_v19, %v26426_v4  ;;  %v7225_v49 = vmax.f32 %v20375_v38, 0.0  ;;  %v7227_v16 = vmax.f32 %v20385_v63, 0.0  ;;  %v22385_v27 = vld [vmem:[%s29087_s5] ss:$16 sps:$4 sm:$0xff]   ;;  %v22387_v7 = vld [vmem:[%s29087_s5 + $0x4] ss:$16 sps:$4 sm:$0xff]   ;;  %v29160_v32 = vpack.c.bf16 %v24991_v22, %v24989_v43 }
 0x640   :  { %v7379_v52 = vrot.slane %v7365_v6, %v26426_v4  ;;  %v7352_v10 = vrot.slane %v7345_v51, %v26426_v4  ;;  %v22346_v47 = vld [vmem:[#allocation5 + $0x3b0] ss:$8 sps:$4 sm:$0xff]   ;;  %v22393_v17 = vld [vmem:[%s29087_s5 + $0x24] ss:$16 sps:$4 sm:$0xff]   ;;  %13239 = vmatprep.subr.bf16.mxu1 %v22387_v7  ;;  %v7507_v54 = vld [vmem:[#allocation2 + $0x149] sm:$0x1]  ;;  %v29159_v6 = vpack.c.bf16 %v24955_v18, %v24953_v13  ;;  %v29161_v7 = vpack.c.bf16 %v25027_v40, %v25025_v8 }
 0x641   :  { %v7399_v39 = vcombine.low %v7224_v46, %v7225_v49  ;;  %v7400_v59 = vcombine.low %v7226_v0, %v7227_v16  ;;  %8768 = vmatpush1.bf16.msra.mxu0 %v22343_v35  ;;  %v22351_v24 = vld [vmem:[#allocation5 + $0x3c4] ss:$8 sps:$4 sm:$0xff]   ;;  %13240 = vmatpush1.bf16.msra.mxu1 %v22385_v27  ;;  %v22391_v34 = vld [vmem:[%s29087_s5 + $0x20] ss:$16 sps:$4 sm:$0xff]   ;;  %v7514_v61 = vpack.c.bf16 %v7507_v54, %v7507_v54  ;;  %v22354_v38 = vld [vmem:[#allocation5 + $0x3d4] ss:$8 sps:$4 sm:$0xff]  }
 0x642   :  { %v7380_v15 = vcombine.low %v7372_v29, %v7379_v52  ;;  %7355 = vst.msk [vmem:[#allocation4 + $0x20] ss:$2 sm:$0xf] %vm26446_vm5, %v7352_v10  ;;  %v7356_v20 = vcombine.high %v7352_v10, %v7352_v10  ;;  %8769 = vmatprep.subr.bf16.mxu0 %v22348_v30  ;;  %13241 = vmatprep.subr.bf16.mxu1 %v22393_v17  ;;  %v22399_v57 = vld [vmem:[%s29087_s5 + $0x44] ss:$16 sps:$4 sm:$0xff]   ;;  %v7525_v18 = vld [vmem:[#allocation2 + $0xf8] sm:$0xff] }
 0x643   :  { %8729 = vmatmul.mubr.bf16.gmra.mrb[148].mxu0 %v7513_v26  ;;  %v7407_v21 = vrot.slane %v7399_v39, %v26426_v4  ;;  %v7414_v37 = vrot.slane %v7400_v59, %v26426_v4  ;;  %v22349_v19 = vld [vmem:[#allocation5 + $0x3c0] ss:$8 sps:$4 sm:$0xff]   ;;  %v22405_v41 = vld [vmem:[%s29087_s5 + $0x64] ss:$16 sps:$4 sm:$0xff]   ;;  %v22352_v46 = vld [vmem:[#allocation5 + $0x3d0] ss:$8 sps:$4 sm:$0xff]  }
 0x644   :  { %8738 = vmatprep.mubr.bf16.mxu0 %v7523_v12  ;;  %v7387_v23 = vrot.slane %v7380_v15, %v26426_v4  ;;  %7359 = vst.msk [vmem:[#allocation4 + $0x28] ss:$2 sm:$0xf] %vm26446_vm5, %v7356_v20  ;;  %v22397_v60 = vld [vmem:[%s29087_s5 + $0x40] ss:$16 sps:$4 sm:$0xff]   ;;  %v7527_v12 = vld [vmem:[#allocation2 + $0x108] sm:$0xff] }
 0x645   :  { %v7415_v5 = vcombine.low %v7407_v21, %v7414_v37  ;;  %8770 = vmatpush1.bf16.msra.mxu0 %v22346_v47  ;;  %13242 = vmatpush1.bf16.msra.mxu1 %v22391_v34  ;;  %v22357_v63 = vld [vmem:[#allocation5 + $0x3e4] ss:$8 sps:$4 sm:$0xff]   ;;  %v22403_v25 = vld [vmem:[%s29087_s5 + $0x60] ss:$16 sps:$4 sm:$0xff]   ;;  %v22360_v26 = vld [vmem:[#allocation5 + $0x3f4] ss:$8 sps:$4 sm:$0xff]   ;;  %v29162_v21 = vpack.c.bf16 %v25063_v31, %v25061_v14 }
 0x646   :  { %7390 = vst.msk [vmem:[#allocation4 + $0x30] ss:$2 sm:$0xf] %vm26446_vm5, %v7387_v23  ;;  %v7391_v45 = vcombine.high %v7387_v23, %v7387_v23  ;;  %8771 = vmatprep.subr.bf16.mxu0 %v22351_v24  ;;  %13243 = vmatprep.subr.bf16.mxu1 %v22399_v57  ;;  %v22355_v62 = vld [vmem:[#allocation5 + $0x3e0] ss:$8 sps:$4 sm:$0xff]   ;;  %v7524_v13 = vld [vmem:[#allocation2 + $0xf0] sm:$0xff]  ;;  %v29163_v57 = vpack.c.bf16 %v25089_v56, %v25087_v1 }
 0x647   :  { %v7422_v50 = vrot.slane %v7415_v5, %v26426_v4  ;;  %v22358_v35 = vld [vmem:[#allocation5 + $0x3f0] ss:$8 sps:$4 sm:$0xff]   ;;  %v22363_v51 = vld [vmem:[#allocation5 + $0x404] ss:$8 sps:$4 sm:$0xff]   ;;  %v22361_v29 = vld [vmem:[#allocation5 + $0x400] ss:$8 sps:$4 sm:$0xff]   ;;  %v7537_v0 = vpack.c.bf16 %v7525_v18, %v7524_v13 }
 0x648   :  { %7394 = vst.msk [vmem:[#allocation4 + $0x38] ss:$2 sm:$0xf] %vm26446_vm5, %v7391_v45  ;;  %v22366_v49 = vld [vmem:[#allocation5 + $0x414] ss:$8 sps:$4 sm:$0xff]   ;;  %v7526_v16 = vld [vmem:[#allocation2 + $0x100] sm:$0xff] }
 0x649   :  { %7425 = vst.msk [vmem:[#allocation4 + $0x40] ss:$2 sm:$0xf] %vm26446_vm5, %v7422_v50  ;;  %8772 = vmatpush1.bf16.msra.mxu0 %v22349_v19  ;;  %13244 = vmatpush1.bf16.msra.mxu1 %v22397_v60  ;;  %v22364_v30 = vld [vmem:[#allocation5 + $0x410] ss:$8 sps:$4 sm:$0xff]   ;;  %v7538_v39 = vpack.c.bf16 %v7527_v12, %v7526_v16  ;;  %v7530_v8 = vld [vmem:[#allocation2 + $0x120] sm:$0xff] }
 0x64a   :  { %8773 = vmatprep.subr.bf16.mxu0 %v22354_v38  ;;  %13245 = vmatprep.subr.bf16.mxu1 %v22405_v41  ;;  %v22369_v52 = vld [vmem:[#allocation5 + $0x424] ss:$8 sps:$4 sm:$0xff]   ;;  %v22367_v10 = vld [vmem:[#allocation5 + $0x420] ss:$8 sps:$4 sm:$0xff]   ;;  %v22372_v27 = vld [vmem:[#allocation5 + $0x434] ss:$8 sps:$4 sm:$0xff]  }
 0x64b   :  { %8739 = vmatmul.mubr.bf16.gmra.mrb[152].mxu0 %v7514_v61  ;;  %v22370_v15 = vld [vmem:[#allocation5 + $0x430] ss:$8 sps:$4 sm:$0xff]   ;;  %v22375_v43 = vld [vmem:[#allocation5 + $0x444] ss:$8 sps:$4 sm:$0xff]   ;;  %v22373_v47 = vld [vmem:[#allocation5 + $0x440] ss:$8 sps:$4 sm:$0xff]  }
 0x64c   :  { %8779 = vmatprep.mubr.bf16.mxu0 %v29159_v6  ;;  %v7528_v22 = vld [vmem:[#allocation2 + $0x110] sm:$0xff]  ;;  %v7529_v59 = vld [vmem:[#allocation2 + $0x118] sm:$0xff]  ;;  %v22381_v40 = vld [vmem:[#allocation5 + $0x464] ss:$8 sps:$4 sm:$0xff]  }
 0x64d   :  { %8774 = vmatpush1.bf16.msra.mxu0 %v22352_v46  ;;  %13246 = vmatpush1.bf16.msra.mxu1 %v22403_v25  ;;  %v7539_v17 = vpack.c.bf16 %v7529_v59, %v7528_v22  ;;  %v22378_v20 = vld [vmem:[#allocation5 + $0x454] ss:$8 sps:$4 sm:$0xff]   ;;  %v22376_v24 = vld [vmem:[#allocation5 + $0x450] ss:$8 sps:$4 sm:$0xff]   ;;  %v7531_v23 = vld [vmem:[#allocation2 + $0x128] sm:$0xff] }
 0x64e   :  { %8775 = vmatprep.subr.bf16.mxu0 %v22357_v63  ;;  %v22379_v37 = vld [vmem:[#allocation5 + $0x460] ss:$8 sps:$4 sm:$0xff]   ;;  %v7540_v54 = vpack.c.bf16 %v7531_v23, %v7530_v8  ;;  %v22384_v34 = vld [vmem:[#allocation5 + $0x474] ss:$8 sps:$4 sm:$0xff]   ;;  %v22382_v45 = vld [vmem:[#allocation5 + $0x470] ss:$8 sps:$4 sm:$0xff]  }
 0x64f   :  { %v22390_v31 = vld [vmem:[%s29087_s5 + $0xc] ss:$16 sps:$4 sm:$0xff]   ;;  %v7532_v14 = vld [vmem:[#allocation2 + $0x130] sm:$0xff]  ;;  %v7534_v50 = vld [vmem:[#allocation2 + $0x140] sm:$0xff]  ;;  %v29164_v63 = vmov 0  }
 0x650   :  { %v7533_v5 = vld [vmem:[#allocation2 + $0x138] sm:$0xff]  ;;  %v7535_v56 = vld [vmem:[#allocation2 + $0x148] sm:$0xff]  ;;  %v7556_v1 = vld [vmem:[#allocation2 + $0x1c1] sm:$0x1] }
 0x651   :  { %8776 = vmatpush1.bf16.msra.mxu0 %v22355_v62  ;;  %v7555_v19 = vld [vmem:[#allocation2 + $0x1b9] sm:$0xff]  ;;  %v7541_v61 = vpack.c.bf16 %v7533_v5, %v7532_v14  ;;  %v7542_v60 = vpack.c.bf16 %v7535_v56, %v7534_v50  ;;  %v7563_v41 = vpack.c.bf16 %v7556_v1, %v7556_v1  ;;  %v7536_v6 = vld [vmem:[#allocation2 + $0x150] sm:$0x1]  ;;  %v7565_v18 = vld [vmem:[#allocation2 + $0x151] sm:$0x1] }
 0x652   :  { %8777 = vmatprep.subr.bf16.mxu0 %v22360_v26  ;;  %v7562_v38 = vpack.c.bf16 %v7555_v19, %v26380_v33  ;;  %v7543_v46 = vpack.c.bf16 %v7536_v6, %v7536_v6  ;;  %v22388_v25 = vld [vmem:[%s29087_s5 + $0x8] ss:$16 sps:$4 sm:$0xff]   ;;  %v22396_v33 = vld [vmem:[%s29087_s5 + $0x2c] ss:$16 sps:$4 sm:$0xff]   ;;  %v22423_v16 = vld [vmem:[%s29087_s5 + $0xc4] ss:$16 sps:$4 sm:$0xff]  }
 0x653   :  { %v22394_v62 = vld [vmem:[%s29087_s5 + $0x28] ss:$16 sps:$4 sm:$0xff]   ;;  %v22402_v26 = vld [vmem:[%s29087_s5 + $0x4c] ss:$16 sps:$4 sm:$0xff]   ;;  %v22435_v22 = vld [vmem:[%s29087_s5 + $0x104] ss:$16 sps:$4 sm:$0xff]  }
 0x654   :  { %v22424_v12 = vld [vmem:[%s29087_s5 + $0xc8] ss:$16 sps:$4 sm:$0xff]   ;;  %v22447_v8 = vld [vmem:[%s29087_s5 + $0x144] ss:$16 sps:$4 sm:$0xff]   ;;  %v22462_v19 = vld [vmem:[%s29087_s5 + $0x18c] ss:$16 sps:$4 sm:$0xff]  }
 0x655   :  { %8778 = vmatpush1.bf16.msra.mxu0 %v22358_v35  ;;  %v22400_v35 = vld [vmem:[%s29087_s5 + $0x48] ss:$16 sps:$4 sm:$0xff]   ;;  %v22459_v14 = vld [vmem:[%s29087_s5 + $0x184] ss:$16 sps:$4 sm:$0xff]   ;;  %v22463_v50 = vld [vmem:[%s29087_s5 + $0x1a0] ss:$16 sps:$4 sm:$0xff]  }
 0x656   :  { %8848 = vmatprep.subr.bf16.mxu0 %v22363_v51  ;;  %v22406_v51 = vld [vmem:[%s29087_s5 + $0x68] ss:$16 sps:$4 sm:$0xff]   ;;  %v22469_v1 = vld [vmem:[%s29087_s5 + $0x1c0] ss:$16 sps:$4 sm:$0xff]   ;;  %v22474_v6 = vld [vmem:[%s29087_s5 + $0x1cc] ss:$16 sps:$4 sm:$0xff]  }
 0x657   :  { %v22436_v59 = vld [vmem:[%s29087_s5 + $0x108] ss:$16 sps:$4 sm:$0xff]  }
 0x658   :  { %8780 = vmatmul.mubr.bf16.vlgmr.msra.gmra.mrb[128].mxu0 %v7537_v0  ;;  %v22417_v0 = vld [vmem:[%s29087_s5 + $0xa4] ss:$16 sps:$4 sm:$0xff]   ;;  %v22448_v23 = vld [vmem:[%s29087_s5 + $0x148] ss:$16 sps:$4 sm:$0xff]  }
 0x659   :  { %8789 = vmatprep.mubr.bf16.mxu0 %v29160_v32  ;;  %8849 = vmatpush1.bf16.msra.mxu0 %v22361_v29  ;;  %v7567_v29 = vpack.c.bf16 %v7565_v18, %v7565_v18  ;;  %v22415_v32 = vld [vmem:[%s29087_s5 + $0xa0] ss:$16 sps:$4 sm:$0xff]   ;;  %v22460_v5 = vld [vmem:[%s29087_s5 + $0x188] ss:$16 sps:$4 sm:$0xff]  }
 0x65a   :  { %8850 = vmatprep.subr.bf16.mxu0 %v22366_v49  ;;  %v22420_v49 = vld [vmem:[%s29087_s5 + $0xac] ss:$16 sps:$4 sm:$0xff]   ;;  %v22466_v56 = vld [vmem:[%s29087_s5 + $0x1a8] ss:$16 sps:$4 sm:$0xff]  }
 0x65d   :  { %8851 = vmatpush1.bf16.msra.mxu0 %v22364_v30  ;;  %v22418_v30 = vld [vmem:[%s29087_s5 + $0xa8] ss:$16 sps:$4 sm:$0xff]  }
 0x65e   :  { %8852 = vmatprep.subr.bf16.mxu0 %v22369_v52  ;;  %v22421_v52 = vld [vmem:[%s29087_s5 + $0xc0] ss:$16 sps:$4 sm:$0xff]  }
 0x660   :  { %8790 = vmatmul.mubr.bf16.gmra.mrb[132].mxu0 %v7538_v39  ;;  %v22429_v39 = vld [vmem:[%s29087_s5 + $0xe4] ss:$16 sps:$4 sm:$0xff]  }
 0x661   :  { %8799 = vmatprep.mubr.bf16.mxu0 %v29161_v7  ;;  %8853 = vmatpush1.bf16.msra.mxu0 %v22367_v10  ;;  %v22426_v10 = vld [vmem:[%s29087_s5 + $0xcc] ss:$16 sps:$4 sm:$0xff]   ;;  %v22427_v7 = vld [vmem:[%s29087_s5 + $0xe0] ss:$16 sps:$4 sm:$0xff]  }
 0x662   :  { %8854 = vmatprep.subr.bf16.mxu0 %v22372_v27  ;;  %v22432_v27 = vld [vmem:[%s29087_s5 + $0xec] ss:$16 sps:$4 sm:$0xff]  }
 0x665   :  { %8855 = vmatpush1.bf16.msra.mxu0 %v22370_v15  ;;  %v22430_v15 = vld [vmem:[%s29087_s5 + $0xe8] ss:$16 sps:$4 sm:$0xff]  }
 0x666   :  { %8856 = vmatprep.subr.bf16.mxu0 %v22375_v43  ;;  %v22433_v43 = vld [vmem:[%s29087_s5 + $0x100] ss:$16 sps:$4 sm:$0xff]  }
 0x668   :  { %8800 = vmatmul.mubr.bf16.gmra.mrb[136].mxu0 %v7539_v17  ;;  %v22441_v17 = vld [vmem:[%s29087_s5 + $0x124] ss:$16 sps:$4 sm:$0xff]  }
 0x669   :  { %8809 = vmatprep.mubr.bf16.mxu0 %v29162_v21  ;;  %8857 = vmatpush1.bf16.msra.mxu0 %v22373_v47  ;;  %v22438_v47 = vld [vmem:[%s29087_s5 + $0x10c] ss:$16 sps:$4 sm:$0xff]   ;;  %v22439_v21 = vld [vmem:[%s29087_s5 + $0x120] ss:$16 sps:$4 sm:$0xff]  }
 0x66a   :  { %8858 = vmatprep.subr.bf16.mxu0 %v22378_v20  ;;  %v22444_v20 = vld [vmem:[%s29087_s5 + $0x12c] ss:$16 sps:$4 sm:$0xff]  }
 0x66d   :  { %8859 = vmatpush1.bf16.msra.mxu0 %v22376_v24  ;;  %v22442_v24 = vld [vmem:[%s29087_s5 + $0x128] ss:$16 sps:$4 sm:$0xff]  }
 0x66e   :  { %8860 = vmatprep.subr.bf16.mxu0 %v22381_v40  ;;  %v22445_v40 = vld [vmem:[%s29087_s5 + $0x140] ss:$16 sps:$4 sm:$0xff]  }
 0x670   :  { %8810 = vmatmul.mubr.bf16.gmra.mrb[140].mxu0 %v7540_v54  ;;  %v22453_v54 = vld [vmem:[%s29087_s5 + $0x164] ss:$16 sps:$4 sm:$0xff]  }
 0x671   :  { %8819 = vmatprep.mubr.bf16.mxu0 %v29163_v57  ;;  %8861 = vmatpush1.bf16.msra.mxu0 %v22379_v37  ;;  %v22450_v37 = vld [vmem:[%s29087_s5 + $0x14c] ss:$16 sps:$4 sm:$0xff]   ;;  %v22451_v57 = vld [vmem:[%s29087_s5 + $0x160] ss:$16 sps:$4 sm:$0xff]  }
 0x672   :  { %8862 = vmatprep.subr.bf16.mxu0 %v22384_v34  ;;  %v22456_v34 = vld [vmem:[%s29087_s5 + $0x16c] ss:$16 sps:$4 sm:$0xff]  }
 0x675   :  { %8863 = vmatpush1.bf16.msra.mxu0 %v22382_v45  ;;  %v22454_v45 = vld [vmem:[%s29087_s5 + $0x168] ss:$16 sps:$4 sm:$0xff]  }
 0x676   :  { %13788 = vmatprep.subr.bf16.mxu0 %v22390_v31  ;;  %v22457_v31 = vld [vmem:[%s29087_s5 + $0x180] ss:$16 sps:$4 sm:$0xff]  }
 0x678   :  { %8820 = vmatmul.mubr.bf16.gmra.mrb[144].mxu0 %v7541_v61  ;;  %v22465_v61 = vld [vmem:[%s29087_s5 + $0x1a4] ss:$16 sps:$4 sm:$0xff]  }
 0x679   :  { %8829 = vmatprep.mubr.bf16.mxu0 %v7562_v38  ;;  %v22468_v38 = vld [vmem:[%s29087_s5 + $0x1ac] ss:$16 sps:$4 sm:$0xff]  }
 0x680   :  { %8830 = vmatmul.mubr.bf16.gmra.mrb[148].mxu0 %v7542_v60  ;;  %v22471_v60 = vld [vmem:[%s29087_s5 + $0x1c4] ss:$16 sps:$4 sm:$0xff]  }
 0x681   :  { %8839 = vmatprep.mubr.bf16.mxu0 %v7563_v41  ;;  %v22472_v41 = vld [vmem:[%s29087_s5 + $0x1c8] ss:$16 sps:$4 sm:$0xff]  }
 0x688   :  { %8840 = vmatmul.mubr.bf16.gmra.mrb[152].mxu0 %v7543_v46  ;;  %v22477_v46 = vld [vmem:[%s29087_s5 + $0x1e4] ss:$16 sps:$4 sm:$0xff]  }
 0x689   :  { %8880 = vmatprep.mubr.bf16.mxu0 %v29164_v63 }
 0x690   :  { %8881 = vmatmul.mubr.bf16.vlgmr.msra.gmra.mrb[128].mxu0 %v26359_v28  ;;  %v22408_v28 = vld [vmem:[%s29087_s5 + $0x6c] ss:$16 sps:$4 sm:$0xff]  }
 0x691   :  { %8890 = vmatprep.mubr.bf16.mxu0 %v29164_v63  ;;  %13789 = vmatpush1.bf16.msra.mxu0 %v22388_v25  ;;  %v22475_v25 = vld [vmem:[%s29087_s5 + $0x1e0] ss:$16 sps:$4 sm:$0xff]  }
 0x692   :  { %13790 = vmatprep.subr.bf16.mxu0 %v22396_v33  ;;  %v22478_v33 = vld [vmem:[%s29087_s5 + $0x1e8] ss:$16 sps:$4 sm:$0xff]  }
 0x695   :  { %13791 = vmatpush1.bf16.msra.mxu0 %v22394_v62  ;;  %v22483_v62 = vld [vmem:[%s29087_s5 + $0x204] ss:$16 sps:$4 sm:$0xff]  }
 0x696   :  { %13792 = vmatprep.subr.bf16.mxu0 %v22402_v26  ;;  %v22486_v26 = vld [vmem:[%s29087_s5 + $0x20c] ss:$16 sps:$4 sm:$0xff]  }
 0x698   :  { %8891 = vmatmul.mubr.bf16.gmra.mrb[132].mxu0 %v26362_v44  ;;  %v7564_v44 = vld [vmem:[#allocation2 + $0x149] sm:$0xff] }
 0x699   :  { %8900 = vmatprep.mubr.bf16.mxu0 %v29164_v63  ;;  %13793 = vmatpush1.bf16.msra.mxu0 %v22400_v35  ;;  %v7566_v13 = vpack.c.bf16 %v7564_v44, %v26470_v3  ;;  %v22414_v3 = vld [vmem:[%s29087_s5 + $0x8c] ss:$16 sps:$4 sm:$0xff]   ;;  %v7712_v35 = vld [vmem:[%s29086_s4] sm:$0x3] }
 0x69a   :  { %13794 = vmatprep.subr.bf16.mxu0 %v22408_v28  ;;  %v26731_v28 = vrot.slane %v7712_v35, %v24424_v36 }
 0x69d   :  { %13795 = vmatpush1.bf16.msra.mxu0 %v22406_v51  ;;  %v26734_v51 = vrot.slane %v7712_v35, %v24427_v48 }
 0x69e   :  { %13796 = vmatprep.subr.bf16.mxu0 %v22414_v3 }
 0x6a0   :  { %8901 = vmatmul.mubr.bf16.gmra.mrb[136].mxu0 %v26365_v2  ;;  %v22409_v2 = vld [vmem:[%s29087_s5 + $0x80] ss:$16 sps:$4 sm:$0xff]  }
 0x6a1   :  { %8910 = vmatprep.mubr.bf16.mxu0 %v29164_v63 }
 0x6a8   :  { %8911 = vmatmul.mubr.bf16.gmra.mrb[140].mxu0 %v26370_v42  ;;  %v22411_v42 = vld [vmem:[%s29087_s5 + $0x84] ss:$16 sps:$4 sm:$0xff]  }
 0x6a9   :  { %8920 = vmatprep.mubr.bf16.mxu0 %v29164_v63  ;;  %13247 = vmatprep.subr.bf16.mxu1 %v22411_v42 }
 0x6aa   :  { %13248 = vmatpush1.bf16.msra.mxu1 %v22409_v2 }
 0x6ab   :  { %13249 = vmatprep.subr.bf16.mxu1 %v22417_v0 }
 0x6ae   :  { %13250 = vmatpush1.bf16.msra.mxu1 %v22415_v32 }
 0x6af   :  { %13251 = vmatprep.subr.bf16.mxu1 %v22423_v16 }
 0x6b0   :  { %8921 = vmatmul.mubr.bf16.gmra.mrb[144].mxu0 %v26377_v58  ;;  %v22412_v58 = vld [vmem:[%s29087_s5 + $0x88] ss:$16 sps:$4 sm:$0xff]  }
 0x6b1   :  { %8930 = vmatprep.mubr.bf16.mxu0 %v29164_v63  ;;  %13797 = vmatpush1.bf16.msra.mxu0 %v22412_v58 }
 0x6b2   :  { %13798 = vmatprep.subr.bf16.mxu0 %v22420_v49  ;;  %13252 = vmatpush1.bf16.msra.mxu1 %v22421_v52 }
 0x6b3   :  { %13253 = vmatprep.subr.bf16.mxu1 %v22429_v39 }
 0x6b5   :  { %13799 = vmatpush1.bf16.msra.mxu0 %v22418_v30 }
 0x6b6   :  { %13800 = vmatprep.subr.bf16.mxu0 %v22426_v10  ;;  %13254 = vmatpush1.bf16.msra.mxu1 %v22427_v7 }
 0x6b7   :  { %13255 = vmatprep.subr.bf16.mxu1 %v22435_v22 }
 0x6b8   :  { %8931 = vmatmul.mubr.bf16.gmra.mrb[148].mxu0 %v7566_v13 }
 0x6b9   :  { %8940 = vmatprep.mubr.bf16.mxu0 %v29164_v63  ;;  %13801 = vmatpush1.bf16.msra.mxu0 %v22424_v12  ;;  %v22480_v63 = vld [vmem:[%s29087_s5 + $0x1ec] ss:$16 sps:$4 sm:$0xff]  }
 0x6ba   :  { %13802 = vmatprep.subr.bf16.mxu0 %v22432_v27  ;;  %13256 = vmatpush1.bf16.msra.mxu1 %v22433_v43 }
 0x6bb   :  { %13257 = vmatprep.subr.bf16.mxu1 %v22441_v17 }
 0x6bd   :  { %13803 = vmatpush1.bf16.msra.mxu0 %v22430_v15 }
 0x6be   :  { %13804 = vmatprep.subr.bf16.mxu0 %v22438_v47  ;;  %13258 = vmatpush1.bf16.msra.mxu1 %v22439_v21 }
 0x6bf   :  { %13259 = vmatprep.subr.bf16.mxu1 %v22447_v8 }
 0x6c0   :  { %8941 = vmatmul.mubr.bf16.gmra.mrb[152].mxu0 %v7567_v29 }
 0x6c1   :  { %13805 = vmatpush1.bf16.msra.mxu0 %v22436_v59 }
 0x6c2   :  { %13806 = vmatprep.subr.bf16.mxu0 %v22444_v20  ;;  %13260 = vmatpush1.bf16.msra.mxu1 %v22445_v40 }
 0x6c3   :  { %13261 = vmatprep.subr.bf16.mxu1 %v22453_v54 }
 0x6c5   :  { %13807 = vmatpush1.bf16.msra.mxu0 %v22442_v24 }
 0x6c6   :  { %13808 = vmatprep.subr.bf16.mxu0 %v22450_v37  ;;  %13262 = vmatpush1.bf16.msra.mxu1 %v22451_v57 }
 0x6c7   :  { %13263 = vmatprep.subr.bf16.mxu1 %v22459_v14 }
 0x6c9   :  { %13809 = vmatpush1.bf16.msra.mxu0 %v22448_v23 }
 0x6ca   :  { %13810 = vmatprep.subr.bf16.mxu0 %v22456_v34  ;;  %13264 = vmatpush1.bf16.msra.mxu1 %v22457_v31 }
 0x6cb   :  { %13265 = vmatprep.subr.bf16.mxu1 %v22465_v61 }
 0x6cd   :  { %13811 = vmatpush1.bf16.msra.mxu0 %v22454_v45 }
 0x6ce   :  { %13812 = vmatprep.subr.bf16.mxu0 %v22462_v19  ;;  %13266 = vmatpush1.bf16.msra.mxu1 %v22463_v50 }
 0x6cf   :  { %13267 = vmatprep.subr.bf16.mxu1 %v22471_v60 }
 0x6d1   :  { %13813 = vmatpush1.bf16.msra.mxu0 %v22460_v5 }
 0x6d2   :  { %13814 = vmatprep.subr.bf16.mxu0 %v22468_v38  ;;  %13268 = vmatpush1.bf16.msra.mxu1 %v22469_v1 }
 0x6d3   :  { %13269 = vmatprep.subr.bf16.mxu1 %v22477_v46 }
 0x6d5   :  { %13815 = vmatpush1.bf16.msra.mxu0 %v22466_v56 }
 0x6d6   :  { %13816 = vmatprep.subr.bf16.mxu0 %v22474_v6  ;;  %13270 = vmatpush1.bf16.msra.mxu1 %v22475_v25 }
 0x6d7   :  { %13300 = vmatprep.subr.bf16.mxu1 %v22483_v62 }
 0x6d9   :  { %13817 = vmatpush1.bf16.msra.mxu0 %v22472_v41 }
 0x6da   :  { %13818 = vmatprep.subr.bf16.mxu0 %v22480_v63 }
 0x6dd   :  { %13819 = vmatpush1.bf16.msra.mxu0 %v22478_v33 }
 0x6de   :  { %13849 = vmatprep.subr.bf16.mxu0 %v22486_v26 }
 0x763   :  { %v8882_v44 = vpop.f32.mrb[128].mxu0 }
 0x764   :  { %v20386_v13 = vadd.f32 %v8882_v44, %v26731_v28  ;;  %v8884_v18 = vpop.f32.mrb[129].mxu0 }
 0x765   :  { %v20387_v29 = vadd.f32 %v8884_v18, %v26734_v51  ;;  %v8886_v2 = vpop.f32.mrb[130].mxu0 }
 0x766   :  { %v8949_v42 = vmax.f32 %v20386_v13, 0.0  ;;  %v8888_v58 = vpop.f32.mrb[131].mxu0  ;;  %v20388_v49 = vadd.f32 %v8886_v2, %v26731_v28 }
 0x767   :  { %v8950_v3 = vmax.f32 %v20387_v29, 0.0  ;;  %v20389_v30 = vadd.f32 %v8888_v58, %v26734_v51 }
 0x768   :  { %v8977_v0 = vrot.slane %v8949_v42, 7  ;;  %v8951_v16 = vmax.f32 %v20388_v49, 0.0 }
 0x769   :  { %v8978_v32 = vrot.slane %v8950_v3, 7  ;;  %v8952_v39 = vmax.f32 %v20389_v30, 0.0 }
 0x76a   :  { %8981 = vst [vmem:[#allocation3 + $0x60] sm:$0xfe] %v8977_v0  ;;  %v8988_v17 = vrot.slane %v8951_v16, 7 }
 0x76b   :  { %8982 = vst [vmem:[#allocation3 + $0x68] sm:$0xfe] %v8978_v32  ;;  %v8892_v52 = vpop.f32.mrb[132].mxu0  ;;  %v8991_v24 = vrot.slane %v8952_v39, 7 }
 0x76c   :  { %v20390_v12 = vadd.f32 %v8892_v52, %v26731_v28  ;;  %v8894_v10 = vpop.f32.mrb[133].mxu0 }
 0x76d   :  { %v20391_v27 = vadd.f32 %v8894_v10, %v26734_v51  ;;  %v8896_v7 = vpop.f32.mrb[134].mxu0 }
 0x76e   :  { %v8953_v15 = vmax.f32 %v20390_v12, 0.0  ;;  %v20392_v43 = vadd.f32 %v8896_v7, %v26731_v28  ;;  %v8898_v22 = vpop.f32.mrb[135].mxu0 }
 0x76f   :  { %v8954_v59 = vmax.f32 %v20391_v27, 0.0  ;;  %v20393_v47 = vadd.f32 %v8898_v22, %v26734_v51 }
 0x770   :  { %v8989_v20 = vrot.slane %v8953_v15, 7  ;;  %v8955_v21 = vmax.f32 %v20392_v43, 0.0 }
 0x771   :  { %v8992_v40 = vrot.slane %v8954_v59, 7  ;;  %v8956_v8 = vmax.f32 %v20393_v47, 0.0  ;;  %v9088_v47 = vld [vmem:[#allocation3 + $0x60] sm:$0xfe] }
 0x772   :  { %v8990_v23 = vsel %vm8987_vm6, %v8988_v17, %v8989_v20  ;;  %v9002_v37 = vrot.slane %v8955_v21, 7  ;;  %v9089_v22 = vld [vmem:[#allocation3 + $0x68] sm:$0xfe] }
 0x773   :  { %8996 = vst [vmem:[#allocation3 + $0x70] sm:$0x7f] %v8990_v23  ;;  %v8993_v54 = vsel %vm8987_vm6, %v8991_v24, %v8992_v40  ;;  %v9003_v34 = vrot.slane %v8956_v8, 7  ;;  %v8902_v57 = vpop.f32.mrb[136].mxu0 }
 0x774   :  { %8997 = vst [vmem:[#allocation3 + $0x78] sm:$0x7f] %v8993_v54  ;;  %9012 = vst [vmem:[#allocation3 + $0x70] sm:$0x80] %v9002_v37  ;;  %v20394_v45 = vadd.f32 %v8902_v57, %v26731_v28  ;;  %v8904_v31 = vpop.f32.mrb[137].mxu0 }
 0x775   :  { %9013 = vst [vmem:[#allocation3 + $0x78] sm:$0x80] %v9003_v34  ;;  %v20395_v14 = vadd.f32 %v8904_v31, %v26734_v51  ;;  %v8906_v5 = vpop.f32.mrb[138].mxu0 }
 0x776   :  { %v8957_v19 = vmax.f32 %v20394_v45, 0.0  ;;  %v20396_v61 = vadd.f32 %v8906_v5, %v26731_v28  ;;  %v8908_v38 = vpop.f32.mrb[139].mxu0 }
 0x777   :  { %v8958_v50 = vmax.f32 %v20395_v14, 0.0  ;;  %v20397_v56 = vadd.f32 %v8908_v38, %v26734_v51 }
 0x778   :  { %v9004_v1 = vrot.slane %v8957_v19, 7  ;;  %v8959_v60 = vmax.f32 %v20396_v61, 0.0 }
 0x779   :  { %v9006_v41 = vrot.slane %v8958_v50, 7  ;;  %v8960_v6 = vmax.f32 %v20397_v56, 0.0  ;;  %v9105_v56 = vld [vmem:[#allocation3 + $0x68] sm:$0xfc] }
 0x77a   :  { %v9005_v46 = vsel %vm8987_vm6, %v9002_v37, %v9004_v1  ;;  %v9020_v63 = vrot.slane %v8959_v60, 7 }
 0x77b   :  { %9014 = vst [vmem:[#allocation3 + $0x80] sm:$0x3f] %v9005_v46  ;;  %v9007_v25 = vsel %vm8987_vm6, %v9003_v34, %v9006_v41  ;;  %v9021_v33 = vrot.slane %v8960_v6, 7  ;;  %v8912_v62 = vpop.f32.mrb[140].mxu0  ;;  %v26759_v12 = vld [vmem:[#allocation3 + $0x70] sm:$0xff] }
 0x77c   :  { %9015 = vst [vmem:[#allocation3 + $0x88] sm:$0x3f] %v9007_v25  ;;  %9030 = vst [vmem:[#allocation3 + $0x80] sm:$0xc0] %v9020_v63  ;;  %v20398_v26 = vadd.f32 %v8912_v62, %v26731_v28  ;;  %v8914_v35 = vpop.f32.mrb[141].mxu0  ;;  %v26757_v16 = vld [vmem:[#allocation3 + $0x78] sm:$0xff]  ;;  %v9098_v40 = vpack.c.bf16 %v26759_v12, %v9088_v47 }
 0x77d   :  { %9031 = vst [vmem:[#allocation3 + $0x88] sm:$0xc0] %v9021_v33  ;;  %v20399_v44 = vadd.f32 %v8914_v35, %v26734_v51  ;;  %v8916_v13 = vpop.f32.mrb[142].mxu0  ;;  %v9099_v24 = vpack.c.bf16 %v26757_v16, %v9089_v22  ;;  %v26785_v46 = vpack.c.bf16 %v26757_v16, %v9105_v56 }
 0x77e   :  { %v8961_v18 = vmax.f32 %v20398_v26, 0.0  ;;  %v20400_v29 = vadd.f32 %v8916_v13, %v26731_v28  ;;  %v8918_v2 = vpop.f32.mrb[143].mxu0  ;;  %v9950_v61 = vshll.u32 %v9098_v40, 16  ;;  %v9948_v22 = vshrl.u32 %v9098_v40, 16 }
 0x77f   :  { %v8962_v42 = vmax.f32 %v20399_v44, 0.0  ;;  %v20401_v58 = vadd.f32 %v8918_v2, %v26734_v51  ;;  %v9958_v19 = vshll.u32 %v9099_v24, 16  ;;  %v9956_v62 = vshrl.u32 %v9099_v24, 16 }
 0x780   :  { %v9022_v3 = vrot.slane %v8961_v18, 7  ;;  %v8963_v0 = vmax.f32 %v20400_v29, 0.0  ;;  %v9952_v29 = vrot.slane %v9950_v61, 1 }
 0x781   :  { %v9024_v49 = vrot.slane %v8962_v42, 7  ;;  %v8964_v32 = vmax.f32 %v20401_v58, 0.0  ;;  %v9960_v18 = vrot.slane %v9958_v19, 1 }
 0x782   :  { %v9023_v30 = vsel %vm8987_vm6, %v9020_v63, %v9022_v3  ;;  %v9038_v52 = vrot.slane %v8963_v0, 7 }
 0x783   :  { %9032 = vst [vmem:[#allocation3 + $0x90] sm:$0x1f] %v9023_v30  ;;  %v9025_v10 = vsel %vm8987_vm6, %v9021_v33, %v9024_v49  ;;  %v9039_v39 = vrot.slane %v8964_v32, 7  ;;  %v8922_v27 = vpop.f32.mrb[144].mxu0  ;;  %v26762_v7 = vld [vmem:[#allocation3 + $0x80] sm:$0xff]  ;;  %v9961_v24 = vor.u32 %v9960_v18, %v9956_v62 }
 0x784   :  { %9033 = vst [vmem:[#allocation3 + $0x98] sm:$0x1f] %v9025_v10  ;;  %9048 = vst [vmem:[#allocation3 + $0x90] sm:$0xe0] %v9038_v52  ;;  %v20402_v15 = vadd.f32 %v8922_v27, %v26731_v28  ;;  %v8924_v43 = vpop.f32.mrb[145].mxu0  ;;  %v26765_v59 = vld [vmem:[#allocation3 + $0x88] sm:$0xff]  ;;  %v26769_v17 = vpack.c.bf16 %v26762_v7, %v26759_v12 }
 0x785   :  { %9049 = vst [vmem:[#allocation3 + $0x98] sm:$0xe0] %v9039_v39  ;;  %v20403_v20 = vadd.f32 %v8924_v43, %v26734_v51  ;;  %v8926_v21 = vpop.f32.mrb[146].mxu0  ;;  %v26776_v8 = vpack.c.bf16 %v26765_v59, %v26757_v16  ;;  %v22481_v27 = vld [vmem:[%s29087_s5 + $0x200] ss:$16 sps:$4 sm:$0xff]  }
 0x786   :  { %v8965_v23 = vmax.f32 %v20402_v15, 0.0  ;;  %v20404_v37 = vadd.f32 %v8926_v21, %v26731_v28  ;;  %v8928_v54 = vpop.f32.mrb[147].mxu0  ;;  %v22484_v15 = vld [vmem:[%s29087_s5 + $0x208] ss:$16 sps:$4 sm:$0xff]  }
 0x787   :  { %v8966_v34 = vmax.f32 %v20403_v20, 0.0  ;;  %v20405_v57 = vadd.f32 %v8928_v54, %v26734_v51 }
 0x788   :  { %v9040_v45 = vrot.slane %v8965_v23, 7  ;;  %v8967_v31 = vmax.f32 %v20404_v37, 0.0  ;;  %v22489_v23 = vld [vmem:[%s29087_s5 + $0x224] ss:$16 sps:$4 sm:$0xff]  }
 0x789   :  { %v9042_v14 = vrot.slane %v8966_v34, 7  ;;  %v8968_v5 = vmax.f32 %v20405_v57, 0.0  ;;  %v9953_v34 = vor.u32 %v9952_v29, %v9948_v22  ;;  %v22492_v57 = vld [vmem:[%s29087_s5 + $0x22c] ss:$16 sps:$4 sm:$0xff]  }
 0x78a   :  { %v9041_v38 = vsel %vm8987_vm6, %v9038_v52, %v9040_v45  ;;  %v9056_v50 = vrot.slane %v8967_v31, 7  ;;  %v9183_v52 = vshll.u32 %v26785_v46, 16 }
 0x78b   :  { %9050 = vst [vmem:[#allocation3 + $0xa0] sm:$0xf] %v9041_v38  ;;  %v9043_v1 = vsel %vm8987_vm6, %v9039_v39, %v9042_v14  ;;  %v9057_v60 = vrot.slane %v8968_v5, 7  ;;  %v8932_v41 = vpop.f32.mrb[148].mxu0  ;;  %v26782_v6 = vld [vmem:[#allocation3 + $0x90] sm:$0xff] }
 0x78c   :  { %9051 = vst [vmem:[#allocation3 + $0xa8] sm:$0xf] %v9043_v1  ;;  %9066 = vst [vmem:[#allocation3 + $0xa0] sm:$0xf0] %v9056_v50  ;;  %v20406_v63 = vadd.f32 %v8932_v41, %v26731_v28  ;;  %v8934_v25 = vpop.f32.mrb[149].mxu0  ;;  %v26788_v33 = vld [vmem:[#allocation3 + $0x98] sm:$0xff]  ;;  %v26792_v26 = vpack.c.bf16 %v26782_v6, %v26762_v7 }
 0x78d   :  { %9067 = vst [vmem:[#allocation3 + $0xa8] sm:$0xf0] %v9057_v60  ;;  %v20407_v35 = vadd.f32 %v8934_v25, %v26734_v51  ;;  %v8936_v44 = vpop.f32.mrb[150].mxu0  ;;  %v26797_v13 = vpack.c.bf16 %v26788_v33, %v26765_v59  ;;  %v9185_v38 = vrot.slane %v9183_v52, 1  ;;  %v22487_v25 = vld [vmem:[%s29087_s5 + $0x220] ss:$16 sps:$4 sm:$0xff]  }
 0x78e   :  { %v8969_v2 = vmax.f32 %v20406_v63, 0.0  ;;  %v20408_v42 = vadd.f32 %v8936_v44, %v26731_v28  ;;  %v8938_v58 = vpop.f32.mrb[151].mxu0  ;;  %v9176_v3 = vshll.u32 %v26792_v26, 16  ;;  %v9192_v0 = vshrl.u32 %v26792_v26, 16 }
 0x78f   :  { %v8970_v49 = vmax.f32 %v20407_v35, 0.0  ;;  %v20409_v32 = vadd.f32 %v8938_v58, %v26734_v51  ;;  %v29107_v30 = vshll.u32 %v26797_v13, 16  ;;  %v9181_v35 = vshrl.u32 %v26785_v46, 16  ;;  %v22495_v46 = vld [vmem:[%s29087_s5 + $0x244] ss:$16 sps:$4 sm:$0xff]  }
 0x790   :  { %v9058_v10 = vrot.slane %v8969_v2, 7  ;;  %v8971_v39 = vmax.f32 %v20408_v42, 0.0  ;;  %v26811_v43 = vrot.slane %v9176_v3, 1  ;;  %v26824_v40 = vrot.slane %v9192_v0, 7 }
 0x791   :  { %v9060_v47 = vrot.slane %v8970_v49, 7  ;;  %v8972_v20 = vmax.f32 %v20409_v32, 0.0  ;;  %v9190_v21 = vrot.slane %v29107_v30, 1  ;;  %v29109_v29 = vshrl.u32 %v26797_v13, 16 }
 0x792   :  { %v9059_v37 = vsel %vm8987_vm6, %v9056_v50, %v9058_v10  ;;  %v9074_v54 = vrot.slane %v8971_v39, 7  ;;  %v9096_v45 = vld [vmem:[#allocation3 + $0xa0] sm:$0x3]  ;;  %v9954_v1 = vsel %vm2388_vm1, %v9953_v34, %v26811_v43  ;;  %v26846_v42 = vor.u32 %v26824_v40, %v9176_v3  ;;  %v22498_v3 = vld [vmem:[%s29087_s5 + $0x24c] ss:$16 sps:$4 sm:$0xff]  }
 0x793   :  { %9068 = vst [vmem:[#allocation3 + $0xb0] sm:$0x7] %v9059_v37  ;;  %v9061_v31 = vsel %vm8987_vm6, %v9057_v60, %v9060_v47  ;;  %v9075_v14 = vrot.slane %v8972_v20, 7  ;;  %v8942_v5 = vpop.f32.mrb[152].mxu0  ;;  %v9962_v19 = vsel %vm2388_vm1, %v9961_v24, %v9190_v21  ;;  %v9097_v61 = vld [vmem:[#allocation3 + $0xa8] sm:$0x3]  ;;  %v26837_v62 = vpack.c.bf16 %v9096_v45, %v9096_v45 }
 0x794   :  { %9069 = vst [vmem:[#allocation3 + $0xb8] sm:$0x7] %v9061_v31  ;;  %9084 = vst [vmem:[#allocation3 + $0xb0] sm:$0xf8] %v9074_v54  ;;  %v20410_v50 = vadd.f32 %v8942_v5, %v26731_v28  ;;  %v8944_v56 = vpop.f32.mrb[153].mxu0  ;;  %13271 = vmatprep.mubr.bf16.mxu1 %v9962_v19  ;;  %13820 = vmatprep.mubr.bf16.mxu0 %v9962_v19  ;;  %v26831_v41 = vpack.c.bf16 %v9097_v61, %v9097_v61  ;;  %v9239_v5 = vshrl.u32 %v26776_v8, 16 }
 0x795   :  { %9085 = vst [vmem:[#allocation3 + $0xb8] sm:$0xf8] %v9075_v14  ;;  %v20411_v60 = vadd.f32 %v8944_v56, %v26734_v51  ;;  %v8946_v63 = vpop.f32.mrb[154].mxu0  ;;  %13272 = vmatmul.mubr.bf16.vlgmr.msra.gmra.mrb[40].mxu1 %v9954_v1  ;;  %13821 = vmatmul.mubr.bf16.vlgmr.msra.gmra.mrb[156].mxu0 %v9954_v1  ;;  %v9107_v28 = vld [vmem:[#allocation3 + $0xa8] sm:$0x7]  ;;  %v10142_v49 = vshll.u32 %v26837_v62, 16  ;;  %v9186_v32 = vor.u32 %v9185_v38, %v9181_v35 }
 0x796   :  { %v8973_v44 = vmax.f32 %v20410_v50, 0.0  ;;  %13301 = vmatpush1.bf16.msra.mxu1 %v22481_v27  ;;  %13850 = vmatpush1.bf16.msra.mxu0 %v22484_v15  ;;  %v8947_v18 = vpop.f32.mrb[155].mxu0  ;;  %v22490_v51 = vld [vmem:[%s29087_s5 + $0x228] ss:$16 sps:$4 sm:$0xff]   ;;  %v10147_v2 = vshll.u32 %v26831_v41, 16  ;;  %v9202_v10 = vor.u32 %v29109_v29, %v9190_v21  ;;  %v26857_v27 = vpack.c.bf16 %v9107_v28, %v9107_v28 }
 0x797   :  { %v8974_v58 = vmax.f32 %v20411_v60, 0.0  ;;  %13302 = vmatprep.subr.bf16.mxu1 %v22489_v23  ;;  %13851 = vmatprep.subr.bf16.mxu0 %v22492_v57  ;;  %v9113_v15 = vld [vmem:[#allocation3 + $0x68] sm:$0xf8]  ;;  %v10144_v47 = vrot.slane %v10142_v49, 1  ;;  %v26860_v20 = vsel %vm2388_vm1, %v9186_v32, %v9190_v21  ;;  %v22496_v57 = vld [vmem:[%s29087_s5 + $0x248] ss:$16 sps:$4 sm:$0xff]   ;;  %v26874_v21 = vor.u32 %v9192_v0, %v26811_v43 }
 0x798   :  { %v9076_v52 = vrot.slane %v8973_v44, 7  ;;  %v10149_v39 = vrot.slane %v10147_v2, 1  ;;  %v9117_v24 = vpack.c.bf16 %v26757_v16, %v9113_v15  ;;  %v22493_v34 = vld [vmem:[%s29087_s5 + $0x240] ss:$16 sps:$4 sm:$0xff]   ;;  %v9204_v16 = vshll.u32 %v26857_v27, 16 }
 0x799   :  { %v9078_v22 = vrot.slane %v8974_v58, 7  ;;  %v22501_v45 = vld [vmem:[%s29087_s5 + $0x264] ss:$16 sps:$4 sm:$0xff]   ;;  %v9115_v31 = vld [vmem:[#allocation3 + $0xa8] sm:$0xf]  ;;  %v10145_v0 = vsel %vm2388_vm1, %v26874_v21, %v10144_v47  ;;  %v9978_v61 = vshll.u32 %v26860_v20, 16 }
 0x79a   :  { %v9077_v23 = vsel %vm8987_vm6, %v9074_v54, %v9076_v52  ;;  %13303 = vmatpush1.bf16.msra.mxu1 %v22487_v25  ;;  %13852 = vmatpush1.bf16.msra.mxu0 %v22490_v51  ;;  %v10150_v37 = vsel %vm2388_vm1, %v9202_v10, %v10149_v39  ;;  %v22504_v19 = vld [vmem:[%s29087_s5 + $0x26c] ss:$16 sps:$4 sm:$0xff]   ;;  %v9224_v38 = vrot.slane %v26797_v13, 1  ;;  %v10271_v50 = vshrl.u32 %v26831_v41, 16  ;;  %v22499_v56 = vld [vmem:[%s29087_s5 + $0x260] ss:$16 sps:$4 sm:$0xff]  }
 0x79b   :  { %9086 = vst [vmem:[#allocation3 + $0xc0] sm:$0x3] %v9077_v23  ;;  %v9079_v54 = vsel %vm8987_vm6, %v9075_v14, %v9078_v22  ;;  %13281 = vmatprep.mubr.bf16.mxu1 %v10150_v37  ;;  %13830 = vmatprep.mubr.bf16.mxu0 %v10150_v37  ;;  %v26887_v14 = vrot.slane %v9204_v16, 1  ;;  %v22502_v1 = vld [vmem:[%s29087_s5 + $0x268] ss:$16 sps:$4 sm:$0xff]   ;;  %v9119_v63 = vpack.c.bf16 %v9115_v31, %v9115_v31  ;;  %v9223_v25 = vrot.slane %v9117_v24, 1 }
 0x79c   :  { %9087 = vst [vmem:[#allocation3 + $0xc8] sm:$0x3] %v9079_v54  ;;  %13304 = vmatprep.subr.bf16.mxu1 %v22495_v46  ;;  %13853 = vmatprep.subr.bf16.mxu0 %v22498_v3  ;;  %v22507_v41 = vld [vmem:[%s29087_s5 + $0x284] ss:$16 sps:$4 sm:$0xff]   ;;  %v22510_v28 = vld [vmem:[%s29087_s5 + $0x28c] ss:$16 sps:$4 sm:$0xff]  }
 0x79d   :  { %13282 = vmatmul.mubr.bf16.gmra.mrb[44].mxu1 %v10145_v0  ;;  %13831 = vmatmul.mubr.bf16.gmra.mrb[160].mxu0 %v10145_v0  ;;  %v26900_v60 = vsel %vm2388_vm1, %v9202_v10, %v26887_v14  ;;  %v26909_v44 = vrot.slane %v9239_v5, 7  ;;  %v9980_v18 = vrot.slane %v9978_v61, 1  ;;  %v9225_v51 = vsel %vm2445_vm3, %v9223_v25, %v9224_v38  ;;  %v9112_v2 = vld [vmem:[#allocation3 + $0x60] sm:$0xf8]  ;;  %v22505_v58 = vld [vmem:[%s29087_s5 + $0x280] ss:$16 sps:$4 sm:$0xff]  }
 0x79e   :  { %13305 = vmatpush1.bf16.msra.mxu1 %v22493_v34  ;;  %13854 = vmatpush1.bf16.msra.mxu0 %v22496_v57  ;;  %v9983_v35 = vshll.u32 %v26900_v60, 16  ;;  %v9114_v46 = vld [vmem:[#allocation3 + $0xa0] sm:$0xf]  ;;  %v9116_v49 = vpack.c.bf16 %v26759_v12, %v9112_v2  ;;  %v9242_v32 = vshll.u32 %v26776_v8, 16  ;;  %v9976_v10 = vshrl.u32 %v26860_v20, 16  ;;  %v26933_v24 = vld [vmem:[#allocation3 + $0xa8] sm:$0xff] }
 0x79f   :  { %13291 = vmatprep.mubr.bf16.mxu1 %v10271_v50  ;;  %13840 = vmatprep.mubr.bf16.mxu0 %v10271_v50  ;;  %v22508_v52 = vld [vmem:[%s29087_s5 + $0x288] ss:$16 sps:$4 sm:$0xff]   ;;  %v26923_v3 = vrot.slane %v9119_v63, 1  ;;  %v10269_v15 = vshrl.u32 %v26837_v62, 16  ;;  %v22513_v8 = vld [vmem:[%s29087_s5 + $0x2a4] ss:$16 sps:$4 sm:$0xff]   ;;  %v9118_v57 = vpack.c.bf16 %v9114_v46, %v9114_v46 }
 0x7a0   :  { %13306 = vmatprep.subr.bf16.mxu1 %v22501_v45  ;;  %13855 = vmatprep.subr.bf16.mxu0 %v22504_v19  ;;  %v26921_v39 = vrot.slane %v9983_v35, 1  ;;  %v26930_v22 = vor.u32 %v9242_v32, %v26909_v44  ;;  %v9232_v47 = vshrl.u32 %v26769_v17, 16  ;;  %v9981_v20 = vor.u32 %v9980_v18, %v9976_v10  ;;  %v22516_v23 = vld [vmem:[%s29087_s5 + $0x2ac] ss:$16 sps:$4 sm:$0xff]   ;;  %v22511_v16 = vld [vmem:[%s29087_s5 + $0x2a0] ss:$16 sps:$4 sm:$0xff]  }
 0x7a1   :  { %v9104_v37 = vld [vmem:[#allocation3 + $0x60] sm:$0xfc]  ;;  %v26940_v62 = vsel %vm2445_vm3, %v9224_v38, %v26923_v3  ;;  %v10002_v34 = vshll.u32 %v9225_v51, 16  ;;  %v9220_v31 = vrot.slane %v9116_v49, 1  ;;  %v9221_v5 = vrot.slane %v26792_v26, 1 }
 0x7a2   :  { %13307 = vmatpush1.bf16.msra.mxu1 %v22499_v56  ;;  %13856 = vmatpush1.bf16.msra.mxu0 %v22502_v1  ;;  %v26946_v54 = vpack.c.bf16 %v26759_v12, %v9104_v37  ;;  %v10007_v45 = vshll.u32 %v26940_v62, 16  ;;  %v26950_v0 = vld [vmem:[#allocation3 + $0xa0] sm:$0xff]  ;;  %v9986_v19 = vsel %vm2388_vm1, %v9981_v20, %v26921_v39  ;;  %v10000_v38 = vshrl.u32 %v9225_v51, 16  ;;  %v22519_v26 = vld [vmem:[%s29087_s5 + $0x2c4] ss:$16 sps:$4 sm:$0xff]  }
 0x7a3   :  { %13308 = vmatprep.subr.bf16.mxu1 %v22507_v41  ;;  %13857 = vmatprep.subr.bf16.mxu0 %v22510_v28  ;;  %v22514_v61 = vld [vmem:[%s29087_s5 + $0x2a8] ss:$16 sps:$4 sm:$0xff]   ;;  %v10004_v50 = vrot.slane %v10002_v34, 1  ;;  %v26957_v12 = vrot.slane %v9118_v57, 1  ;;  %v26961_v56 = vpack.c.bf16 %v26933_v24, %v26788_v33  ;;  %v22522_v1 = vld [vmem:[%s29087_s5 + $0x2cc] ss:$16 sps:$4 sm:$0xff]   ;;  %v9222_v25 = vsel %vm2445_vm3, %v9220_v31, %v9221_v5 }
 0x7a4   :  { %v26969_v63 = vrot.slane %v10007_v45, 1  ;;  %v26972_v41 = vrot.slane %v9232_v47, 7  ;;  %v9990_v18 = vshll.u32 %v9222_v25, 16  ;;  %v10026_v51 = vshll.u32 %v26930_v22, 16  ;;  %v22520_v46 = vld [vmem:[%s29087_s5 + $0x2c8] ss:$16 sps:$4 sm:$0xff]  }
 0x7a5   :  { %13292 = vmatmul.mubr.bf16.gmra.mrb[48].mxu1 %v10269_v15  ;;  %13841 = vmatmul.mubr.bf16.gmra.mrb[164].mxu0 %v10269_v15  ;;  %v10005_v28 = vor.u32 %v10004_v50, %v10000_v38  ;;  %v26976_v35 = vsel %vm2445_vm3, %v9221_v5, %v26957_v12  ;;  %v26981_v2 = vpack.c.bf16 %v26950_v0, %v26782_v6  ;;  %v9235_v32 = vshll.u32 %v26769_v17, 16  ;;  %v9123_v47 = vld [vmem:[#allocation3 + $0xb8] sm:$0x1]  ;;  %v22528_v20 = vld [vmem:[%s29087_s5 + $0x2ec] ss:$16 sps:$4 sm:$0xff]  }
 0x7a6   :  { %13309 = vmatpush1.bf16.msra.mxu1 %v22505_v58  ;;  %13858 = vmatpush1.bf16.msra.mxu0 %v22508_v52  ;;  %v22517_v58 = vld [vmem:[%s29087_s5 + $0x2c0] ss:$16 sps:$4 sm:$0xff]   ;;  %v9995_v49 = vshll.u32 %v26976_v35, 16  ;;  %v22525_v52 = vld [vmem:[%s29087_s5 + $0x2e4] ss:$16 sps:$4 sm:$0xff]   ;;  %v9988_v15 = vshrl.u32 %v9222_v25, 16  ;;  %v9129_v38 = vpack.c.bf16 %v9123_v47, %v9123_v47 }
 0x7a7   :  { %13332 = vmatprep.mubr.bf16.mxu1 %v9986_v19  ;;  %13881 = vmatprep.mubr.bf16.mxu0 %v9986_v19  ;;  %v26996_v10 = vsel %vm2388_vm1, %v10005_v28, %v26969_v63  ;;  %v9237_v37 = vor.u32 %v9235_v32, %v26972_v41  ;;  %v9122_v34 = vld [vmem:[#allocation3 + $0xb0] sm:$0x1]  ;;  %v22523_v57 = vld [vmem:[%s29087_s5 + $0x2e0] ss:$16 sps:$4 sm:$0xff]   ;;  %v10028_v31 = vrot.slane %v10026_v51, 1  ;;  %v9257_v19 = vshll.u32 %v26961_v56, 16 }
 0x7a8   :  { %13310 = vmatprep.subr.bf16.mxu1 %v22513_v8  ;;  %13859 = vmatprep.subr.bf16.mxu0 %v22516_v23  ;;  %v9992_v8 = vrot.slane %v9990_v18, 1  ;;  %v27001_v17 = vrot.slane %v9995_v49, 1  ;;  %v9254_v23 = vshrl.u32 %v26961_v56, 16  ;;  %v9131_v50 = vld [vmem:[#allocation3 + $0x78] sm:$0xfe]  ;;  %v10024_v28 = vshrl.u32 %v26930_v22, 16 }
 0x7a9   :  { %v9128_v18 = vpack.c.bf16 %v9122_v34, %v9122_v34  ;;  %v27023_v51 = vpack.c.bf16 %v26765_v59, %v9131_v50  ;;  %v9249_v32 = vshll.u32 %v26981_v2, 16  ;;  %v22529_v47 = vld [vmem:[%s29087_s5 + $0x300] ss:$16 sps:$4 sm:$0xff]   ;;  %v22532_v50 = vld [vmem:[%s29087_s5 + $0x308] ss:$16 sps:$4 sm:$0xff]   ;;  %v29165_v11 = vshrl.u32 %v26797_v13, 16 }
 0x7aa   :  { %13311 = vmatpush1.bf16.msra.mxu1 %v22511_v16  ;;  %13860 = vmatpush1.bf16.msra.mxu0 %v22514_v61  ;;  %v9171_v16 = vshll.u32 %v26946_v54, 16  ;;  %v9993_v45 = vor.u32 %v9992_v8, %v9988_v15  ;;  %v9256_v5 = vrot.slane %v9254_v23, 7  ;;  %v29108_v61 = vshrl.u32 %v26981_v2, 16  ;;  %v9141_v29 = vld [vmem:[#allocation3 + $0xb8] sm:$0x7] }
 0x7ab   :  { %13312 = vmatprep.subr.bf16.mxu1 %v22519_v26  ;;  %13861 = vmatprep.subr.bf16.mxu0 %v22522_v1  ;;  %v22526_v26 = vld [vmem:[%s29087_s5 + $0x2e8] ss:$16 sps:$4 sm:$0xff]   ;;  %v22531_v1 = vld [vmem:[%s29087_s5 + $0x304] ss:$16 sps:$4 sm:$0xff]   ;;  %v10014_v15 = vshll.u32 %v9237_v37, 16  ;;  %v10029_v22 = vor.u32 %v10028_v31, %v10024_v28  ;;  %v9262_v53 = vshll.u32 %v9128_v18, 16 }
 0x7ac   :  { %v27019_v25 = vsel %vm2388_vm1, %v9993_v45, %v27001_v17  ;;  %v9248_v49 = vrot.slane %v29108_v61, 7  ;;  %v27031_v8 = vrot.slane %v9171_v16, 1  ;;  %v9266_v45 = vshll.u32 %v9129_v38, 16  ;;  %v9106_v28 = vld [vmem:[#allocation3 + $0xa0] sm:$0x7] }
 0x7ad   :  { %v10016_v34 = vrot.slane %v10014_v15, 1  ;;  %v10012_v16 = vshrl.u32 %v9237_v37, 16  ;;  %v27041_v31 = vrot.slane %v9257_v19, 1  ;;  %v9130_v15 = vld [vmem:[#allocation3 + $0x70] sm:$0xfe]  ;;  %v27084_v4 = vrot.slane %v29165_v11, 7 }
 0x7ae   :  { %13313 = vmatpush1.bf16.msra.mxu1 %v22517_v58  ;;  %13862 = vmatpush1.bf16.msra.mxu0 %v22520_v46  ;;  %v22534_v58 = vld [vmem:[%s29087_s5 + $0x30c] ss:$16 sps:$4 sm:$0xff]   ;;  %v9259_v46 = vor.u32 %v9257_v19, %v9256_v5  ;;  %v10046_v19 = vshll.u32 %v27023_v51, 16  ;;  %v9140_v61 = vld [vmem:[#allocation3 + $0xb0] sm:$0x7]  ;;  %v9211_v36 = vshrl.u32 %v26857_v27, 16 }
 0x7af   :  { %13314 = vmatprep.subr.bf16.mxu1 %v22525_v52  ;;  %13863 = vmatprep.subr.bf16.mxu0 %v22528_v20  ;;  %v9251_v20 = vor.u32 %v9249_v32, %v9248_v49  ;;  %v27062_v30 = vor.u32 %v27041_v31, %v9254_v23  ;;  %v22541_v11 = vld [vmem:[%s29087_s5 + $0x340] ss:$16 sps:$4 sm:$0xff]  }
 0x7b0   :  { %v9260_v52 = vsel %vm9230_vm7, %v26909_v44, %v9259_v46  ;;  %v22537_v44 = vld [vmem:[%s29087_s5 + $0x324] ss:$16 sps:$4 sm:$0xff]   ;;  %v27059_v46 = vsel %vm9230_vm7, %v9248_v49, %v9262_v53 }
 0x7b1   :  { %v10031_v55 = vshll.u32 %v9260_v52, 16  ;;  %v9252_v38 = vsel %vm9230_vm7, %v26972_v41, %v9251_v20  ;;  %v10191_v37 = vshrl.u32 %v9260_v52, 16  ;;  %v22538_v41 = vld [vmem:[%s29087_s5 + $0x328] ss:$16 sps:$4 sm:$0xff]   ;;  %v22543_v53 = vld [vmem:[%s29087_s5 + $0x344] ss:$16 sps:$4 sm:$0xff]  }
 0x7b2   :  { %13315 = vmatpush1.bf16.msra.mxu1 %v22523_v57  ;;  %13864 = vmatpush1.bf16.msra.mxu0 %v22526_v26  ;;  %v22540_v57 = vld [vmem:[%s29087_s5 + $0x32c] ss:$16 sps:$4 sm:$0xff]   ;;  %v27052_v26 = vsel %vm9230_vm7, %v9256_v5, %v9266_v45  ;;  %v10017_v5 = vor.u32 %v10016_v34, %v10012_v16  ;;  %v10183_v20 = vshrl.u32 %v9252_v38, 16  ;;  %v9134_v45 = vpack.c.bf16 %v26762_v7, %v9130_v15 }
 0x7b3   :  { %13316 = vmatprep.subr.bf16.mxu1 %v22531_v1  ;;  %13865 = vmatprep.subr.bf16.mxu0 %v22534_v58  ;;  %v22535_v1 = vld [vmem:[%s29087_s5 + $0x320] ss:$16 sps:$4 sm:$0xff]   ;;  %v10033_v18 = vrot.slane %v10031_v55, 1  ;;  %v10019_v58 = vshll.u32 %v9252_v38, 16  ;;  %v10195_v52 = vshll.u32 %v27052_v26, 16  ;;  %v10187_v16 = vshll.u32 %v27059_v46, 16 }
 0x7b4   :  { %v22546_v55 = vld [vmem:[%s29087_s5 + $0x34c] ss:$16 sps:$4 sm:$0xff]   ;;  %v27079_v38 = vpack.c.bf16 %v9106_v28, %v9106_v28  ;;  %v10048_v15 = vrot.slane %v10046_v19, 1  ;;  %v22544_v19 = vld [vmem:[%s29087_s5 + $0x348] ss:$16 sps:$4 sm:$0xff]  }
 0x7b5   :  { %v27076_v23 = vsel %vm2388_vm1, %v10029_v22, %v10033_v18  ;;  %v10021_v49 = vrot.slane %v10019_v58, 1  ;;  %v10193_v34 = vor.u32 %v10191_v37, %v10033_v18  ;;  %v27089_v37 = vpack.c.bf16 %v9140_v61, %v9140_v61 }
 0x7b6   :  { %13317 = vmatpush1.bf16.msra.mxu1 %v22529_v47  ;;  %13866 = vmatpush1.bf16.msra.mxu0 %v22532_v50  ;;  %v10197_v47 = vrot.slane %v10195_v52, 1  ;;  %v10044_v50 = vshrl.u32 %v27023_v51, 16  ;;  %v27094_v18 = vrot.slane %v9249_v32, 1  ;;  %v9139_v51 = vld [vmem:[#allocation3 + $0x78] sm:$0xfc]  ;;  %v9169_v61 = vshrl.u32 %v26946_v54, 16 }
 0x7b7   :  { %13318 = vmatprep.subr.bf16.mxu1 %v22537_v44  ;;  %13867 = vmatprep.subr.bf16.mxu0 %v22540_v57  ;;  %v27087_v22 = vsel %vm2388_vm1, %v10017_v5, %v10021_v49  ;;  %v10185_v58 = vor.u32 %v10183_v20, %v10021_v49  ;;  %29166 = vst [vmem:[#allocation19_spill] sm:$0xff] %v27089_v37  ;;  %v10189_v44 = vrot.slane %v10187_v16, 1  ;;  %v10038_v5 = vshll.u32 %v9134_v45, 16 }
 0x7b8   :  { %v27092_v28 = vsel %vm2388_vm1, %v10193_v34, %v10197_v47  ;;  %v10049_v57 = vor.u32 %v10048_v15, %v10044_v50  ;;  %v9143_v52 = vpack.c.bf16 %v26765_v59, %v9139_v51  ;;  %v27104_v20 = vpack.c.bf16 %v9141_v29, %v9141_v29 }
 0x7b9   :  { %v9196_v32 = vshll.u32 %v27079_v38, 16  ;;  %v27114_v49 = vsel %vm2388_vm1, %v10185_v58, %v10189_v44  ;;  %v29168_v29 = vshrl.u32 %v26981_v2, 16  ;;  %v29169_v34 = vshll.u32 %v26797_v13, 16  ;;  %v9138_v58 = vld [vmem:[#allocation3 + $0x70] sm:$0xfc] }
 0x7ba   :  { %13319 = vmatpush1.bf16.msra.mxu1 %v22535_v1  ;;  %13868 = vmatpush1.bf16.msra.mxu0 %v22538_v41  ;;  %29167 = vst [vmem:[#allocation20_spill] sm:$0xff] %v27104_v20  ;;  %v22549_v1 = vld [vmem:[%s29087_s5 + $0x364] ss:$16 sps:$4 sm:$0xff]   ;;  %v22552_v41 = vld [vmem:[%s29087_s5 + $0x36c] ss:$16 sps:$4 sm:$0xff]   ;;  %v27118_v54 = vsel %vm2388_vm1, %v10049_v57, %v27041_v31  ;;  %v9174_v47 = vor.u32 %v27031_v8, %v9169_v61  ;;  %v10036_v50 = vshrl.u32 %v9134_v45, 16 }
 0x7bb   :  { %13320 = vmatprep.subr.bf16.mxu1 %v22543_v53  ;;  %13869 = vmatprep.subr.bf16.mxu0 %v22546_v55  ;;  %v27123_v53 = vor.u32 %v27094_v18, %v29168_v29  ;;  %v9289_v55 = vshll.u32 %v27089_v37, 16  ;;  %v27129_v16 = vor.u32 %v27084_v4, %v29169_v34  ;;  %v10040_v15 = vrot.slane %v10038_v5, 1  ;;  %v22547_v44 = vld [vmem:[%s29087_s5 + $0x360] ss:$16 sps:$4 sm:$0xff]   ;;  %v22550_v57 = vld [vmem:[%s29087_s5 + $0x368] ss:$16 sps:$4 sm:$0xff]  }
 0x7bc   :  { %v9281_v51 = vshll.u32 %v9143_v52, 16  ;;  %v9142_v13 = vpack.c.bf16 %v26762_v7, %v9138_v58  ;;  %v27139_v29 = vrot.slane %v9196_v32, 1  ;;  %v22555_v8 = vld [vmem:[%s29087_s5 + $0x384] ss:$16 sps:$4 sm:$0xff]   ;;  %v22558_v45 = vld [vmem:[%s29087_s5 + $0x38c] ss:$16 sps:$4 sm:$0xff]  }
 0x7bd   :  { %v9295_v61 = vshll.u32 %v27104_v20, 16  ;;  %v27150_v5 = vrot.slane %v9289_v55, 1  ;;  %v22553_v58 = vld [vmem:[%s29087_s5 + $0x380] ss:$16 sps:$4 sm:$0xff]   ;;  %v9147_v37 = vld [vmem:[#allocation3 + $0x78] sm:$0x80] }
 0x7be   :  { %13321 = vmatpush1.bf16.msra.mxu1 %v22541_v11  ;;  %13870 = vmatpush1.bf16.msra.mxu0 %v22544_v19  ;;  %v9179_v11 = vsel %vm2388_vm1, %v9174_v47, %v26811_v43  ;;  %v10041_v19 = vor.u32 %v10040_v15, %v10036_v50  ;;  %v22556_v43 = vld [vmem:[%s29087_s5 + $0x388] ss:$16 sps:$4 sm:$0xff]   ;;  %v9272_v47 = vshll.u32 %v9142_v13, 16  ;;  %v27167_v50 = vsel %vm2388_vm1, %v26874_v21, %v27139_v29  ;;  %v22564_v15 = vld [vmem:[%s29087_s5 + $0x3ac] ss:$16 sps:$4 sm:$0xff]  }
 0x7bf   :  { %13322 = vmatprep.subr.bf16.mxu1 %v22549_v1  ;;  %13871 = vmatprep.subr.bf16.mxu0 %v22552_v41  ;;  %29170 = vst [vmem:[#allocation21_spill] sm:$0xff] %v27150_v5  ;;  %v9279_v1 = vshrl.u32 %v9143_v52, 16  ;;  %v9283_v41 = vrot.slane %v9281_v51, 1  ;;  %v27156_v34 = vrot.slane %v9295_v61, 1  ;;  %v9966_v55 = vshll.u32 %v9179_v11, 16 }
 0x7c0   :  { %v27154_v32 = vsel %vm2388_vm1, %v10041_v19, %v27094_v18  ;;  %v22561_v52 = vld [vmem:[%s29087_s5 + $0x3a4] ss:$16 sps:$4 sm:$0xff]   ;;  %v22559_v21 = vld [vmem:[%s29087_s5 + $0x3a0] ss:$16 sps:$4 sm:$0xff]   ;;  %v27186_v51 = vsel %vm2388_vm1, %v27123_v53, %v27150_v5  ;;  %v9270_v61 = vshrl.u32 %v9142_v13, 16  ;;  %v9971_v9 = vshll.u32 %v27167_v50, 16 }
 0x7c1   :  { %29171 = vst [vmem:[#allocation22_spill] sm:$0xff] %v27156_v34  ;;  %v9968_v48 = vrot.slane %v9966_v55, 1  ;;  %v22570_v13 = vld [vmem:[%s29087_s5 + $0x3cc] ss:$16 sps:$4 sm:$0xff]   ;;  %v27206_v55 = vor.u32 %v9211_v36, %v26887_v14  ;;  %v9208_v27 = vshrl.u32 %v27079_v38, 16 }
 0x7c2   :  { %13323 = vmatpush1.bf16.msra.mxu1 %v22547_v44  ;;  %13872 = vmatpush1.bf16.msra.mxu0 %v22550_v57  ;;  %v9284_v44 = vor.u32 %v9283_v41, %v9279_v1  ;;  %v27178_v57 = vsel %vm2388_vm1, %v27062_v30, %v27156_v34  ;;  %v9274_v1 = vrot.slane %v9272_v47, 1  ;;  %v27194_v41 = vld [vmem:[#allocation3 + $0xb8] sm:$0xff]  ;;  %v9964_v47 = vshrl.u32 %v9179_v11, 16  ;;  %v22568_v14 = vld [vmem:[%s29087_s5 + $0x3c8] ss:$16 sps:$4 sm:$0xff]  }
 0x7c3   :  { %13324 = vmatprep.subr.bf16.mxu1 %v22555_v8  ;;  %13873 = vmatprep.subr.bf16.mxu0 %v22558_v45  ;;  %29172 = vst [vmem:[#allocation23_spill] sm:$0xff] %v27178_v57  ;;  %v22562_v8 = vld [vmem:[%s29087_s5 + $0x3a8] ss:$16 sps:$4 sm:$0xff]   ;;  %v10071_v19 = vshll.u32 %v27178_v57, 16  ;;  %v22565_v36 = vld [vmem:[%s29087_s5 + $0x3c0] ss:$16 sps:$4 sm:$0xff]  }
 0x7c4   :  { %v9286_v45 = vsel %vm2388_vm1, %v9284_v44, %v27041_v31  ;;  %v22567_v31 = vld [vmem:[%s29087_s5 + $0x3c4] ss:$16 sps:$4 sm:$0xff]   ;;  %v27212_v44 = vld [vmem:[#allocation3 + $0xb0] sm:$0xff]  ;;  %v9969_v38 = vor.u32 %v9968_v48, %v9964_v47  ;;  %v10159_v48 = vshrl.u32 %v26900_v60, 16 }
 0x7c5   :  { %v10066_v5 = vshll.u32 %v9286_v45, 16  ;;  %v10064_v57 = vshrl.u32 %v9286_v45, 16  ;;  %v27214_v20 = vrot.slane %v10071_v19, 1  ;;  %v22574_v60 = vld [vmem:[%s29087_s5 + $0x3e8] ss:$16 sps:$4 sm:$0xff]  }
 0x7c6   :  { %13325 = vmatpush1.bf16.msra.mxu1 %v22553_v58  ;;  %13874 = vmatpush1.bf16.msra.mxu0 %v22556_v43  ;;  %v9275_v58 = vor.u32 %v9274_v1, %v9270_v61  ;;  %v9151_v43 = vpack.c.bf16 %v26765_v59, %v9147_v37  ;;  %v9146_v59 = vld [vmem:[#allocation3 + $0x70] sm:$0x80]  ;;  %v27224_v37 = vrot.slane %v9971_v9, 1  ;;  %v9315_v61 = vrot.slane %v26961_v56, 3 }
 0x7c7   :  { %13326 = vmatprep.subr.bf16.mxu1 %v22561_v52  ;;  %13875 = vmatprep.subr.bf16.mxu0 %v22564_v15  ;;  %v10059_v52 = vshll.u32 %v27186_v51, 16  ;;  %v9153_v15 = vpack.c.bf16 %v27194_v41, %v27194_v41  ;;  %v10068_v34 = vrot.slane %v10066_v5, 1  ;;  %v9150_v45 = vpack.c.bf16 %v26762_v7, %v9146_v59  ;;  %v22582_v59 = vld [vmem:[%s29087_s5 + $0x40c] ss:$16 sps:$4 sm:$0xff]  }
 0x7c8   :  { %v9277_v11 = vsel %vm2388_vm1, %v9275_v58, %v27094_v18  ;;  %v22573_v18 = vld [vmem:[%s29087_s5 + $0x3e4] ss:$16 sps:$4 sm:$0xff]   ;;  %v9314_v19 = vrot.slane %v9151_v43, 3  ;;  %v9152_v9 = vpack.c.bf16 %v27212_v44, %v27212_v44  ;;  %v10163_v7 = vshll.u32 %v27206_v55, 16 }
 0x7c9   :  { %v10054_v5 = vshll.u32 %v9277_v11, 16  ;;  %v10052_v1 = vshrl.u32 %v9277_v11, 16  ;;  %v27248_v47 = vrot.slane %v9153_v15, 3  ;;  %v27254_v58 = vor.u32 %v9208_v27, %v27139_v29  ;;  %v22579_v15 = vld [vmem:[%s29087_s5 + $0x404] ss:$16 sps:$4 sm:$0xff]  }
 0x7ca   :  { %13327 = vmatpush1.bf16.msra.mxu1 %v22559_v21  ;;  %13876 = vmatpush1.bf16.msra.mxu0 %v22562_v8  ;;  %v22576_v21 = vld [vmem:[%s29087_s5 + $0x3ec] ss:$16 sps:$4 sm:$0xff]   ;;  %v10069_v8 = vor.u32 %v10068_v34, %v10064_v57  ;;  %v9316_v56 = vsel %vm2567_vm4, %v9314_v19, %v9315_v61  ;;  %v9312_v11 = vrot.slane %v26981_v2, 3  ;;  %v27268_v27 = vrot.slane %v9152_v9, 3 }
 0x7cb   :  { %13328 = vmatprep.subr.bf16.mxu1 %v22567_v31  ;;  %13877 = vmatprep.subr.bf16.mxu0 %v22570_v13  ;;  %v27238_v31 = vrot.slane %v10059_v52, 1  ;;  %v22571_v13 = vld [vmem:[%s29087_s5 + $0x3e0] ss:$16 sps:$4 sm:$0xff]   ;;  %v10056_v57 = vrot.slane %v10054_v5, 1  ;;  %v10090_v43 = vshll.u32 %v9316_v56, 16  ;;  %v9311_v52 = vrot.slane %v9150_v45, 3 }
 0x7cc   :  { %v27245_v34 = vsel %vm2388_vm1, %v10069_v8, %v27214_v20  ;;  %v27266_v29 = vsel %vm2567_vm4, %v9315_v61, %v27248_v47  ;;  %v10165_v2 = vrot.slane %v10163_v7, 1  ;;  %v27272_v5 = vpack.c.bf16 %v27194_v41, %v26933_v24  ;;  %v22585_v41 = vld [vmem:[%s29087_s5 + $0x424] ss:$16 sps:$4 sm:$0xff]  }
 0x7cd   :  { %v10088_v45 = vshrl.u32 %v9316_v56, 16  ;;  %v10092_v19 = vrot.slane %v10090_v43, 1  ;;  %v10095_v61 = vshll.u32 %v27266_v29, 16  ;;  %v27288_v24 = vsel %vm2567_vm4, %v9312_v11, %v27268_v27  ;;  %v9155_v43 = vld [vmem:[#allocation3 + $0xc8] sm:$0x1] }
 0x7ce   :  { %13329 = vmatpush1.bf16.msra.mxu1 %v22565_v36  ;;  %13878 = vmatpush1.bf16.msra.mxu0 %v22568_v14  ;;  %v10161_v36 = vor.u32 %v10159_v48, %v26921_v39  ;;  %v10057_v14 = vor.u32 %v10056_v57, %v10052_v1  ;;  %v22580_v39 = vld [vmem:[%s29087_s5 + $0x408] ss:$16 sps:$4 sm:$0xff]   ;;  %v10151_v9 = vshrl.u32 %v27167_v50, 16  ;;  %v10083_v7 = vshll.u32 %v27288_v24, 16  ;;  %v22588_v57 = vld [vmem:[%s29087_s5 + $0x42c] ss:$16 sps:$4 sm:$0xff]  }
 0x7cf   :  { %13330 = vmatprep.subr.bf16.mxu1 %v22573_v18  ;;  %13879 = vmatprep.subr.bf16.mxu0 %v22576_v21  ;;  %v9313_v18 = vsel %vm2567_vm4, %v9311_v52, %v9312_v11  ;;  %v22577_v21 = vld [vmem:[%s29087_s5 + $0x400] ss:$16 sps:$4 sm:$0xff]   ;;  %v9974_v1 = vsel %vm2388_vm1, %v9969_v38, %v27224_v37  ;;  %v10093_v56 = vor.u32 %v10092_v19, %v10088_v45  ;;  %v9154_v38 = vld [vmem:[#allocation3 + $0xc0] sm:$0x1]  ;;  %v29124_v45 = vshrl.u32 %v27272_v5, 16 }
 0x7d0   :  { %v27283_v8 = vsel %vm2388_vm1, %v10057_v14, %v27238_v31  ;;  %v10078_v48 = vshll.u32 %v9313_v18, 16  ;;  %v27305_v50 = vpack.c.bf16 %v27212_v44, %v26950_v0  ;;  %v10076_v52 = vshrl.u32 %v9313_v18, 16  ;;  %v22583_v0 = vld [vmem:[%s29087_s5 + $0x420] ss:$16 sps:$4 sm:$0xff]  }
 0x7d1   :  { %v27307_v14 = vrot.slane %v10083_v7, 1  ;;  %v10153_v44 = vor.u32 %v10151_v9, %v27224_v37  ;;  %v29126_v19 = vshll.u32 %v27272_v5, 16  ;;  %v10114_v7 = vshll.u32 %v27129_v16, 16 }
 0x7d2   :  { %13331 = vmatpush1.bf16.msra.mxu1 %v22571_v13  ;;  %13880 = vmatpush1.bf16.msra.mxu0 %v22574_v60  ;;  %v10155_v13 = vshll.u32 %v27254_v58, 16  ;;  %v27301_v60 = vrot.slane %v10095_v61, 1  ;;  %v10080_v11 = vrot.slane %v10078_v48, 1  ;;  %v9159_v61 = vpack.c.bf16 %v9155_v43, %v9155_v43 }
 0x7d3   :  { %13361 = vmatprep.subr.bf16.mxu1 %v22579_v15  ;;  %13910 = vmatprep.subr.bf16.mxu0 %v22582_v59  ;;  %v10166_v15 = vsel %vm2388_vm1, %v10161_v36, %v10165_v2  ;;  %v22586_v36 = vld [vmem:[%s29087_s5 + $0x428] ss:$16 sps:$4 sm:$0xff]   ;;  %v22591_v2 = vld [vmem:[%s29087_s5 + $0x444] ss:$16 sps:$4 sm:$0xff]   ;;  %v9158_v48 = vpack.c.bf16 %v9154_v38, %v9154_v38 }
 0x7d4   :  { %v27312_v59 = vsel %vm2388_vm1, %v10093_v56, %v27301_v60  ;;  %v10081_v18 = vor.u32 %v10080_v11, %v10076_v52  ;;  %v10157_v37 = vrot.slane %v10155_v13, 1  ;;  %v10116_v13 = vrot.slane %v10114_v7, 1  ;;  %v22592_v11 = vld [vmem:[%s29087_s5 + $0x448] ss:$16 sps:$4 sm:$0xff]  }
 0x7d5   :  { %13333 = vmatmul.mubr.bf16.vlgmr.msra.gmra.mrb[40].mxu1 %v9974_v1  ;;  %13882 = vmatmul.mubr.bf16.vlgmr.msra.gmra.mrb[156].mxu0 %v9974_v1  ;;  %v29123_v1 = vshrl.u32 %v27305_v50, 16  ;;  %v29125_v52 = vshll.u32 %v27305_v50, 16  ;;  %v10275_v7 = vshrl.u32 %v27206_v55, 16 }
 0x7d6   :  { %13342 = vmatprep.mubr.bf16.mxu1 %v10166_v15  ;;  %13362 = vmatpush1.bf16.msra.mxu1 %v22577_v21  ;;  %v9336_v21 = vrot.slane %v29124_v45, 7  ;;  %v27333_v9 = vsel %vm2388_vm1, %v10081_v18, %v27307_v14  ;;  %v9342_v18 = vshll.u32 %v9158_v48, 16 }
 0x7d7   :  { %13891 = vmatprep.mubr.bf16.mxu0 %v10166_v15  ;;  %13911 = vmatpush1.bf16.msra.mxu0 %v22580_v39  ;;  %v22594_v39 = vld [vmem:[%s29087_s5 + $0x44c] ss:$16 sps:$4 sm:$0xff]   ;;  %v9328_v43 = vrot.slane %v29123_v1, 7  ;;  %v10102_v15 = vshll.u32 %v26846_v42, 16 }
 0x7d8   :  { %13363 = vmatprep.subr.bf16.mxu1 %v22585_v41  ;;  %13912 = vmatprep.subr.bf16.mxu0 %v22588_v57  ;;  %v9339_v56 = vor.u32 %v29126_v19, %v9336_v21  ;;  %v22589_v41 = vld [vmem:[%s29087_s5 + $0x440] ss:$16 sps:$4 sm:$0xff]   ;;  %v10112_v57 = vshrl.u32 %v27129_v16, 16  ;;  %v10158_v16 = vsel %vm2388_vm1, %v10153_v44, %v10157_v37  ;;  %v9160_v19 = vld [vmem:[#allocation3 + $0x80] sm:$0xfe] }
 0x7d9   :  { %v22595_v44 = vld [vmem:[%s29087_s5 + $0x460] ss:$16 sps:$4 sm:$0xff]   ;;  %v10104_v55 = vrot.slane %v10102_v15, 1  ;;  %v27369_v37 = vsel %vm9230_vm7, %v9328_v43, %v9342_v18 }
 0x7da   :  { %13364 = vmatpush1.bf16.msra.mxu1 %v22583_v0  ;;  %v9340_v38 = vsel %vm9230_vm7, %v27084_v4, %v9339_v56  ;;  %v9346_v0 = vshll.u32 %v9159_v61, 16  ;;  %v9331_v4 = vor.u32 %v29125_v52, %v9328_v43  ;;  %v10117_v61 = vor.u32 %v10116_v13, %v10112_v57  ;;  %v22603_v57 = vld [vmem:[%s29087_s5 + $0x484] ss:$16 sps:$4 sm:$0xff]   ;;  %v22606_v43 = vld [vmem:[%s29087_s5 + $0x48c] ss:$16 sps:$4 sm:$0xff]  }
 0x7db   :  { %13913 = vmatpush1.bf16.msra.mxu0 %v22586_v36  ;;  %13365 = vmatprep.subr.bf16.mxu1 %v22591_v2  ;;  %v22597_v36 = vld [vmem:[%s29087_s5 + $0x464] ss:$16 sps:$4 sm:$0xff]   ;;  %v22600_v2 = vld [vmem:[%s29087_s5 + $0x46c] ss:$16 sps:$4 sm:$0xff]   ;;  %v10119_v1 = vshll.u32 %v9340_v38, 16 }
 0x7dc   :  { %13914 = vmatprep.subr.bf16.mxu0 %v22594_v39  ;;  %v27366_v48 = vsel %vm9230_vm7, %v9336_v21, %v9346_v0  ;;  %v9161_v39 = vld [vmem:[#allocation3 + $0x88] sm:$0xfe]  ;;  %v9332_v45 = vsel %vm9230_vm7, %v26824_v40, %v9331_v4  ;;  %v22598_v21 = vld [vmem:[%s29087_s5 + $0x468] ss:$16 sps:$4 sm:$0xff]   ;;  %v9164_v40 = vpack.c.bf16 %v26782_v6, %v9160_v19  ;;  %v10245_v0 = vshll.u32 %v27369_v37, 16 }
 0x7dd   :  { %13343 = vmatmul.mubr.bf16.gmra.mrb[44].mxu1 %v10158_v16  ;;  %13892 = vmatmul.mubr.bf16.gmra.mrb[160].mxu0 %v10158_v16  ;;  %v10121_v56 = vrot.slane %v10119_v1, 1  ;;  %v10249_v16 = vshrl.u32 %v9340_v38, 16  ;;  %v10253_v52 = vshll.u32 %v27366_v48, 16  ;;  %v10107_v1 = vshll.u32 %v9332_v45, 16 }
 0x7de   :  { %13352 = vmatprep.mubr.bf16.mxu1 %v10275_v7  ;;  %13366 = vmatpush1.bf16.msra.mxu1 %v22589_v41  ;;  %v10100_v41 = vshrl.u32 %v26846_v42, 16  ;;  %v9165_v13 = vpack.c.bf16 %v26788_v33, %v9161_v39  ;;  %v22601_v33 = vld [vmem:[%s29087_s5 + $0x480] ss:$16 sps:$4 sm:$0xff]   ;;  %v10241_v19 = vshrl.u32 %v9332_v45, 16  ;;  %v29173_v4 = vshll.u32 %v27272_v5, 16 }
 0x7df   :  { %13901 = vmatprep.mubr.bf16.mxu0 %v10275_v7  ;;  %13915 = vmatpush1.bf16.msra.mxu0 %v22592_v11  ;;  %v27387_v11 = vsel %vm2388_vm1, %v10117_v61, %v10121_v56  ;;  %v10251_v38 = vor.u32 %v10249_v16, %v10121_v56  ;;  %v10255_v15 = vrot.slane %v10253_v52, 1  ;;  %v10109_v6 = vrot.slane %v10107_v1, 1  ;;  %v22604_v52 = vld [vmem:[%s29087_s5 + $0x488] ss:$16 sps:$4 sm:$0xff]   ;;  %v22609_v61 = vld [vmem:[%s29087_s5 + $0x4a4] ss:$16 sps:$4 sm:$0xff]  }
 0x7e0   :  { %13367 = vmatprep.subr.bf16.mxu1 %v22597_v36  ;;  %13916 = vmatprep.subr.bf16.mxu0 %v22600_v2  ;;  %v10105_v18 = vor.u32 %v10104_v55, %v10100_v41  ;;  %v10247_v7 = vrot.slane %v10245_v0, 1  ;;  %v10273_v36 = vshrl.u32 %v27254_v58, 16  ;;  %v10135_v2 = vshll.u32 %v9165_v13, 16  ;;  %v22612_v45 = vld [vmem:[%s29087_s5 + $0x4ac] ss:$16 sps:$4 sm:$0xff]  }
 0x7e1   :  { %v27394_v42 = vsel %vm2388_vm1, %v10251_v38, %v10255_v15  ;;  %v10243_v55 = vor.u32 %v10241_v19, %v10109_v6  ;;  %v10126_v39 = vshll.u32 %v9164_v40, 16  ;;  %v29174_v56 = vshll.u32 %v27305_v50, 16 }
 0x7e2   :  { %13368 = vmatpush1.bf16.msra.mxu1 %v22595_v44  ;;  %v10139_v44 = vrot.slane %v29173_v4, 1  ;;  %v27409_v58 = vsel %vm2388_vm1, %v10105_v18, %v10109_v6  ;;  %v29175_v41 = vshrl.u32 %v27272_v5, 16  ;;  %v10124_v15 = vshrl.u32 %v9164_v40, 16  ;;  %v22610_v5 = vld [vmem:[%s29087_s5 + $0x4a8] ss:$16 sps:$4 sm:$0xff]  }
 0x7e3   :  { %13917 = vmatpush1.bf16.msra.mxu0 %v22598_v21  ;;  %13369 = vmatprep.subr.bf16.mxu1 %v22603_v57  ;;  %v10130_v16 = vrot.slane %v29174_v56, 1  ;;  %v10133_v21 = vshrl.u32 %v9165_v13, 16  ;;  %v10137_v57 = vrot.slane %v10135_v2, 1  ;;  %v27422_v38 = vsel %vm2388_vm1, %v10243_v55, %v10247_v7  ;;  %v22624_v2 = vld [vmem:[%s29087_s5 + $0x4ec] ss:$16 sps:$4 sm:$0xff]  }
 0x7e4   :  { %13918 = vmatprep.subr.bf16.mxu0 %v22606_v43  ;;  %v27415_v1 = vor.u32 %v10139_v44, %v29175_v41  ;;  %v22607_v43 = vld [vmem:[%s29087_s5 + $0x4a0] ss:$16 sps:$4 sm:$0xff]   ;;  %v10128_v0 = vrot.slane %v10126_v39, 1  ;;  %v29176_v18 = vshrl.u32 %v27305_v50, 16  ;;  %v22618_v50 = vld [vmem:[%s29087_s5 + $0x4cc] ss:$16 sps:$4 sm:$0xff]  }
 0x7e5   :  { %13353 = vmatmul.mubr.bf16.gmra.mrb[48].mxu1 %v10273_v36  ;;  %13902 = vmatmul.mubr.bf16.gmra.mrb[164].mxu0 %v10273_v36  ;;  %v10138_v6 = vor.u32 %v10137_v57, %v10133_v21  ;;  %v22616_v36 = vld [vmem:[%s29087_s5 + $0x4c8] ss:$16 sps:$4 sm:$0xff]   ;;  %v22619_v4 = vld [vmem:[%s29087_s5 + $0x4e0] ss:$16 sps:$4 sm:$0xff]   ;;  %v22633_v56 = vld [vmem:[%s29087_s5 + $0x524] ss:$16 sps:$4 sm:$0xff]  }
 0x7e6   :  { %13370 = vmatpush1.bf16.msra.mxu1 %v22601_v33  ;;  %13393 = vmatprep.mubr.bf16.mxu1 %v26996_v10  ;;  %v27426_v13 = vor.u32 %v10130_v16, %v29176_v18  ;;  %v22615_v33 = vld [vmem:[%s29087_s5 + $0x4c4] ss:$16 sps:$4 sm:$0xff]   ;;  %v10129_v40 = vor.u32 %v10128_v0, %v10124_v15  ;;  %v22625_v55 = vld [vmem:[%s29087_s5 + $0x500] ss:$16 sps:$4 sm:$0xff]   ;;  %v22628_v39 = vld [vmem:[%s29087_s5 + $0x508] ss:$16 sps:$4 sm:$0xff]  }
 0x7e7   :  { %13919 = vmatpush1.bf16.msra.mxu0 %v22604_v52  ;;  %13942 = vmatprep.mubr.bf16.mxu0 %v26996_v10  ;;  %v27439_v19 = vsel %vm2388_vm1, %v10138_v6, %v10139_v44  ;;  %v22613_v10 = vld [vmem:[%s29087_s5 + $0x4c0] ss:$16 sps:$4 sm:$0xff]   ;;  %v22621_v52 = vld [vmem:[%s29087_s5 + $0x4e4] ss:$16 sps:$4 sm:$0xff]   ;;  %v22622_v44 = vld [vmem:[%s29087_s5 + $0x4e8] ss:$16 sps:$4 sm:$0xff]  }
 0x7e8   :  { %13371 = vmatprep.subr.bf16.mxu1 %v22609_v61  ;;  %13920 = vmatprep.subr.bf16.mxu0 %v22612_v45  ;;  %v27445_v7 = vsel %vm2388_vm1, %v10129_v40, %v10130_v16  ;;  %v22627_v61 = vld [vmem:[%s29087_s5 + $0x504] ss:$16 sps:$4 sm:$0xff]   ;;  %v22630_v45 = vld [vmem:[%s29087_s5 + $0x50c] ss:$16 sps:$4 sm:$0xff]   ;;  %v22631_v21 = vld [vmem:[%s29087_s5 + $0x520] ss:$16 sps:$4 sm:$0xff]  }
 0x7e9   :  { %v22636_v16 = vld [vmem:[%s29087_s5 + $0x52c] ss:$16 sps:$4 sm:$0xff]   ;;  %v22634_v57 = vld [vmem:[%s29087_s5 + $0x528] ss:$16 sps:$4 sm:$0xff]   ;;  %v22639_v41 = vld [vmem:[%s29087_s5 + $0x544] ss:$16 sps:$4 sm:$0xff]  }
 0x7ea   :  { %13372 = vmatpush1.bf16.msra.mxu1 %v22607_v43  ;;  %v22642_v43 = vld [vmem:[%s29087_s5 + $0x54c] ss:$16 sps:$4 sm:$0xff]   ;;  %v22637_v15 = vld [vmem:[%s29087_s5 + $0x540] ss:$16 sps:$4 sm:$0xff]   ;;  %v22640_v0 = vld [vmem:[%s29087_s5 + $0x548] ss:$16 sps:$4 sm:$0xff]  }
 0x7eb   :  { %13921 = vmatpush1.bf16.msra.mxu0 %v22610_v5  ;;  %13373 = vmatprep.subr.bf16.mxu1 %v22615_v33  ;;  %v22645_v18 = vld [vmem:[%s29087_s5 + $0x564] ss:$16 sps:$4 sm:$0xff]   ;;  %v22648_v5 = vld [vmem:[%s29087_s5 + $0x56c] ss:$16 sps:$4 sm:$0xff]   ;;  %v22643_v33 = vld [vmem:[%s29087_s5 + $0x560] ss:$16 sps:$4 sm:$0xff]  }
 0x7ec   :  { %13922 = vmatprep.subr.bf16.mxu0 %v22618_v50  ;;  %v22646_v6 = vld [vmem:[%s29087_s5 + $0x568] ss:$16 sps:$4 sm:$0xff]   ;;  %v22651_v50 = vld [vmem:[%s29087_s5 + $0x584] ss:$16 sps:$4 sm:$0xff]   ;;  %v22654_v40 = vld [vmem:[%s29087_s5 + $0x58c] ss:$16 sps:$4 sm:$0xff]  }
 0x7ee   :  { %13374 = vmatpush1.bf16.msra.mxu1 %v22613_v10  ;;  %v22649_v10 = vld [vmem:[%s29087_s5 + $0x580] ss:$16 sps:$4 sm:$0xff]  }
 0x7ef   :  { %13923 = vmatpush1.bf16.msra.mxu0 %v22616_v36  ;;  %13375 = vmatprep.subr.bf16.mxu1 %v22621_v52  ;;  %v22652_v36 = vld [vmem:[%s29087_s5 + $0x588] ss:$16 sps:$4 sm:$0xff]   ;;  %v22657_v52 = vld [vmem:[%s29087_s5 + $0x5a4] ss:$16 sps:$4 sm:$0xff]  }
 0x7f0   :  { %13924 = vmatprep.subr.bf16.mxu0 %v22624_v2  ;;  %v22660_v2 = vld [vmem:[%s29087_s5 + $0x5ac] ss:$16 sps:$4 sm:$0xff]  }
 0x7f2   :  { %13376 = vmatpush1.bf16.msra.mxu1 %v22619_v4  ;;  %v22655_v4 = vld [vmem:[%s29087_s5 + $0x5a0] ss:$16 sps:$4 sm:$0xff]  }
 0x7f3   :  { %13925 = vmatpush1.bf16.msra.mxu0 %v22622_v44  ;;  %13377 = vmatprep.subr.bf16.mxu1 %v22627_v61  ;;  %v22658_v44 = vld [vmem:[%s29087_s5 + $0x5a8] ss:$16 sps:$4 sm:$0xff]   ;;  %v22663_v61 = vld [vmem:[%s29087_s5 + $0x5c4] ss:$16 sps:$4 sm:$0xff]  }
 0x7f4   :  { %13926 = vmatprep.subr.bf16.mxu0 %v22630_v45  ;;  %v22666_v45 = vld [vmem:[%s29087_s5 + $0x5cc] ss:$16 sps:$4 sm:$0xff]  }
 0x7f6   :  { %13378 = vmatpush1.bf16.msra.mxu1 %v22625_v55  ;;  %v22661_v55 = vld [vmem:[%s29087_s5 + $0x5c0] ss:$16 sps:$4 sm:$0xff]  }
 0x7f7   :  { %13927 = vmatpush1.bf16.msra.mxu0 %v22628_v39  ;;  %13379 = vmatprep.subr.bf16.mxu1 %v22633_v56  ;;  %v22664_v39 = vld [vmem:[%s29087_s5 + $0x5c8] ss:$16 sps:$4 sm:$0xff]   ;;  %v22669_v56 = vld [vmem:[%s29087_s5 + $0x5e4] ss:$16 sps:$4 sm:$0xff]  }
 0x7f8   :  { %13928 = vmatprep.subr.bf16.mxu0 %v22636_v16  ;;  %v22672_v16 = vld [vmem:[%s29087_s5 + $0x5ec] ss:$16 sps:$4 sm:$0xff]  }
 0x7fa   :  { %13380 = vmatpush1.bf16.msra.mxu1 %v22631_v21  ;;  %v22667_v21 = vld [vmem:[%s29087_s5 + $0x5e0] ss:$16 sps:$4 sm:$0xff]  }
 0x7fb   :  { %13929 = vmatpush1.bf16.msra.mxu0 %v22634_v57  ;;  %13381 = vmatprep.subr.bf16.mxu1 %v22639_v41  ;;  %v22670_v57 = vld [vmem:[%s29087_s5 + $0x5e8] ss:$16 sps:$4 sm:$0xff]   ;;  %v22675_v41 = vld [vmem:[%s29087_s5 + $0x604] ss:$16 sps:$4 sm:$0xff]  }
 0x7fc   :  { %13930 = vmatprep.subr.bf16.mxu0 %v22642_v43  ;;  %v10175_v43 = vshrl.u32 %v26940_v62, 16  ;;  %v22676_v62 = vld [vmem:[%s29087_s5 + $0x608] ss:$16 sps:$4 sm:$0xff]  }
 0x7fe   :  { %13382 = vmatpush1.bf16.msra.mxu1 %v22637_v15  ;;  %v10179_v15 = vshll.u32 %v26923_v3, 16 }
 0x7ff   :  { %13931 = vmatpush1.bf16.msra.mxu0 %v22640_v0  ;;  %13383 = vmatprep.subr.bf16.mxu1 %v22645_v18  ;;  %v22678_v0 = vld [vmem:[%s29087_s5 + $0x60c] ss:$16 sps:$4 sm:$0xff]   ;;  %v10177_v18 = vor.u32 %v10175_v43, %v26969_v63  ;;  %v22700_v43 = vld [vmem:[%s29087_s5 + $0x688] ss:$16 sps:$4 sm:$0xff]  }
 0x800   :  { %13932 = vmatprep.subr.bf16.mxu0 %v22648_v5  ;;  %v22673_v5 = vld [vmem:[%s29087_s5 + $0x600] ss:$16 sps:$4 sm:$0xff]  }
 0x802   :  { %13384 = vmatpush1.bf16.msra.mxu1 %v22643_v33  ;;  %v10181_v33 = vrot.slane %v10179_v15, 1  ;;  %v22705_v15 = vld [vmem:[%s29087_s5 + $0x6a4] ss:$16 sps:$4 sm:$0xff]  }
 0x803   :  { %13933 = vmatpush1.bf16.msra.mxu0 %v22646_v6  ;;  %13385 = vmatprep.subr.bf16.mxu1 %v22651_v50  ;;  %v22681_v6 = vld [vmem:[%s29087_s5 + $0x624] ss:$16 sps:$4 sm:$0xff]   ;;  %v22684_v50 = vld [vmem:[%s29087_s5 + $0x62c] ss:$16 sps:$4 sm:$0xff]  }
 0x804   :  { %13934 = vmatprep.subr.bf16.mxu0 %v22654_v40  ;;  %v10182_v63 = vsel %vm2388_vm1, %v10177_v18, %v10181_v33  ;;  %v10167_v40 = vshrl.u32 %v26976_v35, 16  ;;  %v22687_v35 = vld [vmem:[%s29087_s5 + $0x644] ss:$16 sps:$4 sm:$0xff]   ;;  %v22706_v18 = vld [vmem:[%s29087_s5 + $0x6a8] ss:$16 sps:$4 sm:$0xff]  }
 0x805   :  { %v22714_v33 = vld [vmem:[%s29087_s5 + $0x6cc] ss:$16 sps:$4 sm:$0xff]  }
 0x806   :  { %13386 = vmatpush1.bf16.msra.mxu1 %v22649_v10  ;;  %v10171_v10 = vshll.u32 %v26957_v12, 16 }
 0x807   :  { %13935 = vmatpush1.bf16.msra.mxu0 %v22652_v36  ;;  %13387 = vmatprep.subr.bf16.mxu1 %v22657_v52  ;;  %v22679_v36 = vld [vmem:[%s29087_s5 + $0x620] ss:$16 sps:$4 sm:$0xff]   ;;  %v22682_v52 = vld [vmem:[%s29087_s5 + $0x628] ss:$16 sps:$4 sm:$0xff]  }
 0x808   :  { %13936 = vmatprep.subr.bf16.mxu0 %v22660_v2  ;;  %v10169_v2 = vor.u32 %v10167_v40, %v27001_v17  ;;  %v22688_v17 = vld [vmem:[%s29087_s5 + $0x648] ss:$16 sps:$4 sm:$0xff]  }
 0x809   :  { %v22718_v40 = vld [vmem:[%s29087_s5 + $0x6e8] ss:$16 sps:$4 sm:$0xff]  }
 0x80a   :  { %13388 = vmatpush1.bf16.msra.mxu1 %v22655_v4  ;;  %v10173_v4 = vrot.slane %v10171_v10, 1  ;;  %v22723_v10 = vld [vmem:[%s29087_s5 + $0x704] ss:$16 sps:$4 sm:$0xff]  }
 0x80b   :  { %13937 = vmatpush1.bf16.msra.mxu0 %v22658_v44  ;;  %13389 = vmatprep.subr.bf16.mxu1 %v22663_v61  ;;  %v22685_v44 = vld [vmem:[%s29087_s5 + $0x640] ss:$16 sps:$4 sm:$0xff]  }
 0x80c   :  { %13938 = vmatprep.subr.bf16.mxu0 %v22666_v45  ;;  %v10174_v61 = vsel %vm2388_vm1, %v10169_v2, %v10173_v4  ;;  %v10279_v45 = vshrl.u32 %v26923_v3, 16  ;;  %v22694_v3 = vld [vmem:[%s29087_s5 + $0x668] ss:$16 sps:$4 sm:$0xff]   ;;  %v22727_v4 = vld [vmem:[%s29087_s5 + $0x720] ss:$16 sps:$4 sm:$0xff]  }
 0x80d   :  { %v22724_v2 = vld [vmem:[%s29087_s5 + $0x708] ss:$16 sps:$4 sm:$0xff]  }
 0x80e   :  { %13390 = vmatpush1.bf16.msra.mxu1 %v22661_v55  ;;  %v22693_v55 = vld [vmem:[%s29087_s5 + $0x664] ss:$16 sps:$4 sm:$0xff]  }
 0x80f   :  { %13939 = vmatpush1.bf16.msra.mxu0 %v22664_v39  ;;  %13391 = vmatprep.subr.bf16.mxu1 %v22669_v56  ;;  %v22696_v39 = vld [vmem:[%s29087_s5 + $0x66c] ss:$16 sps:$4 sm:$0xff]   ;;  %v22691_v56 = vld [vmem:[%s29087_s5 + $0x660] ss:$16 sps:$4 sm:$0xff]  }
 0x810   :  { %13940 = vmatprep.subr.bf16.mxu0 %v22672_v16  ;;  %v22699_v16 = vld [vmem:[%s29087_s5 + $0x684] ss:$16 sps:$4 sm:$0xff]  }
 0x812   :  { %13392 = vmatpush1.bf16.msra.mxu1 %v22667_v21  ;;  %v22702_v21 = vld [vmem:[%s29087_s5 + $0x68c] ss:$16 sps:$4 sm:$0xff]  }
 0x813   :  { %13941 = vmatpush1.bf16.msra.mxu0 %v22670_v57  ;;  %13422 = vmatprep.subr.bf16.mxu1 %v22675_v41  ;;  %v10277_v57 = vshrl.u32 %v26957_v12, 16  ;;  %v22697_v41 = vld [vmem:[%s29087_s5 + $0x680] ss:$16 sps:$4 sm:$0xff]   ;;  %v22708_v12 = vld [vmem:[%s29087_s5 + $0x6ac] ss:$16 sps:$4 sm:$0xff]  }
 0x814   :  { %13971 = vmatprep.subr.bf16.mxu0 %v22678_v0  ;;  %v22703_v0 = vld [vmem:[%s29087_s5 + $0x6a0] ss:$16 sps:$4 sm:$0xff]  }
 0x815   :  { %13394 = vmatmul.mubr.bf16.vlgmr.msra.gmra.mrb[40].mxu1 %v27019_v25 }
 0x816   :  { %13943 = vmatmul.mubr.bf16.vlgmr.msra.gmra.mrb[156].mxu0 %v27019_v25  ;;  %13403 = vmatprep.mubr.bf16.mxu1 %v10182_v63  ;;  %v22690_v25 = vld [vmem:[%s29087_s5 + $0x64c] ss:$16 sps:$4 sm:$0xff]  }
 0x817   :  { %13423 = vmatpush1.bf16.msra.mxu1 %v22673_v5  ;;  %13952 = vmatprep.mubr.bf16.mxu0 %v10182_v63  ;;  %v22711_v5 = vld [vmem:[%s29087_s5 + $0x6c4] ss:$16 sps:$4 sm:$0xff]   ;;  %v22720_v63 = vld [vmem:[%s29087_s5 + $0x6ec] ss:$16 sps:$4 sm:$0xff]  }
 0x818   :  { %13972 = vmatpush1.bf16.msra.mxu0 %v22676_v62  ;;  %13424 = vmatprep.subr.bf16.mxu1 %v22681_v6  ;;  %v22712_v62 = vld [vmem:[%s29087_s5 + $0x6c8] ss:$16 sps:$4 sm:$0xff]   ;;  %v22717_v6 = vld [vmem:[%s29087_s5 + $0x6e4] ss:$16 sps:$4 sm:$0xff]  }
 0x819   :  { %13973 = vmatprep.subr.bf16.mxu0 %v22684_v50  ;;  %v22715_v50 = vld [vmem:[%s29087_s5 + $0x6e0] ss:$16 sps:$4 sm:$0xff]  }
 0x81b   :  { %13425 = vmatpush1.bf16.msra.mxu1 %v22679_v36  ;;  %v22726_v36 = vld [vmem:[%s29087_s5 + $0x70c] ss:$16 sps:$4 sm:$0xff]  }
 0x81c   :  { %13974 = vmatpush1.bf16.msra.mxu0 %v22682_v52  ;;  %13426 = vmatprep.subr.bf16.mxu1 %v22687_v35  ;;  %v22721_v52 = vld [vmem:[%s29087_s5 + $0x700] ss:$16 sps:$4 sm:$0xff]   ;;  %v22729_v35 = vld [vmem:[%s29087_s5 + $0x724] ss:$16 sps:$4 sm:$0xff]  }
 0x81d   :  { %13404 = vmatmul.mubr.bf16.gmra.mrb[44].mxu1 %v10174_v61  ;;  %13975 = vmatprep.subr.bf16.mxu0 %v22690_v25  ;;  %v22732_v25 = vld [vmem:[%s29087_s5 + $0x72c] ss:$16 sps:$4 sm:$0xff]  }
 0x81e   :  { %13953 = vmatmul.mubr.bf16.gmra.mrb[160].mxu0 %v10174_v61  ;;  %13413 = vmatprep.mubr.bf16.mxu1 %v10279_v45  ;;  %v22735_v61 = vld [vmem:[%s29087_s5 + $0x744] ss:$16 sps:$4 sm:$0xff]  }
 0x81f   :  { %13427 = vmatpush1.bf16.msra.mxu1 %v22685_v44  ;;  %13962 = vmatprep.mubr.bf16.mxu0 %v10279_v45  ;;  %v22730_v44 = vld [vmem:[%s29087_s5 + $0x728] ss:$16 sps:$4 sm:$0xff]   ;;  %v22733_v45 = vld [vmem:[%s29087_s5 + $0x740] ss:$16 sps:$4 sm:$0xff]  }
 0x820   :  { %13976 = vmatpush1.bf16.msra.mxu0 %v22688_v17  ;;  %13428 = vmatprep.subr.bf16.mxu1 %v22693_v55  ;;  %v22738_v17 = vld [vmem:[%s29087_s5 + $0x74c] ss:$16 sps:$4 sm:$0xff]   ;;  %v22736_v55 = vld [vmem:[%s29087_s5 + $0x748] ss:$16 sps:$4 sm:$0xff]  }
 0x821   :  { %13977 = vmatprep.subr.bf16.mxu0 %v22696_v39  ;;  %v22741_v39 = vld [vmem:[%s29087_s5 + $0x764] ss:$16 sps:$4 sm:$0xff]  }
 0x823   :  { %13429 = vmatpush1.bf16.msra.mxu1 %v22691_v56  ;;  %v22744_v56 = vld [vmem:[%s29087_s5 + $0x76c] ss:$16 sps:$4 sm:$0xff]  }
 0x824   :  { %13978 = vmatpush1.bf16.msra.mxu0 %v22694_v3  ;;  %13430 = vmatprep.subr.bf16.mxu1 %v22699_v16  ;;  %v22739_v3 = vld [vmem:[%s29087_s5 + $0x760] ss:$16 sps:$4 sm:$0xff]   ;;  %v22742_v16 = vld [vmem:[%s29087_s5 + $0x768] ss:$16 sps:$4 sm:$0xff]  }
 0x825   :  { %13414 = vmatmul.mubr.bf16.gmra.mrb[48].mxu1 %v10277_v57  ;;  %13979 = vmatprep.subr.bf16.mxu0 %v22702_v21  ;;  %v22747_v21 = vld [vmem:[%s29087_s5 + $0x784] ss:$16 sps:$4 sm:$0xff]  }
 0x826   :  { %13963 = vmatmul.mubr.bf16.gmra.mrb[164].mxu0 %v10277_v57  ;;  %13454 = vmatprep.mubr.bf16.mxu1 %v27076_v23  ;;  %v22750_v57 = vld [vmem:[%s29087_s5 + $0x78c] ss:$16 sps:$4 sm:$0xff]  }
 0x827   :  { %13431 = vmatpush1.bf16.msra.mxu1 %v22697_v41  ;;  %14003 = vmatprep.mubr.bf16.mxu0 %v27076_v23  ;;  %v22709_v23 = vld [vmem:[%s29087_s5 + $0x6c0] ss:$16 sps:$4 sm:$0xff]  }
 0x828   :  { %13980 = vmatpush1.bf16.msra.mxu0 %v22700_v43  ;;  %13432 = vmatprep.subr.bf16.mxu1 %v22705_v15  ;;  %v22745_v41 = vld [vmem:[%s29087_s5 + $0x780] ss:$16 sps:$4 sm:$0xff]   ;;  %v22748_v43 = vld [vmem:[%s29087_s5 + $0x788] ss:$16 sps:$4 sm:$0xff]   ;;  %v22753_v15 = vld [vmem:[%s29087_s5 + $0x7a4] ss:$16 sps:$4 sm:$0xff]  }
 0x829   :  { %13981 = vmatprep.subr.bf16.mxu0 %v22708_v12  ;;  %v22756_v12 = vld [vmem:[%s29087_s5 + $0x7ac] ss:$16 sps:$4 sm:$0xff]  }
 0x82b   :  { %13433 = vmatpush1.bf16.msra.mxu1 %v22703_v0  ;;  %v22751_v0 = vld [vmem:[%s29087_s5 + $0x7a0] ss:$16 sps:$4 sm:$0xff]  }
 0x82c   :  { %13982 = vmatpush1.bf16.msra.mxu0 %v22706_v18  ;;  %13434 = vmatprep.subr.bf16.mxu1 %v22711_v5  ;;  %v22754_v18 = vld [vmem:[%s29087_s5 + $0x7a8] ss:$16 sps:$4 sm:$0xff]   ;;  %v22759_v5 = vld [vmem:[%s29087_s5 + $0x7c4] ss:$16 sps:$4 sm:$0xff]  }
 0x82d   :  { %13983 = vmatprep.subr.bf16.mxu0 %v22714_v33  ;;  %v22762_v33 = vld [vmem:[%s29087_s5 + $0x7cc] ss:$16 sps:$4 sm:$0xff]  }
 0x82f   :  { %13435 = vmatpush1.bf16.msra.mxu1 %v22709_v23  ;;  %v22757_v23 = vld [vmem:[%s29087_s5 + $0x7c0] ss:$16 sps:$4 sm:$0xff]  }
 0x830   :  { %13984 = vmatpush1.bf16.msra.mxu0 %v22712_v62  ;;  %13436 = vmatprep.subr.bf16.mxu1 %v22717_v6  ;;  %v22760_v62 = vld [vmem:[%s29087_s5 + $0x7c8] ss:$16 sps:$4 sm:$0xff]   ;;  %v22765_v6 = vld [vmem:[%s29087_s5 + $0x7e4] ss:$16 sps:$4 sm:$0xff]  }
 0x831   :  { %13985 = vmatprep.subr.bf16.mxu0 %v22720_v63  ;;  %v22768_v63 = vld [vmem:[%s29087_s5 + $0x7ec] ss:$16 sps:$4 sm:$0xff]  }
 0x833   :  { %13437 = vmatpush1.bf16.msra.mxu1 %v22715_v50  ;;  %v22763_v50 = vld [vmem:[%s29087_s5 + $0x7e0] ss:$16 sps:$4 sm:$0xff]  }
 0x834   :  { %13986 = vmatpush1.bf16.msra.mxu0 %v22718_v40  ;;  %13438 = vmatprep.subr.bf16.mxu1 %v22723_v10  ;;  %v22766_v40 = vld [vmem:[%s29087_s5 + $0x7e8] ss:$16 sps:$4 sm:$0xff]   ;;  %v22771_v10 = vld [vmem:[%s29087_s5 + $0x804] ss:$16 sps:$4 sm:$0xff]  }
 0x835   :  { %13987 = vmatprep.subr.bf16.mxu0 %v22726_v36  ;;  %v22774_v36 = vld [vmem:[%s29087_s5 + $0x80c] ss:$16 sps:$4 sm:$0xff]  }
 0x837   :  { %13439 = vmatpush1.bf16.msra.mxu1 %v22721_v52  ;;  %v22769_v52 = vld [vmem:[%s29087_s5 + $0x800] ss:$16 sps:$4 sm:$0xff]  }
 0x838   :  { %13988 = vmatpush1.bf16.msra.mxu0 %v22724_v2  ;;  %13440 = vmatprep.subr.bf16.mxu1 %v22729_v35  ;;  %v22772_v2 = vld [vmem:[%s29087_s5 + $0x808] ss:$16 sps:$4 sm:$0xff]   ;;  %v22777_v35 = vld [vmem:[%s29087_s5 + $0x824] ss:$16 sps:$4 sm:$0xff]  }
 0x839   :  { %13989 = vmatprep.subr.bf16.mxu0 %v22732_v25  ;;  %v22780_v25 = vld [vmem:[%s29087_s5 + $0x82c] ss:$16 sps:$4 sm:$0xff]  }
 0x83b   :  { %13441 = vmatpush1.bf16.msra.mxu1 %v22727_v4  ;;  %v22775_v4 = vld [vmem:[%s29087_s5 + $0x820] ss:$16 sps:$4 sm:$0xff]  }
 0x83c   :  { %13990 = vmatpush1.bf16.msra.mxu0 %v22730_v44  ;;  %13442 = vmatprep.subr.bf16.mxu1 %v22735_v61  ;;  %v22778_v44 = vld [vmem:[%s29087_s5 + $0x828] ss:$16 sps:$4 sm:$0xff]   ;;  %v22783_v61 = vld [vmem:[%s29087_s5 + $0x844] ss:$16 sps:$4 sm:$0xff]  }
 0x83d   :  { %13991 = vmatprep.subr.bf16.mxu0 %v22738_v17  ;;  %v22784_v17 = vld [vmem:[%s29087_s5 + $0x848] ss:$16 sps:$4 sm:$0xff]  }
 0x83f   :  { %13443 = vmatpush1.bf16.msra.mxu1 %v22733_v45  ;;  %v10283_v45 = vshrl.u32 %v27052_v26, 16  ;;  %v22787_v26 = vld [vmem:[%s29087_s5 + $0x860] ss:$16 sps:$4 sm:$0xff]  }
 0x840   :  { %13992 = vmatpush1.bf16.msra.mxu0 %v22736_v55  ;;  %13444 = vmatprep.subr.bf16.mxu1 %v22741_v39  ;;  %v22789_v55 = vld [vmem:[%s29087_s5 + $0x864] ss:$16 sps:$4 sm:$0xff]   ;;  %v22792_v39 = vld [vmem:[%s29087_s5 + $0x86c] ss:$16 sps:$4 sm:$0xff]  }
 0x841   :  { %13993 = vmatprep.subr.bf16.mxu0 %v22744_v56  ;;  %v22790_v56 = vld [vmem:[%s29087_s5 + $0x868] ss:$16 sps:$4 sm:$0xff]  }
 0x843   :  { %13445 = vmatpush1.bf16.msra.mxu1 %v22739_v3  ;;  %v22795_v3 = vld [vmem:[%s29087_s5 + $0x884] ss:$16 sps:$4 sm:$0xff]  }
 0x844   :  { %13994 = vmatpush1.bf16.msra.mxu0 %v22742_v16  ;;  %13446 = vmatprep.subr.bf16.mxu1 %v22747_v21  ;;  %v10281_v16 = vshrl.u32 %v27059_v46, 16  ;;  %v22793_v21 = vld [vmem:[%s29087_s5 + $0x880] ss:$16 sps:$4 sm:$0xff]   ;;  %v22804_v46 = vld [vmem:[%s29087_s5 + $0x8ac] ss:$16 sps:$4 sm:$0xff]  }
 0x845   :  { %13995 = vmatprep.subr.bf16.mxu0 %v22750_v57  ;;  %v22796_v57 = vld [vmem:[%s29087_s5 + $0x888] ss:$16 sps:$4 sm:$0xff]  }
 0x847   :  { %13447 = vmatpush1.bf16.msra.mxu1 %v22745_v41  ;;  %v22801_v41 = vld [vmem:[%s29087_s5 + $0x8a4] ss:$16 sps:$4 sm:$0xff]  }
 0x848   :  { %13996 = vmatpush1.bf16.msra.mxu0 %v22748_v43  ;;  %13448 = vmatprep.subr.bf16.mxu1 %v22753_v15  ;;  %v22799_v43 = vld [vmem:[%s29087_s5 + $0x8a0] ss:$16 sps:$4 sm:$0xff]   ;;  %v22802_v15 = vld [vmem:[%s29087_s5 + $0x8a8] ss:$16 sps:$4 sm:$0xff]  }
 0x849   :  { %13997 = vmatprep.subr.bf16.mxu0 %v22756_v12  ;;  %v22807_v12 = vld [vmem:[%s29087_s5 + $0x8c4] ss:$16 sps:$4 sm:$0xff]  }
 0x84b   :  { %13449 = vmatpush1.bf16.msra.mxu1 %v22751_v0  ;;  %v22810_v0 = vld [vmem:[%s29087_s5 + $0x8cc] ss:$16 sps:$4 sm:$0xff]  }
 0x84c   :  { %13998 = vmatpush1.bf16.msra.mxu0 %v22754_v18  ;;  %13450 = vmatprep.subr.bf16.mxu1 %v22759_v5  ;;  %v22808_v18 = vld [vmem:[%s29087_s5 + $0x8c8] ss:$16 sps:$4 sm:$0xff]   ;;  %v22813_v5 = vld [vmem:[%s29087_s5 + $0x8e4] ss:$16 sps:$4 sm:$0xff]  }
 0x84d   :  { %13999 = vmatprep.subr.bf16.mxu0 %v22762_v33  ;;  %v22816_v33 = vld [vmem:[%s29087_s5 + $0x8ec] ss:$16 sps:$4 sm:$0xff]  }
 0x84f   :  { %13451 = vmatpush1.bf16.msra.mxu1 %v22757_v23  ;;  %v22811_v23 = vld [vmem:[%s29087_s5 + $0x8e0] ss:$16 sps:$4 sm:$0xff]  }
 0x850   :  { %14000 = vmatpush1.bf16.msra.mxu0 %v22760_v62  ;;  %13452 = vmatprep.subr.bf16.mxu1 %v22765_v6  ;;  %v22814_v62 = vld [vmem:[%s29087_s5 + $0x8e8] ss:$16 sps:$4 sm:$0xff]   ;;  %v22819_v6 = vld [vmem:[%s29087_s5 + $0x904] ss:$16 sps:$4 sm:$0xff]  }
 0x851   :  { %14001 = vmatprep.subr.bf16.mxu0 %v22768_v63  ;;  %v22822_v63 = vld [vmem:[%s29087_s5 + $0x90c] ss:$16 sps:$4 sm:$0xff]  }
 0x853   :  { %13453 = vmatpush1.bf16.msra.mxu1 %v22763_v50  ;;  %v22817_v50 = vld [vmem:[%s29087_s5 + $0x900] ss:$16 sps:$4 sm:$0xff]  }
 0x854   :  { %14002 = vmatpush1.bf16.msra.mxu0 %v22766_v40  ;;  %13483 = vmatprep.subr.bf16.mxu1 %v22771_v10  ;;  %v22820_v40 = vld [vmem:[%s29087_s5 + $0x908] ss:$16 sps:$4 sm:$0xff]   ;;  %v22825_v10 = vld [vmem:[%s29087_s5 + $0x924] ss:$16 sps:$4 sm:$0xff]  }
 0x855   :  { %14032 = vmatprep.subr.bf16.mxu0 %v22774_v36  ;;  %v22828_v36 = vld [vmem:[%s29087_s5 + $0x92c] ss:$16 sps:$4 sm:$0xff]  }
 0x856   :  { %13455 = vmatmul.mubr.bf16.vlgmr.msra.gmra.mrb[40].mxu1 %v27087_v22 }
 0x857   :  { %14004 = vmatmul.mubr.bf16.vlgmr.msra.gmra.mrb[156].mxu0 %v27087_v22  ;;  %13464 = vmatprep.mubr.bf16.mxu1 %v27092_v28  ;;  %v22786_v22 = vld [vmem:[%s29087_s5 + $0x84c] ss:$16 sps:$4 sm:$0xff]  }
 0x858   :  { %13484 = vmatpush1.bf16.msra.mxu1 %v22769_v52  ;;  %14013 = vmatprep.mubr.bf16.mxu0 %v27092_v28  ;;  %v22781_v28 = vld [vmem:[%s29087_s5 + $0x840] ss:$16 sps:$4 sm:$0xff]  }
 0x859   :  { %14033 = vmatpush1.bf16.msra.mxu0 %v22772_v2  ;;  %13485 = vmatprep.subr.bf16.mxu1 %v22777_v35  ;;  %v22823_v52 = vld [vmem:[%s29087_s5 + $0x920] ss:$16 sps:$4 sm:$0xff]   ;;  %v22826_v2 = vld [vmem:[%s29087_s5 + $0x928] ss:$16 sps:$4 sm:$0xff]   ;;  %v22831_v35 = vld [vmem:[%s29087_s5 + $0x944] ss:$16 sps:$4 sm:$0xff]  }
 0x85a   :  { %14034 = vmatprep.subr.bf16.mxu0 %v22780_v25  ;;  %v22834_v25 = vld [vmem:[%s29087_s5 + $0x94c] ss:$16 sps:$4 sm:$0xff]  }
 0x85c   :  { %13486 = vmatpush1.bf16.msra.mxu1 %v22775_v4  ;;  %v22829_v4 = vld [vmem:[%s29087_s5 + $0x940] ss:$16 sps:$4 sm:$0xff]  }
 0x85d   :  { %14035 = vmatpush1.bf16.msra.mxu0 %v22778_v44  ;;  %13487 = vmatprep.subr.bf16.mxu1 %v22783_v61  ;;  %v22832_v44 = vld [vmem:[%s29087_s5 + $0x948] ss:$16 sps:$4 sm:$0xff]   ;;  %v22837_v61 = vld [vmem:[%s29087_s5 + $0x964] ss:$16 sps:$4 sm:$0xff]  }
 0x85e   :  { %13465 = vmatmul.mubr.bf16.gmra.mrb[44].mxu1 %v27114_v49  ;;  %14036 = vmatprep.subr.bf16.mxu0 %v22786_v22  ;;  %v22840_v22 = vld [vmem:[%s29087_s5 + $0x96c] ss:$16 sps:$4 sm:$0xff]  }
 0x85f   :  { %14014 = vmatmul.mubr.bf16.gmra.mrb[160].mxu0 %v27114_v49  ;;  %13474 = vmatprep.mubr.bf16.mxu1 %v10283_v45  ;;  %v22798_v49 = vld [vmem:[%s29087_s5 + $0x88c] ss:$16 sps:$4 sm:$0xff]  }
 0x860   :  { %13488 = vmatpush1.bf16.msra.mxu1 %v22781_v28  ;;  %14023 = vmatprep.mubr.bf16.mxu0 %v10283_v45  ;;  %v22835_v28 = vld [vmem:[%s29087_s5 + $0x960] ss:$16 sps:$4 sm:$0xff]   ;;  %v22843_v45 = vld [vmem:[%s29087_s5 + $0x984] ss:$16 sps:$4 sm:$0xff]  }
 0x861   :  { %14037 = vmatpush1.bf16.msra.mxu0 %v22784_v17  ;;  %13489 = vmatprep.subr.bf16.mxu1 %v22789_v55  ;;  %v22838_v17 = vld [vmem:[%s29087_s5 + $0x968] ss:$16 sps:$4 sm:$0xff]   ;;  %v22846_v55 = vld [vmem:[%s29087_s5 + $0x98c] ss:$16 sps:$4 sm:$0xff]  }
 0x862   :  { %14038 = vmatprep.subr.bf16.mxu0 %v22792_v39  ;;  %v22841_v39 = vld [vmem:[%s29087_s5 + $0x980] ss:$16 sps:$4 sm:$0xff]  }
 0x864   :  { %13490 = vmatpush1.bf16.msra.mxu1 %v22787_v26  ;;  %v22844_v26 = vld [vmem:[%s29087_s5 + $0x988] ss:$16 sps:$4 sm:$0xff]  }
 0x865   :  { %14039 = vmatpush1.bf16.msra.mxu0 %v22790_v56  ;;  %13491 = vmatprep.subr.bf16.mxu1 %v22795_v3  ;;  %v22849_v56 = vld [vmem:[%s29087_s5 + $0x9a4] ss:$16 sps:$4 sm:$0xff]   ;;  %v22852_v3 = vld [vmem:[%s29087_s5 + $0x9ac] ss:$16 sps:$4 sm:$0xff]  }
 0x866   :  { %13475 = vmatmul.mubr.bf16.gmra.mrb[48].mxu1 %v10281_v16  ;;  %14040 = vmatprep.subr.bf16.mxu0 %v22798_v49  ;;  %v22847_v49 = vld [vmem:[%s29087_s5 + $0x9a0] ss:$16 sps:$4 sm:$0xff]  }
 0x867   :  { %14024 = vmatmul.mubr.bf16.gmra.mrb[164].mxu0 %v10281_v16  ;;  %13515 = vmatprep.mubr.bf16.mxu1 %v27118_v54  ;;  %v9133_v16 = vld [vmem:[#allocation3 + $0xb8] sm:$0x3] }
 0x868   :  { %13492 = vmatpush1.bf16.msra.mxu1 %v22793_v21  ;;  %14064 = vmatprep.mubr.bf16.mxu0 %v27118_v54  ;;  %v22805_v54 = vld [vmem:[%s29087_s5 + $0x8c0] ss:$16 sps:$4 sm:$0xff]   ;;  %v22850_v21 = vld [vmem:[%s29087_s5 + $0x9a8] ss:$16 sps:$4 sm:$0xff]  }
 0x869   :  { %14041 = vmatpush1.bf16.msra.mxu0 %v22796_v57  ;;  %13493 = vmatprep.subr.bf16.mxu1 %v22801_v41  ;;  %v22855_v57 = vld [vmem:[%s29087_s5 + $0x9c4] ss:$16 sps:$4 sm:$0xff]   ;;  %v22858_v41 = vld [vmem:[%s29087_s5 + $0x9cc] ss:$16 sps:$4 sm:$0xff]  }
 0x86a   :  { %14042 = vmatprep.subr.bf16.mxu0 %v22804_v46  ;;  %v9137_v46 = vpack.c.bf16 %v9133_v16, %v9133_v16  ;;  %v22897_v16 = vld [vmem:[%s29087_s5 + $0xaa4] ss:$16 sps:$4 sm:$0xff]  }
 0x86c   :  { %13494 = vmatpush1.bf16.msra.mxu1 %v22799_v43  ;;  %v22853_v43 = vld [vmem:[%s29087_s5 + $0x9c0] ss:$16 sps:$4 sm:$0xff]  }
 0x86d   :  { %14043 = vmatpush1.bf16.msra.mxu0 %v22802_v15  ;;  %13495 = vmatprep.subr.bf16.mxu1 %v22807_v12  ;;  %v22856_v15 = vld [vmem:[%s29087_s5 + $0x9c8] ss:$16 sps:$4 sm:$0xff]   ;;  %v22861_v12 = vld [vmem:[%s29087_s5 + $0x9e4] ss:$16 sps:$4 sm:$0xff]  }
 0x86e   :  { %14044 = vmatprep.subr.bf16.mxu0 %v22810_v0  ;;  %v22864_v0 = vld [vmem:[%s29087_s5 + $0x9ec] ss:$16 sps:$4 sm:$0xff]  }
 0x870   :  { %13496 = vmatpush1.bf16.msra.mxu1 %v22805_v54  ;;  %v10205_v54 = vshll.u32 %v9137_v46, 16 }
 0x871   :  { %14045 = vmatpush1.bf16.msra.mxu0 %v22808_v18  ;;  %13497 = vmatprep.subr.bf16.mxu1 %v22813_v5  ;;  %v9132_v18 = vld [vmem:[#allocation3 + $0xb0] sm:$0x3]  ;;  %v22859_v5 = vld [vmem:[%s29087_s5 + $0x9e0] ss:$16 sps:$4 sm:$0xff]  }
 0x872   :  { %14046 = vmatprep.subr.bf16.mxu0 %v22816_v33  ;;  %v22862_v33 = vld [vmem:[%s29087_s5 + $0x9e8] ss:$16 sps:$4 sm:$0xff]  }
 0x874   :  { %13498 = vmatpush1.bf16.msra.mxu1 %v22811_v23  ;;  %v22867_v23 = vld [vmem:[%s29087_s5 + $0xa04] ss:$16 sps:$4 sm:$0xff]  }
 0x875   :  { %14047 = vmatpush1.bf16.msra.mxu0 %v22814_v62  ;;  %13499 = vmatprep.subr.bf16.mxu1 %v22819_v6  ;;  %v22870_v62 = vld [vmem:[%s29087_s5 + $0xa0c] ss:$16 sps:$4 sm:$0xff]   ;;  %v9136_v6 = vpack.c.bf16 %v9132_v18, %v9132_v18  ;;  %v22910_v18 = vld [vmem:[%s29087_s5 + $0xae8] ss:$16 sps:$4 sm:$0xff]  }
 0x876   :  { %14048 = vmatprep.subr.bf16.mxu0 %v22822_v63  ;;  %v10207_v63 = vrot.slane %v10205_v54, 1  ;;  %v22907_v54 = vld [vmem:[%s29087_s5 + $0xae0] ss:$16 sps:$4 sm:$0xff]  }
 0x878   :  { %13500 = vmatpush1.bf16.msra.mxu1 %v22817_v50  ;;  %v22865_v50 = vld [vmem:[%s29087_s5 + $0xa00] ss:$16 sps:$4 sm:$0xff]  }
 0x879   :  { %14049 = vmatpush1.bf16.msra.mxu0 %v22820_v40  ;;  %13501 = vmatprep.subr.bf16.mxu1 %v22825_v10  ;;  %v22868_v40 = vld [vmem:[%s29087_s5 + $0xa08] ss:$16 sps:$4 sm:$0xff]   ;;  %v22873_v10 = vld [vmem:[%s29087_s5 + $0xa24] ss:$16 sps:$4 sm:$0xff]  }
 0x87a   :  { %14050 = vmatprep.subr.bf16.mxu0 %v22828_v36  ;;  %v10200_v36 = vshll.u32 %v9136_v6, 16 }
 0x87c   :  { %13502 = vmatpush1.bf16.msra.mxu1 %v22823_v52  ;;  %v10208_v52 = vsel %vm2388_vm1, %v27062_v30, %v10207_v63  ;;  %v10202_v30 = vrot.slane %v10200_v36, 1  ;;  %v22924_v63 = vld [vmem:[%s29087_s5 + $0xb2c] ss:$16 sps:$4 sm:$0xff]  }
 0x87d   :  { %14051 = vmatpush1.bf16.msra.mxu0 %v22826_v2  ;;  %13503 = vmatprep.subr.bf16.mxu1 %v22831_v35  ;;  %v22876_v2 = vld [vmem:[%s29087_s5 + $0xa2c] ss:$16 sps:$4 sm:$0xff]   ;;  %v22871_v35 = vld [vmem:[%s29087_s5 + $0xa20] ss:$16 sps:$4 sm:$0xff]  }
 0x87e   :  { %14052 = vmatprep.subr.bf16.mxu0 %v22834_v25  ;;  %v22874_v25 = vld [vmem:[%s29087_s5 + $0xa28] ss:$16 sps:$4 sm:$0xff]   ;;  %v22930_v36 = vld [vmem:[%s29087_s5 + $0xb4c] ss:$16 sps:$4 sm:$0xff]  }
 0x880   :  { %13504 = vmatpush1.bf16.msra.mxu1 %v22829_v4  ;;  %v22879_v4 = vld [vmem:[%s29087_s5 + $0xa44] ss:$16 sps:$4 sm:$0xff]  }
 0x881   :  { %14053 = vmatpush1.bf16.msra.mxu0 %v22832_v44  ;;  %13505 = vmatprep.subr.bf16.mxu1 %v22837_v61  ;;  %v22877_v44 = vld [vmem:[%s29087_s5 + $0xa40] ss:$16 sps:$4 sm:$0xff]   ;;  %v10203_v61 = vsel %vm2388_vm1, %v27123_v53, %v10202_v30 }
 0x882   :  { %14054 = vmatprep.subr.bf16.mxu0 %v22840_v22  ;;  %v22880_v22 = vld [vmem:[%s29087_s5 + $0xa48] ss:$16 sps:$4 sm:$0xff]   ;;  %v22883_v53 = vld [vmem:[%s29087_s5 + $0xa60] ss:$16 sps:$4 sm:$0xff]  }
 0x883   :  { %v22931_v30 = vld [vmem:[%s29087_s5 + $0xb60] ss:$16 sps:$4 sm:$0xff]  }
 0x884   :  { %13506 = vmatpush1.bf16.msra.mxu1 %v22835_v28  ;;  %v10287_v28 = vshrl.u32 %v9137_v46, 16  ;;  %v22903_v46 = vld [vmem:[%s29087_s5 + $0xac4] ss:$16 sps:$4 sm:$0xff]  }
 0x885   :  { %14055 = vmatpush1.bf16.msra.mxu0 %v22838_v17  ;;  %13507 = vmatprep.subr.bf16.mxu1 %v22843_v45  ;;  %v22885_v17 = vld [vmem:[%s29087_s5 + $0xa64] ss:$16 sps:$4 sm:$0xff]   ;;  %v22888_v45 = vld [vmem:[%s29087_s5 + $0xa6c] ss:$16 sps:$4 sm:$0xff]  }
 0x886   :  { %14056 = vmatprep.subr.bf16.mxu0 %v22846_v55  ;;  %v22886_v55 = vld [vmem:[%s29087_s5 + $0xa68] ss:$16 sps:$4 sm:$0xff]  }
 0x888   :  { %13508 = vmatpush1.bf16.msra.mxu1 %v22841_v39  ;;  %v22891_v39 = vld [vmem:[%s29087_s5 + $0xa84] ss:$16 sps:$4 sm:$0xff]  }
 0x889   :  { %14057 = vmatpush1.bf16.msra.mxu0 %v22844_v26  ;;  %13509 = vmatprep.subr.bf16.mxu1 %v22849_v56  ;;  %v22894_v26 = vld [vmem:[%s29087_s5 + $0xa8c] ss:$16 sps:$4 sm:$0xff]   ;;  %v10285_v56 = vshrl.u32 %v9136_v6, 16  ;;  %v22921_v6 = vld [vmem:[%s29087_s5 + $0xb24] ss:$16 sps:$4 sm:$0xff]  }
 0x88a   :  { %14058 = vmatprep.subr.bf16.mxu0 %v22852_v3  ;;  %v22889_v3 = vld [vmem:[%s29087_s5 + $0xa80] ss:$16 sps:$4 sm:$0xff]  }
 0x88c   :  { %13510 = vmatpush1.bf16.msra.mxu1 %v22847_v49  ;;  %v22892_v49 = vld [vmem:[%s29087_s5 + $0xa88] ss:$16 sps:$4 sm:$0xff]  }
 0x88d   :  { %14059 = vmatpush1.bf16.msra.mxu0 %v22850_v21  ;;  %13511 = vmatprep.subr.bf16.mxu1 %v22855_v57  ;;  %v22900_v21 = vld [vmem:[%s29087_s5 + $0xaac] ss:$16 sps:$4 sm:$0xff]   ;;  %v22895_v57 = vld [vmem:[%s29087_s5 + $0xaa0] ss:$16 sps:$4 sm:$0xff]  }
 0x88e   :  { %14060 = vmatprep.subr.bf16.mxu0 %v22858_v41  ;;  %v22898_v41 = vld [vmem:[%s29087_s5 + $0xaa8] ss:$16 sps:$4 sm:$0xff]  }
 0x890   :  { %13512 = vmatpush1.bf16.msra.mxu1 %v22853_v43  ;;  %v22906_v43 = vld [vmem:[%s29087_s5 + $0xacc] ss:$16 sps:$4 sm:$0xff]  }
 0x891   :  { %14061 = vmatpush1.bf16.msra.mxu0 %v22856_v15  ;;  %13513 = vmatprep.subr.bf16.mxu1 %v22861_v12  ;;  %v22904_v15 = vld [vmem:[%s29087_s5 + $0xac8] ss:$16 sps:$4 sm:$0xff]   ;;  %v22909_v12 = vld [vmem:[%s29087_s5 + $0xae4] ss:$16 sps:$4 sm:$0xff]  }
 0x892   :  { %14062 = vmatprep.subr.bf16.mxu0 %v22864_v0  ;;  %v22912_v0 = vld [vmem:[%s29087_s5 + $0xaec] ss:$16 sps:$4 sm:$0xff]  }
 0x894   :  { %13514 = vmatpush1.bf16.msra.mxu1 %v22859_v5  ;;  %v22915_v5 = vld [vmem:[%s29087_s5 + $0xb04] ss:$16 sps:$4 sm:$0xff]  }
 0x895   :  { %14063 = vmatpush1.bf16.msra.mxu0 %v22862_v33  ;;  %13544 = vmatprep.subr.bf16.mxu1 %v22867_v23  ;;  %v22918_v33 = vld [vmem:[%s29087_s5 + $0xb0c] ss:$16 sps:$4 sm:$0xff]   ;;  %v22913_v23 = vld [vmem:[%s29087_s5 + $0xb00] ss:$16 sps:$4 sm:$0xff]  }
 0x896   :  { %14093 = vmatprep.subr.bf16.mxu0 %v22870_v62  ;;  %v22916_v62 = vld [vmem:[%s29087_s5 + $0xb08] ss:$16 sps:$4 sm:$0xff]  }
 0x897   :  { %13516 = vmatmul.mubr.bf16.vlgmr.msra.gmra.mrb[40].mxu1 %v27154_v32 }
 0x898   :  { %14065 = vmatmul.mubr.bf16.vlgmr.msra.gmra.mrb[156].mxu0 %v27154_v32  ;;  %13525 = vmatprep.mubr.bf16.mxu1 %v10208_v52  ;;  %v22882_v32 = vld [vmem:[%s29087_s5 + $0xa4c] ss:$16 sps:$4 sm:$0xff]  }
 0x899   :  { %13545 = vmatpush1.bf16.msra.mxu1 %v22865_v50  ;;  %14074 = vmatprep.mubr.bf16.mxu0 %v10208_v52  ;;  %v22919_v50 = vld [vmem:[%s29087_s5 + $0xb20] ss:$16 sps:$4 sm:$0xff]  }
 0x89a   :  { %14094 = vmatpush1.bf16.msra.mxu0 %v22868_v40  ;;  %13546 = vmatprep.subr.bf16.mxu1 %v22873_v10  ;;  %v22922_v40 = vld [vmem:[%s29087_s5 + $0xb28] ss:$16 sps:$4 sm:$0xff]   ;;  %v22927_v10 = vld [vmem:[%s29087_s5 + $0xb44] ss:$16 sps:$4 sm:$0xff]   ;;  %v22925_v52 = vld [vmem:[%s29087_s5 + $0xb40] ss:$16 sps:$4 sm:$0xff]  }
 0x89b   :  { %14095 = vmatprep.subr.bf16.mxu0 %v22876_v2  ;;  %v22928_v2 = vld [vmem:[%s29087_s5 + $0xb48] ss:$16 sps:$4 sm:$0xff]  }
 0x89d   :  { %13547 = vmatpush1.bf16.msra.mxu1 %v22871_v35  ;;  %v22933_v35 = vld [vmem:[%s29087_s5 + $0xb64] ss:$16 sps:$4 sm:$0xff]  }
 0x89e   :  { %14096 = vmatpush1.bf16.msra.mxu0 %v22874_v25  ;;  %13548 = vmatprep.subr.bf16.mxu1 %v22879_v4  ;;  %v22936_v25 = vld [vmem:[%s29087_s5 + $0xb6c] ss:$16 sps:$4 sm:$0xff]   ;;  %v22934_v4 = vld [vmem:[%s29087_s5 + $0xb68] ss:$16 sps:$4 sm:$0xff]  }
 0x89f   :  { %13526 = vmatmul.mubr.bf16.gmra.mrb[44].mxu1 %v10203_v61  ;;  %14097 = vmatprep.subr.bf16.mxu0 %v22882_v32  ;;  %v22939_v32 = vld [vmem:[%s29087_s5 + $0xb84] ss:$16 sps:$4 sm:$0xff]  }
 0x8a0   :  { %14075 = vmatmul.mubr.bf16.gmra.mrb[160].mxu0 %v10203_v61  ;;  %13535 = vmatprep.mubr.bf16.mxu1 %v10287_v28  ;;  %v22937_v61 = vld [vmem:[%s29087_s5 + $0xb80] ss:$16 sps:$4 sm:$0xff]  }
 0x8a1   :  { %13549 = vmatpush1.bf16.msra.mxu1 %v22877_v44  ;;  %14084 = vmatprep.mubr.bf16.mxu0 %v10287_v28  ;;  %v22942_v44 = vld [vmem:[%s29087_s5 + $0xb8c] ss:$16 sps:$4 sm:$0xff]   ;;  %v22945_v28 = vld [vmem:[%s29087_s5 + $0xba4] ss:$16 sps:$4 sm:$0xff]  }
 0x8a2   :  { %14098 = vmatpush1.bf16.msra.mxu0 %v22880_v22  ;;  %13550 = vmatprep.subr.bf16.mxu1 %v22885_v17  ;;  %v22940_v22 = vld [vmem:[%s29087_s5 + $0xb88] ss:$16 sps:$4 sm:$0xff]   ;;  %v22948_v17 = vld [vmem:[%s29087_s5 + $0xbac] ss:$16 sps:$4 sm:$0xff]  }
 0x8a3   :  { %14099 = vmatprep.subr.bf16.mxu0 %v22888_v45  ;;  %v22943_v45 = vld [vmem:[%s29087_s5 + $0xba0] ss:$16 sps:$4 sm:$0xff]  }
 0x8a5   :  { %13551 = vmatpush1.bf16.msra.mxu1 %v22883_v53  ;;  %v22946_v53 = vld [vmem:[%s29087_s5 + $0xba8] ss:$16 sps:$4 sm:$0xff]  }
 0x8a6   :  { %14100 = vmatpush1.bf16.msra.mxu0 %v22886_v55  ;;  %13552 = vmatprep.subr.bf16.mxu1 %v22891_v39  ;;  %v22951_v55 = vld [vmem:[%s29087_s5 + $0xbc4] ss:$16 sps:$4 sm:$0xff]  }
 0x8a7   :  { %13536 = vmatmul.mubr.bf16.gmra.mrb[48].mxu1 %v10285_v56  ;;  %14101 = vmatprep.subr.bf16.mxu0 %v22894_v26  ;;  %v29177_v39 = vld [vmem:[#allocation20_spill] sm:$0xff] }
 0x8a8   :  { %14085 = vmatmul.mubr.bf16.gmra.mrb[164].mxu0 %v10285_v56  ;;  %13576 = vmatprep.mubr.bf16.mxu1 %v27245_v34  ;;  %v9302_v26 = vshrl.u32 %v29177_v39, 16  ;;  %v22954_v56 = vld [vmem:[%s29087_s5 + $0xbcc] ss:$16 sps:$4 sm:$0xff]   ;;  %v22985_v39 = vld [vmem:[%s29087_s5 + $0xc80] ss:$16 sps:$4 sm:$0xff]  }
 0x8a9   :  { %13553 = vmatpush1.bf16.msra.mxu1 %v22889_v3  ;;  %14125 = vmatprep.mubr.bf16.mxu0 %v27245_v34  ;;  %v22901_v34 = vld [vmem:[%s29087_s5 + $0xac0] ss:$16 sps:$4 sm:$0xff]  }
 0x8aa   :  { %14102 = vmatpush1.bf16.msra.mxu0 %v22892_v49  ;;  %13554 = vmatprep.subr.bf16.mxu1 %v22897_v16  ;;  %v29178_v3 = vld [vmem:[#allocation22_spill] sm:$0xff] }
 0x8ab   :  { %14103 = vmatprep.subr.bf16.mxu0 %v22900_v21  ;;  %v9304_v49 = vor.u32 %v9302_v26, %v29178_v3  ;;  %v22949_v16 = vld [vmem:[%s29087_s5 + $0xbc0] ss:$16 sps:$4 sm:$0xff]   ;;  %v22952_v21 = vld [vmem:[%s29087_s5 + $0xbc8] ss:$16 sps:$4 sm:$0xff]   ;;  %v22996_v3 = vld [vmem:[%s29087_s5 + $0xcac] ss:$16 sps:$4 sm:$0xff]  }
 0x8ac   :  { %v22988_v26 = vld [vmem:[%s29087_s5 + $0xc88] ss:$16 sps:$4 sm:$0xff]  }
 0x8ad   :  { %13555 = vmatpush1.bf16.msra.mxu1 %v22895_v57  ;;  %v22957_v57 = vld [vmem:[%s29087_s5 + $0xbe4] ss:$16 sps:$4 sm:$0xff]  }
 0x8ae   :  { %14104 = vmatpush1.bf16.msra.mxu0 %v22898_v41  ;;  %13556 = vmatprep.subr.bf16.mxu1 %v22903_v46  ;;  %v22960_v41 = vld [vmem:[%s29087_s5 + $0xbec] ss:$16 sps:$4 sm:$0xff]   ;;  %v10221_v46 = vshll.u32 %v9304_v49, 16 }
 0x8af   :  { %14105 = vmatprep.subr.bf16.mxu0 %v22906_v43  ;;  %v22955_v43 = vld [vmem:[%s29087_s5 + $0xbe0] ss:$16 sps:$4 sm:$0xff]  }
 0x8b1   :  { %13557 = vmatpush1.bf16.msra.mxu1 %v22901_v34  ;;  %v29179_v34 = vld [vmem:[#allocation19_spill] sm:$0xff] }
 0x8b2   :  { %14106 = vmatpush1.bf16.msra.mxu0 %v22904_v15  ;;  %13558 = vmatprep.subr.bf16.mxu1 %v22909_v12  ;;  %v9299_v15 = vshrl.u32 %v29179_v34, 16  ;;  %v22958_v12 = vld [vmem:[%s29087_s5 + $0xbe8] ss:$16 sps:$4 sm:$0xff]   ;;  %v23003_v34 = vld [vmem:[%s29087_s5 + $0xce0] ss:$16 sps:$4 sm:$0xff]  }
 0x8b3   :  { %14107 = vmatprep.subr.bf16.mxu0 %v22912_v0  ;;  %v22963_v0 = vld [vmem:[%s29087_s5 + $0xc04] ss:$16 sps:$4 sm:$0xff]  }
 0x8b5   :  { %13559 = vmatpush1.bf16.msra.mxu1 %v22907_v54  ;;  %v29180_v54 = vld [vmem:[#allocation23_spill] sm:$0xff] }
 0x8b6   :  { %14108 = vmatpush1.bf16.msra.mxu0 %v22910_v18  ;;  %13560 = vmatprep.subr.bf16.mxu1 %v22915_v5  ;;  %v10217_v18 = vshrl.u32 %v29180_v54, 16  ;;  %v22966_v5 = vld [vmem:[%s29087_s5 + $0xc0c] ss:$16 sps:$4 sm:$0xff]   ;;  %v23009_v54 = vld [vmem:[%s29087_s5 + $0xd00] ss:$16 sps:$4 sm:$0xff]  }
 0x8b7   :  { %14109 = vmatprep.subr.bf16.mxu0 %v22918_v33  ;;  %v29181_v33 = vld [vmem:[#allocation21_spill] sm:$0xff] }
 0x8b9   :  { %13561 = vmatpush1.bf16.msra.mxu1 %v22913_v23  ;;  %v9301_v23 = vor.u32 %v9299_v15, %v29181_v33  ;;  %v23006_v15 = vld [vmem:[%s29087_s5 + $0xce8] ss:$16 sps:$4 sm:$0xff]   ;;  %v23020_v33 = vld [vmem:[%s29087_s5 + $0xd2c] ss:$16 sps:$4 sm:$0xff]  }
 0x8ba   :  { %14110 = vmatpush1.bf16.msra.mxu0 %v22916_v62  ;;  %13562 = vmatprep.subr.bf16.mxu1 %v22921_v6  ;;  %v10219_v62 = vor.u32 %v10217_v18, %v27214_v20  ;;  %v10223_v6 = vrot.slane %v10221_v46, 1  ;;  %v23005_v46 = vld [vmem:[%s29087_s5 + $0xce4] ss:$16 sps:$4 sm:$0xff]   ;;  %v23012_v18 = vld [vmem:[%s29087_s5 + $0xd08] ss:$16 sps:$4 sm:$0xff]  }
 0x8bb   :  { %14111 = vmatprep.subr.bf16.mxu0 %v22924_v63  ;;  %v22961_v63 = vld [vmem:[%s29087_s5 + $0xc00] ss:$16 sps:$4 sm:$0xff]  }
 0x8bc   :  { %v10224_v20 = vsel %vm2388_vm1, %v10219_v62, %v10223_v6  ;;  %v23018_v62 = vld [vmem:[%s29087_s5 + $0xd28] ss:$16 sps:$4 sm:$0xff]   ;;  %v23023_v6 = vld [vmem:[%s29087_s5 + $0xd44] ss:$16 sps:$4 sm:$0xff]  }
 0x8bd   :  { %13563 = vmatpush1.bf16.msra.mxu1 %v22919_v50  ;;  %v22964_v50 = vld [vmem:[%s29087_s5 + $0xc08] ss:$16 sps:$4 sm:$0xff]  }
 0x8be   :  { %14112 = vmatpush1.bf16.msra.mxu0 %v22922_v40  ;;  %13564 = vmatprep.subr.bf16.mxu1 %v22927_v10  ;;  %v22969_v40 = vld [vmem:[%s29087_s5 + $0xc24] ss:$16 sps:$4 sm:$0xff]   ;;  %v10213_v10 = vshll.u32 %v9301_v23, 16 }
 0x8bf   :  { %14113 = vmatprep.subr.bf16.mxu0 %v22930_v36  ;;  %v22972_v36 = vld [vmem:[%s29087_s5 + $0xc2c] ss:$16 sps:$4 sm:$0xff]  }
 0x8c1   :  { %13565 = vmatpush1.bf16.msra.mxu1 %v22925_v52  ;;  %v10209_v52 = vshrl.u32 %v27186_v51, 16  ;;  %v22978_v51 = vld [vmem:[%s29087_s5 + $0xc4c] ss:$16 sps:$4 sm:$0xff]  }
 0x8c2   :  { %14114 = vmatpush1.bf16.msra.mxu0 %v22928_v2  ;;  %13566 = vmatprep.subr.bf16.mxu1 %v22933_v35  ;;  %v22967_v2 = vld [vmem:[%s29087_s5 + $0xc20] ss:$16 sps:$4 sm:$0xff]   ;;  %v22970_v35 = vld [vmem:[%s29087_s5 + $0xc28] ss:$16 sps:$4 sm:$0xff]  }
 0x8c3   :  { %14115 = vmatprep.subr.bf16.mxu0 %v22936_v25  ;;  %v10211_v25 = vor.u32 %v10209_v52, %v27238_v31  ;;  %v22976_v31 = vld [vmem:[%s29087_s5 + $0xc48] ss:$16 sps:$4 sm:$0xff]  }
 0x8c4   :  { %v23030_v52 = vld [vmem:[%s29087_s5 + $0xd68] ss:$16 sps:$4 sm:$0xff]  }
 0x8c5   :  { %13567 = vmatpush1.bf16.msra.mxu1 %v22931_v30  ;;  %v10215_v30 = vrot.slane %v10213_v10, 1  ;;  %v23029_v10 = vld [vmem:[%s29087_s5 + $0xd64] ss:$16 sps:$4 sm:$0xff]  }
 0x8c6   :  { %14116 = vmatpush1.bf16.msra.mxu0 %v22934_v4  ;;  %13568 = vmatprep.subr.bf16.mxu1 %v22939_v32  ;;  %v22973_v4 = vld [vmem:[%s29087_s5 + $0xc40] ss:$16 sps:$4 sm:$0xff]  }
 0x8c7   :  { %14117 = vmatprep.subr.bf16.mxu0 %v22942_v44  ;;  %v10216_v32 = vsel %vm2388_vm1, %v10211_v25, %v10215_v30  ;;  %v10291_v44 = vshrl.u32 %v9304_v49, 16  ;;  %v22991_v49 = vld [vmem:[%s29087_s5 + $0xca0] ss:$16 sps:$4 sm:$0xff]   ;;  %v23036_v30 = vld [vmem:[%s29087_s5 + $0xd88] ss:$16 sps:$4 sm:$0xff]  }
 0x8c8   :  { %v23033_v25 = vld [vmem:[%s29087_s5 + $0xd80] ss:$16 sps:$4 sm:$0xff]  }
 0x8c9   :  { %13569 = vmatpush1.bf16.msra.mxu1 %v22937_v61  ;;  %v22981_v61 = vld [vmem:[%s29087_s5 + $0xc64] ss:$16 sps:$4 sm:$0xff]  }
 0x8ca   :  { %14118 = vmatpush1.bf16.msra.mxu0 %v22940_v22  ;;  %13570 = vmatprep.subr.bf16.mxu1 %v22945_v28  ;;  %v22984_v22 = vld [vmem:[%s29087_s5 + $0xc6c] ss:$16 sps:$4 sm:$0xff]   ;;  %v22979_v28 = vld [vmem:[%s29087_s5 + $0xc60] ss:$16 sps:$4 sm:$0xff]  }
 0x8cb   :  { %14119 = vmatprep.subr.bf16.mxu0 %v22948_v17  ;;  %v22982_v17 = vld [vmem:[%s29087_s5 + $0xc68] ss:$16 sps:$4 sm:$0xff]  }
 0x8cd   :  { %13571 = vmatpush1.bf16.msra.mxu1 %v22943_v45  ;;  %v22987_v45 = vld [vmem:[%s29087_s5 + $0xc84] ss:$16 sps:$4 sm:$0xff]  }
 0x8ce   :  { %14120 = vmatpush1.bf16.msra.mxu0 %v22946_v53  ;;  %13572 = vmatprep.subr.bf16.mxu1 %v22951_v55  ;;  %v22990_v53 = vld [vmem:[%s29087_s5 + $0xc8c] ss:$16 sps:$4 sm:$0xff]   ;;  %v10289_v55 = vshrl.u32 %v9301_v23, 16  ;;  %v23015_v23 = vld [vmem:[%s29087_s5 + $0xd20] ss:$16 sps:$4 sm:$0xff]  }
 0x8cf   :  { %14121 = vmatprep.subr.bf16.mxu0 %v22954_v56  ;;  %v22993_v56 = vld [vmem:[%s29087_s5 + $0xca4] ss:$16 sps:$4 sm:$0xff]  }
 0x8d1   :  { %13573 = vmatpush1.bf16.msra.mxu1 %v22949_v16  ;;  %v22994_v16 = vld [vmem:[%s29087_s5 + $0xca8] ss:$16 sps:$4 sm:$0xff]  }
 0x8d2   :  { %14122 = vmatpush1.bf16.msra.mxu0 %v22952_v21  ;;  %13574 = vmatprep.subr.bf16.mxu1 %v22957_v57  ;;  %v22999_v21 = vld [vmem:[%s29087_s5 + $0xcc4] ss:$16 sps:$4 sm:$0xff]   ;;  %v23002_v57 = vld [vmem:[%s29087_s5 + $0xccc] ss:$16 sps:$4 sm:$0xff]  }
 0x8d3   :  { %14123 = vmatprep.subr.bf16.mxu0 %v22960_v41  ;;  %v23000_v41 = vld [vmem:[%s29087_s5 + $0xcc8] ss:$16 sps:$4 sm:$0xff]  }
 0x8d5   :  { %13575 = vmatpush1.bf16.msra.mxu1 %v22955_v43  ;;  %v23008_v43 = vld [vmem:[%s29087_s5 + $0xcec] ss:$16 sps:$4 sm:$0xff]  }
 0x8d6   :  { %14124 = vmatpush1.bf16.msra.mxu0 %v22958_v12  ;;  %13605 = vmatprep.subr.bf16.mxu1 %v22963_v0  ;;  %v23011_v12 = vld [vmem:[%s29087_s5 + $0xd04] ss:$16 sps:$4 sm:$0xff]   ;;  %v23014_v0 = vld [vmem:[%s29087_s5 + $0xd0c] ss:$16 sps:$4 sm:$0xff]  }
 0x8d7   :  { %14154 = vmatprep.subr.bf16.mxu0 %v22966_v5  ;;  %v23017_v5 = vld [vmem:[%s29087_s5 + $0xd24] ss:$16 sps:$4 sm:$0xff]  }
 0x8d8   :  { %13577 = vmatmul.mubr.bf16.vlgmr.msra.gmra.mrb[40].mxu1 %v27283_v8 }
 0x8d9   :  { %14126 = vmatmul.mubr.bf16.vlgmr.msra.gmra.mrb[156].mxu0 %v27283_v8  ;;  %13586 = vmatprep.mubr.bf16.mxu1 %v10224_v20  ;;  %v22975_v8 = vld [vmem:[%s29087_s5 + $0xc44] ss:$16 sps:$4 sm:$0xff]  }
 0x8da   :  { %13606 = vmatpush1.bf16.msra.mxu1 %v22961_v63  ;;  %14135 = vmatprep.mubr.bf16.mxu0 %v10224_v20  ;;  %v23026_v63 = vld [vmem:[%s29087_s5 + $0xd4c] ss:$16 sps:$4 sm:$0xff]  }
 0x8db   :  { %14155 = vmatpush1.bf16.msra.mxu0 %v22964_v50  ;;  %13607 = vmatprep.subr.bf16.mxu1 %v22969_v40  ;;  %v23021_v50 = vld [vmem:[%s29087_s5 + $0xd40] ss:$16 sps:$4 sm:$0xff]   ;;  %v23024_v40 = vld [vmem:[%s29087_s5 + $0xd48] ss:$16 sps:$4 sm:$0xff]   ;;  %v23032_v20 = vld [vmem:[%s29087_s5 + $0xd6c] ss:$16 sps:$4 sm:$0xff]  }
 0x8dc   :  { %14156 = vmatprep.subr.bf16.mxu0 %v22972_v36  ;;  %v23027_v36 = vld [vmem:[%s29087_s5 + $0xd60] ss:$16 sps:$4 sm:$0xff]  }
 0x8de   :  { %13608 = vmatpush1.bf16.msra.mxu1 %v22967_v2  ;;  %v23035_v2 = vld [vmem:[%s29087_s5 + $0xd84] ss:$16 sps:$4 sm:$0xff]  }
 0x8df   :  { %14157 = vmatpush1.bf16.msra.mxu0 %v22970_v35  ;;  %13609 = vmatprep.subr.bf16.mxu1 %v22975_v8  ;;  %v23038_v35 = vld [vmem:[%s29087_s5 + $0xd8c] ss:$16 sps:$4 sm:$0xff]   ;;  %v23041_v8 = vld [vmem:[%s29087_s5 + $0xda4] ss:$16 sps:$4 sm:$0xff]  }
 0x8e0   :  { %13587 = vmatmul.mubr.bf16.gmra.mrb[44].mxu1 %v10216_v32  ;;  %14158 = vmatprep.subr.bf16.mxu0 %v22978_v51  ;;  %v23044_v51 = vld [vmem:[%s29087_s5 + $0xdac] ss:$16 sps:$4 sm:$0xff]  }
 0x8e1   :  { %14136 = vmatmul.mubr.bf16.gmra.mrb[160].mxu0 %v10216_v32  ;;  %13596 = vmatprep.mubr.bf16.mxu1 %v10291_v44  ;;  %v23042_v32 = vld [vmem:[%s29087_s5 + $0xda8] ss:$16 sps:$4 sm:$0xff]  }
 0x8e2   :  { %13610 = vmatpush1.bf16.msra.mxu1 %v22973_v4  ;;  %14145 = vmatprep.mubr.bf16.mxu0 %v10291_v44  ;;  %v23039_v4 = vld [vmem:[%s29087_s5 + $0xda0] ss:$16 sps:$4 sm:$0xff]   ;;  %v23050_v44 = vld [vmem:[%s29087_s5 + $0xdcc] ss:$16 sps:$4 sm:$0xff]  }
 0x8e3   :  { %14159 = vmatpush1.bf16.msra.mxu0 %v22976_v31  ;;  %13611 = vmatprep.subr.bf16.mxu1 %v22981_v61  ;;  %v23047_v31 = vld [vmem:[%s29087_s5 + $0xdc4] ss:$16 sps:$4 sm:$0xff]   ;;  %v23045_v61 = vld [vmem:[%s29087_s5 + $0xdc0] ss:$16 sps:$4 sm:$0xff]  }
 0x8e4   :  { %14160 = vmatprep.subr.bf16.mxu0 %v22984_v22  ;;  %v23048_v22 = vld [vmem:[%s29087_s5 + $0xdc8] ss:$16 sps:$4 sm:$0xff]  }
 0x8e6   :  { %13612 = vmatpush1.bf16.msra.mxu1 %v22979_v28  ;;  %v23053_v28 = vld [vmem:[%s29087_s5 + $0xde4] ss:$16 sps:$4 sm:$0xff]  }
 0x8e7   :  { %14161 = vmatpush1.bf16.msra.mxu0 %v22982_v17  ;;  %13613 = vmatprep.subr.bf16.mxu1 %v22987_v45  ;;  %v23056_v17 = vld [vmem:[%s29087_s5 + $0xdec] ss:$16 sps:$4 sm:$0xff]   ;;  %v23051_v45 = vld [vmem:[%s29087_s5 + $0xde0] ss:$16 sps:$4 sm:$0xff]  }
 0x8e8   :  { %13597 = vmatmul.mubr.bf16.gmra.mrb[48].mxu1 %v10289_v55  ;;  %14162 = vmatprep.subr.bf16.mxu0 %v22990_v53  ;;  %v23054_v53 = vld [vmem:[%s29087_s5 + $0xde8] ss:$16 sps:$4 sm:$0xff]  }
 0x8e9   :  { %14146 = vmatmul.mubr.bf16.gmra.mrb[164].mxu0 %v10289_v55  ;;  %13637 = vmatprep.mubr.bf16.mxu1 %v27312_v59  ;;  %v23059_v55 = vld [vmem:[%s29087_s5 + $0xe04] ss:$16 sps:$4 sm:$0xff]  }
 0x8ea   :  { %13614 = vmatpush1.bf16.msra.mxu1 %v22985_v39  ;;  %14186 = vmatprep.mubr.bf16.mxu0 %v27312_v59  ;;  %v22997_v59 = vld [vmem:[%s29087_s5 + $0xcc0] ss:$16 sps:$4 sm:$0xff]   ;;  %v10233_v39 = vshrl.u32 %v27266_v29, 16  ;;  %v23060_v29 = vld [vmem:[%s29087_s5 + $0xe08] ss:$16 sps:$4 sm:$0xff]  }
 0x8eb   :  { %14163 = vmatpush1.bf16.msra.mxu0 %v22988_v26  ;;  %13615 = vmatprep.subr.bf16.mxu1 %v22993_v56  ;;  %v10237_v26 = vshll.u32 %v27248_v47, 16  ;;  %v23062_v56 = vld [vmem:[%s29087_s5 + $0xe0c] ss:$16 sps:$4 sm:$0xff]  }
 0x8ec   :  { %14164 = vmatprep.subr.bf16.mxu0 %v22996_v3  ;;  %v10235_v3 = vor.u32 %v10233_v39, %v27301_v60  ;;  %v23125_v39 = vld [vmem:[%s29087_s5 + $0xf64] ss:$16 sps:$4 sm:$0xff]  }
 0x8ee   :  { %13616 = vmatpush1.bf16.msra.mxu1 %v22991_v49  ;;  %v23057_v49 = vld [vmem:[%s29087_s5 + $0xe00] ss:$16 sps:$4 sm:$0xff]  }
 0x8ef   :  { %14165 = vmatpush1.bf16.msra.mxu0 %v22994_v16  ;;  %13617 = vmatprep.subr.bf16.mxu1 %v22999_v21  ;;  %v10239_v16 = vrot.slane %v10237_v26, 1  ;;  %v23065_v21 = vld [vmem:[%s29087_s5 + $0xe24] ss:$16 sps:$4 sm:$0xff]   ;;  %v23128_v26 = vld [vmem:[%s29087_s5 + $0xf6c] ss:$16 sps:$4 sm:$0xff]  }
 0x8f0   :  { %14166 = vmatprep.subr.bf16.mxu0 %v23002_v57  ;;  %v23068_v57 = vld [vmem:[%s29087_s5 + $0xe2c] ss:$16 sps:$4 sm:$0xff]  }
 0x8f1   :  { %v10240_v60 = vsel %vm2388_vm1, %v10235_v3, %v10239_v16  ;;  %v23126_v3 = vld [vmem:[%s29087_s5 + $0xf68] ss:$16 sps:$4 sm:$0xff]   ;;  %v23134_v16 = vld [vmem:[%s29087_s5 + $0xf8c] ss:$16 sps:$4 sm:$0xff]  }
 0x8f2   :  { %13618 = vmatpush1.bf16.msra.mxu1 %v22997_v59  ;;  %v10225_v59 = vshrl.u32 %v27288_v24, 16  ;;  %v23071_v24 = vld [vmem:[%s29087_s5 + $0xe44] ss:$16 sps:$4 sm:$0xff]  }
 0x8f3   :  { %14167 = vmatpush1.bf16.msra.mxu0 %v23000_v41  ;;  %13619 = vmatprep.subr.bf16.mxu1 %v23005_v46  ;;  %v10229_v41 = vshll.u32 %v27268_v27, 16  ;;  %v23063_v46 = vld [vmem:[%s29087_s5 + $0xe20] ss:$16 sps:$4 sm:$0xff]  }
 0x8f4   :  { %14168 = vmatprep.subr.bf16.mxu0 %v23008_v43  ;;  %v23066_v43 = vld [vmem:[%s29087_s5 + $0xe28] ss:$16 sps:$4 sm:$0xff]  }
 0x8f6   :  { %13620 = vmatpush1.bf16.msra.mxu1 %v23003_v34  ;;  %v10227_v34 = vor.u32 %v10225_v59, %v27307_v14  ;;  %v23072_v14 = vld [vmem:[%s29087_s5 + $0xe48] ss:$16 sps:$4 sm:$0xff]   ;;  %v23135_v59 = vld [vmem:[%s29087_s5 + $0xfa0] ss:$16 sps:$4 sm:$0xff]  }
 0x8f7   :  { %14169 = vmatpush1.bf16.msra.mxu0 %v23006_v15  ;;  %13621 = vmatprep.subr.bf16.mxu1 %v23011_v12  ;;  %v10231_v15 = vrot.slane %v10229_v41, 1  ;;  %v23069_v12 = vld [vmem:[%s29087_s5 + $0xe40] ss:$16 sps:$4 sm:$0xff]   ;;  %v23138_v41 = vld [vmem:[%s29087_s5 + $0xfa8] ss:$16 sps:$4 sm:$0xff]  }
 0x8f8   :  { %14170 = vmatprep.subr.bf16.mxu0 %v23014_v0 }
 0x8f9   :  { %v10232_v0 = vsel %vm2388_vm1, %v10227_v34, %v10231_v15  ;;  %v23141_v34 = vld [vmem:[%s29087_s5 + $0xfc0] ss:$16 sps:$4 sm:$0xff]   ;;  %v23152_v15 = vld [vmem:[%s29087_s5 + $0xfec] ss:$16 sps:$4 sm:$0xff]  }
 0x8fa   :  { %13622 = vmatpush1.bf16.msra.mxu1 %v23009_v54  ;;  %v10295_v54 = vshrl.u32 %v27248_v47, 16  ;;  %v23078_v47 = vld [vmem:[%s29087_s5 + $0xe68] ss:$16 sps:$4 sm:$0xff]  }
 0x8fb   :  { %14171 = vmatpush1.bf16.msra.mxu0 %v23012_v18  ;;  %13623 = vmatprep.subr.bf16.mxu1 %v23017_v5  ;;  %v23077_v18 = vld [vmem:[%s29087_s5 + $0xe64] ss:$16 sps:$4 sm:$0xff]   ;;  %v23080_v5 = vld [vmem:[%s29087_s5 + $0xe6c] ss:$16 sps:$4 sm:$0xff]  }
 0x8fc   :  { %14172 = vmatprep.subr.bf16.mxu0 %v23020_v33  ;;  %v23075_v33 = vld [vmem:[%s29087_s5 + $0xe60] ss:$16 sps:$4 sm:$0xff]  }
 0x8fe   :  { %13624 = vmatpush1.bf16.msra.mxu1 %v23015_v23  ;;  %v23083_v23 = vld [vmem:[%s29087_s5 + $0xe84] ss:$16 sps:$4 sm:$0xff]  }
 0x8ff   :  { %14173 = vmatpush1.bf16.msra.mxu0 %v23018_v62  ;;  %13625 = vmatprep.subr.bf16.mxu1 %v23023_v6  ;;  %v23086_v62 = vld [vmem:[%s29087_s5 + $0xe8c] ss:$16 sps:$4 sm:$0xff]   ;;  %v10293_v6 = vshrl.u32 %v27268_v27, 16 }
 0x900   :  { %14174 = vmatprep.subr.bf16.mxu0 %v23026_v63  ;;  %v23081_v63 = vld [vmem:[%s29087_s5 + $0xe80] ss:$16 sps:$4 sm:$0xff]   ;;  %v23092_v27 = vld [vmem:[%s29087_s5 + $0xeac] ss:$16 sps:$4 sm:$0xff]  }
 0x902   :  { %13626 = vmatpush1.bf16.msra.mxu1 %v23021_v50  ;;  %v23084_v50 = vld [vmem:[%s29087_s5 + $0xe88] ss:$16 sps:$4 sm:$0xff]  }
 0x903   :  { %14175 = vmatpush1.bf16.msra.mxu0 %v23024_v40  ;;  %13627 = vmatprep.subr.bf16.mxu1 %v23029_v10  ;;  %v23089_v40 = vld [vmem:[%s29087_s5 + $0xea4] ss:$16 sps:$4 sm:$0xff]   ;;  %v23087_v10 = vld [vmem:[%s29087_s5 + $0xea0] ss:$16 sps:$4 sm:$0xff]  }
 0x904   :  { %14176 = vmatprep.subr.bf16.mxu0 %v23032_v20  ;;  %v23090_v20 = vld [vmem:[%s29087_s5 + $0xea8] ss:$16 sps:$4 sm:$0xff]  }
 0x906   :  { %13628 = vmatpush1.bf16.msra.mxu1 %v23027_v36  ;;  %v23095_v36 = vld [vmem:[%s29087_s5 + $0xec4] ss:$16 sps:$4 sm:$0xff]  }
 0x907   :  { %14177 = vmatpush1.bf16.msra.mxu0 %v23030_v52  ;;  %13629 = vmatprep.subr.bf16.mxu1 %v23035_v2  ;;  %v23098_v52 = vld [vmem:[%s29087_s5 + $0xecc] ss:$16 sps:$4 sm:$0xff]   ;;  %v23096_v2 = vld [vmem:[%s29087_s5 + $0xec8] ss:$16 sps:$4 sm:$0xff]  }
 0x908   :  { %14178 = vmatprep.subr.bf16.mxu0 %v23038_v35  ;;  %v23101_v35 = vld [vmem:[%s29087_s5 + $0xee4] ss:$16 sps:$4 sm:$0xff]  }
 0x90a   :  { %13630 = vmatpush1.bf16.msra.mxu1 %v23033_v25  ;;  %v23104_v25 = vld [vmem:[%s29087_s5 + $0xeec] ss:$16 sps:$4 sm:$0xff]  }
 0x90b   :  { %14179 = vmatpush1.bf16.msra.mxu0 %v23036_v30  ;;  %13631 = vmatprep.subr.bf16.mxu1 %v23041_v8  ;;  %v23099_v30 = vld [vmem:[%s29087_s5 + $0xee0] ss:$16 sps:$4 sm:$0xff]   ;;  %v23102_v8 = vld [vmem:[%s29087_s5 + $0xee8] ss:$16 sps:$4 sm:$0xff]  }
 0x90c   :  { %14180 = vmatprep.subr.bf16.mxu0 %v23044_v51  ;;  %v23107_v51 = vld [vmem:[%s29087_s5 + $0xf04] ss:$16 sps:$4 sm:$0xff]  }
 0x90e   :  { %13632 = vmatpush1.bf16.msra.mxu1 %v23039_v4  ;;  %v23110_v4 = vld [vmem:[%s29087_s5 + $0xf0c] ss:$16 sps:$4 sm:$0xff]  }
 0x90f   :  { %14181 = vmatpush1.bf16.msra.mxu0 %v23042_v32  ;;  %13633 = vmatprep.subr.bf16.mxu1 %v23047_v31  ;;  %v23105_v32 = vld [vmem:[%s29087_s5 + $0xf00] ss:$16 sps:$4 sm:$0xff]   ;;  %v23108_v31 = vld [vmem:[%s29087_s5 + $0xf08] ss:$16 sps:$4 sm:$0xff]  }
 0x910   :  { %14182 = vmatprep.subr.bf16.mxu0 %v23050_v44  ;;  %v23113_v44 = vld [vmem:[%s29087_s5 + $0xf24] ss:$16 sps:$4 sm:$0xff]  }
 0x912   :  { %13634 = vmatpush1.bf16.msra.mxu1 %v23045_v61  ;;  %v23116_v61 = vld [vmem:[%s29087_s5 + $0xf2c] ss:$16 sps:$4 sm:$0xff]  }
 0x913   :  { %14183 = vmatpush1.bf16.msra.mxu0 %v23048_v22  ;;  %13635 = vmatprep.subr.bf16.mxu1 %v23053_v28  ;;  %v23111_v22 = vld [vmem:[%s29087_s5 + $0xf20] ss:$16 sps:$4 sm:$0xff]   ;;  %v23114_v28 = vld [vmem:[%s29087_s5 + $0xf28] ss:$16 sps:$4 sm:$0xff]  }
 0x914   :  { %14184 = vmatprep.subr.bf16.mxu0 %v23056_v17  ;;  %v23119_v17 = vld [vmem:[%s29087_s5 + $0xf44] ss:$16 sps:$4 sm:$0xff]  }
 0x916   :  { %13636 = vmatpush1.bf16.msra.mxu1 %v23051_v45  ;;  %v23122_v45 = vld [vmem:[%s29087_s5 + $0xf4c] ss:$16 sps:$4 sm:$0xff]  }
 0x917   :  { %14185 = vmatpush1.bf16.msra.mxu0 %v23054_v53  ;;  %13666 = vmatprep.subr.bf16.mxu1 %v23059_v55  ;;  %v23117_v53 = vld [vmem:[%s29087_s5 + $0xf40] ss:$16 sps:$4 sm:$0xff]   ;;  %v23120_v55 = vld [vmem:[%s29087_s5 + $0xf48] ss:$16 sps:$4 sm:$0xff]  }
 0x918   :  { %14215 = vmatprep.subr.bf16.mxu0 %v23062_v56  ;;  %v23123_v56 = vld [vmem:[%s29087_s5 + $0xf60] ss:$16 sps:$4 sm:$0xff]  }
 0x919   :  { %13638 = vmatmul.mubr.bf16.vlgmr.msra.gmra.mrb[40].mxu1 %v27333_v9 }
 0x91a   :  { %14187 = vmatmul.mubr.bf16.vlgmr.msra.gmra.mrb[156].mxu0 %v27333_v9  ;;  %13647 = vmatprep.mubr.bf16.mxu1 %v10240_v60  ;;  %v23074_v9 = vld [vmem:[%s29087_s5 + $0xe4c] ss:$16 sps:$4 sm:$0xff]  }
 0x91b   :  { %13667 = vmatpush1.bf16.msra.mxu1 %v23057_v49  ;;  %14196 = vmatprep.mubr.bf16.mxu0 %v10240_v60  ;;  %v23131_v49 = vld [vmem:[%s29087_s5 + $0xf84] ss:$16 sps:$4 sm:$0xff]  }
 0x91c   :  { %14216 = vmatpush1.bf16.msra.mxu0 %v23060_v29  ;;  %13668 = vmatprep.subr.bf16.mxu1 %v23065_v21  ;;  %v23129_v29 = vld [vmem:[%s29087_s5 + $0xf80] ss:$16 sps:$4 sm:$0xff]   ;;  %v23132_v21 = vld [vmem:[%s29087_s5 + $0xf88] ss:$16 sps:$4 sm:$0xff]   ;;  %v23137_v60 = vld [vmem:[%s29087_s5 + $0xfa4] ss:$16 sps:$4 sm:$0xff]  }
 0x91d   :  { %14217 = vmatprep.subr.bf16.mxu0 %v23068_v57  ;;  %v23140_v57 = vld [vmem:[%s29087_s5 + $0xfac] ss:$16 sps:$4 sm:$0xff]  }
 0x91f   :  { %13669 = vmatpush1.bf16.msra.mxu1 %v23063_v46  ;;  %v23143_v46 = vld [vmem:[%s29087_s5 + $0xfc4] ss:$16 sps:$4 sm:$0xff]  }
 0x920   :  { %14218 = vmatpush1.bf16.msra.mxu0 %v23066_v43  ;;  %13670 = vmatprep.subr.bf16.mxu1 %v23071_v24  ;;  %v23146_v43 = vld [vmem:[%s29087_s5 + $0xfcc] ss:$16 sps:$4 sm:$0xff]   ;;  %v23144_v24 = vld [vmem:[%s29087_s5 + $0xfc8] ss:$16 sps:$4 sm:$0xff]  }
 0x921   :  { %13648 = vmatmul.mubr.bf16.gmra.mrb[44].mxu1 %v10232_v0  ;;  %14219 = vmatprep.subr.bf16.mxu0 %v23074_v9  ;;  %v23149_v9 = vld [vmem:[%s29087_s5 + $0xfe4] ss:$16 sps:$4 sm:$0xff]  }
 0x922   :  { %14197 = vmatmul.mubr.bf16.gmra.mrb[160].mxu0 %v10232_v0  ;;  %13657 = vmatprep.mubr.bf16.mxu1 %v10295_v54  ;;  %v23150_v0 = vld [vmem:[%s29087_s5 + $0xfe8] ss:$16 sps:$4 sm:$0xff]  }
 0x923   :  { %13671 = vmatpush1.bf16.msra.mxu1 %v23069_v12  ;;  %14206 = vmatprep.mubr.bf16.mxu0 %v10295_v54  ;;  %v23147_v12 = vld [vmem:[%s29087_s5 + $0xfe0] ss:$16 sps:$4 sm:$0xff]   ;;  %v23158_v54 = vld [vmem:[%s29087_s5 + $0x100c] ss:$16 sps:$4 sm:$0xff]  }
 0x924   :  { %14220 = vmatpush1.bf16.msra.mxu0 %v23072_v14  ;;  %13672 = vmatprep.subr.bf16.mxu1 %v23077_v18  ;;  %v23155_v14 = vld [vmem:[%s29087_s5 + $0x1004] ss:$16 sps:$4 sm:$0xff]   ;;  %v23153_v18 = vld [vmem:[%s29087_s5 + $0x1000] ss:$16 sps:$4 sm:$0xff]  }
 0x925   :  { %14221 = vmatprep.subr.bf16.mxu0 %v23080_v5  ;;  %v23156_v5 = vld [vmem:[%s29087_s5 + $0x1008] ss:$16 sps:$4 sm:$0xff]  }
 0x927   :  { %13673 = vmatpush1.bf16.msra.mxu1 %v23075_v33  ;;  %v23161_v33 = vld [vmem:[%s29087_s5 + $0x1024] ss:$16 sps:$4 sm:$0xff]  }
 0x928   :  { %14222 = vmatpush1.bf16.msra.mxu0 %v23078_v47  ;;  %13674 = vmatprep.subr.bf16.mxu1 %v23083_v23  ;;  %v23164_v47 = vld [vmem:[%s29087_s5 + $0x102c] ss:$16 sps:$4 sm:$0xff]   ;;  %v23159_v23 = vld [vmem:[%s29087_s5 + $0x1020] ss:$16 sps:$4 sm:$0xff]  }
 0x929   :  { %13658 = vmatmul.mubr.bf16.gmra.mrb[48].mxu1 %v10293_v6  ;;  %14223 = vmatprep.subr.bf16.mxu0 %v23086_v62  ;;  %v23162_v62 = vld [vmem:[%s29087_s5 + $0x1028] ss:$16 sps:$4 sm:$0xff]  }
 0x92a   :  { %14207 = vmatmul.mubr.bf16.gmra.mrb[164].mxu0 %v10293_v6  ;;  %13698 = vmatprep.mubr.bf16.mxu1 %v27387_v11  ;;  %v23167_v6 = vld [vmem:[%s29087_s5 + $0x1044] ss:$16 sps:$4 sm:$0xff]  }
 0x92b   :  { %13675 = vmatpush1.bf16.msra.mxu1 %v23081_v63  ;;  %14247 = vmatprep.mubr.bf16.mxu0 %v27387_v11  ;;  %v23093_v11 = vld [vmem:[%s29087_s5 + $0xec0] ss:$16 sps:$4 sm:$0xff]   ;;  %v23168_v63 = vld [vmem:[%s29087_s5 + $0x1048] ss:$16 sps:$4 sm:$0xff]  }
 0x92c   :  { %14224 = vmatpush1.bf16.msra.mxu0 %v23084_v50  ;;  %13676 = vmatprep.subr.bf16.mxu1 %v23089_v40  ;;  %v10299_v50 = vshrl.u32 %v27366_v48, 16  ;;  %v23173_v40 = vld [vmem:[%s29087_s5 + $0x1064] ss:$16 sps:$4 sm:$0xff]   ;;  %v23171_v48 = vld [vmem:[%s29087_s5 + $0x1060] ss:$16 sps:$4 sm:$0xff]  }
 0x92d   :  { %14225 = vmatprep.subr.bf16.mxu0 %v23092_v27  ;;  %v23176_v27 = vld [vmem:[%s29087_s5 + $0x106c] ss:$16 sps:$4 sm:$0xff]  }
 0x92f   :  { %13677 = vmatpush1.bf16.msra.mxu1 %v23087_v10  ;;  %v23174_v10 = vld [vmem:[%s29087_s5 + $0x1068] ss:$16 sps:$4 sm:$0xff]  }
 0x930   :  { %14226 = vmatpush1.bf16.msra.mxu0 %v23090_v20  ;;  %13678 = vmatprep.subr.bf16.mxu1 %v23095_v36  ;;  %v23179_v20 = vld [vmem:[%s29087_s5 + $0x1084] ss:$16 sps:$4 sm:$0xff]   ;;  %v10297_v36 = vshrl.u32 %v27369_v37, 16  ;;  %v23188_v37 = vld [vmem:[%s29087_s5 + $0x10ac] ss:$16 sps:$4 sm:$0xff]  }
 0x931   :  { %14227 = vmatprep.subr.bf16.mxu0 %v23098_v52  ;;  %v23177_v52 = vld [vmem:[%s29087_s5 + $0x1080] ss:$16 sps:$4 sm:$0xff]  }
 0x933   :  { %13679 = vmatpush1.bf16.msra.mxu1 %v23093_v11  ;;  %v23180_v11 = vld [vmem:[%s29087_s5 + $0x1088] ss:$16 sps:$4 sm:$0xff]  }
 0x934   :  { %14228 = vmatpush1.bf16.msra.mxu0 %v23096_v2  ;;  %13680 = vmatprep.subr.bf16.mxu1 %v23101_v35  ;;  %v23185_v2 = vld [vmem:[%s29087_s5 + $0x10a4] ss:$16 sps:$4 sm:$0xff]   ;;  %v23183_v35 = vld [vmem:[%s29087_s5 + $0x10a0] ss:$16 sps:$4 sm:$0xff]  }
 0x935   :  { %14229 = vmatprep.subr.bf16.mxu0 %v23104_v25  ;;  %v23186_v25 = vld [vmem:[%s29087_s5 + $0x10a8] ss:$16 sps:$4 sm:$0xff]  }
 0x937   :  { %13681 = vmatpush1.bf16.msra.mxu1 %v23099_v30  ;;  %v23191_v30 = vld [vmem:[%s29087_s5 + $0x10c4] ss:$16 sps:$4 sm:$0xff]  }
 0x938   :  { %14230 = vmatpush1.bf16.msra.mxu0 %v23102_v8  ;;  %13682 = vmatprep.subr.bf16.mxu1 %v23107_v51  ;;  %v23194_v8 = vld [vmem:[%s29087_s5 + $0x10cc] ss:$16 sps:$4 sm:$0xff]   ;;  %v23192_v51 = vld [vmem:[%s29087_s5 + $0x10c8] ss:$16 sps:$4 sm:$0xff]  }
 0x939   :  { %14231 = vmatprep.subr.bf16.mxu0 %v23110_v4  ;;  %v23197_v4 = vld [vmem:[%s29087_s5 + $0x10e4] ss:$16 sps:$4 sm:$0xff]  }
 0x93b   :  { %13683 = vmatpush1.bf16.msra.mxu1 %v23105_v32  ;;  %v23200_v32 = vld [vmem:[%s29087_s5 + $0x10ec] ss:$16 sps:$4 sm:$0xff]  }
 0x93c   :  { %14232 = vmatpush1.bf16.msra.mxu0 %v23108_v31  ;;  %13684 = vmatprep.subr.bf16.mxu1 %v23113_v44  ;;  %v23195_v31 = vld [vmem:[%s29087_s5 + $0x10e0] ss:$16 sps:$4 sm:$0xff]   ;;  %v23198_v44 = vld [vmem:[%s29087_s5 + $0x10e8] ss:$16 sps:$4 sm:$0xff]  }
 0x93d   :  { %14233 = vmatprep.subr.bf16.mxu0 %v23116_v61  ;;  %v23203_v61 = vld [vmem:[%s29087_s5 + $0x1104] ss:$16 sps:$4 sm:$0xff]  }
 0x93f   :  { %13685 = vmatpush1.bf16.msra.mxu1 %v23111_v22  ;;  %v23206_v22 = vld [vmem:[%s29087_s5 + $0x110c] ss:$16 sps:$4 sm:$0xff]  }
 0x940   :  { %14234 = vmatpush1.bf16.msra.mxu0 %v23114_v28  ;;  %13686 = vmatprep.subr.bf16.mxu1 %v23119_v17  ;;  %v23201_v28 = vld [vmem:[%s29087_s5 + $0x1100] ss:$16 sps:$4 sm:$0xff]   ;;  %v23204_v17 = vld [vmem:[%s29087_s5 + $0x1108] ss:$16 sps:$4 sm:$0xff]  }
 0x941   :  { %14235 = vmatprep.subr.bf16.mxu0 %v23122_v45  ;;  %v23209_v45 = vld [vmem:[%s29087_s5 + $0x1124] ss:$16 sps:$4 sm:$0xff]  }
 0x943   :  { %13687 = vmatpush1.bf16.msra.mxu1 %v23117_v53  ;;  %v23212_v53 = vld [vmem:[%s29087_s5 + $0x112c] ss:$16 sps:$4 sm:$0xff]  }
 0x944   :  { %14236 = vmatpush1.bf16.msra.mxu0 %v23120_v55  ;;  %13688 = vmatprep.subr.bf16.mxu1 %v23125_v39  ;;  %v23207_v55 = vld [vmem:[%s29087_s5 + $0x1120] ss:$16 sps:$4 sm:$0xff]   ;;  %v23210_v39 = vld [vmem:[%s29087_s5 + $0x1128] ss:$16 sps:$4 sm:$0xff]  }
 0x945   :  { %14237 = vmatprep.subr.bf16.mxu0 %v23128_v26  ;;  %v23215_v26 = vld [vmem:[%s29087_s5 + $0x1144] ss:$16 sps:$4 sm:$0xff]  }
 0x947   :  { %13689 = vmatpush1.bf16.msra.mxu1 %v23123_v56  ;;  %v23218_v56 = vld [vmem:[%s29087_s5 + $0x114c] ss:$16 sps:$4 sm:$0xff]  }
 0x948   :  { %14238 = vmatpush1.bf16.msra.mxu0 %v23126_v3  ;;  %13690 = vmatprep.subr.bf16.mxu1 %v23131_v49  ;;  %v23213_v3 = vld [vmem:[%s29087_s5 + $0x1140] ss:$16 sps:$4 sm:$0xff]   ;;  %v23216_v49 = vld [vmem:[%s29087_s5 + $0x1148] ss:$16 sps:$4 sm:$0xff]  }
 0x949   :  { %14239 = vmatprep.subr.bf16.mxu0 %v23134_v16  ;;  %v23221_v16 = vld [vmem:[%s29087_s5 + $0x1164] ss:$16 sps:$4 sm:$0xff]  }
 0x94b   :  { %13691 = vmatpush1.bf16.msra.mxu1 %v23129_v29  ;;  %v23224_v29 = vld [vmem:[%s29087_s5 + $0x116c] ss:$16 sps:$4 sm:$0xff]  }
 0x94c   :  { %14240 = vmatpush1.bf16.msra.mxu0 %v23132_v21  ;;  %13692 = vmatprep.subr.bf16.mxu1 %v23137_v60  ;;  %v23219_v21 = vld [vmem:[%s29087_s5 + $0x1160] ss:$16 sps:$4 sm:$0xff]   ;;  %v23222_v60 = vld [vmem:[%s29087_s5 + $0x1168] ss:$16 sps:$4 sm:$0xff]  }
 0x94d   :  { %14241 = vmatprep.subr.bf16.mxu0 %v23140_v57  ;;  %v23227_v57 = vld [vmem:[%s29087_s5 + $0x1184] ss:$16 sps:$4 sm:$0xff]  }
 0x94f   :  { %13693 = vmatpush1.bf16.msra.mxu1 %v23135_v59  ;;  %v23230_v59 = vld [vmem:[%s29087_s5 + $0x118c] ss:$16 sps:$4 sm:$0xff]  }
 0x950   :  { %14242 = vmatpush1.bf16.msra.mxu0 %v23138_v41  ;;  %13694 = vmatprep.subr.bf16.mxu1 %v23143_v46  ;;  %v23225_v41 = vld [vmem:[%s29087_s5 + $0x1180] ss:$16 sps:$4 sm:$0xff]   ;;  %v23228_v46 = vld [vmem:[%s29087_s5 + $0x1188] ss:$16 sps:$4 sm:$0xff]  }
 0x951   :  { %14243 = vmatprep.subr.bf16.mxu0 %v23146_v43  ;;  %v23233_v43 = vld [vmem:[%s29087_s5 + $0x11a4] ss:$16 sps:$4 sm:$0xff]  }
 0x953   :  { %13695 = vmatpush1.bf16.msra.mxu1 %v23141_v34  ;;  %v23236_v34 = vld [vmem:[%s29087_s5 + $0x11ac] ss:$16 sps:$4 sm:$0xff]  }
 0x954   :  { %14244 = vmatpush1.bf16.msra.mxu0 %v23144_v24  ;;  %13696 = vmatprep.subr.bf16.mxu1 %v23149_v9  ;;  %v23231_v24 = vld [vmem:[%s29087_s5 + $0x11a0] ss:$16 sps:$4 sm:$0xff]  }
 0x955   :  { %14245 = vmatprep.subr.bf16.mxu0 %v23152_v15  ;;  %v9163_v9 = vld [vmem:[#allocation3 + $0xc8] sm:$0x3]  ;;  %v23234_v15 = vld [vmem:[%s29087_s5 + $0x11a8] ss:$16 sps:$4 sm:$0xff]  }
 0x957   :  { %13697 = vmatpush1.bf16.msra.mxu1 %v23147_v12  ;;  %v23239_v12 = vld [vmem:[%s29087_s5 + $0x11c4] ss:$16 sps:$4 sm:$0xff]  }
 0x958   :  { %14246 = vmatpush1.bf16.msra.mxu0 %v23150_v0  ;;  %13727 = vmatprep.subr.bf16.mxu1 %v23155_v14  ;;  %v23242_v0 = vld [vmem:[%s29087_s5 + $0x11cc] ss:$16 sps:$4 sm:$0xff]   ;;  %v9167_v14 = vpack.c.bf16 %v9163_v9, %v9163_v9 }
 0x959   :  { %14276 = vmatprep.subr.bf16.mxu0 %v23158_v54  ;;  %v23237_v54 = vld [vmem:[%s29087_s5 + $0x11c0] ss:$16 sps:$4 sm:$0xff]  }
 0x95a   :  { %13699 = vmatmul.mubr.bf16.vlgmr.msra.gmra.mrb[40].mxu1 %v27409_v58 }
 0x95b   :  { %14248 = vmatmul.mubr.bf16.vlgmr.msra.gmra.mrb[156].mxu0 %v27409_v58  ;;  %13708 = vmatprep.mubr.bf16.mxu1 %v27394_v42  ;;  %v23170_v58 = vld [vmem:[%s29087_s5 + $0x104c] ss:$16 sps:$4 sm:$0xff]  }
 0x95c   :  { %13728 = vmatpush1.bf16.msra.mxu1 %v23153_v18  ;;  %14257 = vmatprep.mubr.bf16.mxu0 %v27394_v42  ;;  %v23165_v42 = vld [vmem:[%s29087_s5 + $0x1040] ss:$16 sps:$4 sm:$0xff]   ;;  %v23240_v18 = vld [vmem:[%s29087_s5 + $0x11c8] ss:$16 sps:$4 sm:$0xff]  }
 0x95d   :  { %14277 = vmatpush1.bf16.msra.mxu0 %v23156_v5  ;;  %13729 = vmatprep.subr.bf16.mxu1 %v23161_v33  ;;  %v23245_v5 = vld [vmem:[%s29087_s5 + $0x11e4] ss:$16 sps:$4 sm:$0xff]   ;;  %v23248_v33 = vld [vmem:[%s29087_s5 + $0x11ec] ss:$16 sps:$4 sm:$0xff]  }
 0x95e   :  { %14278 = vmatprep.subr.bf16.mxu0 %v23164_v47  ;;  %v10265_v47 = vshll.u32 %v9167_v14, 16 }
 0x960   :  { %13730 = vmatpush1.bf16.msra.mxu1 %v23159_v23  ;;  %v9162_v23 = vld [vmem:[#allocation3 + $0xc0] sm:$0x3] }
 0x961   :  { %14279 = vmatpush1.bf16.msra.mxu0 %v23162_v62  ;;  %13731 = vmatprep.subr.bf16.mxu1 %v23167_v6  ;;  %v23243_v62 = vld [vmem:[%s29087_s5 + $0x11e0] ss:$16 sps:$4 sm:$0xff]   ;;  %v23246_v6 = vld [vmem:[%s29087_s5 + $0x11e8] ss:$16 sps:$4 sm:$0xff]  }
 0x962   :  { %13709 = vmatmul.mubr.bf16.gmra.mrb[44].mxu1 %v27422_v38  ;;  %14280 = vmatprep.subr.bf16.mxu0 %v23170_v58  ;;  %v23249_v58 = vld [vmem:[#allocation8 + $0x40] sm:$0xff]  }
 0x963   :  { %14258 = vmatmul.mubr.bf16.gmra.mrb[160].mxu0 %v27422_v38  ;;  %13718 = vmatprep.mubr.bf16.mxu1 %v10299_v50  ;;  %v23182_v38 = vld [vmem:[%s29087_s5 + $0x108c] ss:$16 sps:$4 sm:$0xff]  }
 0x964   :  { %13732 = vmatpush1.bf16.msra.mxu1 %v23165_v42  ;;  %14267 = vmatprep.mubr.bf16.mxu0 %v10299_v50  ;;  %v9166_v42 = vpack.c.bf16 %v9162_v23, %v9162_v23  ;;  %v23250_v50 = vld [vmem:[#allocation8] sm:$0xff]  }
 0x965   :  { %14281 = vmatpush1.bf16.msra.mxu0 %v23168_v63  ;;  %13733 = vmatprep.subr.bf16.mxu1 %v23173_v40  ;;  %v10267_v63 = vrot.slane %v10265_v47, 1 }
 0x966   :  { %14282 = vmatprep.subr.bf16.mxu0 %v23176_v27  ;;  %v10259_v40 = vshll.u32 %v9166_v42, 16 }
 0x967   :  { %v10268_v27 = vsel %vm2388_vm1, %v27415_v1, %v10267_v63  ;;  %v23252_v1 = vld [vmem:[#allocation8 + $0x8] sm:$0xff]  }
 0x968   :  { %13734 = vmatpush1.bf16.msra.mxu1 %v23171_v48  ;;  %v10261_v48 = vrot.slane %v10259_v40, 1 }
 0x969   :  { %14283 = vmatpush1.bf16.msra.mxu0 %v23174_v10  ;;  %13735 = vmatprep.subr.bf16.mxu1 %v23179_v20  ;;  %v10303_v20 = vshrl.u32 %v9167_v14, 16 }
 0x96a   :  { %13719 = vmatmul.mubr.bf16.gmra.mrb[48].mxu1 %v10297_v36  ;;  %14284 = vmatprep.subr.bf16.mxu0 %v23182_v38  ;;  %v10262_v10 = vsel %vm2388_vm1, %v27426_v13, %v10261_v48  ;;  %v10301_v38 = vshrl.u32 %v9166_v42, 16  ;;  %v23258_v13 = vld [vmem:[#allocation8 + $0x388] sm:$0xff]  }
 0x96b   :  { %14268 = vmatmul.mubr.bf16.gmra.mrb[164].mxu0 %v10297_v36  ;;  %13759 = vmatprep.mubr.bf16.mxu1 %v27439_v19  ;;  %v23251_v36 = vld [vmem:[#allocation8 + $0x48] sm:$0xff]  }
 0x96c   :  { %13736 = vmatpush1.bf16.msra.mxu1 %v23177_v52  ;;  %14308 = vmatprep.mubr.bf16.mxu0 %v27439_v19  ;;  %v23189_v19 = vld [vmem:[%s29087_s5 + $0x10c0] ss:$16 sps:$4 sm:$0xff]  }
 0x96d   :  { %14285 = vmatpush1.bf16.msra.mxu0 %v23180_v11  ;;  %13737 = vmatprep.subr.bf16.mxu1 %v23185_v2  ;;  %v23253_v52 = vld [vmem:[#allocation8 + $0x3c0] sm:$0xff]   ;;  %v23255_v11 = vld [vmem:[#allocation8 + $0x50] sm:$0xff]  }
 0x96e   :  { %14286 = vmatprep.subr.bf16.mxu0 %v23188_v37  ;;  %v23256_v2 = vld [vmem:[#allocation8 + $0x10] sm:$0xff]   ;;  %v23257_v37 = vld [vmem:[#allocation8 + $0x3c8] sm:$0xff]  }
 0x970   :  { %13738 = vmatpush1.bf16.msra.mxu1 %v23183_v35  ;;  %v23259_v35 = vld [vmem:[#allocation8 + $0x58] sm:$0xff]  }
 0x971   :  { %14287 = vmatpush1.bf16.msra.mxu0 %v23186_v25  ;;  %13739 = vmatprep.subr.bf16.mxu1 %v23191_v30  ;;  %v23260_v25 = vld [vmem:[#allocation8 + $0x18] sm:$0xff]   ;;  %v23261_v30 = vld [vmem:[#allocation8 + $0x3d0] sm:$0xff]  }
 0x972   :  { %14288 = vmatprep.subr.bf16.mxu0 %v23194_v8  ;;  %v23262_v8 = vld [vmem:[#allocation8 + $0x390] sm:$0xff]  }
 0x974   :  { %13740 = vmatpush1.bf16.msra.mxu1 %v23189_v19  ;;  %v23263_v19 = vld [vmem:[#allocation8 + $0x60] sm:$0xff]  }
 0x975   :  { %14289 = vmatpush1.bf16.msra.mxu0 %v23192_v51  ;;  %13741 = vmatprep.subr.bf16.mxu1 %v23197_v4  ;;  %v23264_v51 = vld [vmem:[#allocation8 + $0x20] sm:$0xff]   ;;  %v23265_v4 = vld [vmem:[#allocation8 + $0x3d8] sm:$0xff]  }
 0x976   :  { %14290 = vmatprep.subr.bf16.mxu0 %v23200_v32  ;;  %v23267_v32 = vld [vmem:[#allocation8 + $0x68] sm:$0xff]  }
 0x978   :  { %13742 = vmatpush1.bf16.msra.mxu1 %v23195_v31  ;;  %v23266_v31 = vld [vmem:[#allocation8 + $0x398] sm:$0xff]  }
 0x979   :  { %14291 = vmatpush1.bf16.msra.mxu0 %v23198_v44  ;;  %13743 = vmatprep.subr.bf16.mxu1 %v23203_v61  ;;  %v23268_v44 = vld [vmem:[#allocation8 + $0x28] sm:$0xff]   ;;  %v23269_v61 = vld [vmem:[#allocation8 + $0x3e0] sm:$0xff]  }
 0x97a   :  { %14292 = vmatprep.subr.bf16.mxu0 %v23206_v22  ;;  %v23271_v22 = vld [vmem:[#allocation8 + $0x70] sm:$0xff]  }
 0x97c   :  { %13744 = vmatpush1.bf16.msra.mxu1 %v23201_v28  ;;  %v23270_v28 = vld [vmem:[#allocation8 + $0x3a0] sm:$0xff]  }
 0x97d   :  { %14293 = vmatpush1.bf16.msra.mxu0 %v23204_v17  ;;  %13745 = vmatprep.subr.bf16.mxu1 %v23209_v45  ;;  %v23272_v17 = vld [vmem:[#allocation8 + $0x30] sm:$0xff]   ;;  %v23273_v45 = vld [vmem:[#allocation8 + $0x3e8] sm:$0xff]  }
 0x97e   :  { %14294 = vmatprep.subr.bf16.mxu0 %v23212_v53  ;;  %v23275_v53 = vld [vmem:[#allocation8 + $0x78] sm:$0xff]  }
 0x980   :  { %13746 = vmatpush1.bf16.msra.mxu1 %v23207_v55  ;;  %v23274_v55 = vld [vmem:[#allocation8 + $0x3a8] sm:$0xff]  }
 0x981   :  { %14295 = vmatpush1.bf16.msra.mxu0 %v23210_v39  ;;  %13747 = vmatprep.subr.bf16.mxu1 %v23215_v26  ;;  %v23276_v39 = vld [vmem:[#allocation8 + $0x38] sm:$0xff]   ;;  %v23277_v26 = vld [vmem:[#allocation8 + $0x3f0] sm:$0xff]  }
 0x982   :  { %14296 = vmatprep.subr.bf16.mxu0 %v23218_v56  ;;  %v23279_v56 = vld [vmem:[#allocation8 + $0xc0] sm:$0xff]  }
 0x984   :  { %13748 = vmatpush1.bf16.msra.mxu1 %v23213_v3  ;;  %v23278_v3 = vld [vmem:[#allocation8 + $0x3b0] sm:$0xff]  }
 0x985   :  { %14297 = vmatpush1.bf16.msra.mxu0 %v23216_v49  ;;  %13749 = vmatprep.subr.bf16.mxu1 %v23221_v16  ;;  %v23282_v49 = vld [vmem:[#allocation8 + $0x3f8] sm:$0xff]  }
 0x986   :  { %14298 = vmatprep.subr.bf16.mxu0 %v23224_v29  ;;  %v23283_v16 = vld [vmem:[#allocation8 + $0x3b8] sm:$0xff]   ;;  %v23287_v29 = vld [vmem:[#allocation8 + $0x4c0] sm:$0xff]  }
 0x988   :  { %13750 = vmatpush1.bf16.msra.mxu1 %v23219_v21  ;;  %v9925_v21 = vld [vmem:[%s29088_s6] sm:$0xf] }
 0x989   :  { %14299 = vmatpush1.bf16.msra.mxu0 %v23222_v60  ;;  %13751 = vmatprep.subr.bf16.mxu1 %v23227_v57  ;;  %v29182_v60 = vld [vmem:[#allocation15_spill] sm:$0xff] }
 0x98a   :  { %14300 = vmatprep.subr.bf16.mxu0 %v23230_v59  ;;  %v28790_v57 = vrot.slane %v9925_v21, %v29182_v60  ;;  %v29183_v59 = vld [vmem:[#allocation14_spill] sm:$0xff] }
 0x98c   :  { %13752 = vmatpush1.bf16.msra.mxu1 %v23225_v41  ;;  %v29184_v41 = vsub.s32 2, %v29183_v59 }
 0x98d   :  { %14301 = vmatpush1.bf16.msra.mxu0 %v23228_v46  ;;  %13753 = vmatprep.subr.bf16.mxu1 %v23233_v43  ;;  %v29185_v43 = vld [vmem:[#allocation16_spill] sm:$0xff] }
 0x98e   :  { %14302 = vmatprep.subr.bf16.mxu0 %v23236_v34  ;;  %v28794_v46 = vrot.slane %v9925_v21, %v29184_v41  ;;  %v28797_v34 = vrot.slane %v9925_v21, %v29185_v43 }
 0x990   :  { %13754 = vmatpush1.bf16.msra.mxu1 %v23231_v24  ;;  %v29186_v24 = vsub.s32 3, %v29183_v59 }
 0x991   :  { %14303 = vmatpush1.bf16.msra.mxu0 %v23234_v15  ;;  %13755 = vmatprep.subr.bf16.mxu1 %v23239_v12 }
 0x992   :  { %14304 = vmatprep.subr.bf16.mxu0 %v23242_v0  ;;  %v28801_v9 = vrot.slane %v9925_v21, %v29186_v24 }
 0x994   :  { %13756 = vmatpush1.bf16.msra.mxu1 %v23237_v54 }
 0x995   :  { %14305 = vmatpush1.bf16.msra.mxu0 %v23240_v18  ;;  %13757 = vmatprep.subr.bf16.mxu1 %v23245_v5 }
 0x996   :  { %14306 = vmatprep.subr.bf16.mxu0 %v23248_v33 }
 0x998   :  { %13758 = vmatpush1.bf16.msra.mxu1 %v23243_v62 }
 0x999   :  { %14307 = vmatpush1.bf16.msra.mxu0 %v23246_v6  ;;  %19783 = vmatprep.subr.bf16.mxu1 %v23249_v58 }
 0x99a   :  { %19937 = vmatprep.subr.bf16.mxu0 %v23253_v52 }
 0x99b   :  { %13760 = vmatmul.mubr.bf16.vlgmr.msra.gmra.mrb[40].mxu1 %v27445_v7 }
 0x99c   :  { %14309 = vmatmul.mubr.bf16.vlgmr.msra.gmra.mrb[156].mxu0 %v27445_v7  ;;  %13769 = vmatprep.mubr.bf16.mxu1 %v10268_v27  ;;  %v23254_v7 = vld [vmem:[#allocation8 + $0x380] sm:$0xff]  }
 0x99d   :  { %14318 = vmatprep.mubr.bf16.mxu0 %v10268_v27  ;;  %19784 = vmatpush3.bf16.msra.mxu1 %v23250_v50 }
 0x99e   :  { %19785 = vmatprep.subr.bf16.mxu1 %v23251_v36  ;;  %19938 = vmatpush3.bf16.msra.mxu0 %v23254_v7 }
 0x99f   :  { %19939 = vmatprep.subr.bf16.mxu0 %v23257_v37 }
 0x9a1   :  { %19786 = vmatpush3.bf16.msra.mxu1 %v23252_v1 }
 0x9a2   :  { %19787 = vmatprep.subr.bf16.mxu1 %v23255_v11  ;;  %19940 = vmatpush3.bf16.msra.mxu0 %v23258_v13  ;;  %v29187_v13 = vld [vmem:[#allocation17_spill] sm:$0xff] }
 0x9a3   :  { %13770 = vmatmul.mubr.bf16.gmra.mrb[44].mxu1 %v10262_v10  ;;  %19941 = vmatprep.subr.bf16.mxu0 %v23261_v30 }
 0x9a4   :  { %14319 = vmatmul.mubr.bf16.gmra.mrb[160].mxu0 %v10262_v10  ;;  %13779 = vmatprep.mubr.bf16.mxu1 %v10303_v20 }
 0x9a5   :  { %14328 = vmatprep.mubr.bf16.mxu0 %v10303_v20  ;;  %19788 = vmatpush3.bf16.msra.mxu1 %v23256_v2 }
 0x9a6   :  { %19789 = vmatprep.subr.bf16.mxu1 %v23259_v35  ;;  %19942 = vmatpush3.bf16.msra.mxu0 %v23262_v8 }
 0x9a7   :  { %19943 = vmatprep.subr.bf16.mxu0 %v23265_v4 }
 0x9a9   :  { %19790 = vmatpush3.bf16.msra.mxu1 %v23260_v25 }
 0x9aa   :  { %19791 = vmatprep.subr.bf16.mxu1 %v23263_v19  ;;  %19944 = vmatpush3.bf16.msra.mxu0 %v23266_v31 }
 0x9ab   :  { %13780 = vmatmul.mubr.bf16.gmra.mrb[48].mxu1 %v10301_v38  ;;  %19945 = vmatprep.subr.bf16.mxu0 %v23269_v61 }
 0x9ac   :  { %14329 = vmatmul.mubr.bf16.gmra.mrb[164].mxu0 %v10301_v38  ;;  %v23679_v38 = vmov 1983009808  }
 0x9ad   :  { %19792 = vmatpush3.bf16.msra.mxu1 %v23264_v51  ;;  %v28811_v36 = vunpack.c.l.s4 %v23679_v38 }
 0x9ae   :  { %19793 = vmatprep.subr.bf16.mxu1 %v23267_v32  ;;  %19946 = vmatpush3.bf16.msra.mxu0 %v23270_v28 }
 0x9af   :  { %19947 = vmatprep.subr.bf16.mxu0 %v23273_v45 }
 0x9b1   :  { %19794 = vmatpush3.bf16.msra.mxu1 %v23268_v44 }
 0x9b2   :  { %19795 = vmatprep.subr.bf16.mxu1 %v23271_v22  ;;  %19948 = vmatpush3.bf16.msra.mxu0 %v23274_v55  ;;  %v14573_v55 = vunpack.c.0.s8 %v28811_v36 }
 0x9b3   :  { %19949 = vmatprep.subr.bf16.mxu0 %v23277_v26 }
 0x9b5   :  { %19796 = vmatpush3.bf16.msra.mxu1 %v23272_v17 }
 0x9b6   :  { %19797 = vmatprep.subr.bf16.mxu1 %v23275_v53  ;;  %19950 = vmatpush3.bf16.msra.mxu0 %v23278_v3 }
 0x9b7   :  { %19951 = vmatprep.subr.bf16.mxu0 %v23282_v49 }
 0x9b9   :  { %19798 = vmatpush3.bf16.msra.mxu1 %v23276_v39 }
 0x9ba   :  { %19805 = vmatprep.subr.bf16.mxu1 %v23279_v56  ;;  %19952 = vmatpush3.bf16.msra.mxu0 %v23283_v16 }
 0x9bb   :  { %19981 = vmatprep.subr.bf16.mxu0 %v23287_v29 }
 0xa6e   :  { %v13761_v15 = vpop.f32.mrb[40].mxu1 }
 0xa6f   :  { %v20412_v12 = vadd.f32 %v13761_v15, %v28790_v57  ;;  %v14310_v0 = vpop.f32.mrb[156].mxu0  ;;  %v13763_v14 = vpop.f32.mrb[41].mxu1 }
 0xa70   :  { %v20422_v54 = vadd.f32 %v14310_v0, %v28794_v46  ;;  %v20413_v18 = vadd.f32 %v13763_v14, %v28797_v34  ;;  %v14312_v5 = vpop.f32.mrb[157].mxu0  ;;  %v13765_v33 = vpop.f32.mrb[42].mxu1 }
 0xa71   :  { %v14337_v47 = vmax.f32 %v20412_v12, 0.0  ;;  %v20423_v23 = vadd.f32 %v14312_v5, %v28801_v9  ;;  %v20414_v62 = vadd.f32 %v13765_v33, %v28790_v57  ;;  %v14314_v6 = vpop.f32.mrb[158].mxu0  ;;  %v13767_v58 = vpop.f32.mrb[43].mxu1 }
 0xa72   :  { %v14339_v42 = vmax.f32 %v20422_v54, 0.0  ;;  %v14338_v63 = vmax.f32 %v20413_v18, 0.0  ;;  %v20424_v50 = vadd.f32 %v14314_v6, %v28794_v46  ;;  %v20415_v40 = vadd.f32 %v13767_v58, %v28797_v34  ;;  %v14316_v27 = vpop.f32.mrb[159].mxu0 }
 0xa73   :  { %v14340_v48 = vmax.f32 %v20423_v23, 0.0  ;;  %v14341_v10 = vmax.f32 %v20414_v62, 0.0  ;;  %v20425_v20 = vadd.f32 %v14316_v27, %v28801_v9 }
 0xa74   :  { %v14361_v1 = vcombine.low %v14337_v47, %v14338_v63  ;;  %v14392_v52 = vcombine.high %v14337_v47, %v14338_v63  ;;  %v14343_v7 = vmax.f32 %v20424_v50, 0.0  ;;  %v14342_v11 = vmax.f32 %v20415_v40, 0.0 }
 0xa75   :  { %v14362_v2 = vcombine.low %v14339_v42, %v14340_v48  ;;  %v14393_v37 = vcombine.high %v14339_v42, %v14340_v48  ;;  %v14344_v35 = vmax.f32 %v20425_v20, 0.0 }
 0xa76   :  { %v14369_v25 = vrot.slane %v14361_v1, %v29187_v13  ;;  %v14400_v30 = vrot.slane %v14392_v52, %v29187_v13  ;;  %v14423_v8 = vcombine.high %v14341_v10, %v14342_v11  ;;  %v13771_v19 = vpop.f32.mrb[44].mxu1 }
 0xa77   :  { %v14376_v51 = vrot.slane %v14362_v2, %v29187_v13  ;;  %v14407_v4 = vrot.slane %v14393_v37, %v29187_v13  ;;  %v14424_v32 = vcombine.high %v14343_v7, %v14344_v35  ;;  %v20416_v31 = vadd.f32 %v13771_v19, %v28790_v57  ;;  %v14320_v44 = vpop.f32.mrb[160].mxu0  ;;  %v13773_v61 = vpop.f32.mrb[45].mxu1 }
 0xa78   :  { %v14431_v22 = vrot.slane %v14423_v8, %v29187_v13  ;;  %v20426_v28 = vadd.f32 %v14320_v44, %v28794_v46  ;;  %v20417_v17 = vadd.f32 %v13773_v61, %v28797_v34  ;;  %v14322_v45 = vpop.f32.mrb[161].mxu0  ;;  %v13775_v53 = vpop.f32.mrb[46].mxu1 }
 0xa79   :  { %v14377_v39 = vcombine.low %v14369_v25, %v14376_v51  ;;  %v14408_v26 = vcombine.low %v14400_v30, %v14407_v4  ;;  %v14438_v56 = vrot.slane %v14424_v32, %v29187_v13  ;;  %v14345_v3 = vmax.f32 %v20416_v31, 0.0  ;;  %v14324_v49 = vpop.f32.mrb[162].mxu0  ;;  %v13777_v16 = vpop.f32.mrb[47].mxu1 }
 0xa7a   :  { %v14347_v29 = vmax.f32 %v20426_v28, 0.0  ;;  %v14346_v21 = vmax.f32 %v20417_v17, 0.0  ;;  %v20427_v60 = vadd.f32 %v14322_v45, %v28801_v9  ;;  %v20418_v41 = vadd.f32 %v13775_v53, %v28790_v57  ;;  %v14326_v43 = vpop.f32.mrb[163].mxu0 }
 0xa7b   :  { %v14384_v24 = vrot.slane %v14377_v39, %v29187_v13  ;;  %v14415_v15 = vrot.slane %v14408_v26, %v29187_v13  ;;  %v14439_v12 = vcombine.low %v14431_v22, %v14438_v56  ;;  %v20428_v0 = vadd.f32 %v14324_v49, %v28794_v46 }
 0xa7c   :  { %v14455_v14 = vcombine.low %v14345_v3, %v14346_v21  ;;  %v14348_v54 = vmax.f32 %v20427_v60, 0.0  ;;  %v14349_v18 = vmax.f32 %v20418_v41, 0.0  ;;  %v20419_v5 = vadd.f32 %v13777_v16, %v28797_v34 }
 0xa7d   :  { %14387 = vst.msk [vmem:[#allocation4 + $0x1] ss:$2 sm:$0xf] %vm26446_vm5, %v14384_v24  ;;  %v14388_v47 = vcombine.high %v14384_v24, %v14384_v24  ;;  %14418 = vst.msk [vmem:[#allocation4 + $0x11] ss:$2 sm:$0xf] %vm26446_vm5, %v14415_v15  ;;  %v14446_v23 = vrot.slane %v14439_v12, %v29187_v13  ;;  %v20429_v6 = vadd.f32 %v14326_v43, %v28801_v9 }
 0xa7e   :  { %v14351_v62 = vmax.f32 %v20428_v0, 0.0  ;;  %v14463_v58 = vrot.slane %v14455_v14, %v29187_v13  ;;  %v14456_v42 = vcombine.low %v14347_v29, %v14348_v54  ;;  %v14350_v63 = vmax.f32 %v20419_v5, 0.0  ;;  %v13781_v50 = vpop.f32.mrb[48].mxu1  ;;  %v23280_v29 = vld [vmem:[#allocation8 + $0x80] sm:$0xff]   ;;  %v23284_v43 = vld [vmem:[#allocation8 + $0xc8] sm:$0xff]  }
 0xa7f   :  { %14391 = vst.msk [vmem:[#allocation4 + $0x9] ss:$2 sm:$0xf] %vm26446_vm5, %v14388_v47  ;;  %v14447_v40 = vcombine.high %v14446_v23, %v14446_v23  ;;  %v14352_v27 = vmax.f32 %v20429_v6, 0.0  ;;  %v20420_v48 = vadd.f32 %v13781_v50, %v28790_v57  ;;  %v14330_v10 = vpop.f32.mrb[164].mxu0  ;;  %v13783_v20 = vpop.f32.mrb[49].mxu1  ;;  %v28846_v30 = vsub.s32 %v14573_v55, %v29183_v59 }
 0xa80   :  { %v14470_v38 = vrot.slane %v14456_v42, %v29187_v13  ;;  %v14490_v36 = vcombine.high %v14349_v18, %v14350_v63  ;;  %v20430_v1 = vadd.f32 %v14330_v10, %v28794_v46  ;;  %v20421_v52 = vadd.f32 %v13783_v20, %v28797_v34  ;;  %v14332_v7 = vpop.f32.mrb[165].mxu0  ;;  %v13785_v11 = vpop.f32.mrb[50].mxu1  ;;  %v23285_v0 = vld [vmem:[#allocation8 + $0x88] sm:$0xff]   ;;  %v23289_v18 = vld [vmem:[#allocation8 + $0xd0] sm:$0xff]   ;;  %v23288_v23 = vld [vmem:[#allocation8 + $0x480] sm:$0xff]  }
 0xa81   :  { %14450 = vst.msk [vmem:[#allocation4 + $0x19] ss:$2 sm:$0xf] %vm26446_vm5, %v14447_v40  ;;  %v14491_v2 = vcombine.high %v14351_v62, %v14352_v27  ;;  %v14353_v37 = vmax.f32 %v20420_v48, 0.0  ;;  %v20431_v35 = vadd.f32 %v14332_v7, %v28801_v9  ;;  %v14334_v25 = vpop.f32.mrb[166].mxu0  ;;  %v13786_v57 = vpop.f32.mrb[51].mxu1 }
 0xa82   :  { %v14471_v8 = vcombine.low %v14463_v58, %v14470_v38  ;;  %v14498_v19 = vrot.slane %v14490_v36, %v29187_v13  ;;  %v14355_v46 = vmax.f32 %v20430_v1, 0.0  ;;  %v14354_v51 = vmax.f32 %v20421_v52, 0.0  ;;  %v14335_v34 = vpop.f32.mrb[167].mxu0  ;;  %v23291_v58 = vld [vmem:[#allocation8 + $0x4c8] sm:$0xff]   ;;  %v23290_v50 = vld [vmem:[#allocation8 + $0x90] sm:$0xff]   ;;  %v23294_v27 = vld [vmem:[#allocation8 + $0xd8] sm:$0xff]  }
 0xa83   :  { %v14505_v4 = vrot.slane %v14491_v2, %v29187_v13  ;;  %v14356_v32 = vmax.f32 %v20431_v35, 0.0  ;;  %v23293_v48 = vld [vmem:[#allocation8 + $0x488] sm:$0xff]   ;;  %v23296_v20 = vld [vmem:[#allocation8 + $0x4d0] sm:$0xff]   ;;  %v23295_v38 = vld [vmem:[#allocation8 + $0x98] sm:$0xff]  }
 0xa84   :  { %v14478_v31 = vrot.slane %v14471_v8, %v29187_v13  ;;  %v14525_v44 = vcombine.low %v14353_v37, %v14354_v51  ;;  %v14552_v61 = vld [vmem:[#allocation4] sm:$0xff]  ;;  %v23298_v52 = vld [vmem:[#allocation8 + $0xe0] sm:$0xff]   ;;  %v23297_v11 = vld [vmem:[#allocation8 + $0x490] sm:$0xff]  }
 0xa85   :  { %v14506_v22 = vcombine.low %v14498_v19, %v14505_v4  ;;  %v14526_v9 = vcombine.low %v14355_v46, %v14356_v32  ;;  %v14577_v28 = vrot.slane %v14552_v61, %v28846_v30  ;;  %v14570_v17 = vcombine.high %v14552_v61, %v14552_v61  ;;  %v23300_v2 = vld [vmem:[#allocation8 + $0x4d8] sm:$0xff]   ;;  %v23299_v25 = vld [vmem:[#allocation8 + $0xa0] sm:$0xff]   ;;  %v23302_v8 = vld [vmem:[#allocation8 + $0xe8] sm:$0xff]  }
 0xa86   :  { %14481 = vst.msk [vmem:[#allocation4 + $0x21] ss:$2 sm:$0xf] %vm26446_vm5, %v14478_v31  ;;  %v14482_v59 = vcombine.high %v14478_v31, %v14478_v31  ;;  %v14533_v45 = vrot.slane %v14525_v44, %v29187_v13  ;;  %v23301_v19 = vld [vmem:[#allocation8 + $0x498] sm:$0xff]   ;;  %v23304_v46 = vld [vmem:[#allocation8 + $0x4e0] sm:$0xff]   ;;  %v23303_v51 = vld [vmem:[#allocation8 + $0xa8] sm:$0xff]  }
 0xa87   :  { %v14513_v53 = vrot.slane %v14506_v22, %v29187_v13  ;;  %v14540_v55 = vrot.slane %v14526_v9, %v29187_v13  ;;  %v14585_v39 = vcombine.high %v14577_v28, %v14577_v28  ;;  %v28860_v26 = vrot.slane %v14570_v17, %v28846_v30  ;;  %v23306_v34 = vld [vmem:[#allocation8 + $0xf0] sm:$0xff]   ;;  %v23305_v4 = vld [vmem:[#allocation8 + $0x4a0] sm:$0xff]   ;;  %v23308_v32 = vld [vmem:[#allocation8 + $0x4e8] sm:$0xff]  }
 0xa88   :  { %14485 = vst.msk [vmem:[#allocation4 + $0x29] ss:$2 sm:$0xf] %vm26446_vm5, %v14482_v59  ;;  %v14555_v56 = vld [vmem:[#allocation4 + $0x18] sm:$0xff]  ;;  %v14759_v60 = vpack.c.bf16 %v14577_v28, %v14577_v28  ;;  %v28907_v31 = vld [vmem:[#allocation4 + $0x8] sm:$0xff]  ;;  %v23310_v61 = vld [vmem:[#allocation8 + $0xf8] sm:$0xff]  }
 0xa89   :  { %14516 = vst.msk [vmem:[#allocation4 + $0x31] ss:$2 sm:$0xf] %vm26446_vm5, %v14513_v53  ;;  %v14517_v3 = vcombine.high %v14513_v53, %v14513_v53  ;;  %v14541_v49 = vcombine.low %v14533_v45, %v14540_v55  ;;  %v14760_v16 = vpack.c.bf16 %v14585_v39, %v14585_v39  ;;  %v14621_v21 = vcombine.high %v14555_v56, %v14555_v56  ;;  %v23307_v44 = vld [vmem:[#allocation8 + $0xb0] sm:$0xff]   ;;  %v23309_v22 = vld [vmem:[#allocation8 + $0x4a8] sm:$0xff]   ;;  %v23311_v17 = vld [vmem:[#allocation8 + $0xb8] sm:$0xff]  }
 0xa8a   :  { %v14586_v41 = vcombine.high %v28860_v26, %v28860_v26  ;;  %v28911_v9 = vrot.slane %v28907_v31, %v28846_v30  ;;  %v23312_v28 = vld [vmem:[#allocation8 + $0x4f0] sm:$0xff]   ;;  %v23314_v45 = vld [vmem:[#allocation8 + $0x140] sm:$0xff]   ;;  %v23316_v39 = vld [vmem:[#allocation8 + $0x4f8] sm:$0xff]  }
 0xa8b   :  { %14520 = vst.msk [vmem:[#allocation4 + $0x39] ss:$2 sm:$0xf] %vm26446_vm5, %v14517_v3  ;;  %v14548_v24 = vrot.slane %v14541_v49, %v29187_v13  ;;  %17138 = vmatprep.mubr.bf16.mxu1 %v14760_v16  ;;  %v14635_v15 = vrot.slane %v14621_v21, %v28846_v30  ;;  %v28875_v13 = vrot.slane %v14555_v56, %v28846_v30  ;;  %v23313_v53 = vld [vmem:[#allocation8 + $0x4b0] sm:$0xff]   ;;  %v23315_v56 = vld [vmem:[#allocation8 + $0x100] sm:$0xff]   ;;  %v23318_v16 = vld [vmem:[#allocation8 + $0x148] sm:$0xff]  }
 0xa8c   :  { %17139 = vmatmul.mubr.bf16.vlgmr.msra.gmra.mrb[52].mxu1 %v14759_v60  ;;  %v14762_v12 = vpack.c.bf16 %v14586_v41, %v14586_v41  ;;  %v14602_v55 = vcombine.high %v28911_v9, %v28911_v9  ;;  %v14761_v49 = vpack.c.bf16 %v28860_v26, %v28860_v26  ;;  %v23317_v21 = vld [vmem:[#allocation8 + $0x4b8] sm:$0xff]   ;;  %v23320_v60 = vld [vmem:[#allocation8 + $0x5c0] sm:$0xff]   ;;  %v23319_v41 = vld [vmem:[#allocation8 + $0x108] sm:$0xff]  }
 0xa8d   :  { %14551 = vst.msk [vmem:[#allocation4 + $0x41] ss:$2 sm:$0xf] %vm26446_vm5, %v14548_v24  ;;  %19806 = vmatpush3.bf16.msra.mxu1 %v23280_v29  ;;  %v14637_v14 = vcombine.high %v14635_v15, %v14635_v15  ;;  %v14556_v54 = vld [vmem:[#allocation4 + $0x20] sm:$0xff]  ;;  %v14773_v33 = vpack.c.bf16 %v14635_v15, %v14635_v15  ;;  %v23323_v24 = vld [vmem:[#allocation8 + $0x150] sm:$0xff]   ;;  %v23321_v15 = vld [vmem:[#allocation8 + $0x580] sm:$0xff]  }
 0xa8e   :  { %17178 = vmatprep.mubr.bf16.mxu1 %v14762_v12  ;;  %19807 = vmatprep.subr.bf16.mxu1 %v23284_v43  ;;  %v14638_v5 = vcombine.high %v14556_v54, %v14556_v54  ;;  %v28878_v6 = vrot.slane %v14556_v54, %v28846_v30  ;;  %v14764_v29 = vpack.c.bf16 %v14602_v55, %v14602_v55  ;;  %v23325_v12 = vld [vmem:[#allocation8 + $0x5c8] sm:$0xff]   ;;  %v23327_v54 = vld [vmem:[#allocation8 + $0x158] sm:$0xff]   ;;  %v23355_v55 = vld [vmem:[#allocation8 + $0x680] sm:$0xff]  }
 0xa8f   :  { %v14774_v47 = vpack.c.bf16 %v14637_v14, %v14637_v14  ;;  %v28872_v62 = vld [vmem:[#allocation4 + $0x28] sm:$0xff]  ;;  %v23324_v14 = vld [vmem:[#allocation8 + $0x110] sm:$0xff]  }
 0xa90   :  { %v28881_v42 = vrot.slane %v14638_v5, %v28846_v30  ;;  %v28885_v63 = vrot.slane %v28872_v62, %v28846_v30  ;;  %v28889_v36 = vld [vmem:[#allocation4 + $0x30] sm:$0xff]  ;;  %v14655_v59 = vcombine.high %v28872_v62, %v28872_v62  ;;  %v23329_v5 = vld [vmem:[#allocation8 + $0x5d0] sm:$0xff]  }
 0xa91   :  { %19808 = vmatpush3.bf16.msra.mxu1 %v23285_v0  ;;  %17418 = vmatprep.mubr.bf16.mxu0 %v14774_v47  ;;  %v28897_v37 = vrot.slane %v28889_v36, %v28846_v30  ;;  %v23328_v47 = vld [vmem:[#allocation8 + $0x118] sm:$0xff]   ;;  %v23330_v62 = vld [vmem:[#allocation8 + $0x590] sm:$0xff]  }
 0xa92   :  { %17419 = vmatmul.mubr.bf16.vlgmr.msra.gmra.mrb[168].mxu0 %v14773_v33  ;;  %19809 = vmatprep.subr.bf16.mxu1 %v23289_v18  ;;  %v14654_v40 = vcombine.high %v28881_v42, %v28881_v42  ;;  %v28891_v1 = vld [vmem:[#allocation4 + $0x38] sm:$0xff]  ;;  %v28918_v3 = vrot.slane %v14655_v59, %v28846_v30  ;;  %v14777_v26 = vpack.c.bf16 %v28881_v42, %v28881_v42  ;;  %v23326_v18 = vld [vmem:[#allocation8 + $0x588] sm:$0xff]   ;;  %v23333_v33 = vld [vmem:[#allocation8 + $0x5d8] sm:$0xff]  }
 0xa93   :  { %19982 = vmatpush3.bf16.msra.mxu0 %v23288_v23  ;;  %v28901_v35 = vrot.slane %v28891_v1, %v28846_v30  ;;  %v23331_v23 = vld [vmem:[#allocation8 + $0x160] sm:$0xff]   ;;  %v23335_v42 = vld [vmem:[#allocation8 + $0x168] sm:$0xff]  }
 0xa94   :  { %19983 = vmatprep.subr.bf16.mxu0 %v23291_v58  ;;  %v14778_v10 = vpack.c.bf16 %v14654_v40, %v14654_v40  ;;  %v28893_v7 = vld [vmem:[#allocation4 + $0x40] sm:$0xff]  ;;  %v14671_v43 = vcombine.high %v28918_v3, %v28918_v3  ;;  %v23332_v58 = vld [vmem:[#allocation8 + $0x120] sm:$0xff]   ;;  %v23353_v59 = vld [vmem:[#allocation8 + $0x188] sm:$0xff]  }
 0xa95   :  { %19810 = vmatpush3.bf16.msra.mxu1 %v23290_v50  ;;  %v28905_v57 = vrot.slane %v28893_v7, %v28846_v30  ;;  %v23334_v50 = vld [vmem:[#allocation8 + $0x598] sm:$0xff]   ;;  %v23337_v40 = vld [vmem:[#allocation8 + $0x5e0] sm:$0xff]  }
 0xa96   :  { %17498 = vmatprep.mubr.bf16.mxu0 %v14778_v10  ;;  %19811 = vmatprep.subr.bf16.mxu1 %v23294_v27  ;;  %v14782_v0 = vpack.c.bf16 %v14671_v43, %v14671_v43  ;;  %v23336_v27 = vld [vmem:[#allocation8 + $0x128] sm:$0xff]   ;;  %v23338_v10 = vld [vmem:[#allocation8 + $0x5a0] sm:$0xff]   ;;  %v23364_v43 = vld [vmem:[#allocation8 + $0x690] sm:$0xff]  }
 0xa97   :  { %19984 = vmatpush3.bf16.msra.mxu0 %v23293_v48  ;;  %v23339_v48 = vld [vmem:[#allocation8 + $0x170] sm:$0xff]  }
 0xa98   :  { %19985 = vmatprep.subr.bf16.mxu0 %v23296_v20  ;;  %v14587_v20 = vcombine.high %v28907_v31, %v28907_v31  ;;  %v23348_v31 = vld [vmem:[#allocation8 + $0x180] sm:$0xff]  }
 0xa99   :  { %19812 = vmatpush3.bf16.msra.mxu1 %v23295_v38  ;;  %v23341_v38 = vld [vmem:[#allocation8 + $0x5e8] sm:$0xff]  }
 0xa9a   :  { %19813 = vmatprep.subr.bf16.mxu1 %v23298_v52  ;;  %v23340_v52 = vld [vmem:[#allocation8 + $0x130] sm:$0xff]  }
 0xa9b   :  { %19986 = vmatpush3.bf16.msra.mxu0 %v23297_v11  ;;  %v23343_v11 = vld [vmem:[#allocation8 + $0x178] sm:$0xff]  }
 0xa9c   :  { %19987 = vmatprep.subr.bf16.mxu0 %v23300_v2  ;;  %v23342_v2 = vld [vmem:[#allocation8 + $0x5a8] sm:$0xff]  }
 0xa9d   :  { %19814 = vmatpush3.bf16.msra.mxu1 %v23299_v25  ;;  %v28929_v25 = vrot.slane %v14587_v20, %v28846_v30  ;;  %v23382_v20 = vld [vmem:[#allocation8 + $0x200] sm:$0xff]  }
 0xa9e   :  { %19815 = vmatprep.subr.bf16.mxu1 %v23302_v8  ;;  %v23345_v8 = vld [vmem:[#allocation8 + $0x5f0] sm:$0xff]  }
 0xa9f   :  { %19988 = vmatpush3.bf16.msra.mxu0 %v23301_v19  ;;  %v23344_v19 = vld [vmem:[#allocation8 + $0x138] sm:$0xff]  }
 0xaa0   :  { %19989 = vmatprep.subr.bf16.mxu0 %v23304_v46  ;;  %v14672_v46 = vcombine.high %v28889_v36, %v28889_v36 }
 0xaa1   :  { %19816 = vmatpush3.bf16.msra.mxu1 %v23303_v51  ;;  %v23347_v51 = vld [vmem:[#allocation8 + $0x1c0] sm:$0xff]  }
 0xaa2   :  { %19817 = vmatprep.subr.bf16.mxu1 %v23306_v34  ;;  %v23346_v34 = vld [vmem:[#allocation8 + $0x5b0] sm:$0xff]  }
 0xaa3   :  { %19990 = vmatpush3.bf16.msra.mxu0 %v23305_v4  ;;  %v14603_v4 = vcombine.high %v28929_v25, %v28929_v25 }
 0xaa4   :  { %19991 = vmatprep.subr.bf16.mxu0 %v23308_v32  ;;  %v23350_v32 = vld [vmem:[#allocation8 + $0x5f8] sm:$0xff]  }
 0xaa5   :  { %19818 = vmatpush3.bf16.msra.mxu1 %v23307_v44  ;;  %v28936_v44 = vrot.slane %v14672_v46, %v28846_v30  ;;  %v14766_v36 = vpack.c.bf16 %v14603_v4, %v14603_v4  ;;  %v23392_v4 = vld [vmem:[#allocation8 + $0x7c8] sm:$0xff]  }
 0xaa6   :  { %19819 = vmatprep.subr.bf16.mxu1 %v23310_v61  ;;  %v14763_v61 = vpack.c.bf16 %v28911_v9, %v28911_v9  ;;  %v14781_v9 = vpack.c.bf16 %v28918_v3, %v28918_v3  ;;  %v23367_v3 = vld [vmem:[#allocation8 + $0x6d8] sm:$0xff]  }
 0xaa7   :  { %19992 = vmatpush3.bf16.msra.mxu0 %v23309_v22  ;;  %v23352_v22 = vld [vmem:[#allocation8 + $0x1c8] sm:$0xff]  }
 0xaa8   :  { %19993 = vmatprep.subr.bf16.mxu0 %v23312_v28  ;;  %v23351_v28 = vld [vmem:[#allocation8 + $0x5b8] sm:$0xff]  }
 0xaa9   :  { %19820 = vmatpush3.bf16.msra.mxu1 %v23311_v17  ;;  %v23354_v17 = vld [vmem:[#allocation8 + $0x6c0] sm:$0xff]  }
 0xaaa   :  { %19827 = vmatprep.subr.bf16.mxu1 %v23314_v45  ;;  %v14688_v45 = vcombine.high %v28936_v44, %v28936_v44 }
 0xaab   :  { %19994 = vmatpush3.bf16.msra.mxu0 %v23313_v53  ;;  %v23357_v53 = vld [vmem:[#allocation8 + $0x1d0] sm:$0xff]  }
 0xaac   :  { %17179 = vmatmul.mubr.bf16.vlgmr.msra.gmra.mrb[56].mxu1 %v14761_v49  ;;  %19995 = vmatprep.subr.bf16.mxu0 %v23316_v39  ;;  %v23359_v39 = vld [vmem:[#allocation8 + $0x6c8] sm:$0xff]   ;;  %v23358_v49 = vld [vmem:[#allocation8 + $0x190] sm:$0xff]  }
 0xaad   :  { %19828 = vmatpush3.bf16.msra.mxu1 %v23315_v56  ;;  %17218 = vmatprep.mubr.bf16.mxu1 %v14764_v29  ;;  %v14786_v56 = vpack.c.bf16 %v14688_v45, %v14688_v45  ;;  %v23360_v29 = vld [vmem:[#allocation8 + $0x688] sm:$0xff]   ;;  %v23399_v45 = vld [vmem:[#allocation8 + $0x220] sm:$0xff]  }
 0xaae   :  { %19829 = vmatprep.subr.bf16.mxu1 %v23318_v16  ;;  %v23361_v16 = vld [vmem:[#allocation8 + $0x1d8] sm:$0xff]  }
 0xaaf   :  { %19996 = vmatpush3.bf16.msra.mxu0 %v23317_v21  ;;  %v23363_v21 = vld [vmem:[#allocation8 + $0x6d0] sm:$0xff]  }
 0xab0   :  { %20025 = vmatprep.subr.bf16.mxu0 %v23320_v60  ;;  %v23362_v60 = vld [vmem:[#allocation8 + $0x198] sm:$0xff]  }
 0xab1   :  { %19830 = vmatpush3.bf16.msra.mxu1 %v23319_v41  ;;  %v23365_v41 = vld [vmem:[#allocation8 + $0x1e0] sm:$0xff]  }
 0xab2   :  { %17499 = vmatmul.mubr.bf16.vlgmr.msra.gmra.mrb[172].mxu0 %v14777_v26  ;;  %19831 = vmatprep.subr.bf16.mxu1 %v23323_v24  ;;  %v23366_v24 = vld [vmem:[#allocation8 + $0x1a0] sm:$0xff]   ;;  %v23368_v26 = vld [vmem:[#allocation8 + $0x698] sm:$0xff]  }
 0xab3   :  { %20026 = vmatpush3.bf16.msra.mxu0 %v23321_v15  ;;  %17578 = vmatprep.mubr.bf16.mxu0 %v14782_v0  ;;  %v23369_v15 = vld [vmem:[#allocation8 + $0x1e8] sm:$0xff]  }
 0xab4   :  { %20027 = vmatprep.subr.bf16.mxu0 %v23325_v12  ;;  %v23371_v12 = vld [vmem:[#allocation8 + $0x6e0] sm:$0xff]   ;;  %v23370_v0 = vld [vmem:[#allocation8 + $0x1a8] sm:$0xff]  }
 0xab5   :  { %19832 = vmatpush3.bf16.msra.mxu1 %v23324_v14  ;;  %v23373_v14 = vld [vmem:[#allocation8 + $0x1f0] sm:$0xff]  }
 0xab6   :  { %19833 = vmatprep.subr.bf16.mxu1 %v23327_v54  ;;  %v23372_v54 = vld [vmem:[#allocation8 + $0x6a0] sm:$0xff]  }
 0xab7   :  { %20028 = vmatpush3.bf16.msra.mxu0 %v23326_v18  ;;  %v23375_v18 = vld [vmem:[#allocation8 + $0x6e8] sm:$0xff]  }
 0xab8   :  { %20029 = vmatprep.subr.bf16.mxu0 %v23329_v5  ;;  %v28944_v5 = vld [vmem:[#allocation4 + $0x10] sm:$0xff] }
 0xab9   :  { %19834 = vmatpush3.bf16.msra.mxu1 %v23328_v47  ;;  %v23374_v47 = vld [vmem:[#allocation8 + $0x1b0] sm:$0xff]  }
 0xaba   :  { %19835 = vmatprep.subr.bf16.mxu1 %v23331_v23  ;;  %v23377_v23 = vld [vmem:[#allocation8 + $0x1f8] sm:$0xff]  }
 0xabb   :  { %20030 = vmatpush3.bf16.msra.mxu0 %v23330_v62  ;;  %v23376_v62 = vld [vmem:[#allocation8 + $0x6a8] sm:$0xff]  }
 0xabc   :  { %20031 = vmatprep.subr.bf16.mxu0 %v23333_v33  ;;  %v28948_v33 = vrot.slane %v28944_v5, %v28846_v30 }
 0xabd   :  { %19836 = vmatpush3.bf16.msra.mxu1 %v23332_v58  ;;  %v23379_v58 = vld [vmem:[#allocation8 + $0x6f0] sm:$0xff]  }
 0xabe   :  { %19837 = vmatprep.subr.bf16.mxu1 %v23335_v42  ;;  %v23378_v42 = vld [vmem:[#allocation8 + $0x1b8] sm:$0xff]  }
 0xabf   :  { %20032 = vmatpush3.bf16.msra.mxu0 %v23334_v50  ;;  %v14689_v50 = vcombine.high %v28891_v1, %v28891_v1 }
 0xac0   :  { %20033 = vmatprep.subr.bf16.mxu0 %v23337_v40  ;;  %v23381_v40 = vld [vmem:[#allocation8 + $0x240] sm:$0xff]  }
 0xac1   :  { %19838 = vmatpush3.bf16.msra.mxu1 %v23336_v27  ;;  %v23380_v27 = vld [vmem:[#allocation8 + $0x6b0] sm:$0xff]  }
 0xac2   :  { %19839 = vmatprep.subr.bf16.mxu1 %v23339_v48  ;;  %v14619_v48 = vcombine.high %v28948_v33, %v28948_v33 }
 0xac3   :  { %20034 = vmatpush3.bf16.msra.mxu0 %v23338_v10  ;;  %v23383_v10 = vld [vmem:[#allocation8 + $0x6f8] sm:$0xff]  }
 0xac4   :  { %20035 = vmatprep.subr.bf16.mxu0 %v23341_v38  ;;  %v28955_v38 = vrot.slane %v14689_v50, %v28846_v30  ;;  %v14768_v1 = vpack.c.bf16 %v14619_v48, %v14619_v48  ;;  %v23422_v50 = vld [vmem:[#allocation8 + $0x880] sm:$0xff]   ;;  %v23425_v48 = vld [vmem:[#allocation8 + $0x290] sm:$0xff]  }
 0xac5   :  { %19840 = vmatpush3.bf16.msra.mxu1 %v23340_v52  ;;  %v14765_v52 = vpack.c.bf16 %v28929_v25, %v28929_v25  ;;  %v14785_v25 = vpack.c.bf16 %v28936_v44, %v28936_v44  ;;  %v23400_v44 = vld [vmem:[#allocation8 + $0x7d8] sm:$0xff]  }
 0xac6   :  { %19841 = vmatprep.subr.bf16.mxu1 %v23343_v11  ;;  %v23385_v11 = vld [vmem:[#allocation8 + $0x248] sm:$0xff]   ;;  %v14705_v46 = vcombine.high %v28955_v38, %v28955_v38 }
 0xac7   :  { %20036 = vmatpush3.bf16.msra.mxu0 %v23342_v2  ;;  %v23384_v2 = vld [vmem:[#allocation8 + $0x6b8] sm:$0xff]  }
 0xac8   :  { %20037 = vmatprep.subr.bf16.mxu0 %v23345_v8  ;;  %v23387_v8 = vld [vmem:[#allocation8 + $0x7c0] sm:$0xff]  }
 0xac9   :  { %19842 = vmatpush3.bf16.msra.mxu1 %v23344_v19  ;;  %v23386_v19 = vld [vmem:[#allocation8 + $0x208] sm:$0xff]  }
 0xaca   :  { %19849 = vmatprep.subr.bf16.mxu1 %v23347_v51  ;;  %v23390_v51 = vld [vmem:[#allocation8 + $0x250] sm:$0xff]  }
 0xacb   :  { %20038 = vmatpush3.bf16.msra.mxu0 %v23346_v34  ;;  %v23388_v34 = vld [vmem:[#allocation8 + $0x780] sm:$0xff]  }
 0xacc   :  { %17219 = vmatmul.mubr.bf16.vlgmr.msra.gmra.mrb[60].mxu1 %v14763_v61  ;;  %20039 = vmatprep.subr.bf16.mxu0 %v23350_v32  ;;  %v14790_v32 = vpack.c.bf16 %v14705_v46, %v14705_v46  ;;  %v23394_v61 = vld [vmem:[#allocation8 + $0x258] sm:$0xff]  }
 0xacd   :  { %19850 = vmatpush3.bf16.msra.mxu1 %v23348_v31  ;;  %17258 = vmatprep.mubr.bf16.mxu1 %v14766_v36  ;;  %v23391_v31 = vld [vmem:[#allocation8 + $0x210] sm:$0xff]   ;;  %v23435_v46 = vld [vmem:[#allocation8 + $0x898] sm:$0xff]  }
 0xace   :  { %19851 = vmatprep.subr.bf16.mxu1 %v23352_v22  ;;  %v23393_v22 = vld [vmem:[#allocation8 + $0x788] sm:$0xff]   ;;  %v23396_v36 = vld [vmem:[#allocation8 + $0x7d0] sm:$0xff]  }
 0xacf   :  { %20040 = vmatpush3.bf16.msra.mxu0 %v23351_v28  ;;  %v23395_v28 = vld [vmem:[#allocation8 + $0x218] sm:$0xff]  }
 0xad0   :  { %20069 = vmatprep.subr.bf16.mxu0 %v23354_v17  ;;  %v23398_v17 = vld [vmem:[#allocation8 + $0x260] sm:$0xff]  }
 0xad1   :  { %19852 = vmatpush3.bf16.msra.mxu1 %v23353_v59  ;;  %v23397_v59 = vld [vmem:[#allocation8 + $0x790] sm:$0xff]  }
 0xad2   :  { %17579 = vmatmul.mubr.bf16.vlgmr.msra.gmra.mrb[176].mxu0 %v14781_v9  ;;  %19853 = vmatprep.subr.bf16.mxu1 %v23357_v53  ;;  %v23402_v53 = vld [vmem:[#allocation8 + $0x268] sm:$0xff]   ;;  %v23404_v9 = vld [vmem:[#allocation8 + $0x7e0] sm:$0xff]  }
 0xad3   :  { %20070 = vmatpush3.bf16.msra.mxu0 %v23355_v55  ;;  %17658 = vmatprep.mubr.bf16.mxu0 %v14786_v56  ;;  %v23401_v55 = vld [vmem:[#allocation8 + $0x798] sm:$0xff]   ;;  %v23406_v56 = vld [vmem:[#allocation8 + $0x270] sm:$0xff]  }
 0xad4   :  { %20071 = vmatprep.subr.bf16.mxu0 %v23359_v39  ;;  %v23403_v39 = vld [vmem:[#allocation8 + $0x228] sm:$0xff]  }
 0xad5   :  { %19854 = vmatpush3.bf16.msra.mxu1 %v23358_v49  ;;  %v23405_v49 = vld [vmem:[#allocation8 + $0x7a0] sm:$0xff]  }
 0xad6   :  { %19855 = vmatprep.subr.bf16.mxu1 %v23361_v16  ;;  %v14604_v16 = vcombine.high %v28944_v5, %v28944_v5  ;;  %v14767_v5 = vpack.c.bf16 %v28948_v33, %v28948_v33  ;;  %v14789_v33 = vpack.c.bf16 %v28955_v38, %v28955_v38  ;;  %v23434_v38 = vld [vmem:[#allocation8 + $0x8d8] sm:$0xff]  }
 0xad7   :  { %20072 = vmatpush3.bf16.msra.mxu0 %v23360_v29  ;;  %v23408_v29 = vld [vmem:[#allocation8 + $0x7e8] sm:$0xff]  }
 0xad8   :  { %20073 = vmatprep.subr.bf16.mxu0 %v23363_v21  ;;  %v23407_v21 = vld [vmem:[#allocation8 + $0x230] sm:$0xff]  }
 0xad9   :  { %19856 = vmatpush3.bf16.msra.mxu1 %v23362_v60  ;;  %v23410_v60 = vld [vmem:[#allocation8 + $0x278] sm:$0xff]  }
 0xada   :  { %19857 = vmatprep.subr.bf16.mxu1 %v23365_v41  ;;  %v23409_v41 = vld [vmem:[#allocation8 + $0x7a8] sm:$0xff]  }
 0xadb   :  { %20074 = vmatpush3.bf16.msra.mxu0 %v23364_v43  ;;  %v28966_v43 = vrot.slane %v14604_v16, %v28846_v30  ;;  %v23454_v16 = vld [vmem:[#allocation8 + $0x350] sm:$0xff]  }
 0xadc   :  { %20075 = vmatprep.subr.bf16.mxu0 %v23367_v3  ;;  %v23412_v3 = vld [vmem:[#allocation8 + $0x7f0] sm:$0xff]  }
 0xadd   :  { %19858 = vmatpush3.bf16.msra.mxu1 %v23366_v24  ;;  %v23411_v24 = vld [vmem:[#allocation8 + $0x238] sm:$0xff]  }
 0xade   :  { %19859 = vmatprep.subr.bf16.mxu1 %v23369_v15  ;;  %v14706_v15 = vcombine.high %v28893_v7, %v28893_v7 }
 0xadf   :  { %20076 = vmatpush3.bf16.msra.mxu0 %v23368_v26  ;;  %v23414_v26 = vld [vmem:[#allocation8 + $0x2c0] sm:$0xff]  }
 0xae0   :  { %20077 = vmatprep.subr.bf16.mxu0 %v23371_v12  ;;  %v23413_v12 = vld [vmem:[#allocation8 + $0x7b0] sm:$0xff]  }
 0xae1   :  { %19860 = vmatpush3.bf16.msra.mxu1 %v23370_v0  ;;  %v14620_v0 = vcombine.high %v28966_v43, %v28966_v43 }
 0xae2   :  { %19861 = vmatprep.subr.bf16.mxu1 %v23373_v14  ;;  %v23417_v14 = vld [vmem:[#allocation8 + $0x7f8] sm:$0xff]  }
 0xae3   :  { %20078 = vmatpush3.bf16.msra.mxu0 %v23372_v54  ;;  %v23415_v54 = vld [vmem:[#allocation8 + $0x280] sm:$0xff]   ;;  %v14770_v7 = vpack.c.bf16 %v14620_v0, %v14620_v0  ;;  %v23464_v0 = vld [vmem:[#allocation8 + $0x378] sm:$0xff]  }
 0xae4   :  { %20079 = vmatprep.subr.bf16.mxu0 %v23375_v18  ;;  %v28973_v18 = vrot.slane %v14706_v15, %v28846_v30  ;;  %v23424_v30 = vld [vmem:[#allocation8 + $0x2d0] sm:$0xff]   ;;  %v23461_v15 = vld [vmem:[#allocation8 + $0x328] sm:$0xff]  }
 0xae5   :  { %19862 = vmatpush3.bf16.msra.mxu1 %v23374_v47  ;;  %v23419_v47 = vld [vmem:[#allocation8 + $0x2c8] sm:$0xff]  }
 0xae6   :  { %19863 = vmatprep.subr.bf16.mxu1 %v23377_v23  ;;  %v23418_v23 = vld [vmem:[#allocation8 + $0x7b8] sm:$0xff]  }
 0xae7   :  { %20080 = vmatpush3.bf16.msra.mxu0 %v23376_v62  ;;  %v23421_v62 = vld [vmem:[#allocation8 + $0x8c0] sm:$0xff]  }
 0xae8   :  { %20081 = vmatprep.subr.bf16.mxu0 %v23379_v58  ;;  %v23420_v58 = vld [vmem:[#allocation8 + $0x288] sm:$0xff]  }
 0xae9   :  { %19864 = vmatpush3.bf16.msra.mxu1 %v23378_v42  ;;  %v14722_v42 = vcombine.high %v28973_v18, %v28973_v18 }
 0xaea   :  { %19871 = vmatprep.subr.bf16.mxu1 %v23381_v40  ;;  %v23426_v40 = vld [vmem:[#allocation8 + $0x8c8] sm:$0xff]  }
 0xaeb   :  { %20082 = vmatpush3.bf16.msra.mxu0 %v23380_v27  ;;  %v14794_v27 = vpack.c.bf16 %v14722_v42, %v14722_v42  ;;  %v23471_v42 = vld [vmem:[#allocation8 + $0x410] sm:$0xff]  }
 0xaec   :  { %17259 = vmatmul.mubr.bf16.vlgmr.msra.gmra.mrb[64].mxu1 %v14765_v52  ;;  %20083 = vmatprep.subr.bf16.mxu0 %v23383_v10  ;;  %v23428_v10 = vld [vmem:[#allocation8 + $0x2d8] sm:$0xff]   ;;  %v23430_v52 = vld [vmem:[#allocation8 + $0x8d0] sm:$0xff]  }
 0xaed   :  { %19872 = vmatpush3.bf16.msra.mxu1 %v23382_v20  ;;  %17298 = vmatprep.mubr.bf16.mxu1 %v14768_v1  ;;  %v23427_v20 = vld [vmem:[#allocation8 + $0x888] sm:$0xff]   ;;  %v23432_v1 = vld [vmem:[#allocation8 + $0x2e0] sm:$0xff]  }
 0xaee   :  { %19873 = vmatprep.subr.bf16.mxu1 %v23385_v11  ;;  %v23429_v11 = vld [vmem:[#allocation8 + $0x298] sm:$0xff]  }
 0xaef   :  { %20084 = vmatpush3.bf16.msra.mxu0 %v23384_v2  ;;  %v23431_v2 = vld [vmem:[#allocation8 + $0x890] sm:$0xff]  }
 0xaf0   :  { %20113 = vmatprep.subr.bf16.mxu0 %v23387_v8  ;;  %v23433_v8 = vld [vmem:[#allocation8 + $0x2a0] sm:$0xff]  }
 0xaf1   :  { %19874 = vmatpush3.bf16.msra.mxu1 %v23386_v19  ;;  %v23436_v19 = vld [vmem:[#allocation8 + $0x2e8] sm:$0xff]  }
 0xaf2   :  { %17659 = vmatmul.mubr.bf16.vlgmr.msra.gmra.mrb[180].mxu0 %v14785_v25  ;;  %19875 = vmatprep.subr.bf16.mxu1 %v23390_v51  ;;  %v23438_v51 = vld [vmem:[#allocation8 + $0x8e0] sm:$0xff]   ;;  %v23440_v25 = vld [vmem:[#allocation8 + $0x2f0] sm:$0xff]  }
 0xaf3   :  { %20114 = vmatpush3.bf16.msra.mxu0 %v23388_v34  ;;  %17738 = vmatprep.mubr.bf16.mxu0 %v14790_v32  ;;  %v23437_v34 = vld [vmem:[#allocation8 + $0x2a8] sm:$0xff]  }
 0xaf4   :  { %20115 = vmatprep.subr.bf16.mxu0 %v23392_v4  ;;  %v23439_v4 = vld [vmem:[#allocation8 + $0x8a0] sm:$0xff]   ;;  %v23442_v32 = vld [vmem:[#allocation8 + $0x8e8] sm:$0xff]  }
 0xaf5   :  { %19876 = vmatpush3.bf16.msra.mxu1 %v23391_v31  ;;  %v23441_v31 = vld [vmem:[#allocation8 + $0x2b0] sm:$0xff]  }
 0xaf6   :  { %19877 = vmatprep.subr.bf16.mxu1 %v23394_v61  ;;  %v23444_v61 = vld [vmem:[#allocation8 + $0x2f8] sm:$0xff]  }
 0xaf7   :  { %20116 = vmatpush3.bf16.msra.mxu0 %v23393_v22  ;;  %v23443_v22 = vld [vmem:[#allocation8 + $0x8a8] sm:$0xff]  }
 0xaf8   :  { %20117 = vmatprep.subr.bf16.mxu0 %v23396_v36  ;;  %v23446_v36 = vld [vmem:[#allocation8 + $0x8f0] sm:$0xff]  }
 0xaf9   :  { %19878 = vmatpush3.bf16.msra.mxu1 %v23395_v28  ;;  %v23445_v28 = vld [vmem:[#allocation8 + $0x2b8] sm:$0xff]  }
 0xafa   :  { %19879 = vmatprep.subr.bf16.mxu1 %v23398_v17  ;;  %v23448_v17 = vld [vmem:[#allocation8 + $0x340] sm:$0xff]  }
 0xafb   :  { %20118 = vmatpush3.bf16.msra.mxu0 %v23397_v59  ;;  %v23447_v59 = vld [vmem:[#allocation8 + $0x8b0] sm:$0xff]  }
 0xafc   :  { %20119 = vmatprep.subr.bf16.mxu0 %v23400_v44  ;;  %v14636_v44 = vcombine.high %v28875_v13, %v28875_v13 }
 0xafd   :  { %19880 = vmatpush3.bf16.msra.mxu1 %v23399_v45  ;;  %v23450_v45 = vld [vmem:[#allocation8 + $0x8f8] sm:$0xff]  }
 0xafe   :  { %19881 = vmatprep.subr.bf16.mxu1 %v23402_v53  ;;  %v23449_v53 = vld [vmem:[#allocation8 + $0x300] sm:$0xff]  }
 0xaff   :  { %20120 = vmatpush3.bf16.msra.mxu0 %v23401_v55  ;;  %v14769_v55 = vpack.c.bf16 %v28966_v43, %v28966_v43  ;;  %v23458_v43 = vld [vmem:[#allocation8 + $0x360] sm:$0xff]  }
 0xb00   :  { %20121 = vmatprep.subr.bf16.mxu0 %v23404_v9  ;;  %v23452_v9 = vld [vmem:[#allocation8 + $0x348] sm:$0xff]  }
 0xb01   :  { %19882 = vmatpush3.bf16.msra.mxu1 %v23403_v39  ;;  %v14772_v39 = vpack.c.bf16 %v14636_v44, %v14636_v44  ;;  %v23488_v44 = vld [vmem:[#allocation8 + $0x558] sm:$0xff]  }
 0xb02   :  { %19883 = vmatprep.subr.bf16.mxu1 %v23406_v56  ;;  %v23451_v56 = vld [vmem:[#allocation8 + $0x8b8] sm:$0xff]  }
 0xb03   :  { %20122 = vmatpush3.bf16.msra.mxu0 %v23405_v49  ;;  %v23453_v49 = vld [vmem:[#allocation8 + $0x308] sm:$0xff]  }
 0xb04   :  { %20123 = vmatprep.subr.bf16.mxu0 %v23408_v29  ;;  %v14793_v29 = vpack.c.bf16 %v28973_v18, %v28973_v18  ;;  %v14653_v18 = vcombine.high %v28878_v6, %v28878_v6 }
 0xb05   :  { %19884 = vmatpush3.bf16.msra.mxu1 %v23407_v21  ;;  %v23455_v21 = vld [vmem:[#allocation8 + $0x310] sm:$0xff]  }
 0xb06   :  { %19885 = vmatprep.subr.bf16.mxu1 %v23410_v60  ;;  %v23456_v60 = vld [vmem:[#allocation8 + $0x358] sm:$0xff]  }
 0xb07   :  { %20124 = vmatpush3.bf16.msra.mxu0 %v23409_v41  ;;  %v23457_v41 = vld [vmem:[#allocation8 + $0x318] sm:$0xff]  }
 0xb08   :  { %20125 = vmatprep.subr.bf16.mxu0 %v23412_v3  ;;  %v23459_v3 = vld [vmem:[#allocation8 + $0x320] sm:$0xff]  }
 0xb09   :  { %19886 = vmatpush3.bf16.msra.mxu1 %v23411_v24  ;;  %v23460_v24 = vld [vmem:[#allocation8 + $0x368] sm:$0xff]  }
 0xb0a   :  { %19893 = vmatprep.subr.bf16.mxu1 %v23414_v26  ;;  %v23462_v26 = vld [vmem:[#allocation8 + $0x370] sm:$0xff]  }
 0xb0b   :  { %20126 = vmatpush3.bf16.msra.mxu0 %v23413_v12  ;;  %v23463_v12 = vld [vmem:[#allocation8 + $0x330] sm:$0xff]  }
 0xb0c   :  { %17299 = vmatmul.mubr.bf16.vlgmr.msra.gmra.mrb[68].mxu1 %v14767_v5  ;;  %20127 = vmatprep.subr.bf16.mxu0 %v23417_v14  ;;  %v23465_v14 = vld [vmem:[#allocation8 + $0x338] sm:$0xff]   ;;  %v23467_v5 = vld [vmem:[#allocation8 + $0x400] sm:$0xff]  }
 0xb0d   :  { %19894 = vmatpush3.bf16.msra.mxu1 %v23415_v54  ;;  %17338 = vmatprep.mubr.bf16.mxu1 %v14770_v7  ;;  %v23466_v54 = vld [vmem:[#allocation8 + $0x440] sm:$0xff]   ;;  %v23468_v7 = vld [vmem:[#allocation8 + $0x448] sm:$0xff]  }
 0xb0e   :  { %19895 = vmatprep.subr.bf16.mxu1 %v23419_v47  ;;  %v14771_v47 = vpack.c.bf16 %v28875_v13, %v28875_v13  ;;  %v23476_v13 = vld [vmem:[#allocation8 + $0x468] sm:$0xff]  }
 0xb0f   :  { %20128 = vmatpush3.bf16.msra.mxu0 %v23418_v23  ;;  %v14776_v23 = vpack.c.bf16 %v14653_v18, %v14653_v18  ;;  %v14687_v18 = vcombine.high %v28897_v37, %v28897_v37 }
 0xb10   :  { %20157 = vmatprep.subr.bf16.mxu0 %v23421_v62  ;;  %v23469_v62 = vld [vmem:[#allocation8 + $0x408] sm:$0xff]  }
 0xb11   :  { %19896 = vmatpush3.bf16.msra.mxu1 %v23420_v58  ;;  %v23470_v58 = vld [vmem:[#allocation8 + $0x450] sm:$0xff]  }
 0xb12   :  { %17739 = vmatmul.mubr.bf16.vlgmr.msra.gmra.mrb[184].mxu0 %v14789_v33  ;;  %19897 = vmatprep.subr.bf16.mxu1 %v23424_v30  ;;  %v23472_v30 = vld [vmem:[#allocation8 + $0x458] sm:$0xff]   ;;  %v23474_v33 = vld [vmem:[#allocation8 + $0x460] sm:$0xff]  }
 0xb13   :  { %20158 = vmatpush3.bf16.msra.mxu0 %v23422_v50  ;;  %17818 = vmatprep.mubr.bf16.mxu0 %v14794_v27  ;;  %v23473_v50 = vld [vmem:[#allocation8 + $0x418] sm:$0xff]   ;;  %v23477_v27 = vld [vmem:[#allocation8 + $0x428] sm:$0xff]  }
 0xb14   :  { %20159 = vmatprep.subr.bf16.mxu0 %v23426_v40  ;;  %v23475_v40 = vld [vmem:[#allocation8 + $0x420] sm:$0xff]  }
 0xb15   :  { %19898 = vmatpush3.bf16.msra.mxu1 %v23425_v48  ;;  %v23478_v48 = vld [vmem:[#allocation8 + $0x470] sm:$0xff]  }
 0xb16   :  { %19899 = vmatprep.subr.bf16.mxu1 %v23428_v10 }
 0xb17   :  { %20160 = vmatpush3.bf16.msra.mxu0 %v23427_v20 }
 0xb18   :  { %20161 = vmatprep.subr.bf16.mxu0 %v23430_v52 }
 0xb19   :  { %19900 = vmatpush3.bf16.msra.mxu1 %v23429_v11 }
 0xb1a   :  { %19901 = vmatprep.subr.bf16.mxu1 %v23432_v1  ;;  %v23479_v1 = vld [vmem:[#allocation8 + $0x430] sm:$0xff]  }
 0xb1b   :  { %20162 = vmatpush3.bf16.msra.mxu0 %v23431_v2 }
 0xb1c   :  { %20163 = vmatprep.subr.bf16.mxu0 %v23434_v38  ;;  %v23480_v38 = vld [vmem:[#allocation8 + $0x478] sm:$0xff]  }
 0xb1d   :  { %19902 = vmatpush3.bf16.msra.mxu1 %v23433_v8 }
 0xb1e   :  { %19903 = vmatprep.subr.bf16.mxu1 %v23436_v19  ;;  %v23481_v19 = vld [vmem:[#allocation8 + $0x438] sm:$0xff]  }
 0xb1f   :  { %20164 = vmatpush3.bf16.msra.mxu0 %v23435_v46 }
 0xb20   :  { %20165 = vmatprep.subr.bf16.mxu0 %v23438_v51  ;;  %v23482_v51 = vld [vmem:[#allocation8 + $0x540] sm:$0xff]  }
 0xb21   :  { %19904 = vmatpush3.bf16.msra.mxu1 %v23437_v34 }
 0xb22   :  { %19905 = vmatprep.subr.bf16.mxu1 %v23440_v25 }
 0xb23   :  { %20166 = vmatpush3.bf16.msra.mxu0 %v23439_v4  ;;  %v14670_v4 = vcombine.high %v28885_v63, %v28885_v63 }
 0xb24   :  { %20167 = vmatprep.subr.bf16.mxu0 %v23442_v32 }
 0xb25   :  { %19906 = vmatpush3.bf16.msra.mxu1 %v23441_v31  ;;  %v23483_v31 = vld [vmem:[#allocation8 + $0x500] sm:$0xff]  }
 0xb26   :  { %19907 = vmatprep.subr.bf16.mxu1 %v23444_v61  ;;  %v14775_v61 = vpack.c.bf16 %v28878_v6, %v28878_v6  ;;  %v23492_v6 = vld [vmem:[#allocation8 + $0x568] sm:$0xff]  }
 0xb27   :  { %20168 = vmatpush3.bf16.msra.mxu0 %v23443_v22  ;;  %v23484_v22 = vld [vmem:[#allocation8 + $0x548] sm:$0xff]  }
 0xb28   :  { %20169 = vmatprep.subr.bf16.mxu0 %v23446_v36  ;;  %v14780_v36 = vpack.c.bf16 %v14670_v4, %v14670_v4 }
 0xb29   :  { %19908 = vmatpush3.bf16.msra.mxu1 %v23445_v28  ;;  %v23485_v28 = vld [vmem:[#allocation8 + $0x508] sm:$0xff]  }
 0xb2a   :  { %19915 = vmatprep.subr.bf16.mxu1 %v23448_v17  ;;  %v23486_v17 = vld [vmem:[#allocation8 + $0x550] sm:$0xff]  }
 0xb2b   :  { %20170 = vmatpush3.bf16.msra.mxu0 %v23447_v59  ;;  %v23487_v59 = vld [vmem:[#allocation8 + $0x510] sm:$0xff]  }
 0xb2c   :  { %17339 = vmatmul.mubr.bf16.vlgmr.msra.gmra.mrb[72].mxu1 %v14769_v55  ;;  %20171 = vmatprep.subr.bf16.mxu0 %v23450_v45  ;;  %v23489_v45 = vld [vmem:[#allocation8 + $0x518] sm:$0xff]   ;;  %v23491_v55 = vld [vmem:[#allocation8 + $0x520] sm:$0xff]  }
 0xb2d   :  { %19916 = vmatpush3.bf16.msra.mxu1 %v23449_v53  ;;  %17378 = vmatprep.mubr.bf16.mxu1 %v14772_v39  ;;  %v23490_v53 = vld [vmem:[#allocation8 + $0x560] sm:$0xff]  }
 0xb2e   :  { %19917 = vmatprep.subr.bf16.mxu1 %v23452_v9  ;;  %v23493_v9 = vld [vmem:[#allocation8 + $0x528] sm:$0xff]   ;;  %v19448_v39 = vld [vmem:[%s29090_s8] ss:$0 sm:$0xff] }
 0xb2f   :  { %20172 = vmatpush3.bf16.msra.mxu0 %v23451_v56  ;;  %v23494_v56 = vld [vmem:[#allocation8 + $0x570] sm:$0xff]  }
 0xb31   :  { %19918 = vmatpush3.bf16.msra.mxu1 %v23453_v49 }
 0xb32   :  { %17819 = vmatmul.mubr.bf16.vlgmr.msra.gmra.mrb[188].mxu0 %v14793_v29  ;;  %19919 = vmatprep.subr.bf16.mxu1 %v23454_v16 }
 0xb35   :  { %19920 = vmatpush3.bf16.msra.mxu1 %v23455_v21 }
 0xb36   :  { %19921 = vmatprep.subr.bf16.mxu1 %v23456_v60 }
 0xb39   :  { %19922 = vmatpush3.bf16.msra.mxu1 %v23457_v41  ;;  %v23495_v41 = vld [vmem:[#allocation8 + $0x530] sm:$0xff]  }
 0xb3a   :  { %19923 = vmatprep.subr.bf16.mxu1 %v23458_v43 }
 0xb3d   :  { %19924 = vmatpush3.bf16.msra.mxu1 %v23459_v3  ;;  %v23496_v3 = vld [vmem:[#allocation8 + $0x578] sm:$0xff]  }
 0xb3e   :  { %19925 = vmatprep.subr.bf16.mxu1 %v23460_v24 }
 0xb41   :  { %19926 = vmatpush3.bf16.msra.mxu1 %v23461_v15 }
 0xb42   :  { %19927 = vmatprep.subr.bf16.mxu1 %v23462_v26  ;;  %v23497_v26 = vld [vmem:[#allocation8 + $0x538] sm:$0xff]  }
 0xb45   :  { %19928 = vmatpush3.bf16.msra.mxu1 %v23463_v12 }
 0xb46   :  { %19929 = vmatprep.subr.bf16.mxu1 %v23464_v0  ;;  %v23498_v0 = vld [vmem:[#allocation8 + $0x640] sm:$0xff]  }
 0xb49   :  { %19930 = vmatpush3.bf16.msra.mxu1 %v23465_v14 }
 0xb4a   :  { %19959 = vmatprep.subr.bf16.mxu1 %v23466_v54 }
 0xb4c   :  { %17379 = vmatmul.mubr.bf16.vlgmr.msra.gmra.mrb[76].mxu1 %v14771_v47  ;;  %v23499_v47 = vld [vmem:[#allocation8 + $0x600] sm:$0xff]  }
 0xb4d   :  { %19960 = vmatpush3.bf16.msra.mxu1 %v23467_v5  ;;  %17458 = vmatprep.mubr.bf16.mxu1 %v14776_v23  ;;  %v23500_v23 = vld [vmem:[#allocation8 + $0x648] sm:$0xff]  }
 0xb4e   :  { %19961 = vmatprep.subr.bf16.mxu1 %v23468_v7  ;;  %v14779_v7 = vpack.c.bf16 %v28885_v63, %v28885_v63  ;;  %v23508_v63 = vld [vmem:[#allocation8 + $0x668] sm:$0xff]  }
 0xb51   :  { %19962 = vmatpush3.bf16.msra.mxu1 %v23469_v62  ;;  %v14784_v62 = vpack.c.bf16 %v14687_v18, %v14687_v18  ;;  %v14721_v18 = vcombine.high %v28905_v57, %v28905_v57 }
 0xb52   :  { %19963 = vmatprep.subr.bf16.mxu1 %v23470_v58  ;;  %v23501_v58 = vld [vmem:[#allocation8 + $0x608] sm:$0xff]  }
 0xb55   :  { %19964 = vmatpush3.bf16.msra.mxu1 %v23471_v42  ;;  %v23502_v42 = vld [vmem:[#allocation8 + $0x650] sm:$0xff]  }
 0xb56   :  { %19965 = vmatprep.subr.bf16.mxu1 %v23472_v30  ;;  %v23503_v30 = vld [vmem:[#allocation8 + $0x610] sm:$0xff]  }
 0xb59   :  { %19966 = vmatpush3.bf16.msra.mxu1 %v23473_v50  ;;  %v23504_v50 = vld [vmem:[#allocation8 + $0x658] sm:$0xff]  }
 0xb5a   :  { %19967 = vmatprep.subr.bf16.mxu1 %v23474_v33  ;;  %v23505_v33 = vld [vmem:[#allocation8 + $0x618] sm:$0xff]  }
 0xb5d   :  { %19968 = vmatpush3.bf16.msra.mxu1 %v23475_v40  ;;  %v23506_v40 = vld [vmem:[#allocation8 + $0x660] sm:$0xff]  }
 0xb5e   :  { %19969 = vmatprep.subr.bf16.mxu1 %v23476_v13  ;;  %v23507_v13 = vld [vmem:[#allocation8 + $0x620] sm:$0xff]  }
 0xb5f   :  { %v19799_v10 = vpop.f32.mrb[52].mxu1 }
 0xb60   :  { %v19800_v20 = vpop.f32.mrb[53].mxu1 }
 0xb61   :  { %v19801_v52 = vadd.f32 %v19800_v20, %v19799_v10  ;;  %19970 = vmatpush3.bf16.msra.mxu1 %v23477_v27  ;;  %v19802_v11 = vpop.f32.mrb[54].mxu1  ;;  %v23509_v27 = vld [vmem:[#allocation8 + $0x628] sm:$0xff]  }
 0xb62   :  { %v19803_v2 = vpop.f32.mrb[55].mxu1  ;;  %19971 = vmatprep.subr.bf16.mxu1 %v23478_v48  ;;  %v23510_v48 = vld [vmem:[#allocation8 + $0x670] sm:$0xff]  }
 0xb63   :  { %v17141_v29 = vadd.f32 %v19801_v52, %v19448_v39  ;;  %v23525_v39 = vld [vmem:[#allocation8 + $0x728] sm:$0xff]  }
 0xb65   :  { %19972 = vmatpush3.bf16.msra.mxu1 %v23479_v1  ;;  %v19953_v8 = vpop.f32.mrb[168].mxu0  ;;  %v23511_v1 = vld [vmem:[#allocation8 + $0x630] sm:$0xff]  }
 0xb66   :  { %v19954_v46 = vpop.f32.mrb[169].mxu0  ;;  %19973 = vmatprep.subr.bf16.mxu1 %v23480_v38  ;;  %v23512_v38 = vld [vmem:[#allocation8 + $0x678] sm:$0xff]  }
 0xb67   :  { %v28991_v34 = vadd.f32 %v19954_v46, %v19953_v8  ;;  %v19956_v25 = vpop.f32.mrb[170].mxu0  ;;  %v23513_v46 = vld [vmem:[#allocation8 + $0x638] sm:$0xff]  }
 0xb68   :  { %v19957_v32 = vpop.f32.mrb[171].mxu0  ;;  %v23514_v25 = vld [vmem:[#allocation8 + $0x740] sm:$0xff]  }
 0xb69   :  { %19974 = vmatpush3.bf16.msra.mxu1 %v23481_v19 }
 0xb6a   :  { %20003 = vmatprep.subr.bf16.mxu1 %v23482_v51 }
 0xb6c   :  { %17459 = vmatmul.mubr.bf16.vlgmr.msra.gmra.mrb[80].mxu1 %v14775_v61 }
 0xb6d   :  { %20004 = vmatpush3.bf16.msra.mxu1 %v23483_v31  ;;  %17538 = vmatprep.mubr.bf16.mxu1 %v14780_v36  ;;  %v14704_v31 = vcombine.high %v28901_v35, %v28901_v35  ;;  %v14783_v36 = vpack.c.bf16 %v28897_v37, %v28897_v37  ;;  %v23524_v37 = vld [vmem:[#allocation8 + $0x768] sm:$0xff]  }
 0xb6e   :  { %20005 = vmatprep.subr.bf16.mxu1 %v23484_v22  ;;  %v23515_v22 = vld [vmem:[#allocation8 + $0x700] sm:$0xff]  }
 0xb71   :  { %20006 = vmatpush3.bf16.msra.mxu1 %v23485_v28  ;;  %v23516_v28 = vld [vmem:[#allocation8 + $0x748] sm:$0xff]  }
 0xb72   :  { %20007 = vmatprep.subr.bf16.mxu1 %v23486_v17  ;;  %v14788_v17 = vpack.c.bf16 %v14704_v31, %v14704_v31  ;;  %v14791_v31 = vpack.c.bf16 %v28905_v57, %v28905_v57 }
 0xb75   :  { %20008 = vmatpush3.bf16.msra.mxu1 %v23487_v59  ;;  %v23517_v59 = vld [vmem:[#allocation8 + $0x708] sm:$0xff]  }
 0xb76   :  { %20009 = vmatprep.subr.bf16.mxu1 %v23488_v44  ;;  %v23518_v44 = vld [vmem:[#allocation8 + $0x750] sm:$0xff]  }
 0xb79   :  { %20010 = vmatpush3.bf16.msra.mxu1 %v23489_v45  ;;  %v23519_v45 = vld [vmem:[#allocation8 + $0x710] sm:$0xff]  }
 0xb7a   :  { %20011 = vmatprep.subr.bf16.mxu1 %v23490_v53  ;;  %v23520_v53 = vld [vmem:[#allocation8 + $0x758] sm:$0xff]  }
 0xb7d   :  { %20012 = vmatpush3.bf16.msra.mxu1 %v23491_v55  ;;  %v23521_v55 = vld [vmem:[#allocation8 + $0x718] sm:$0xff]  }
 0xb7e   :  { %20013 = vmatprep.subr.bf16.mxu1 %v23492_v6  ;;  %v23522_v6 = vld [vmem:[#allocation8 + $0x760] sm:$0xff]  }
 0xb7f   :  { %v19821_v49 = vpop.f32.mrb[56].mxu1 }
 0xb80   :  { %v19822_v16 = vpop.f32.mrb[57].mxu1 }
 0xb81   :  { %v19823_v21 = vadd.f32 %v19822_v16, %v19821_v49  ;;  %v19824_v60 = vpop.f32.mrb[58].mxu1  ;;  %20014 = vmatpush3.bf16.msra.mxu1 %v23493_v9  ;;  %v23523_v9 = vld [vmem:[#allocation8 + $0x720] sm:$0xff]  }
 0xb82   :  { %v19825_v43 = vpop.f32.mrb[59].mxu1  ;;  %20015 = vmatprep.subr.bf16.mxu1 %v23494_v56  ;;  %v23526_v56 = vld [vmem:[#allocation8 + $0x770] sm:$0xff]  }
 0xb83   :  { %v17181_v24 = vadd.f32 %v19823_v21, %v17141_v29  ;;  %v23527_v60 = vld [vmem:[#allocation8 + $0x730] sm:$0xff]   ;;  %v23528_v43 = vld [vmem:[#allocation8 + $0x778] sm:$0xff]  }
 0xb85   :  { %v19997_v15 = vpop.f32.mrb[172].mxu0  ;;  %20016 = vmatpush3.bf16.msra.mxu1 %v23495_v41 }
 0xb86   :  { %v19998_v12 = vpop.f32.mrb[173].mxu0  ;;  %20017 = vmatprep.subr.bf16.mxu1 %v23496_v3 }
 0xb87   :  { %v29000_v14 = vadd.f32 %v19998_v12, %v19997_v15  ;;  %v20000_v54 = vpop.f32.mrb[174].mxu0  ;;  %v23529_v15 = vld [vmem:[#allocation8 + $0x738] sm:$0xff]   ;;  %v23530_v12 = vld [vmem:[#allocation8 + $0x840] sm:$0xff]  }
 0xb88   :  { %v20001_v5 = vpop.f32.mrb[175].mxu0 }
 0xb89   :  { %20018 = vmatpush3.bf16.msra.mxu1 %v23497_v26 }
 0xb8a   :  { %20047 = vmatprep.subr.bf16.mxu1 %v23498_v0 }
 0xb8c   :  { %17539 = vmatmul.mubr.bf16.vlgmr.msra.gmra.mrb[84].mxu1 %v14779_v7  ;;  %v14787_v7 = vpack.c.bf16 %v28901_v35, %v28901_v35  ;;  %v23540_v35 = vld [vmem:[#allocation8 + $0x868] sm:$0xff]  }
 0xb8d   :  { %20048 = vmatpush3.bf16.msra.mxu1 %v23499_v47  ;;  %17618 = vmatprep.mubr.bf16.mxu1 %v14784_v62  ;;  %v23531_v47 = vld [vmem:[#allocation8 + $0x800] sm:$0xff]   ;;  %v14792_v62 = vpack.c.bf16 %v14721_v18, %v14721_v18 }
 0xb8e   :  { %20049 = vmatprep.subr.bf16.mxu1 %v23500_v23  ;;  %v23532_v23 = vld [vmem:[#allocation8 + $0x848] sm:$0xff]  }
 0xb91   :  { %20050 = vmatpush3.bf16.msra.mxu1 %v23501_v58  ;;  %v23533_v58 = vld [vmem:[#allocation8 + $0x808] sm:$0xff]  }
 0xb92   :  { %20051 = vmatprep.subr.bf16.mxu1 %v23502_v42  ;;  %v23534_v42 = vld [vmem:[#allocation8 + $0x850] sm:$0xff]  }
 0xb95   :  { %20052 = vmatpush3.bf16.msra.mxu1 %v23503_v30  ;;  %v23535_v30 = vld [vmem:[#allocation8 + $0x810] sm:$0xff]  }
 0xb96   :  { %20053 = vmatprep.subr.bf16.mxu1 %v23504_v50  ;;  %v23536_v50 = vld [vmem:[#allocation8 + $0x858] sm:$0xff]  }
 0xb99   :  { %20054 = vmatpush3.bf16.msra.mxu1 %v23505_v33  ;;  %v23537_v33 = vld [vmem:[#allocation8 + $0x818] sm:$0xff]  }
 0xb9a   :  { %20055 = vmatprep.subr.bf16.mxu1 %v23506_v40  ;;  %v23538_v40 = vld [vmem:[#allocation8 + $0x860] sm:$0xff]  }
 0xb9d   :  { %20056 = vmatpush3.bf16.msra.mxu1 %v23507_v13  ;;  %v23539_v13 = vld [vmem:[#allocation8 + $0x820] sm:$0xff]  }
 0xb9e   :  { %20057 = vmatprep.subr.bf16.mxu1 %v23508_v63  ;;  %v23541_v63 = vld [vmem:[#allocation8 + $0x828] sm:$0xff]  }
 0xb9f   :  { %v19843_v10 = vpop.f32.mrb[60].mxu1 }
 0xba0   :  { %v19844_v20 = vpop.f32.mrb[61].mxu1 }
 0xba1   :  { %v19845_v52 = vadd.f32 %v19844_v20, %v19843_v10  ;;  %v19846_v11 = vpop.f32.mrb[62].mxu1  ;;  %20058 = vmatpush3.bf16.msra.mxu1 %v23509_v27  ;;  %v23542_v27 = vld [vmem:[#allocation8 + $0x870] sm:$0xff]  }
 0xba2   :  { %v19847_v2 = vpop.f32.mrb[63].mxu1  ;;  %20059 = vmatprep.subr.bf16.mxu1 %v23510_v48  ;;  %v23543_v11 = vld [vmem:[#allocation8 + $0x830] sm:$0xff]  }
 0xba3   :  { %v17221_v8 = vadd.f32 %v19845_v52, %v17181_v24  ;;  %v23544_v2 = vld [vmem:[#allocation8 + $0x878] sm:$0xff]  }
 0xba5   :  { %v20041_v19 = vpop.f32.mrb[176].mxu0  ;;  %20060 = vmatpush3.bf16.msra.mxu1 %v23511_v1 }
 0xba6   :  { %v20042_v51 = vpop.f32.mrb[177].mxu0  ;;  %20061 = vmatprep.subr.bf16.mxu1 %v23512_v38 }
 0xba7   :  { %v29006_v4 = vadd.f32 %v20042_v51, %v20041_v19  ;;  %v20044_v32 = vpop.f32.mrb[178].mxu0  ;;  %v23545_v19 = vld [vmem:[#allocation8 + $0x838] sm:$0xff]  }
 0xba8   :  { %v20045_v61 = vpop.f32.mrb[179].mxu0 }
 0xba9   :  { %20062 = vmatpush3.bf16.msra.mxu1 %v23513_v46  ;;  %v29189_v61 = vmov 0.0  }
 0xbaa   :  { %20091 = vmatprep.subr.bf16.mxu1 %v23514_v25 }
 0xbac   :  { %17619 = vmatmul.mubr.bf16.vlgmr.msra.gmra.mrb[88].mxu1 %v14783_v36 }
 0xbad   :  { %20092 = vmatpush3.bf16.msra.mxu1 %v23515_v22  ;;  %17698 = vmatprep.mubr.bf16.mxu1 %v14788_v17 }
 0xbae   :  { %20093 = vmatprep.subr.bf16.mxu1 %v23516_v28 }
 0xbb1   :  { %20094 = vmatpush3.bf16.msra.mxu1 %v23517_v59 }
 0xbb2   :  { %20095 = vmatprep.subr.bf16.mxu1 %v23518_v44 }
 0xbb5   :  { %20096 = vmatpush3.bf16.msra.mxu1 %v23519_v45 }
 0xbb6   :  { %20097 = vmatprep.subr.bf16.mxu1 %v23520_v53 }
 0xbb9   :  { %20098 = vmatpush3.bf16.msra.mxu1 %v23521_v55 }
 0xbba   :  { %20099 = vmatprep.subr.bf16.mxu1 %v23522_v6 }
 0xbbd   :  { %20100 = vmatpush3.bf16.msra.mxu1 %v23523_v9 }
 0xbbe   :  { %20101 = vmatprep.subr.bf16.mxu1 %v23524_v37 }
 0xbbf   :  { %v19865_v49 = vpop.f32.mrb[64].mxu1 }
 0xbc0   :  { %v19866_v16 = vpop.f32.mrb[65].mxu1 }
 0xbc1   :  { %v19867_v29 = vadd.f32 %v19866_v16, %v19865_v49  ;;  %v19868_v21 = vpop.f32.mrb[66].mxu1  ;;  %20102 = vmatpush3.bf16.msra.mxu1 %v23525_v39 }
 0xbc2   :  { %v19869_v41 = vpop.f32.mrb[67].mxu1  ;;  %20103 = vmatprep.subr.bf16.mxu1 %v23526_v56 }
 0xbc3   :  { %v17261_v3 = vadd.f32 %v19867_v29, %v17221_v8  ;;  %v23546_v29 = vld [vmem:[%s29091_s9] sm:$0xff]   ;;  %v23548_v41 = vld [vmem:[%s29091_s9 + $0x10] sm:$0xff]  }
 0xbc5   :  { %v20085_v24 = vpop.f32.mrb[180].mxu0  ;;  %20104 = vmatpush3.bf16.msra.mxu1 %v23527_v60  ;;  %v23547_v60 = vld [vmem:[%s29091_s9 + $0x8] sm:$0xff]  }
 0xbc6   :  { %v20086_v26 = vpop.f32.mrb[181].mxu0  ;;  %20105 = vmatprep.subr.bf16.mxu1 %v23528_v43  ;;  %v23549_v43 = vld [vmem:[%s29091_s9 + $0x18] sm:$0xff]  }
 0xbc7   :  { %v29012_v0 = vadd.f32 %v20086_v26, %v20085_v24  ;;  %v20088_v54 = vpop.f32.mrb[182].mxu0 }
 0xbc8   :  { %v20089_v5 = vpop.f32.mrb[183].mxu0 }
 0xbc9   :  { %20106 = vmatpush3.bf16.msra.mxu1 %v23529_v15  ;;  %v23551_v5 = vld [vmem:[%s29091_s9 + $0x28] sm:$0xff]  }
 0xbca   :  { %20135 = vmatprep.subr.bf16.mxu1 %v23530_v12 }
 0xbcc   :  { %17699 = vmatmul.mubr.bf16.vlgmr.msra.gmra.mrb[92].mxu1 %v14787_v7  ;;  %v23553_v7 = vld [vmem:[%s29091_s9 + $0x38] sm:$0xff]  }
 0xbcd   :  { %20136 = vmatpush3.bf16.msra.mxu1 %v23531_v47  ;;  %17778 = vmatprep.mubr.bf16.mxu1 %v14792_v62  ;;  %v23552_v47 = vld [vmem:[%s29091_s9 + $0x30] sm:$0xff]  }
 0xbce   :  { %20137 = vmatprep.subr.bf16.mxu1 %v23532_v23 }
 0xbd1   :  { %20138 = vmatpush3.bf16.msra.mxu1 %v23533_v58 }
 0xbd2   :  { %20139 = vmatprep.subr.bf16.mxu1 %v23534_v42 }
 0xbd5   :  { %20140 = vmatpush3.bf16.msra.mxu1 %v23535_v30 }
 0xbd6   :  { %20141 = vmatprep.subr.bf16.mxu1 %v23536_v50 }
 0xbd9   :  { %20142 = vmatpush3.bf16.msra.mxu1 %v23537_v33 }
 0xbda   :  { %20143 = vmatprep.subr.bf16.mxu1 %v23538_v40 }
 0xbdd   :  { %20144 = vmatpush3.bf16.msra.mxu1 %v23539_v13 }
 0xbde   :  { %20145 = vmatprep.subr.bf16.mxu1 %v23540_v35 }
 0xbdf   :  { %v19887_v48 = vpop.f32.mrb[68].mxu1 }
 0xbe0   :  { %v19888_v10 = vpop.f32.mrb[69].mxu1 }
 0xbe1   :  { %v19889_v20 = vadd.f32 %v19888_v10, %v19887_v48  ;;  %v19890_v52 = vpop.f32.mrb[70].mxu1  ;;  %20146 = vmatpush3.bf16.msra.mxu1 %v23541_v63 }
 0xbe2   :  { %v19891_v1 = vpop.f32.mrb[71].mxu1  ;;  %20147 = vmatprep.subr.bf16.mxu1 %v23542_v27 }
 0xbe3   :  { %v17301_v38 = vadd.f32 %v19889_v20, %v17261_v3 }
 0xbe5   :  { %v20129_v8 = vpop.f32.mrb[184].mxu0  ;;  %20148 = vmatpush3.bf16.msra.mxu1 %v23543_v11 }
 0xbe6   :  { %v20130_v46 = vpop.f32.mrb[185].mxu0  ;;  %20149 = vmatprep.subr.bf16.mxu1 %v23544_v2 }
 0xbe7   :  { %v29018_v51 = vadd.f32 %v20130_v46, %v20129_v8  ;;  %v20132_v25 = vpop.f32.mrb[186].mxu0 }
 0xbe8   :  { %v20133_v32 = vpop.f32.mrb[187].mxu0 }
 0xbe9   :  { %20150 = vmatpush3.bf16.msra.mxu1 %v23545_v19 }
 0xbea   :  { %20320 = vmatprep.subr.bf16.mxu1 %v29189_v61 }
 0xbec   :  { %17779 = vmatmul.mubr.bf16.vlgmr.msra.gmra.mrb[96].mxu1 %v14791_v31 }
 0xbed   :  { %20336 = vmatprep.mubr.msk.bf16.mxu1 %vm23676_vm0, %v29189_v61  ;;  %20321 = vmatpush3.bf16.msra.mxu1 %v23546_v29 }
 0xbee   :  { %20322 = vmatprep.subr.bf16.mxu1 %v29189_v61 }
 0xbf1   :  { %20323 = vmatpush3.bf16.msra.mxu1 %v23547_v60 }
 0xbf2   :  { %20324 = vmatprep.subr.bf16.mxu1 %v29189_v61 }
 0xbf5   :  { %20325 = vmatpush3.bf16.msra.mxu1 %v23548_v41 }
 0xbf6   :  { %20326 = vmatprep.subr.bf16.mxu1 %v29189_v61 }
 0xbf9   :  { %20327 = vmatpush3.bf16.msra.mxu1 %v23549_v43 }
 0xbfa   :  { %20328 = vmatprep.subr.bf16.mxu1 %v29189_v61 }
 0xbff   :  { %v19909_v22 = vpop.f32.mrb[72].mxu1 }
 0xc00   :  { %v19910_v36 = vpop.f32.mrb[73].mxu1 }
 0xc01   :  { %v19911_v28 = vadd.f32 %v19910_v36, %v19909_v22  ;;  %v19912_v17 = vpop.f32.mrb[74].mxu1 }
 0xc02   :  { %v19913_v59 = vpop.f32.mrb[75].mxu1 }
 0xc03   :  { %v17341_v44 = vadd.f32 %v19911_v28, %v17301_v38 }
 0xc05   :  { %v20173_v45 = vpop.f32.mrb[188].mxu0 }
 0xc06   :  { %v20174_v53 = vpop.f32.mrb[189].mxu0 }
 0xc07   :  { %v29025_v55 = vadd.f32 %v20174_v53, %v20173_v45  ;;  %v20176_v6 = vpop.f32.mrb[190].mxu0 }
 0xc08   :  { %v20177_v9 = vpop.f32.mrb[191].mxu0 }
 0xc1f   :  { %v19931_v37 = vpop.f32.mrb[76].mxu1 }
 0xc20   :  { %v19932_v57 = vpop.f32.mrb[77].mxu1 }
 0xc21   :  { %v19933_v39 = vadd.f32 %v19932_v57, %v19931_v37  ;;  %v19934_v56 = vpop.f32.mrb[78].mxu1 }
 0xc22   :  { %v19935_v49 = vpop.f32.mrb[79].mxu1 }
 0xc23   :  { %v17381_v16 = vadd.f32 %v19933_v39, %v17341_v44 }
 0xc25   :  { %v17421_v21 = vadd.f32 %v28991_v34, %v17381_v16  ;;  %v23550_v34 = vld [vmem:[%s29091_s9 + $0x20] sm:$0xff]  }
 0xc26   :  { %20329 = vmatpush3.bf16.msra.mxu1 %v23550_v34 }
 0xc27   :  { %20330 = vmatprep.subr.bf16.mxu1 %v29189_v61 }
 0xc2a   :  { %20331 = vmatpush3.bf16.msra.mxu1 %v23551_v5 }
 0xc2b   :  { %20332 = vmatprep.subr.bf16.mxu1 %v29189_v61 }
 0xc2e   :  { %20333 = vmatpush3.bf16.msra.mxu1 %v23552_v47 }
 0xc2f   :  { %20334 = vmatprep.subr.bf16.mxu1 %v29189_v61 }
 0xc32   :  { %20335 = vmatpush3.bf16.msra.mxu1 %v23553_v7 }
 0xc3f   :  { %v19975_v3 = vpop.f32.mrb[80].mxu1 }
 0xc40   :  { %v19976_v24 = vpop.f32.mrb[81].mxu1 }
 0xc41   :  { %v19977_v15 = vadd.f32 %v19976_v24, %v19975_v3  ;;  %v19978_v26 = vpop.f32.mrb[82].mxu1 }
 0xc42   :  { %v19979_v12 = vpop.f32.mrb[83].mxu1 }
 0xc43   :  { %v17461_v54 = vadd.f32 %v19977_v15, %v17421_v21 }
 0xc45   :  { %v17501_v18 = vadd.f32 %v29000_v14, %v17461_v54 }
 0xc5f   :  { %v20019_v14 = vpop.f32.mrb[84].mxu1 }
 0xc60   :  { %v20020_v23 = vpop.f32.mrb[85].mxu1 }
 0xc61   :  { %v20021_v62 = vadd.f32 %v20020_v23, %v20019_v14  ;;  %v20022_v58 = vpop.f32.mrb[86].mxu1 }
 0xc62   :  { %v20023_v42 = vpop.f32.mrb[87].mxu1 }
 0xc63   :  { %v17541_v30 = vadd.f32 %v20021_v62, %v17501_v18 }
 0xc65   :  { %v17581_v50 = vadd.f32 %v29006_v4, %v17541_v30 }
 0xc7f   :  { %v20063_v33 = vpop.f32.mrb[88].mxu1 }
 0xc80   :  { %v20064_v40 = vpop.f32.mrb[89].mxu1 }
 0xc81   :  { %v20065_v13 = vadd.f32 %v20064_v40, %v20063_v33  ;;  %v20066_v35 = vpop.f32.mrb[90].mxu1 }
 0xc82   :  { %v20067_v63 = vpop.f32.mrb[91].mxu1 }
 0xc83   :  { %v17621_v27 = vadd.f32 %v20065_v13, %v17581_v50 }
 0xc85   :  { %v17661_v48 = vadd.f32 %v29012_v0, %v17621_v27  ;;  %v19737_v0 = vld [vmem:[%s29092_s10] ss:$0 sm:$0xff]  ;;  %s23680_s10 = smov [#allocation10]  }
 0xc86   :  { %s17960_s21 = sshll.u32 %s23680_s10, 4  ;;  %s17961_s21 = int_to_ptr.vmem [resolvable:$true] %s17960_s21 }
 0xc87   :  { %s23641_s22 = scalar_lea.vmem %s17961_s21, 32  ;;  %p23646_p3 = scmp.lt.s32.totalorder %s17961_s21, %s17961_s21 }
 0xc88   :  { %p23642_p2 = scmp.ne.s32.totalorder %s17961_s21, %s23641_s22  ;;  %p23647_p4 = scmp.lt.s32.totalorder %s23641_s22, %s23641_s22 }
 0xc8a   :  { %p23648_p5 = por %p23647_p4, %p23646_p3 }
 0xc8c   :  { %p23649_p6 = pnand %p23648_p5, %p23642_p2 }
 0xc9f   :  { %v20107_v10 = vpop.f32.mrb[92].mxu1 }
 0xca0   :  { %v20108_v20 = vpop.f32.mrb[93].mxu1 }
 0xca1   :  { %v20109_v52 = vadd.f32 %v20108_v20, %v20107_v10  ;;  %v20110_v11 = vpop.f32.mrb[94].mxu1 }
 0xca2   :  { %v20111_v1 = vpop.f32.mrb[95].mxu1 }
 0xca3   :  { %v17701_v2 = vadd.f32 %v20109_v52, %v17661_v48 }
 0xca5   :  { %v17741_v38 = vadd.f32 %v29018_v51, %v17701_v2 }
 0xcbf   :  { %v20151_v8 = vpop.f32.mrb[96].mxu1 }
 0xcc0   :  { %v20152_v19 = vpop.f32.mrb[97].mxu1 }
 0xcc1   :  { %v20153_v46 = vadd.f32 %v20152_v19, %v20151_v8  ;;  %v20154_v4 = vpop.f32.mrb[98].mxu1 }
 0xcc2   :  { %v20155_v25 = vpop.f32.mrb[99].mxu1 }
 0xcc3   :  { %v17781_v32 = vadd.f32 %v20153_v46, %v17741_v38 }
 0xcc5   :  { %v17821_v31 = vadd.f32 %v29025_v55, %v17781_v32 }
 0xcc7   :  { %v17826_v61 = vmax.f32 %v17821_v31, 0.0 }
 0xcc9   :  { %v17827_v22 = vpack.c.bf16 %v17826_v61, %v17826_v61 }
 0xccb   :  { %20337 = vmatmul.mubr.bf16.vlgmr.msra.gmra.mrb[100].mxu1 %v17827_v22 }
 0xd9e   :  { %v17933_v36 = vpop.f32.mrb[100].mxu1 }
 0xd9f   :  { %v17934_v28 = vadd.f32 %v19737_v0, %v17933_v36  ;;  %v20338_v17 = vpop.f32.mrb[101].mxu1 }
 0xda0   :  { %v17936_v51 = vpop.f32.mrb[102].mxu1 }
 0xda1   :  { %v20339_v59 = vpop.f32.mrb[103].mxu1  ;;  %v17940_v44 = vsel %vm17939_vm8, %v17934_v28, -inf }
 0xda2   :  { %17941 = vmax.xlane.f32.xlu0 %v17940_v44 }
 0xe2f   :  { %v17942_v45 = vpop.xlane.xlu0 %17941 }
 0xe30   :  { %v17943_v53 = vsub.f32 %v17934_v28, %v17942_v45 }
 0xe32   :  { %v17944_v6 = vmul.f32 1.442695, %v17943_v53 }
 0xe34   :  { %23554 = vpow2.f32 %v17944_v6 }
 0xe3e   :  { %v23555_v55 = vpop.eup %23554 }
 0xe3f   :  { %v17946_v9 = vsel %vm17939_vm8, %v23555_v55, 0.0 }
 0xe40   :  { %17947 = vadd.xlane.f32.xlu0 %v17946_v9 }
 0xecd   :  { %v17948_v37 = vpop.xlane.xlu0 %17947 }
 0xece   :  { %23556 = vlog2.f32 %v17948_v37 }
 0xed8   :  { %v23557_v57 = vpop.eup %23556 }
 0xed9   :  { %v17950_v39 = vmul.f32 0.6931472, %v23557_v57 }
 0xedb   :  { %v17951_v56 = vadd.f32 %v17950_v39, %v17942_v45 }
 0xedd   :  { %v17952_v49 = vsub.f32 %v17934_v28, %v17951_v56 }
 0xedf   :  { %17953 = vst.msk [vmem:[#allocation10] sm:$0x3] %vm17939_vm8, %v17952_v49 }
 0xee0   :  { %23652 = shalt.err (!%p23649_p6)
}
 0xee1   :  { %s23653_s18 = scalar_lea.hbm %s29093_s11, 32 }
 0xee2   :  { %p23654_p7 = scmp.ne.s32.totalorder %s29093_s11, %s23653_s18  ;;  %p23657_p8 = scmp.lt.u32.totalorder %s23653_s18, %s29093_s11 }
 0xee4   :  { %p23659_p9 = pnand %p23657_p8, %p23654_p7 }
 0xee6   :  { %23662 = shalt.err (!%p23659_p9)
}
 0xee7   :  { %17963 = dma.vmem_to_hbm [thread:$0]  %s17961_s21, 32, %s29093_s11, [#allocation7]  }
 0xee8   :  { %23667 = dma.done.wait [#allocation7], 32  }
 0xee9   :  { %23668 = vsyncadd [#allocation7], 4294967264 }
 0xeea   :  { %17967 = vsyncpa [#allocation6], 1 }
 0xeeb   :  { %17968 = vsyncpa [#allocation9], 1 }
 0xeec   :  { %17969 = vsyncpa [#allocation7], 1 }

</bundles_post_ra>
